<compile_context>
chip_gen: v5e
topology: v5e:2x2
jax: 0.10.0
libtpu: 0.0.40
codegen_flags: <defaults>
</compile_context>

<pallas_src>
import jax
import jax.numpy as jnp
from jax.experimental import pallas as pl
from jax.experimental.pallas import tpu as pltpu

_SUB = 8                       # sublanes per vreg
_RADIX_BITS = 4
_RADIX = 1 << _RADIX_BITS      # 16 buckets / pass
_N_PASSES = 32 // _RADIX_BITS  # 8 passes
_MSB = -(1 << 31)              # 0x8000_0000 as int32


def _tree_reduce(vals, op):
    """Balanced (depth-log2) reduction of a Python list of (1,1) arrays."""
    vals = list(vals)
    while len(vals) > 1:
        nxt = [op(vals[i], vals[i + 1]) for i in range(0, len(vals) - 1, 2)]
        if len(vals) % 2 == 1:
            nxt.append(vals[-1])
        vals = nxt
    return vals[0]


def _make_kthvalue_mask_kernel(c_valid: int):
    """Kernel factory, closed over the number of valid channels (static)."""

    def kernel(ks_ref, i_ref, thr_ref, mask_ref):
        # ks_ref:   SMEM (L,)     int32  per-layer k (1-indexed, k-th smallest)
        # i_ref:    VMEM (8, Cs)  f32    sublane-packed importance row (row-major)
        # thr_ref:  VMEM (1, 1)   f32    k-th smallest value (freeze threshold)
        # mask_ref: VMEM (8, Cs)  int32  frozen mask (I > threshold); pads junk
        l = pl.program_id(0)
        k0 = ks_ref[l]

        x = i_ref[...]                                   # (8, Cs) f32
        bits = pltpu.bitcast(x, jnp.int32)
        # Monotone (unsigned-order) key: key1 <_u key2  <=>  x1 < x2.
        key = jnp.where(bits < 0, ~bits, bits ^ jnp.int32(_MSB))

        # Validity mask: element index under row-major packing is r*Cs + c.
        sub, cs = x.shape
        lin = (jax.lax.broadcasted_iota(jnp.int32, (sub, cs), 0) * cs
               + jax.lax.broadcasted_iota(jnp.int32, (sub, cs), 1))
        active = lin < c_valid                           # pads never counted

        k_rem = jnp.full((1, 1), k0, dtype=jnp.int32)
        sel = jnp.zeros((1, 1), jnp.int32)

        for p in range(_N_PASSES):                       # MSB digit first
            shift = 32 - _RADIX_BITS * (p + 1)
            # digit in [0, 15]; the &15 discards arithmetic-shift sign fill.
            digit = jnp.right_shift(key, shift) & jnp.int32(_RADIX - 1)

            # cum[d] = #active with digit <= d : 15 independent masked reduces
            # (bucket 15 never needed — its cumulative count is total active).
            cum = [jnp.sum((active & (digit <= d)).astype(jnp.int32),
                           keepdims=True)
                   for d in range(_RADIX - 1)]
            lt = [cum[d] < k_rem for d in range(_RADIX - 1)]   # (1,1) bools

            # Selected digit = #buckets whose cumulative count is still < k.
            sel_digit = _tree_reduce(
                [b.astype(jnp.int32) for b in lt], jnp.add)     # (1,1) in [0,15]
            # k consumed by all buckets strictly below the selected one
            # (= cum[sel_digit - 1], with cum[-1] == 0).
            k_sub = _tree_reduce(
                [jnp.where(lt[d], cum[d], 0) for d in range(_RADIX - 1)],
                jnp.maximum)

            k_rem = k_rem - k_sub
            sel = sel | jnp.left_shift(sel_digit, shift)
            active = active & (digit == sel_digit)

        # Invert the monotone-key transform to recover the exact float bits.
        orig_bits = jnp.where(sel < 0, sel ^ jnp.int32(_MSB), ~sel)
        thr = pltpu.bitcast(orig_bits, jnp.float32)      # (1, 1)

        thr_ref[...] = thr
        mask_ref[...] = (x > thr).astype(jnp.int32)

    return kernel


def _freeze_mask_batched(I_batch, ks):
    """Batched kthvalue-threshold + frozen-mask.

    I_batch: (L, C) importance values.  ks: length-L list of Python ints
    (1-indexed k per layer).  Returns (thr (L,), mask (L, C) int32).
    """
    L, C = int(I_batch.shape[0]), int(I_batch.shape[1])
    assert all(1 <= int(k) <= C for k in ks), \
        "torch.kthvalue requires 1 <= k <= len(I)"
    cs = -(-C // _SUB)           # ceil(C / 8)
    c_pad = cs * _SUB

    I_f = I_batch.astype(jnp.float32)
    if c_pad != C:
        # Pad VALUES are irrelevant: the kernel excludes pads by index.
        I_f = jnp.concatenate(
            [I_f, jnp.zeros((L, c_pad - C), jnp.float32)], axis=1)
    I_packed = I_f.reshape(L, _SUB, cs)       # sublane-dense (8, Cs) tiles
    ks_arr = jnp.asarray([int(k) for k in ks], dtype=jnp.int32)

    thr, mask = pl.pallas_call(
        _make_kthvalue_mask_kernel(C),
        out_shape=(jax.ShapeDtypeStruct((L, 1, 1), jnp.float32),
                   jax.ShapeDtypeStruct((L, _SUB, cs), jnp.int32)),
        grid_spec=pltpu.PrefetchScalarGridSpec(
            num_scalar_prefetch=1,
            grid=(L,),
            in_specs=[pl.BlockSpec((None, _SUB, cs), lambda l, ks: (l, 0, 0))],
            out_specs=[pl.BlockSpec((None, 1, 1), lambda l, ks: (l, 0, 0)),
                       pl.BlockSpec((None, _SUB, cs), lambda l, ks: (l, 0, 0))],
        ),
        compiler_params=pltpu.CompilerParams(
            dimension_semantics=("parallel",)),   # layers shard across TCs (v7x)
    )(ks_arr, I_packed)

    thr = thr.reshape(L)
    mask = mask.reshape(L, c_pad)[:, :C]
    return thr, mask


def freeze_layer_forward(I, *, init_ratio, end_ratio, max_iter, it,
                         ratio=None, indices=None, pre_param_length=None):
    """Returns (threshold, frozen_mask) mirroring freeze_layer.forward."""
    if ratio is None:
        ratio = init_ratio - (init_ratio - end_ratio) * (it / max_iter)
    C_out = int(I.shape[0])
    num_frozen = int(C_out * ratio)   # same Python-float truncation as torch code
    assert 1 <= num_frozen <= C_out, "torch.kthvalue requires 1 <= k <= len(I)"

    thr, mask = _freeze_mask_batched(I.reshape(1, C_out), [num_frozen])
    thr = thr[0]
    frozen_channels = mask[0]

    if indices is not None:
        # scatter: frozen_channels_[indices[i]] = 1 where frozen_channels[i] == 1
        idx = jnp.asarray(indices, jnp.int32)
        frozen = jnp.zeros((pre_param_length,), jnp.int32).at[idx].max(
            frozen_channels)
    else:
        frozen = frozen_channels

    # TODO(synk): `param.requires_grad = False` mutation of a live torch model
    # is a Python-object side effect with no JAX/Pallas equivalent; the
    # returned mask indicates which parameters would be frozen.
    return thr, frozen


if __name__ == "__main__":
    key = jax.random.PRNGKey(0)
    k1, k2 = jax.random.split(key)

    # --- Case 1: single layer, module-equivalent call (C_out = 12) ---
    pre_param_length = 12
    C_out = 12
    I = jax.random.uniform(k1, (C_out,), dtype=jnp.float32)
    init_ratio, end_ratio, max_iter, it = 0.9, 0.3, 100, 25

    thr, frozen = freeze_layer_forward(
        I, init_ratio=init_ratio, end_ratio=end_ratio,
        max_iter=max_iter, it=it, pre_param_length=pre_param_length)
    thr, frozen = jax.block_until_ready((thr, frozen))

    ratio = init_ratio - (init_ratio - end_ratio) * (it / max_iter)
    k = int(C_out * ratio)
    thr_ref = jnp.sort(I)[k - 1]
    frozen_ref = (I > thr_ref).astype(jnp.int32)
    assert jnp.allclose(thr, thr_ref), (thr, thr_ref)
    assert jnp.array_equal(frozen, frozen_ref), (frozen, frozen_ref)

    # --- Case 2: batched layers (parallel grid axis), C not a multiple of 8,
    #             per-layer k, negative values exercise the sign path ---
    L, C = 3, 300
    I_b = jax.random.normal(k2, (L, C), dtype=jnp.float32)
    ks = [17, 150, 300]
    thr_b, mask_b = _freeze_mask_batched(I_b, ks)
    thr_b, mask_b = jax.block_until_ready((thr_b, mask_b))
    for li in range(L):
        t_ref = jnp.sort(I_b[li])[ks[li] - 1]
        m_ref = (I_b[li] > t_ref).astype(jnp.int32)
        assert jnp.allclose(thr_b[li], t_ref), (li, thr_b[li], t_ref)
        assert jnp.array_equal(mask_b[li], m_ref), li

    print("KERNEL_OK")
</pallas_src>

<mosaic_0001>
module attributes {stable_mosaic.version = 11 : i64} {
  func.func @kernel(%arg0: i32, %arg1: memref<1xi32, #tpu.memory_space<smem>>, %arg2: memref<1x8x2xf32, #tpu.memory_space<vmem>>, %arg3: memref<1x1x1xf32, #tpu.memory_space<vmem>>, %arg4: memref<1x8x2xi32, #tpu.memory_space<vmem>>) attributes {dimension_semantics = [#tpu.dimension_semantics<parallel>], iteration_bounds = array<i64: 1>, scalar_prefetch = 1 : i64, scratch_operands = 0 : i64, tpu.core_type = #tpu.core_type<tc>, window_params = [{transform_indices = @transform_0, window_bounds = array<i64: 1, 8, 2>}, {transform_indices = @transform_1, window_bounds = array<i64: 1, 1, 1>}, {transform_indices = @transform_2, window_bounds = array<i64: 1, 8, 2>}]} {
    %0 = arith.index_cast %arg0 : i32 to index
    %1 = memref.load %arg1[%0] : memref<1xi32, #tpu.memory_space<smem>>
    %c0 = arith.constant 0 : index
    %c0_0 = arith.constant 0 : index
    %c0_1 = arith.constant 0 : index
    %2 = vector.load %arg2[%c0, %c0_0, %c0_1] : memref<1x8x2xf32, #tpu.memory_space<vmem>>, vector<1x8x2xf32>
    %3 = vector.shape_cast %2 : vector<1x8x2xf32> to vector<8x2xf32>
    %4 = tpu.bitcast %3 : vector<8x2xf32> -> vector<8x2xi32>
    %c0_i32 = arith.constant 0 : i32
    %5 = vector.broadcast %c0_i32 : i32 to vector<8x2xi32>
    %6 = arith.cmpi slt, %4, %5 : vector<8x2xi32>
    %cst = arith.constant dense<-1> : vector<8x2xi32>
    %7 = arith.xori %4, %cst : vector<8x2xi32>
    %c-2147483648_i32 = arith.constant -2147483648 : i32
    %8 = vector.broadcast %c-2147483648_i32 : i32 to vector<8x2xi32>
    %9 = arith.xori %4, %8 : vector<8x2xi32>
    %10 = arith.select %6, %7, %9 : vector<8x2xi1>, vector<8x2xi32>
    %11 = tpu.iota {dimensions = array<i32: 0>} : vector<8x2xi32>
    %c2_i32 = arith.constant 2 : i32
    %12 = vector.broadcast %c2_i32 : i32 to vector<8x2xi32>
    %13 = arith.muli %11, %12 : vector<8x2xi32>
    %14 = tpu.iota {dimensions = array<i32: 1>} : vector<8x2xi32>
    %15 = arith.addi %13, %14 : vector<8x2xi32>
    %c12_i32 = arith.constant 12 : i32
    %16 = vector.broadcast %c12_i32 : i32 to vector<8x2xi32>
    %17 = arith.cmpi slt, %15, %16 : vector<8x2xi32>
    %18 = vector.broadcast %1 : i32 to vector<1x1xi32>
    %c0_i32_2 = arith.constant 0 : i32
    %19 = vector.broadcast %c0_i32_2 : i32 to vector<1x1xi32>
    %c28_i32 = arith.constant 28 : i32
    %20 = vector.broadcast %c28_i32 : i32 to vector<8x2xi32>
    %21 = arith.shrsi %10, %20 : vector<8x2xi32>
    %c15_i32 = arith.constant 15 : i32
    %22 = vector.broadcast %c15_i32 : i32 to vector<8x2xi32>
    %23 = arith.andi %21, %22 : vector<8x2xi32>
    %c0_i32_3 = arith.constant 0 : i32
    %24 = vector.broadcast %c0_i32_3 : i32 to vector<8x2xi32>
    %25 = arith.cmpi sle, %23, %24 : vector<8x2xi32>
    %26 = arith.andi %17, %25 : vector<8x2xi1>
    %27 = arith.extui %26 : vector<8x2xi1> to vector<8x2xi32>
    %28 = vector.shape_cast %27 : vector<8x2xi32> to vector<1x8x2xi32>
    %cst_4 = arith.constant dense<0> : vector<1xi32>
    %29 = vector.multi_reduction <add>, %28, %cst_4 [1, 2] : vector<1x8x2xi32> to vector<1xi32>
    %30 = vector.shape_cast %29 : vector<1xi32> to vector<1x1x1xi32>
    %31 = vector.extract %30[0, 0, 0] : i32 from vector<1x1x1xi32>
    %32 = vector.broadcast %31 : i32 to vector<1x1xi32>
    %c1_i32 = arith.constant 1 : i32
    %33 = vector.broadcast %c1_i32 : i32 to vector<8x2xi32>
    %34 = arith.cmpi sle, %23, %33 : vector<8x2xi32>
    %35 = arith.andi %17, %34 : vector<8x2xi1>
    %36 = arith.extui %35 : vector<8x2xi1> to vector<8x2xi32>
    %37 = vector.shape_cast %36 : vector<8x2xi32> to vector<1x8x2xi32>
    %cst_5 = arith.constant dense<0> : vector<1xi32>
    %38 = vector.multi_reduction <add>, %37, %cst_5 [1, 2] : vector<1x8x2xi32> to vector<1xi32>
    %39 = vector.shape_cast %38 : vector<1xi32> to vector<1x1x1xi32>
    %40 = vector.extract %39[0, 0, 0] : i32 from vector<1x1x1xi32>
    %41 = vector.broadcast %40 : i32 to vector<1x1xi32>
    %c2_i32_6 = arith.constant 2 : i32
    %42 = vector.broadcast %c2_i32_6 : i32 to vector<8x2xi32>
    %43 = arith.cmpi sle, %23, %42 : vector<8x2xi32>
    %44 = arith.andi %17, %43 : vector<8x2xi1>
    %45 = arith.extui %44 : vector<8x2xi1> to vector<8x2xi32>
    %46 = vector.shape_cast %45 : vector<8x2xi32> to vector<1x8x2xi32>
    %cst_7 = arith.constant dense<0> : vector<1xi32>
    %47 = vector.multi_reduction <add>, %46, %cst_7 [1, 2] : vector<1x8x2xi32> to vector<1xi32>
    %48 = vector.shape_cast %47 : vector<1xi32> to vector<1x1x1xi32>
    %49 = vector.extract %48[0, 0, 0] : i32 from vector<1x1x1xi32>
    %50 = vector.broadcast %49 : i32 to vector<1x1xi32>
    %c3_i32 = arith.constant 3 : i32
    %51 = vector.broadcast %c3_i32 : i32 to vector<8x2xi32>
    %52 = arith.cmpi sle, %23, %51 : vector<8x2xi32>
    %53 = arith.andi %17, %52 : vector<8x2xi1>
    %54 = arith.extui %53 : vector<8x2xi1> to vector<8x2xi32>
    %55 = vector.shape_cast %54 : vector<8x2xi32> to vector<1x8x2xi32>
    %cst_8 = arith.constant dense<0> : vector<1xi32>
    %56 = vector.multi_reduction <add>, %55, %cst_8 [1, 2] : vector<1x8x2xi32> to vector<1xi32>
    %57 = vector.shape_cast %56 : vector<1xi32> to vector<1x1x1xi32>
    %58 = vector.extract %57[0, 0, 0] : i32 from vector<1x1x1xi32>
    %59 = vector.broadcast %58 : i32 to vector<1x1xi32>
    %c4_i32 = arith.constant 4 : i32
    %60 = vector.broadcast %c4_i32 : i32 to vector<8x2xi32>
    %61 = arith.cmpi sle, %23, %60 : vector<8x2xi32>
    %62 = arith.andi %17, %61 : vector<8x2xi1>
    %63 = arith.extui %62 : vector<8x2xi1> to vector<8x2xi32>
    %64 = vector.shape_cast %63 : vector<8x2xi32> to vector<1x8x2xi32>
    %cst_9 = arith.constant dense<0> : vector<1xi32>
    %65 = vector.multi_reduction <add>, %64, %cst_9 [1, 2] : vector<1x8x2xi32> to vector<1xi32>
    %66 = vector.shape_cast %65 : vector<1xi32> to vector<1x1x1xi32>
    %67 = vector.extract %66[0, 0, 0] : i32 from vector<1x1x1xi32>
    %68 = vector.broadcast %67 : i32 to vector<1x1xi32>
    %c5_i32 = arith.constant 5 : i32
    %69 = vector.broadcast %c5_i32 : i32 to vector<8x2xi32>
    %70 = arith.cmpi sle, %23, %69 : vector<8x2xi32>
    %71 = arith.andi %17, %70 : vector<8x2xi1>
    %72 = arith.extui %71 : vector<8x2xi1> to vector<8x2xi32>
    %73 = vector.shape_cast %72 : vector<8x2xi32> to vector<1x8x2xi32>
    %cst_10 = arith.constant dense<0> : vector<1xi32>
    %74 = vector.multi_reduction <add>, %73, %cst_10 [1, 2] : vector<1x8x2xi32> to vector<1xi32>
    %75 = vector.shape_cast %74 : vector<1xi32> to vector<1x1x1xi32>
    %76 = vector.extract %75[0, 0, 0] : i32 from vector<1x1x1xi32>
    %77 = vector.broadcast %76 : i32 to vector<1x1xi32>
    %c6_i32 = arith.constant 6 : i32
    %78 = vector.broadcast %c6_i32 : i32 to vector<8x2xi32>
    %79 = arith.cmpi sle, %23, %78 : vector<8x2xi32>
    %80 = arith.andi %17, %79 : vector<8x2xi1>
    %81 = arith.extui %80 : vector<8x2xi1> to vector<8x2xi32>
    %82 = vector.shape_cast %81 : vector<8x2xi32> to vector<1x8x2xi32>
    %cst_11 = arith.constant dense<0> : vector<1xi32>
    %83 = vector.multi_reduction <add>, %82, %cst_11 [1, 2] : vector<1x8x2xi32> to vector<1xi32>
    %84 = vector.shape_cast %83 : vector<1xi32> to vector<1x1x1xi32>
    %85 = vector.extract %84[0, 0, 0] : i32 from vector<1x1x1xi32>
    %86 = vector.broadcast %85 : i32 to vector<1x1xi32>
    %c7_i32 = arith.constant 7 : i32
    %87 = vector.broadcast %c7_i32 : i32 to vector<8x2xi32>
    %88 = arith.cmpi sle, %23, %87 : vector<8x2xi32>
    %89 = arith.andi %17, %88 : vector<8x2xi1>
    %90 = arith.extui %89 : vector<8x2xi1> to vector<8x2xi32>
    %91 = vector.shape_cast %90 : vector<8x2xi32> to vector<1x8x2xi32>
    %cst_12 = arith.constant dense<0> : vector<1xi32>
    %92 = vector.multi_reduction <add>, %91, %cst_12 [1, 2] : vector<1x8x2xi32> to vector<1xi32>
    %93 = vector.shape_cast %92 : vector<1xi32> to vector<1x1x1xi32>
    %94 = vector.extract %93[0, 0, 0] : i32 from vector<1x1x1xi32>
    %95 = vector.broadcast %94 : i32 to vector<1x1xi32>
    %c8_i32 = arith.constant 8 : i32
    %96 = vector.broadcast %c8_i32 : i32 to vector<8x2xi32>
    %97 = arith.cmpi sle, %23, %96 : vector<8x2xi32>
    %98 = arith.andi %17, %97 : vector<8x2xi1>
    %99 = arith.extui %98 : vector<8x2xi1> to vector<8x2xi32>
    %100 = vector.shape_cast %99 : vector<8x2xi32> to vector<1x8x2xi32>
    %cst_13 = arith.constant dense<0> : vector<1xi32>
    %101 = vector.multi_reduction <add>, %100, %cst_13 [1, 2] : vector<1x8x2xi32> to vector<1xi32>
    %102 = vector.shape_cast %101 : vector<1xi32> to vector<1x1x1xi32>
    %103 = vector.extract %102[0, 0, 0] : i32 from vector<1x1x1xi32>
    %104 = vector.broadcast %103 : i32 to vector<1x1xi32>
    %c9_i32 = arith.constant 9 : i32
    %105 = vector.broadcast %c9_i32 : i32 to vector<8x2xi32>
    %106 = arith.cmpi sle, %23, %105 : vector<8x2xi32>
    %107 = arith.andi %17, %106 : vector<8x2xi1>
    %108 = arith.extui %107 : vector<8x2xi1> to vector<8x2xi32>
    %109 = vector.shape_cast %108 : vector<8x2xi32> to vector<1x8x2xi32>
    %cst_14 = arith.constant dense<0> : vector<1xi32>
    %110 = vector.multi_reduction <add>, %109, %cst_14 [1, 2] : vector<1x8x2xi32> to vector<1xi32>
    %111 = vector.shape_cast %110 : vector<1xi32> to vector<1x1x1xi32>
    %112 = vector.extract %111[0, 0, 0] : i32 from vector<1x1x1xi32>
    %113 = vector.broadcast %112 : i32 to vector<1x1xi32>
    %c10_i32 = arith.constant 10 : i32
    %114 = vector.broadcast %c10_i32 : i32 to vector<8x2xi32>
    %115 = arith.cmpi sle, %23, %114 : vector<8x2xi32>
    %116 = arith.andi %17, %115 : vector<8x2xi1>
    %117 = arith.extui %116 : vector<8x2xi1> to vector<8x2xi32>
    %118 = vector.shape_cast %117 : vector<8x2xi32> to vector<1x8x2xi32>
    %cst_15 = arith.constant dense<0> : vector<1xi32>
    %119 = vector.multi_reduction <add>, %118, %cst_15 [1, 2] : vector<1x8x2xi32> to vector<1xi32>
    %120 = vector.shape_cast %119 : vector<1xi32> to vector<1x1x1xi32>
    %121 = vector.extract %120[0, 0, 0] : i32 from vector<1x1x1xi32>
    %122 = vector.broadcast %121 : i32 to vector<1x1xi32>
    %c11_i32 = arith.constant 11 : i32
    %123 = vector.broadcast %c11_i32 : i32 to vector<8x2xi32>
    %124 = arith.cmpi sle, %23, %123 : vector<8x2xi32>
    %125 = arith.andi %17, %124 : vector<8x2xi1>
    %126 = arith.extui %125 : vector<8x2xi1> to vector<8x2xi32>
    %127 = vector.shape_cast %126 : vector<8x2xi32> to vector<1x8x2xi32>
    %cst_16 = arith.constant dense<0> : vector<1xi32>
    %128 = vector.multi_reduction <add>, %127, %cst_16 [1, 2] : vector<1x8x2xi32> to vector<1xi32>
    %129 = vector.shape_cast %128 : vector<1xi32> to vector<1x1x1xi32>
    %130 = vector.extract %129[0, 0, 0] : i32 from vector<1x1x1xi32>
    %131 = vector.broadcast %130 : i32 to vector<1x1xi32>
    %c12_i32_17 = arith.constant 12 : i32
    %132 = vector.broadcast %c12_i32_17 : i32 to vector<8x2xi32>
    %133 = arith.cmpi sle, %23, %132 : vector<8x2xi32>
    %134 = arith.andi %17, %133 : vector<8x2xi1>
    %135 = arith.extui %134 : vector<8x2xi1> to vector<8x2xi32>
    %136 = vector.shape_cast %135 : vector<8x2xi32> to vector<1x8x2xi32>
    %cst_18 = arith.constant dense<0> : vector<1xi32>
    %137 = vector.multi_reduction <add>, %136, %cst_18 [1, 2] : vector<1x8x2xi32> to vector<1xi32>
    %138 = vector.shape_cast %137 : vector<1xi32> to vector<1x1x1xi32>
    %139 = vector.extract %138[0, 0, 0] : i32 from vector<1x1x1xi32>
    %140 = vector.broadcast %139 : i32 to vector<1x1xi32>
    %c13_i32 = arith.constant 13 : i32
    %141 = vector.broadcast %c13_i32 : i32 to vector<8x2xi32>
    %142 = arith.cmpi sle, %23, %141 : vector<8x2xi32>
    %143 = arith.andi %17, %142 : vector<8x2xi1>
    %144 = arith.extui %143 : vector<8x2xi1> to vector<8x2xi32>
    %145 = vector.shape_cast %144 : vector<8x2xi32> to vector<1x8x2xi32>
    %cst_19 = arith.constant dense<0> : vector<1xi32>
    %146 = vector.multi_reduction <add>, %145, %cst_19 [1, 2] : vector<1x8x2xi32> to vector<1xi32>
    %147 = vector.shape_cast %146 : vector<1xi32> to vector<1x1x1xi32>
    %148 = vector.extract %147[0, 0, 0] : i32 from vector<1x1x1xi32>
    %149 = vector.broadcast %148 : i32 to vector<1x1xi32>
    %c14_i32 = arith.constant 14 : i32
    %150 = vector.broadcast %c14_i32 : i32 to vector<8x2xi32>
    %151 = arith.cmpi sle, %23, %150 : vector<8x2xi32>
    %152 = arith.andi %17, %151 : vector<8x2xi1>
    %153 = arith.extui %152 : vector<8x2xi1> to vector<8x2xi32>
    %154 = vector.shape_cast %153 : vector<8x2xi32> to vector<1x8x2xi32>
    %cst_20 = arith.constant dense<0> : vector<1xi32>
    %155 = vector.multi_reduction <add>, %154, %cst_20 [1, 2] : vector<1x8x2xi32> to vector<1xi32>
    %156 = vector.shape_cast %155 : vector<1xi32> to vector<1x1x1xi32>
    %157 = vector.extract %156[0, 0, 0] : i32 from vector<1x1x1xi32>
    %158 = vector.broadcast %157 : i32 to vector<1x1xi32>
    %159 = arith.cmpi slt, %32, %18 : vector<1x1xi32>
    %160 = arith.cmpi slt, %41, %18 : vector<1x1xi32>
    %161 = arith.cmpi slt, %50, %18 : vector<1x1xi32>
    %162 = arith.cmpi slt, %59, %18 : vector<1x1xi32>
    %163 = arith.cmpi slt, %68, %18 : vector<1x1xi32>
    %164 = arith.cmpi slt, %77, %18 : vector<1x1xi32>
    %165 = arith.cmpi slt, %86, %18 : vector<1x1xi32>
    %166 = arith.cmpi slt, %95, %18 : vector<1x1xi32>
    %167 = arith.cmpi slt, %104, %18 : vector<1x1xi32>
    %168 = arith.cmpi slt, %113, %18 : vector<1x1xi32>
    %169 = arith.cmpi slt, %122, %18 : vector<1x1xi32>
    %170 = arith.cmpi slt, %131, %18 : vector<1x1xi32>
    %171 = arith.cmpi slt, %140, %18 : vector<1x1xi32>
    %172 = arith.cmpi slt, %149, %18 : vector<1x1xi32>
    %173 = arith.cmpi slt, %158, %18 : vector<1x1xi32>
    %174 = arith.extui %159 : vector<1x1xi1> to vector<1x1xi32>
    %175 = arith.extui %160 : vector<1x1xi1> to vector<1x1xi32>
    %176 = arith.extui %161 : vector<1x1xi1> to vector<1x1xi32>
    %177 = arith.extui %162 : vector<1x1xi1> to vector<1x1xi32>
    %178 = arith.extui %163 : vector<1x1xi1> to vector<1x1xi32>
    %179 = arith.extui %164 : vector<1x1xi1> to vector<1x1xi32>
    %180 = arith.extui %165 : vector<1x1xi1> to vector<1x1xi32>
    %181 = arith.extui %166 : vector<1x1xi1> to vector<1x1xi32>
    %182 = arith.extui %167 : vector<1x1xi1> to vector<1x1xi32>
    %183 = arith.extui %168 : vector<1x1xi1> to vector<1x1xi32>
    %184 = arith.extui %169 : vector<1x1xi1> to vector<1x1xi32>
    %185 = arith.extui %170 : vector<1x1xi1> to vector<1x1xi32>
    %186 = arith.extui %171 : vector<1x1xi1> to vector<1x1xi32>
    %187 = arith.extui %172 : vector<1x1xi1> to vector<1x1xi32>
    %188 = arith.extui %173 : vector<1x1xi1> to vector<1x1xi32>
    %189 = arith.addi %174, %175 : vector<1x1xi32>
    %190 = arith.addi %176, %177 : vector<1x1xi32>
    %191 = arith.addi %178, %179 : vector<1x1xi32>
    %192 = arith.addi %180, %181 : vector<1x1xi32>
    %193 = arith.addi %182, %183 : vector<1x1xi32>
    %194 = arith.addi %184, %185 : vector<1x1xi32>
    %195 = arith.addi %186, %187 : vector<1x1xi32>
    %196 = arith.addi %189, %190 : vector<1x1xi32>
    %197 = arith.addi %191, %192 : vector<1x1xi32>
    %198 = arith.addi %193, %194 : vector<1x1xi32>
    %199 = arith.addi %195, %188 : vector<1x1xi32>
    %200 = arith.addi %196, %197 : vector<1x1xi32>
    %201 = arith.addi %198, %199 : vector<1x1xi32>
    %202 = arith.addi %200, %201 : vector<1x1xi32>
    %c0_i32_21 = arith.constant 0 : i32
    %203 = vector.broadcast %c0_i32_21 : i32 to vector<1x1xi32>
    %204 = arith.select %159, %32, %203 : vector<1x1xi1>, vector<1x1xi32>
    %c0_i32_22 = arith.constant 0 : i32
    %205 = vector.broadcast %c0_i32_22 : i32 to vector<1x1xi32>
    %206 = arith.select %160, %41, %205 : vector<1x1xi1>, vector<1x1xi32>
    %c0_i32_23 = arith.constant 0 : i32
    %207 = vector.broadcast %c0_i32_23 : i32 to vector<1x1xi32>
    %208 = arith.select %161, %50, %207 : vector<1x1xi1>, vector<1x1xi32>
    %c0_i32_24 = arith.constant 0 : i32
    %209 = vector.broadcast %c0_i32_24 : i32 to vector<1x1xi32>
    %210 = arith.select %162, %59, %209 : vector<1x1xi1>, vector<1x1xi32>
    %c0_i32_25 = arith.constant 0 : i32
    %211 = vector.broadcast %c0_i32_25 : i32 to vector<1x1xi32>
    %212 = arith.select %163, %68, %211 : vector<1x1xi1>, vector<1x1xi32>
    %c0_i32_26 = arith.constant 0 : i32
    %213 = vector.broadcast %c0_i32_26 : i32 to vector<1x1xi32>
    %214 = arith.select %164, %77, %213 : vector<1x1xi1>, vector<1x1xi32>
    %c0_i32_27 = arith.constant 0 : i32
    %215 = vector.broadcast %c0_i32_27 : i32 to vector<1x1xi32>
    %216 = arith.select %165, %86, %215 : vector<1x1xi1>, vector<1x1xi32>
    %c0_i32_28 = arith.constant 0 : i32
    %217 = vector.broadcast %c0_i32_28 : i32 to vector<1x1xi32>
    %218 = arith.select %166, %95, %217 : vector<1x1xi1>, vector<1x1xi32>
    %c0_i32_29 = arith.constant 0 : i32
    %219 = vector.broadcast %c0_i32_29 : i32 to vector<1x1xi32>
    %220 = arith.select %167, %104, %219 : vector<1x1xi1>, vector<1x1xi32>
    %c0_i32_30 = arith.constant 0 : i32
    %221 = vector.broadcast %c0_i32_30 : i32 to vector<1x1xi32>
    %222 = arith.select %168, %113, %221 : vector<1x1xi1>, vector<1x1xi32>
    %c0_i32_31 = arith.constant 0 : i32
    %223 = vector.broadcast %c0_i32_31 : i32 to vector<1x1xi32>
    %224 = arith.select %169, %122, %223 : vector<1x1xi1>, vector<1x1xi32>
    %c0_i32_32 = arith.constant 0 : i32
    %225 = vector.broadcast %c0_i32_32 : i32 to vector<1x1xi32>
    %226 = arith.select %170, %131, %225 : vector<1x1xi1>, vector<1x1xi32>
    %c0_i32_33 = arith.constant 0 : i32
    %227 = vector.broadcast %c0_i32_33 : i32 to vector<1x1xi32>
    %228 = arith.select %171, %140, %227 : vector<1x1xi1>, vector<1x1xi32>
    %c0_i32_34 = arith.constant 0 : i32
    %229 = vector.broadcast %c0_i32_34 : i32 to vector<1x1xi32>
    %230 = arith.select %172, %149, %229 : vector<1x1xi1>, vector<1x1xi32>
    %c0_i32_35 = arith.constant 0 : i32
    %231 = vector.broadcast %c0_i32_35 : i32 to vector<1x1xi32>
    %232 = arith.select %173, %158, %231 : vector<1x1xi1>, vector<1x1xi32>
    %233 = arith.maxsi %204, %206 : vector<1x1xi32>
    %234 = arith.maxsi %208, %210 : vector<1x1xi32>
    %235 = arith.maxsi %212, %214 : vector<1x1xi32>
    %236 = arith.maxsi %216, %218 : vector<1x1xi32>
    %237 = arith.maxsi %220, %222 : vector<1x1xi32>
    %238 = arith.maxsi %224, %226 : vector<1x1xi32>
    %239 = arith.maxsi %228, %230 : vector<1x1xi32>
    %240 = arith.maxsi %233, %234 : vector<1x1xi32>
    %241 = arith.maxsi %235, %236 : vector<1x1xi32>
    %242 = arith.maxsi %237, %238 : vector<1x1xi32>
    %243 = arith.maxsi %239, %232 : vector<1x1xi32>
    %244 = arith.maxsi %240, %241 : vector<1x1xi32>
    %245 = arith.maxsi %242, %243 : vector<1x1xi32>
    %246 = arith.maxsi %244, %245 : vector<1x1xi32>
    %247 = arith.subi %18, %246 : vector<1x1xi32>
    %c28_i32_36 = arith.constant 28 : i32
    %248 = vector.broadcast %c28_i32_36 : i32 to vector<1x1xi32>
    %249 = arith.shli %202, %248 : vector<1x1xi32>
    %250 = arith.ori %19, %249 : vector<1x1xi32>
    %251 = vector.broadcast %202 : vector<1x1xi32> to vector<8x2xi32>
    %252 = arith.cmpi eq, %23, %251 : vector<8x2xi32>
    %253 = arith.andi %17, %252 : vector<8x2xi1>
    %c24_i32 = arith.constant 24 : i32
    %254 = vector.broadcast %c24_i32 : i32 to vector<8x2xi32>
    %255 = arith.shrsi %10, %254 : vector<8x2xi32>
    %c15_i32_37 = arith.constant 15 : i32
    %256 = vector.broadcast %c15_i32_37 : i32 to vector<8x2xi32>
    %257 = arith.andi %255, %256 : vector<8x2xi32>
    %c0_i32_38 = arith.constant 0 : i32
    %258 = vector.broadcast %c0_i32_38 : i32 to vector<8x2xi32>
    %259 = arith.cmpi sle, %257, %258 : vector<8x2xi32>
    %260 = arith.andi %253, %259 : vector<8x2xi1>
    %261 = arith.extui %260 : vector<8x2xi1> to vector<8x2xi32>
    %262 = vector.shape_cast %261 : vector<8x2xi32> to vector<1x8x2xi32>
    %cst_39 = arith.constant dense<0> : vector<1xi32>
    %263 = vector.multi_reduction <add>, %262, %cst_39 [1, 2] : vector<1x8x2xi32> to vector<1xi32>
    %264 = vector.shape_cast %263 : vector<1xi32> to vector<1x1x1xi32>
    %265 = vector.extract %264[0, 0, 0] : i32 from vector<1x1x1xi32>
    %266 = vector.broadcast %265 : i32 to vector<1x1xi32>
    %c1_i32_40 = arith.constant 1 : i32
    %267 = vector.broadcast %c1_i32_40 : i32 to vector<8x2xi32>
    %268 = arith.cmpi sle, %257, %267 : vector<8x2xi32>
    %269 = arith.andi %253, %268 : vector<8x2xi1>
    %270 = arith.extui %269 : vector<8x2xi1> to vector<8x2xi32>
    %271 = vector.shape_cast %270 : vector<8x2xi32> to vector<1x8x2xi32>
    %cst_41 = arith.constant dense<0> : vector<1xi32>
    %272 = vector.multi_reduction <add>, %271, %cst_41 [1, 2] : vector<1x8x2xi32> to vector<1xi32>
    %273 = vector.shape_cast %272 : vector<1xi32> to vector<1x1x1xi32>
    %274 = vector.extract %273[0, 0, 0] : i32 from vector<1x1x1xi32>
    %275 = vector.broadcast %274 : i32 to vector<1x1xi32>
    %c2_i32_42 = arith.constant 2 : i32
    %276 = vector.broadcast %c2_i32_42 : i32 to vector<8x2xi32>
    %277 = arith.cmpi sle, %257, %276 : vector<8x2xi32>
    %278 = arith.andi %253, %277 : vector<8x2xi1>
    %279 = arith.extui %278 : vector<8x2xi1> to vector<8x2xi32>
    %280 = vector.shape_cast %279 : vector<8x2xi32> to vector<1x8x2xi32>
    %cst_43 = arith.constant dense<0> : vector<1xi32>
    %281 = vector.multi_reduction <add>, %280, %cst_43 [1, 2] : vector<1x8x2xi32> to vector<1xi32>
    %282 = vector.shape_cast %281 : vector<1xi32> to vector<1x1x1xi32>
    %283 = vector.extract %282[0, 0, 0] : i32 from vector<1x1x1xi32>
    %284 = vector.broadcast %283 : i32 to vector<1x1xi32>
    %c3_i32_44 = arith.constant 3 : i32
    %285 = vector.broadcast %c3_i32_44 : i32 to vector<8x2xi32>
    %286 = arith.cmpi sle, %257, %285 : vector<8x2xi32>
    %287 = arith.andi %253, %286 : vector<8x2xi1>
    %288 = arith.extui %287 : vector<8x2xi1> to vector<8x2xi32>
    %289 = vector.shape_cast %288 : vector<8x2xi32> to vector<1x8x2xi32>
    %cst_45 = arith.constant dense<0> : vector<1xi32>
    %290 = vector.multi_reduction <add>, %289, %cst_45 [1, 2] : vector<1x8x2xi32> to vector<1xi32>
    %291 = vector.shape_cast %290 : vector<1xi32> to vector<1x1x1xi32>
    %292 = vector.extract %291[0, 0, 0] : i32 from vector<1x1x1xi32>
    %293 = vector.broadcast %292 : i32 to vector<1x1xi32>
    %c4_i32_46 = arith.constant 4 : i32
    %294 = vector.broadcast %c4_i32_46 : i32 to vector<8x2xi32>
    %295 = arith.cmpi sle, %257, %294 : vector<8x2xi32>
    %296 = arith.andi %253, %295 : vector<8x2xi1>
    %297 = arith.extui %296 : vector<8x2xi1> to vector<8x2xi32>
    %298 = vector.shape_cast %297 : vector<8x2xi32> to vector<1x8x2xi32>
    %cst_47 = arith.constant dense<0> : vector<1xi32>
    %299 = vector.multi_reduction <add>, %298, %cst_47 [1, 2] : vector<1x8x2xi32> to vector<1xi32>
    %300 = vector.shape_cast %299 : vector<1xi32> to vector<1x1x1xi32>
    %301 = vector.extract %300[0, 0, 0] : i32 from vector<1x1x1xi32>
    %302 = vector.broadcast %301 : i32 to vector<1x1xi32>
    %c5_i32_48 = arith.constant 5 : i32
    %303 = vector.broadcast %c5_i32_48 : i32 to vector<8x2xi32>
    %304 = arith.cmpi sle, %257, %303 : vector<8x2xi32>
    %305 = arith.andi %253, %304 : vector<8x2xi1>
    %306 = arith.extui %305 : vector<8x2xi1> to vector<8x2xi32>
    %307 = vector.shape_cast %306 : vector<8x2xi32> to vector<1x8x2xi32>
    %cst_49 = arith.constant dense<0> : vector<1xi32>
    %308 = vector.multi_reduction <add>, %307, %cst_49 [1, 2] : vector<1x8x2xi32> to vector<1xi32>
    %309 = vector.shape_cast %308 : vector<1xi32> to vector<1x1x1xi32>
    %310 = vector.extract %309[0, 0, 0] : i32 from vector<1x1x1xi32>
    %311 = vector.broadcast %310 : i32 to vector<1x1xi32>
    %c6_i32_50 = arith.constant 6 : i32
    %312 = vector.broadcast %c6_i32_50 : i32 to vector<8x2xi32>
    %313 = arith.cmpi sle, %257, %312 : vector<8x2xi32>
    %314 = arith.andi %253, %313 : vector<8x2xi1>
    %315 = arith.extui %314 : vector<8x2xi1> to vector<8x2xi32>
    %316 = vector.shape_cast %315 : vector<8x2xi32> to vector<1x8x2xi32>
    %cst_51 = arith.constant dense<0> : vector<1xi32>
    %317 = vector.multi_reduction <add>, %316, %cst_51 [1, 2] : vector<1x8x2xi32> to vector<1xi32>
    %318 = vector.shape_cast %317 : vector<1xi32> to vector<1x1x1xi32>
    %319 = vector.extract %318[0, 0, 0] : i32 from vector<1x1x1xi32>
    %320 = vector.broadcast %319 : i32 to vector<1x1xi32>
    %c7_i32_52 = arith.constant 7 : i32
    %321 = vector.broadcast %c7_i32_52 : i32 to vector<8x2xi32>
    %322 = arith.cmpi sle, %257, %321 : vector<8x2xi32>
    %323 = arith.andi %253, %322 : vector<8x2xi1>
    %324 = arith.extui %323 : vector<8x2xi1> to vector<8x2xi32>
    %325 = vector.shape_cast %324 : vector<8x2xi32> to vector<1x8x2xi32>
    %cst_53 = arith.constant dense<0> : vector<1xi32>
    %326 = vector.multi_reduction <add>, %325, %cst_53 [1, 2] : vector<1x8x2xi32> to vector<1xi32>
    %327 = vector.shape_cast %326 : vector<1xi32> to vector<1x1x1xi32>
    %328 = vector.extract %327[0, 0, 0] : i32 from vector<1x1x1xi32>
    %329 = vector.broadcast %328 : i32 to vector<1x1xi32>
    %c8_i32_54 = arith.constant 8 : i32
    %330 = vector.broadcast %c8_i32_54 : i32 to vector<8x2xi32>
    %331 = arith.cmpi sle, %257, %330 : vector<8x2xi32>
    %332 = arith.andi %253, %331 : vector<8x2xi1>
    %333 = arith.extui %332 : vector<8x2xi1> to vector<8x2xi32>
    %334 = vector.shape_cast %333 : vector<8x2xi32> to vector<1x8x2xi32>
    %cst_55 = arith.constant dense<0> : vector<1xi32>
    %335 = vector.multi_reduction <add>, %334, %cst_55 [1, 2] : vector<1x8x2xi32> to vector<1xi32>
    %336 = vector.shape_cast %335 : vector<1xi32> to vector<1x1x1xi32>
    %337 = vector.extract %336[0, 0, 0] : i32 from vector<1x1x1xi32>
    %338 = vector.broadcast %337 : i32 to vector<1x1xi32>
    %c9_i32_56 = arith.constant 9 : i32
    %339 = vector.broadcast %c9_i32_56 : i32 to vector<8x2xi32>
    %340 = arith.cmpi sle, %257, %339 : vector<8x2xi32>
    %341 = arith.andi %253, %340 : vector<8x2xi1>
    %342 = arith.extui %341 : vector<8x2xi1> to vector<8x2xi32>
    %343 = vector.shape_cast %342 : vector<8x2xi32> to vector<1x8x2xi32>
    %cst_57 = arith.constant dense<0> : vector<1xi32>
    %344 = vector.multi_reduction <add>, %343, %cst_57 [1, 2] : vector<1x8x2xi32> to vector<1xi32>
    %345 = vector.shape_cast %344 : vector<1xi32> to vector<1x1x1xi32>
    %346 = vector.extract %345[0, 0, 0] : i32 from vector<1x1x1xi32>
    %347 = vector.broadcast %346 : i32 to vector<1x1xi32>
    %c10_i32_58 = arith.constant 10 : i32
    %348 = vector.broadcast %c10_i32_58 : i32 to vector<8x2xi32>
    %349 = arith.cmpi sle, %257, %348 : vector<8x2xi32>
    %350 = arith.andi %253, %349 : vector<8x2xi1>
    %351 = arith.extui %350 : vector<8x2xi1> to vector<8x2xi32>
    %352 = vector.shape_cast %351 : vector<8x2xi32> to vector<1x8x2xi32>
    %cst_59 = arith.constant dense<0> : vector<1xi32>
    %353 = vector.multi_reduction <add>, %352, %cst_59 [1, 2] : vector<1x8x2xi32> to vector<1xi32>
    %354 = vector.shape_cast %353 : vector<1xi32> to vector<1x1x1xi32>
    %355 = vector.extract %354[0, 0, 0] : i32 from vector<1x1x1xi32>
    %356 = vector.broadcast %355 : i32 to vector<1x1xi32>
    %c11_i32_60 = arith.constant 11 : i32
    %357 = vector.broadcast %c11_i32_60 : i32 to vector<8x2xi32>
    %358 = arith.cmpi sle, %257, %357 : vector<8x2xi32>
    %359 = arith.andi %253, %358 : vector<8x2xi1>
    %360 = arith.extui %359 : vector<8x2xi1> to vector<8x2xi32>
    %361 = vector.shape_cast %360 : vector<8x2xi32> to vector<1x8x2xi32>
    %cst_61 = arith.constant dense<0> : vector<1xi32>
    %362 = vector.multi_reduction <add>, %361, %cst_61 [1, 2] : vector<1x8x2xi32> to vector<1xi32>
    %363 = vector.shape_cast %362 : vector<1xi32> to vector<1x1x1xi32>
    %364 = vector.extract %363[0, 0, 0] : i32 from vector<1x1x1xi32>
    %365 = vector.broadcast %364 : i32 to vector<1x1xi32>
    %c12_i32_62 = arith.constant 12 : i32
    %366 = vector.broadcast %c12_i32_62 : i32 to vector<8x2xi32>
    %367 = arith.cmpi sle, %257, %366 : vector<8x2xi32>
    %368 = arith.andi %253, %367 : vector<8x2xi1>
    %369 = arith.extui %368 : vector<8x2xi1> to vector<8x2xi32>
    %370 = vector.shape_cast %369 : vector<8x2xi32> to vector<1x8x2xi32>
    %cst_63 = arith.constant dense<0> : vector<1xi32>
    %371 = vector.multi_reduction <add>, %370, %cst_63 [1, 2] : vector<1x8x2xi32> to vector<1xi32>
    %372 = vector.shape_cast %371 : vector<1xi32> to vector<1x1x1xi32>
    %373 = vector.extract %372[0, 0, 0] : i32 from vector<1x1x1xi32>
    %374 = vector.broadcast %373 : i32 to vector<1x1xi32>
    %c13_i32_64 = arith.constant 13 : i32
    %375 = vector.broadcast %c13_i32_64 : i32 to vector<8x2xi32>
    %376 = arith.cmpi sle, %257, %375 : vector<8x2xi32>
    %377 = arith.andi %253, %376 : vector<8x2xi1>
    %378 = arith.extui %377 : vector<8x2xi1> to vector<8x2xi32>
    %379 = vector.shape_cast %378 : vector<8x2xi32> to vector<1x8x2xi32>
    %cst_65 = arith.constant dense<0> : vector<1xi32>
    %380 = vector.multi_reduction <add>, %379, %cst_65 [1, 2] : vector<1x8x2xi32> to vector<1xi32>
    %381 = vector.shape_cast %380 : vector<1xi32> to vector<1x1x1xi32>
    %382 = vector.extract %381[0, 0, 0] : i32 from vector<1x1x1xi32>
    %383 = vector.broadcast %382 : i32 to vector<1x1xi32>
    %c14_i32_66 = arith.constant 14 : i32
    %384 = vector.broadcast %c14_i32_66 : i32 to vector<8x2xi32>
    %385 = arith.cmpi sle, %257, %384 : vector<8x2xi32>
    %386 = arith.andi %253, %385 : vector<8x2xi1>
    %387 = arith.extui %386 : vector<8x2xi1> to vector<8x2xi32>
    %388 = vector.shape_cast %387 : vector<8x2xi32> to vector<1x8x2xi32>
    %cst_67 = arith.constant dense<0> : vector<1xi32>
    %389 = vector.multi_reduction <add>, %388, %cst_67 [1, 2] : vector<1x8x2xi32> to vector<1xi32>
    %390 = vector.shape_cast %389 : vector<1xi32> to vector<1x1x1xi32>
    %391 = vector.extract %390[0, 0, 0] : i32 from vector<1x1x1xi32>
    %392 = vector.broadcast %391 : i32 to vector<1x1xi32>
    %393 = arith.cmpi slt, %266, %247 : vector<1x1xi32>
    %394 = arith.cmpi slt, %275, %247 : vector<1x1xi32>
    %395 = arith.cmpi slt, %284, %247 : vector<1x1xi32>
    %396 = arith.cmpi slt, %293, %247 : vector<1x1xi32>
    %397 = arith.cmpi slt, %302, %247 : vector<1x1xi32>
    %398 = arith.cmpi slt, %311, %247 : vector<1x1xi32>
    %399 = arith.cmpi slt, %320, %247 : vector<1x1xi32>
    %400 = arith.cmpi slt, %329, %247 : vector<1x1xi32>
    %401 = arith.cmpi slt, %338, %247 : vector<1x1xi32>
    %402 = arith.cmpi slt, %347, %247 : vector<1x1xi32>
    %403 = arith.cmpi slt, %356, %247 : vector<1x1xi32>
    %404 = arith.cmpi slt, %365, %247 : vector<1x1xi32>
    %405 = arith.cmpi slt, %374, %247 : vector<1x1xi32>
    %406 = arith.cmpi slt, %383, %247 : vector<1x1xi32>
    %407 = arith.cmpi slt, %392, %247 : vector<1x1xi32>
    %408 = arith.extui %393 : vector<1x1xi1> to vector<1x1xi32>
    %409 = arith.extui %394 : vector<1x1xi1> to vector<1x1xi32>
    %410 = arith.extui %395 : vector<1x1xi1> to vector<1x1xi32>
    %411 = arith.extui %396 : vector<1x1xi1> to vector<1x1xi32>
    %412 = arith.extui %397 : vector<1x1xi1> to vector<1x1xi32>
    %413 = arith.extui %398 : vector<1x1xi1> to vector<1x1xi32>
    %414 = arith.extui %399 : vector<1x1xi1> to vector<1x1xi32>
    %415 = arith.extui %400 : vector<1x1xi1> to vector<1x1xi32>
    %416 = arith.extui %401 : vector<1x1xi1> to vector<1x1xi32>
    %417 = arith.extui %402 : vector<1x1xi1> to vector<1x1xi32>
    %418 = arith.extui %403 : vector<1x1xi1> to vector<1x1xi32>
    %419 = arith.extui %404 : vector<1x1xi1> to vector<1x1xi32>
    %420 = arith.extui %405 : vector<1x1xi1> to vector<1x1xi32>
    %421 = arith.extui %406 : vector<1x1xi1> to vector<1x1xi32>
    %422 = arith.extui %407 : vector<1x1xi1> to vector<1x1xi32>
    %423 = arith.addi %408, %409 : vector<1x1xi32>
    %424 = arith.addi %410, %411 : vector<1x1xi32>
    %425 = arith.addi %412, %413 : vector<1x1xi32>
    %426 = arith.addi %414, %415 : vector<1x1xi32>
    %427 = arith.addi %416, %417 : vector<1x1xi32>
    %428 = arith.addi %418, %419 : vector<1x1xi32>
    %429 = arith.addi %420, %421 : vector<1x1xi32>
    %430 = arith.addi %423, %424 : vector<1x1xi32>
    %431 = arith.addi %425, %426 : vector<1x1xi32>
    %432 = arith.addi %427, %428 : vector<1x1xi32>
    %433 = arith.addi %429, %422 : vector<1x1xi32>
    %434 = arith.addi %430, %431 : vector<1x1xi32>
    %435 = arith.addi %432, %433 : vector<1x1xi32>
    %436 = arith.addi %434, %435 : vector<1x1xi32>
    %c0_i32_68 = arith.constant 0 : i32
    %437 = vector.broadcast %c0_i32_68 : i32 to vector<1x1xi32>
    %438 = arith.select %393, %266, %437 : vector<1x1xi1>, vector<1x1xi32>
    %c0_i32_69 = arith.constant 0 : i32
    %439 = vector.broadcast %c0_i32_69 : i32 to vector<1x1xi32>
    %440 = arith.select %394, %275, %439 : vector<1x1xi1>, vector<1x1xi32>
    %c0_i32_70 = arith.constant 0 : i32
    %441 = vector.broadcast %c0_i32_70 : i32 to vector<1x1xi32>
    %442 = arith.select %395, %284, %441 : vector<1x1xi1>, vector<1x1xi32>
    %c0_i32_71 = arith.constant 0 : i32
    %443 = vector.broadcast %c0_i32_71 : i32 to vector<1x1xi32>
    %444 = arith.select %396, %293, %443 : vector<1x1xi1>, vector<1x1xi32>
    %c0_i32_72 = arith.constant 0 : i32
    %445 = vector.broadcast %c0_i32_72 : i32 to vector<1x1xi32>
    %446 = arith.select %397, %302, %445 : vector<1x1xi1>, vector<1x1xi32>
    %c0_i32_73 = arith.constant 0 : i32
    %447 = vector.broadcast %c0_i32_73 : i32 to vector<1x1xi32>
    %448 = arith.select %398, %311, %447 : vector<1x1xi1>, vector<1x1xi32>
    %c0_i32_74 = arith.constant 0 : i32
    %449 = vector.broadcast %c0_i32_74 : i32 to vector<1x1xi32>
    %450 = arith.select %399, %320, %449 : vector<1x1xi1>, vector<1x1xi32>
    %c0_i32_75 = arith.constant 0 : i32
    %451 = vector.broadcast %c0_i32_75 : i32 to vector<1x1xi32>
    %452 = arith.select %400, %329, %451 : vector<1x1xi1>, vector<1x1xi32>
    %c0_i32_76 = arith.constant 0 : i32
    %453 = vector.broadcast %c0_i32_76 : i32 to vector<1x1xi32>
    %454 = arith.select %401, %338, %453 : vector<1x1xi1>, vector<1x1xi32>
    %c0_i32_77 = arith.constant 0 : i32
    %455 = vector.broadcast %c0_i32_77 : i32 to vector<1x1xi32>
    %456 = arith.select %402, %347, %455 : vector<1x1xi1>, vector<1x1xi32>
    %c0_i32_78 = arith.constant 0 : i32
    %457 = vector.broadcast %c0_i32_78 : i32 to vector<1x1xi32>
    %458 = arith.select %403, %356, %457 : vector<1x1xi1>, vector<1x1xi32>
    %c0_i32_79 = arith.constant 0 : i32
    %459 = vector.broadcast %c0_i32_79 : i32 to vector<1x1xi32>
    %460 = arith.select %404, %365, %459 : vector<1x1xi1>, vector<1x1xi32>
    %c0_i32_80 = arith.constant 0 : i32
    %461 = vector.broadcast %c0_i32_80 : i32 to vector<1x1xi32>
    %462 = arith.select %405, %374, %461 : vector<1x1xi1>, vector<1x1xi32>
    %c0_i32_81 = arith.constant 0 : i32
    %463 = vector.broadcast %c0_i32_81 : i32 to vector<1x1xi32>
    %464 = arith.select %406, %383, %463 : vector<1x1xi1>, vector<1x1xi32>
    %c0_i32_82 = arith.constant 0 : i32
    %465 = vector.broadcast %c0_i32_82 : i32 to vector<1x1xi32>
    %466 = arith.select %407, %392, %465 : vector<1x1xi1>, vector<1x1xi32>
    %467 = arith.maxsi %438, %440 : vector<1x1xi32>
    %468 = arith.maxsi %442, %444 : vector<1x1xi32>
    %469 = arith.maxsi %446, %448 : vector<1x1xi32>
    %470 = arith.maxsi %450, %452 : vector<1x1xi32>
    %471 = arith.maxsi %454, %456 : vector<1x1xi32>
    %472 = arith.maxsi %458, %460 : vector<1x1xi32>
    %473 = arith.maxsi %462, %464 : vector<1x1xi32>
    %474 = arith.maxsi %467, %468 : vector<1x1xi32>
    %475 = arith.maxsi %469, %470 : vector<1x1xi32>
    %476 = arith.maxsi %471, %472 : vector<1x1xi32>
    %477 = arith.maxsi %473, %466 : vector<1x1xi32>
    %478 = arith.maxsi %474, %475 : vector<1x1xi32>
    %479 = arith.maxsi %476, %477 : vector<1x1xi32>
    %480 = arith.maxsi %478, %479 : vector<1x1xi32>
    %481 = arith.subi %247, %480 : vector<1x1xi32>
    %c24_i32_83 = arith.constant 24 : i32
    %482 = vector.broadcast %c24_i32_83 : i32 to vector<1x1xi32>
    %483 = arith.shli %436, %482 : vector<1x1xi32>
    %484 = arith.ori %250, %483 : vector<1x1xi32>
    %485 = vector.broadcast %436 : vector<1x1xi32> to vector<8x2xi32>
    %486 = arith.cmpi eq, %257, %485 : vector<8x2xi32>
    %487 = arith.andi %253, %486 : vector<8x2xi1>
    %c20_i32 = arith.constant 20 : i32
    %488 = vector.broadcast %c20_i32 : i32 to vector<8x2xi32>
    %489 = arith.shrsi %10, %488 : vector<8x2xi32>
    %c15_i32_84 = arith.constant 15 : i32
    %490 = vector.broadcast %c15_i32_84 : i32 to vector<8x2xi32>
    %491 = arith.andi %489, %490 : vector<8x2xi32>
    %c0_i32_85 = arith.constant 0 : i32
    %492 = vector.broadcast %c0_i32_85 : i32 to vector<8x2xi32>
    %493 = arith.cmpi sle, %491, %492 : vector<8x2xi32>
    %494 = arith.andi %487, %493 : vector<8x2xi1>
    %495 = arith.extui %494 : vector<8x2xi1> to vector<8x2xi32>
    %496 = vector.shape_cast %495 : vector<8x2xi32> to vector<1x8x2xi32>
    %cst_86 = arith.constant dense<0> : vector<1xi32>
    %497 = vector.multi_reduction <add>, %496, %cst_86 [1, 2] : vector<1x8x2xi32> to vector<1xi32>
    %498 = vector.shape_cast %497 : vector<1xi32> to vector<1x1x1xi32>
    %499 = vector.extract %498[0, 0, 0] : i32 from vector<1x1x1xi32>
    %500 = vector.broadcast %499 : i32 to vector<1x1xi32>
    %c1_i32_87 = arith.constant 1 : i32
    %501 = vector.broadcast %c1_i32_87 : i32 to vector<8x2xi32>
    %502 = arith.cmpi sle, %491, %501 : vector<8x2xi32>
    %503 = arith.andi %487, %502 : vector<8x2xi1>
    %504 = arith.extui %503 : vector<8x2xi1> to vector<8x2xi32>
    %505 = vector.shape_cast %504 : vector<8x2xi32> to vector<1x8x2xi32>
    %cst_88 = arith.constant dense<0> : vector<1xi32>
    %506 = vector.multi_reduction <add>, %505, %cst_88 [1, 2] : vector<1x8x2xi32> to vector<1xi32>
    %507 = vector.shape_cast %506 : vector<1xi32> to vector<1x1x1xi32>
    %508 = vector.extract %507[0, 0, 0] : i32 from vector<1x1x1xi32>
    %509 = vector.broadcast %508 : i32 to vector<1x1xi32>
    %c2_i32_89 = arith.constant 2 : i32
    %510 = vector.broadcast %c2_i32_89 : i32 to vector<8x2xi32>
    %511 = arith.cmpi sle, %491, %510 : vector<8x2xi32>
    %512 = arith.andi %487, %511 : vector<8x2xi1>
    %513 = arith.extui %512 : vector<8x2xi1> to vector<8x2xi32>
    %514 = vector.shape_cast %513 : vector<8x2xi32> to vector<1x8x2xi32>
    %cst_90 = arith.constant dense<0> : vector<1xi32>
    %515 = vector.multi_reduction <add>, %514, %cst_90 [1, 2] : vector<1x8x2xi32> to vector<1xi32>
    %516 = vector.shape_cast %515 : vector<1xi32> to vector<1x1x1xi32>
    %517 = vector.extract %516[0, 0, 0] : i32 from vector<1x1x1xi32>
    %518 = vector.broadcast %517 : i32 to vector<1x1xi32>
    %c3_i32_91 = arith.constant 3 : i32
    %519 = vector.broadcast %c3_i32_91 : i32 to vector<8x2xi32>
    %520 = arith.cmpi sle, %491, %519 : vector<8x2xi32>
    %521 = arith.andi %487, %520 : vector<8x2xi1>
    %522 = arith.extui %521 : vector<8x2xi1> to vector<8x2xi32>
    %523 = vector.shape_cast %522 : vector<8x2xi32> to vector<1x8x2xi32>
    %cst_92 = arith.constant dense<0> : vector<1xi32>
    %524 = vector.multi_reduction <add>, %523, %cst_92 [1, 2] : vector<1x8x2xi32> to vector<1xi32>
    %525 = vector.shape_cast %524 : vector<1xi32> to vector<1x1x1xi32>
    %526 = vector.extract %525[0, 0, 0] : i32 from vector<1x1x1xi32>
    %527 = vector.broadcast %526 : i32 to vector<1x1xi32>
    %c4_i32_93 = arith.constant 4 : i32
    %528 = vector.broadcast %c4_i32_93 : i32 to vector<8x2xi32>
    %529 = arith.cmpi sle, %491, %528 : vector<8x2xi32>
    %530 = arith.andi %487, %529 : vector<8x2xi1>
    %531 = arith.extui %530 : vector<8x2xi1> to vector<8x2xi32>
    %532 = vector.shape_cast %531 : vector<8x2xi32> to vector<1x8x2xi32>
    %cst_94 = arith.constant dense<0> : vector<1xi32>
    %533 = vector.multi_reduction <add>, %532, %cst_94 [1, 2] : vector<1x8x2xi32> to vector<1xi32>
    %534 = vector.shape_cast %533 : vector<1xi32> to vector<1x1x1xi32>
    %535 = vector.extract %534[0, 0, 0] : i32 from vector<1x1x1xi32>
    %536 = vector.broadcast %535 : i32 to vector<1x1xi32>
    %c5_i32_95 = arith.constant 5 : i32
    %537 = vector.broadcast %c5_i32_95 : i32 to vector<8x2xi32>
    %538 = arith.cmpi sle, %491, %537 : vector<8x2xi32>
    %539 = arith.andi %487, %538 : vector<8x2xi1>
    %540 = arith.extui %539 : vector<8x2xi1> to vector<8x2xi32>
    %541 = vector.shape_cast %540 : vector<8x2xi32> to vector<1x8x2xi32>
    %cst_96 = arith.constant dense<0> : vector<1xi32>
    %542 = vector.multi_reduction <add>, %541, %cst_96 [1, 2] : vector<1x8x2xi32> to vector<1xi32>
    %543 = vector.shape_cast %542 : vector<1xi32> to vector<1x1x1xi32>
    %544 = vector.extract %543[0, 0, 0] : i32 from vector<1x1x1xi32>
    %545 = vector.broadcast %544 : i32 to vector<1x1xi32>
    %c6_i32_97 = arith.constant 6 : i32
    %546 = vector.broadcast %c6_i32_97 : i32 to vector<8x2xi32>
    %547 = arith.cmpi sle, %491, %546 : vector<8x2xi32>
    %548 = arith.andi %487, %547 : vector<8x2xi1>
    %549 = arith.extui %548 : vector<8x2xi1> to vector<8x2xi32>
    %550 = vector.shape_cast %549 : vector<8x2xi32> to vector<1x8x2xi32>
    %cst_98 = arith.constant dense<0> : vector<1xi32>
    %551 = vector.multi_reduction <add>, %550, %cst_98 [1, 2] : vector<1x8x2xi32> to vector<1xi32>
    %552 = vector.shape_cast %551 : vector<1xi32> to vector<1x1x1xi32>
    %553 = vector.extract %552[0, 0, 0] : i32 from vector<1x1x1xi32>
    %554 = vector.broadcast %553 : i32 to vector<1x1xi32>
    %c7_i32_99 = arith.constant 7 : i32
    %555 = vector.broadcast %c7_i32_99 : i32 to vector<8x2xi32>
    %556 = arith.cmpi sle, %491, %555 : vector<8x2xi32>
    %557 = arith.andi %487, %556 : vector<8x2xi1>
    %558 = arith.extui %557 : vector<8x2xi1> to vector<8x2xi32>
    %559 = vector.shape_cast %558 : vector<8x2xi32> to vector<1x8x2xi32>
    %cst_100 = arith.constant dense<0> : vector<1xi32>
    %560 = vector.multi_reduction <add>, %559, %cst_100 [1, 2] : vector<1x8x2xi32> to vector<1xi32>
    %561 = vector.shape_cast %560 : vector<1xi32> to vector<1x1x1xi32>
    %562 = vector.extract %561[0, 0, 0] : i32 from vector<1x1x1xi32>
    %563 = vector.broadcast %562 : i32 to vector<1x1xi32>
    %c8_i32_101 = arith.constant 8 : i32
    %564 = vector.broadcast %c8_i32_101 : i32 to vector<8x2xi32>
    %565 = arith.cmpi sle, %491, %564 : vector<8x2xi32>
    %566 = arith.andi %487, %565 : vector<8x2xi1>
    %567 = arith.extui %566 : vector<8x2xi1> to vector<8x2xi32>
    %568 = vector.shape_cast %567 : vector<8x2xi32> to vector<1x8x2xi32>
    %cst_102 = arith.constant dense<0> : vector<1xi32>
    %569 = vector.multi_reduction <add>, %568, %cst_102 [1, 2] : vector<1x8x2xi32> to vector<1xi32>
    %570 = vector.shape_cast %569 : vector<1xi32> to vector<1x1x1xi32>
    %571 = vector.extract %570[0, 0, 0] : i32 from vector<1x1x1xi32>
    %572 = vector.broadcast %571 : i32 to vector<1x1xi32>
    %c9_i32_103 = arith.constant 9 : i32
    %573 = vector.broadcast %c9_i32_103 : i32 to vector<8x2xi32>
    %574 = arith.cmpi sle, %491, %573 : vector<8x2xi32>
    %575 = arith.andi %487, %574 : vector<8x2xi1>
    %576 = arith.extui %575 : vector<8x2xi1> to vector<8x2xi32>
    %577 = vector.shape_cast %576 : vector<8x2xi32> to vector<1x8x2xi32>
    %cst_104 = arith.constant dense<0> : vector<1xi32>
    %578 = vector.multi_reduction <add>, %577, %cst_104 [1, 2] : vector<1x8x2xi32> to vector<1xi32>
    %579 = vector.shape_cast %578 : vector<1xi32> to vector<1x1x1xi32>
    %580 = vector.extract %579[0, 0, 0] : i32 from vector<1x1x1xi32>
    %581 = vector.broadcast %580 : i32 to vector<1x1xi32>
    %c10_i32_105 = arith.constant 10 : i32
    %582 = vector.broadcast %c10_i32_105 : i32 to vector<8x2xi32>
    %583 = arith.cmpi sle, %491, %582 : vector<8x2xi32>
    %584 = arith.andi %487, %583 : vector<8x2xi1>
    %585 = arith.extui %584 : vector<8x2xi1> to vector<8x2xi32>
    %586 = vector.shape_cast %585 : vector<8x2xi32> to vector<1x8x2xi32>
    %cst_106 = arith.constant dense<0> : vector<1xi32>
    %587 = vector.multi_reduction <add>, %586, %cst_106 [1, 2] : vector<1x8x2xi32> to vector<1xi32>
    %588 = vector.shape_cast %587 : vector<1xi32> to vector<1x1x1xi32>
    %589 = vector.extract %588[0, 0, 0] : i32 from vector<1x1x1xi32>
    %590 = vector.broadcast %589 : i32 to vector<1x1xi32>
    %c11_i32_107 = arith.constant 11 : i32
    %591 = vector.broadcast %c11_i32_107 : i32 to vector<8x2xi32>
    %592 = arith.cmpi sle, %491, %591 : vector<8x2xi32>
    %593 = arith.andi %487, %592 : vector<8x2xi1>
    %594 = arith.extui %593 : vector<8x2xi1> to vector<8x2xi32>
    %595 = vector.shape_cast %594 : vector<8x2xi32> to vector<1x8x2xi32>
    %cst_108 = arith.constant dense<0> : vector<1xi32>
    %596 = vector.multi_reduction <add>, %595, %cst_108 [1, 2] : vector<1x8x2xi32> to vector<1xi32>
    %597 = vector.shape_cast %596 : vector<1xi32> to vector<1x1x1xi32>
    %598 = vector.extract %597[0, 0, 0] : i32 from vector<1x1x1xi32>
    %599 = vector.broadcast %598 : i32 to vector<1x1xi32>
    %c12_i32_109 = arith.constant 12 : i32
    %600 = vector.broadcast %c12_i32_109 : i32 to vector<8x2xi32>
    %601 = arith.cmpi sle, %491, %600 : vector<8x2xi32>
    %602 = arith.andi %487, %601 : vector<8x2xi1>
    %603 = arith.extui %602 : vector<8x2xi1> to vector<8x2xi32>
    %604 = vector.shape_cast %603 : vector<8x2xi32> to vector<1x8x2xi32>
    %cst_110 = arith.constant dense<0> : vector<1xi32>
    %605 = vector.multi_reduction <add>, %604, %cst_110 [1, 2] : vector<1x8x2xi32> to vector<1xi32>
    %606 = vector.shape_cast %605 : vector<1xi32> to vector<1x1x1xi32>
    %607 = vector.extract %606[0, 0, 0] : i32 from vector<1x1x1xi32>
    %608 = vector.broadcast %607 : i32 to vector<1x1xi32>
    %c13_i32_111 = arith.constant 13 : i32
    %609 = vector.broadcast %c13_i32_111 : i32 to vector<8x2xi32>
    %610 = arith.cmpi sle, %491, %609 : vector<8x2xi32>
    %611 = arith.andi %487, %610 : vector<8x2xi1>
    %612 = arith.extui %611 : vector<8x2xi1> to vector<8x2xi32>
    %613 = vector.shape_cast %612 : vector<8x2xi32> to vector<1x8x2xi32>
    %cst_112 = arith.constant dense<0> : vector<1xi32>
    %614 = vector.multi_reduction <add>, %613, %cst_112 [1, 2] : vector<1x8x2xi32> to vector<1xi32>
    %615 = vector.shape_cast %614 : vector<1xi32> to vector<1x1x1xi32>
    %616 = vector.extract %615[0, 0, 0] : i32 from vector<1x1x1xi32>
    %617 = vector.broadcast %616 : i32 to vector<1x1xi32>
    %c14_i32_113 = arith.constant 14 : i32
    %618 = vector.broadcast %c14_i32_113 : i32 to vector<8x2xi32>
    %619 = arith.cmpi sle, %491, %618 : vector<8x2xi32>
    %620 = arith.andi %487, %619 : vector<8x2xi1>
    %621 = arith.extui %620 : vector<8x2xi1> to vector<8x2xi32>
    %622 = vector.shape_cast %621 : vector<8x2xi32> to vector<1x8x2xi32>
    %cst_114 = arith.constant dense<0> : vector<1xi32>
    %623 = vector.multi_reduction <add>, %622, %cst_114 [1, 2] : vector<1x8x2xi32> to vector<1xi32>
    %624 = vector.shape_cast %623 : vector<1xi32> to vector<1x1x1xi32>
    %625 = vector.extract %624[0, 0, 0] : i32 from vector<1x1x1xi32>
    %626 = vector.broadcast %625 : i32 to vector<1x1xi32>
    %627 = arith.cmpi slt, %500, %481 : vector<1x1xi32>
    %628 = arith.cmpi slt, %509, %481 : vector<1x1xi32>
    %629 = arith.cmpi slt, %518, %481 : vector<1x1xi32>
    %630 = arith.cmpi slt, %527, %481 : vector<1x1xi32>
    %631 = arith.cmpi slt, %536, %481 : vector<1x1xi32>
    %632 = arith.cmpi slt, %545, %481 : vector<1x1xi32>
    %633 = arith.cmpi slt, %554, %481 : vector<1x1xi32>
    %634 = arith.cmpi slt, %563, %481 : vector<1x1xi32>
    %635 = arith.cmpi slt, %572, %481 : vector<1x1xi32>
    %636 = arith.cmpi slt, %581, %481 : vector<1x1xi32>
    %637 = arith.cmpi slt, %590, %481 : vector<1x1xi32>
    %638 = arith.cmpi slt, %599, %481 : vector<1x1xi32>
    %639 = arith.cmpi slt, %608, %481 : vector<1x1xi32>
    %640 = arith.cmpi slt, %617, %481 : vector<1x1xi32>
    %641 = arith.cmpi slt, %626, %481 : vector<1x1xi32>
    %642 = arith.extui %627 : vector<1x1xi1> to vector<1x1xi32>
    %643 = arith.extui %628 : vector<1x1xi1> to vector<1x1xi32>
    %644 = arith.extui %629 : vector<1x1xi1> to vector<1x1xi32>
    %645 = arith.extui %630 : vector<1x1xi1> to vector<1x1xi32>
    %646 = arith.extui %631 : vector<1x1xi1> to vector<1x1xi32>
    %647 = arith.extui %632 : vector<1x1xi1> to vector<1x1xi32>
    %648 = arith.extui %633 : vector<1x1xi1> to vector<1x1xi32>
    %649 = arith.extui %634 : vector<1x1xi1> to vector<1x1xi32>
    %650 = arith.extui %635 : vector<1x1xi1> to vector<1x1xi32>
    %651 = arith.extui %636 : vector<1x1xi1> to vector<1x1xi32>
    %652 = arith.extui %637 : vector<1x1xi1> to vector<1x1xi32>
    %653 = arith.extui %638 : vector<1x1xi1> to vector<1x1xi32>
    %654 = arith.extui %639 : vector<1x1xi1> to vector<1x1xi32>
    %655 = arith.extui %640 : vector<1x1xi1> to vector<1x1xi32>
    %656 = arith.extui %641 : vector<1x1xi1> to vector<1x1xi32>
    %657 = arith.addi %642, %643 : vector<1x1xi32>
    %658 = arith.addi %644, %645 : vector<1x1xi32>
    %659 = arith.addi %646, %647 : vector<1x1xi32>
    %660 = arith.addi %648, %649 : vector<1x1xi32>
    %661 = arith.addi %650, %651 : vector<1x1xi32>
    %662 = arith.addi %652, %653 : vector<1x1xi32>
    %663 = arith.addi %654, %655 : vector<1x1xi32>
    %664 = arith.addi %657, %658 : vector<1x1xi32>
    %665 = arith.addi %659, %660 : vector<1x1xi32>
    %666 = arith.addi %661, %662 : vector<1x1xi32>
    %667 = arith.addi %663, %656 : vector<1x1xi32>
    %668 = arith.addi %664, %665 : vector<1x1xi32>
    %669 = arith.addi %666, %667 : vector<1x1xi32>
    %670 = arith.addi %668, %669 : vector<1x1xi32>
    %c0_i32_115 = arith.constant 0 : i32
    %671 = vector.broadcast %c0_i32_115 : i32 to vector<1x1xi32>
    %672 = arith.select %627, %500, %671 : vector<1x1xi1>, vector<1x1xi32>
    %c0_i32_116 = arith.constant 0 : i32
    %673 = vector.broadcast %c0_i32_116 : i32 to vector<1x1xi32>
    %674 = arith.select %628, %509, %673 : vector<1x1xi1>, vector<1x1xi32>
    %c0_i32_117 = arith.constant 0 : i32
    %675 = vector.broadcast %c0_i32_117 : i32 to vector<1x1xi32>
    %676 = arith.select %629, %518, %675 : vector<1x1xi1>, vector<1x1xi32>
    %c0_i32_118 = arith.constant 0 : i32
    %677 = vector.broadcast %c0_i32_118 : i32 to vector<1x1xi32>
    %678 = arith.select %630, %527, %677 : vector<1x1xi1>, vector<1x1xi32>
    %c0_i32_119 = arith.constant 0 : i32
    %679 = vector.broadcast %c0_i32_119 : i32 to vector<1x1xi32>
    %680 = arith.select %631, %536, %679 : vector<1x1xi1>, vector<1x1xi32>
    %c0_i32_120 = arith.constant 0 : i32
    %681 = vector.broadcast %c0_i32_120 : i32 to vector<1x1xi32>
    %682 = arith.select %632, %545, %681 : vector<1x1xi1>, vector<1x1xi32>
    %c0_i32_121 = arith.constant 0 : i32
    %683 = vector.broadcast %c0_i32_121 : i32 to vector<1x1xi32>
    %684 = arith.select %633, %554, %683 : vector<1x1xi1>, vector<1x1xi32>
    %c0_i32_122 = arith.constant 0 : i32
    %685 = vector.broadcast %c0_i32_122 : i32 to vector<1x1xi32>
    %686 = arith.select %634, %563, %685 : vector<1x1xi1>, vector<1x1xi32>
    %c0_i32_123 = arith.constant 0 : i32
    %687 = vector.broadcast %c0_i32_123 : i32 to vector<1x1xi32>
    %688 = arith.select %635, %572, %687 : vector<1x1xi1>, vector<1x1xi32>
    %c0_i32_124 = arith.constant 0 : i32
    %689 = vector.broadcast %c0_i32_124 : i32 to vector<1x1xi32>
    %690 = arith.select %636, %581, %689 : vector<1x1xi1>, vector<1x1xi32>
    %c0_i32_125 = arith.constant 0 : i32
    %691 = vector.broadcast %c0_i32_125 : i32 to vector<1x1xi32>
    %692 = arith.select %637, %590, %691 : vector<1x1xi1>, vector<1x1xi32>
    %c0_i32_126 = arith.constant 0 : i32
    %693 = vector.broadcast %c0_i32_126 : i32 to vector<1x1xi32>
    %694 = arith.select %638, %599, %693 : vector<1x1xi1>, vector<1x1xi32>
    %c0_i32_127 = arith.constant 0 : i32
    %695 = vector.broadcast %c0_i32_127 : i32 to vector<1x1xi32>
    %696 = arith.select %639, %608, %695 : vector<1x1xi1>, vector<1x1xi32>
    %c0_i32_128 = arith.constant 0 : i32
    %697 = vector.broadcast %c0_i32_128 : i32 to vector<1x1xi32>
    %698 = arith.select %640, %617, %697 : vector<1x1xi1>, vector<1x1xi32>
    %c0_i32_129 = arith.constant 0 : i32
    %699 = vector.broadcast %c0_i32_129 : i32 to vector<1x1xi32>
    %700 = arith.select %641, %626, %699 : vector<1x1xi1>, vector<1x1xi32>
    %701 = arith.maxsi %672, %674 : vector<1x1xi32>
    %702 = arith.maxsi %676, %678 : vector<1x1xi32>
    %703 = arith.maxsi %680, %682 : vector<1x1xi32>
    %704 = arith.maxsi %684, %686 : vector<1x1xi32>
    %705 = arith.maxsi %688, %690 : vector<1x1xi32>
    %706 = arith.maxsi %692, %694 : vector<1x1xi32>
    %707 = arith.maxsi %696, %698 : vector<1x1xi32>
    %708 = arith.maxsi %701, %702 : vector<1x1xi32>
    %709 = arith.maxsi %703, %704 : vector<1x1xi32>
    %710 = arith.maxsi %705, %706 : vector<1x1xi32>
    %711 = arith.maxsi %707, %700 : vector<1x1xi32>
    %712 = arith.maxsi %708, %709 : vector<1x1xi32>
    %713 = arith.maxsi %710, %711 : vector<1x1xi32>
    %714 = arith.maxsi %712, %713 : vector<1x1xi32>
    %715 = arith.subi %481, %714 : vector<1x1xi32>
    %c20_i32_130 = arith.constant 20 : i32
    %716 = vector.broadcast %c20_i32_130 : i32 to vector<1x1xi32>
    %717 = arith.shli %670, %716 : vector<1x1xi32>
    %718 = arith.ori %484, %717 : vector<1x1xi32>
    %719 = vector.broadcast %670 : vector<1x1xi32> to vector<8x2xi32>
    %720 = arith.cmpi eq, %491, %719 : vector<8x2xi32>
    %721 = arith.andi %487, %720 : vector<8x2xi1>
    %c16_i32 = arith.constant 16 : i32
    %722 = vector.broadcast %c16_i32 : i32 to vector<8x2xi32>
    %723 = arith.shrsi %10, %722 : vector<8x2xi32>
    %c15_i32_131 = arith.constant 15 : i32
    %724 = vector.broadcast %c15_i32_131 : i32 to vector<8x2xi32>
    %725 = arith.andi %723, %724 : vector<8x2xi32>
    %c0_i32_132 = arith.constant 0 : i32
    %726 = vector.broadcast %c0_i32_132 : i32 to vector<8x2xi32>
    %727 = arith.cmpi sle, %725, %726 : vector<8x2xi32>
    %728 = arith.andi %721, %727 : vector<8x2xi1>
    %729 = arith.extui %728 : vector<8x2xi1> to vector<8x2xi32>
    %730 = vector.shape_cast %729 : vector<8x2xi32> to vector<1x8x2xi32>
    %cst_133 = arith.constant dense<0> : vector<1xi32>
    %731 = vector.multi_reduction <add>, %730, %cst_133 [1, 2] : vector<1x8x2xi32> to vector<1xi32>
    %732 = vector.shape_cast %731 : vector<1xi32> to vector<1x1x1xi32>
    %733 = vector.extract %732[0, 0, 0] : i32 from vector<1x1x1xi32>
    %734 = vector.broadcast %733 : i32 to vector<1x1xi32>
    %c1_i32_134 = arith.constant 1 : i32
    %735 = vector.broadcast %c1_i32_134 : i32 to vector<8x2xi32>
    %736 = arith.cmpi sle, %725, %735 : vector<8x2xi32>
    %737 = arith.andi %721, %736 : vector<8x2xi1>
    %738 = arith.extui %737 : vector<8x2xi1> to vector<8x2xi32>
    %739 = vector.shape_cast %738 : vector<8x2xi32> to vector<1x8x2xi32>
    %cst_135 = arith.constant dense<0> : vector<1xi32>
    %740 = vector.multi_reduction <add>, %739, %cst_135 [1, 2] : vector<1x8x2xi32> to vector<1xi32>
    %741 = vector.shape_cast %740 : vector<1xi32> to vector<1x1x1xi32>
    %742 = vector.extract %741[0, 0, 0] : i32 from vector<1x1x1xi32>
    %743 = vector.broadcast %742 : i32 to vector<1x1xi32>
    %c2_i32_136 = arith.constant 2 : i32
    %744 = vector.broadcast %c2_i32_136 : i32 to vector<8x2xi32>
    %745 = arith.cmpi sle, %725, %744 : vector<8x2xi32>
    %746 = arith.andi %721, %745 : vector<8x2xi1>
    %747 = arith.extui %746 : vector<8x2xi1> to vector<8x2xi32>
    %748 = vector.shape_cast %747 : vector<8x2xi32> to vector<1x8x2xi32>
    %cst_137 = arith.constant dense<0> : vector<1xi32>
    %749 = vector.multi_reduction <add>, %748, %cst_137 [1, 2] : vector<1x8x2xi32> to vector<1xi32>
    %750 = vector.shape_cast %749 : vector<1xi32> to vector<1x1x1xi32>
    %751 = vector.extract %750[0, 0, 0] : i32 from vector<1x1x1xi32>
    %752 = vector.broadcast %751 : i32 to vector<1x1xi32>
    %c3_i32_138 = arith.constant 3 : i32
    %753 = vector.broadcast %c3_i32_138 : i32 to vector<8x2xi32>
    %754 = arith.cmpi sle, %725, %753 : vector<8x2xi32>
    %755 = arith.andi %721, %754 : vector<8x2xi1>
    %756 = arith.extui %755 : vector<8x2xi1> to vector<8x2xi32>
    %757 = vector.shape_cast %756 : vector<8x2xi32> to vector<1x8x2xi32>
    %cst_139 = arith.constant dense<0> : vector<1xi32>
    %758 = vector.multi_reduction <add>, %757, %cst_139 [1, 2] : vector<1x8x2xi32> to vector<1xi32>
    %759 = vector.shape_cast %758 : vector<1xi32> to vector<1x1x1xi32>
    %760 = vector.extract %759[0, 0, 0] : i32 from vector<1x1x1xi32>
    %761 = vector.broadcast %760 : i32 to vector<1x1xi32>
    %c4_i32_140 = arith.constant 4 : i32
    %762 = vector.broadcast %c4_i32_140 : i32 to vector<8x2xi32>
    %763 = arith.cmpi sle, %725, %762 : vector<8x2xi32>
    %764 = arith.andi %721, %763 : vector<8x2xi1>
    %765 = arith.extui %764 : vector<8x2xi1> to vector<8x2xi32>
    %766 = vector.shape_cast %765 : vector<8x2xi32> to vector<1x8x2xi32>
    %cst_141 = arith.constant dense<0> : vector<1xi32>
    %767 = vector.multi_reduction <add>, %766, %cst_141 [1, 2] : vector<1x8x2xi32> to vector<1xi32>
    %768 = vector.shape_cast %767 : vector<1xi32> to vector<1x1x1xi32>
    %769 = vector.extract %768[0, 0, 0] : i32 from vector<1x1x1xi32>
    %770 = vector.broadcast %769 : i32 to vector<1x1xi32>
    %c5_i32_142 = arith.constant 5 : i32
    %771 = vector.broadcast %c5_i32_142 : i32 to vector<8x2xi32>
    %772 = arith.cmpi sle, %725, %771 : vector<8x2xi32>
    %773 = arith.andi %721, %772 : vector<8x2xi1>
    %774 = arith.extui %773 : vector<8x2xi1> to vector<8x2xi32>
    %775 = vector.shape_cast %774 : vector<8x2xi32> to vector<1x8x2xi32>
    %cst_143 = arith.constant dense<0> : vector<1xi32>
    %776 = vector.multi_reduction <add>, %775, %cst_143 [1, 2] : vector<1x8x2xi32> to vector<1xi32>
    %777 = vector.shape_cast %776 : vector<1xi32> to vector<1x1x1xi32>
    %778 = vector.extract %777[0, 0, 0] : i32 from vector<1x1x1xi32>
    %779 = vector.broadcast %778 : i32 to vector<1x1xi32>
    %c6_i32_144 = arith.constant 6 : i32
    %780 = vector.broadcast %c6_i32_144 : i32 to vector<8x2xi32>
    %781 = arith.cmpi sle, %725, %780 : vector<8x2xi32>
    %782 = arith.andi %721, %781 : vector<8x2xi1>
    %783 = arith.extui %782 : vector<8x2xi1> to vector<8x2xi32>
    %784 = vector.shape_cast %783 : vector<8x2xi32> to vector<1x8x2xi32>
    %cst_145 = arith.constant dense<0> : vector<1xi32>
    %785 = vector.multi_reduction <add>, %784, %cst_145 [1, 2] : vector<1x8x2xi32> to vector<1xi32>
    %786 = vector.shape_cast %785 : vector<1xi32> to vector<1x1x1xi32>
    %787 = vector.extract %786[0, 0, 0] : i32 from vector<1x1x1xi32>
    %788 = vector.broadcast %787 : i32 to vector<1x1xi32>
    %c7_i32_146 = arith.constant 7 : i32
    %789 = vector.broadcast %c7_i32_146 : i32 to vector<8x2xi32>
    %790 = arith.cmpi sle, %725, %789 : vector<8x2xi32>
    %791 = arith.andi %721, %790 : vector<8x2xi1>
    %792 = arith.extui %791 : vector<8x2xi1> to vector<8x2xi32>
    %793 = vector.shape_cast %792 : vector<8x2xi32> to vector<1x8x2xi32>
    %cst_147 = arith.constant dense<0> : vector<1xi32>
    %794 = vector.multi_reduction <add>, %793, %cst_147 [1, 2] : vector<1x8x2xi32> to vector<1xi32>
    %795 = vector.shape_cast %794 : vector<1xi32> to vector<1x1x1xi32>
    %796 = vector.extract %795[0, 0, 0] : i32 from vector<1x1x1xi32>
    %797 = vector.broadcast %796 : i32 to vector<1x1xi32>
    %c8_i32_148 = arith.constant 8 : i32
    %798 = vector.broadcast %c8_i32_148 : i32 to vector<8x2xi32>
    %799 = arith.cmpi sle, %725, %798 : vector<8x2xi32>
    %800 = arith.andi %721, %799 : vector<8x2xi1>
    %801 = arith.extui %800 : vector<8x2xi1> to vector<8x2xi32>
    %802 = vector.shape_cast %801 : vector<8x2xi32> to vector<1x8x2xi32>
    %cst_149 = arith.constant dense<0> : vector<1xi32>
    %803 = vector.multi_reduction <add>, %802, %cst_149 [1, 2] : vector<1x8x2xi32> to vector<1xi32>
    %804 = vector.shape_cast %803 : vector<1xi32> to vector<1x1x1xi32>
    %805 = vector.extract %804[0, 0, 0] : i32 from vector<1x1x1xi32>
    %806 = vector.broadcast %805 : i32 to vector<1x1xi32>
    %c9_i32_150 = arith.constant 9 : i32
    %807 = vector.broadcast %c9_i32_150 : i32 to vector<8x2xi32>
    %808 = arith.cmpi sle, %725, %807 : vector<8x2xi32>
    %809 = arith.andi %721, %808 : vector<8x2xi1>
    %810 = arith.extui %809 : vector<8x2xi1> to vector<8x2xi32>
    %811 = vector.shape_cast %810 : vector<8x2xi32> to vector<1x8x2xi32>
    %cst_151 = arith.constant dense<0> : vector<1xi32>
    %812 = vector.multi_reduction <add>, %811, %cst_151 [1, 2] : vector<1x8x2xi32> to vector<1xi32>
    %813 = vector.shape_cast %812 : vector<1xi32> to vector<1x1x1xi32>
    %814 = vector.extract %813[0, 0, 0] : i32 from vector<1x1x1xi32>
    %815 = vector.broadcast %814 : i32 to vector<1x1xi32>
    %c10_i32_152 = arith.constant 10 : i32
    %816 = vector.broadcast %c10_i32_152 : i32 to vector<8x2xi32>
    %817 = arith.cmpi sle, %725, %816 : vector<8x2xi32>
    %818 = arith.andi %721, %817 : vector<8x2xi1>
    %819 = arith.extui %818 : vector<8x2xi1> to vector<8x2xi32>
    %820 = vector.shape_cast %819 : vector<8x2xi32> to vector<1x8x2xi32>
    %cst_153 = arith.constant dense<0> : vector<1xi32>
    %821 = vector.multi_reduction <add>, %820, %cst_153 [1, 2] : vector<1x8x2xi32> to vector<1xi32>
    %822 = vector.shape_cast %821 : vector<1xi32> to vector<1x1x1xi32>
    %823 = vector.extract %822[0, 0, 0] : i32 from vector<1x1x1xi32>
    %824 = vector.broadcast %823 : i32 to vector<1x1xi32>
    %c11_i32_154 = arith.constant 11 : i32
    %825 = vector.broadcast %c11_i32_154 : i32 to vector<8x2xi32>
    %826 = arith.cmpi sle, %725, %825 : vector<8x2xi32>
    %827 = arith.andi %721, %826 : vector<8x2xi1>
    %828 = arith.extui %827 : vector<8x2xi1> to vector<8x2xi32>
    %829 = vector.shape_cast %828 : vector<8x2xi32> to vector<1x8x2xi32>
    %cst_155 = arith.constant dense<0> : vector<1xi32>
    %830 = vector.multi_reduction <add>, %829, %cst_155 [1, 2] : vector<1x8x2xi32> to vector<1xi32>
    %831 = vector.shape_cast %830 : vector<1xi32> to vector<1x1x1xi32>
    %832 = vector.extract %831[0, 0, 0] : i32 from vector<1x1x1xi32>
    %833 = vector.broadcast %832 : i32 to vector<1x1xi32>
    %c12_i32_156 = arith.constant 12 : i32
    %834 = vector.broadcast %c12_i32_156 : i32 to vector<8x2xi32>
    %835 = arith.cmpi sle, %725, %834 : vector<8x2xi32>
    %836 = arith.andi %721, %835 : vector<8x2xi1>
    %837 = arith.extui %836 : vector<8x2xi1> to vector<8x2xi32>
    %838 = vector.shape_cast %837 : vector<8x2xi32> to vector<1x8x2xi32>
    %cst_157 = arith.constant dense<0> : vector<1xi32>
    %839 = vector.multi_reduction <add>, %838, %cst_157 [1, 2] : vector<1x8x2xi32> to vector<1xi32>
    %840 = vector.shape_cast %839 : vector<1xi32> to vector<1x1x1xi32>
    %841 = vector.extract %840[0, 0, 0] : i32 from vector<1x1x1xi32>
    %842 = vector.broadcast %841 : i32 to vector<1x1xi32>
    %c13_i32_158 = arith.constant 13 : i32
    %843 = vector.broadcast %c13_i32_158 : i32 to vector<8x2xi32>
    %844 = arith.cmpi sle, %725, %843 : vector<8x2xi32>
    %845 = arith.andi %721, %844 : vector<8x2xi1>
    %846 = arith.extui %845 : vector<8x2xi1> to vector<8x2xi32>
    %847 = vector.shape_cast %846 : vector<8x2xi32> to vector<1x8x2xi32>
    %cst_159 = arith.constant dense<0> : vector<1xi32>
    %848 = vector.multi_reduction <add>, %847, %cst_159 [1, 2] : vector<1x8x2xi32> to vector<1xi32>
    %849 = vector.shape_cast %848 : vector<1xi32> to vector<1x1x1xi32>
    %850 = vector.extract %849[0, 0, 0] : i32 from vector<1x1x1xi32>
    %851 = vector.broadcast %850 : i32 to vector<1x1xi32>
    %c14_i32_160 = arith.constant 14 : i32
    %852 = vector.broadcast %c14_i32_160 : i32 to vector<8x2xi32>
    %853 = arith.cmpi sle, %725, %852 : vector<8x2xi32>
    %854 = arith.andi %721, %853 : vector<8x2xi1>
    %855 = arith.extui %854 : vector<8x2xi1> to vector<8x2xi32>
    %856 = vector.shape_cast %855 : vector<8x2xi32> to vector<1x8x2xi32>
    %cst_161 = arith.constant dense<0> : vector<1xi32>
    %857 = vector.multi_reduction <add>, %856, %cst_161 [1, 2] : vector<1x8x2xi32> to vector<1xi32>
    %858 = vector.shape_cast %857 : vector<1xi32> to vector<1x1x1xi32>
    %859 = vector.extract %858[0, 0, 0] : i32 from vector<1x1x1xi32>
    %860 = vector.broadcast %859 : i32 to vector<1x1xi32>
    %861 = arith.cmpi slt, %734, %715 : vector<1x1xi32>
    %862 = arith.cmpi slt, %743, %715 : vector<1x1xi32>
    %863 = arith.cmpi slt, %752, %715 : vector<1x1xi32>
    %864 = arith.cmpi slt, %761, %715 : vector<1x1xi32>
    %865 = arith.cmpi slt, %770, %715 : vector<1x1xi32>
    %866 = arith.cmpi slt, %779, %715 : vector<1x1xi32>
    %867 = arith.cmpi slt, %788, %715 : vector<1x1xi32>
    %868 = arith.cmpi slt, %797, %715 : vector<1x1xi32>
    %869 = arith.cmpi slt, %806, %715 : vector<1x1xi32>
    %870 = arith.cmpi slt, %815, %715 : vector<1x1xi32>
    %871 = arith.cmpi slt, %824, %715 : vector<1x1xi32>
    %872 = arith.cmpi slt, %833, %715 : vector<1x1xi32>
    %873 = arith.cmpi slt, %842, %715 : vector<1x1xi32>
    %874 = arith.cmpi slt, %851, %715 : vector<1x1xi32>
    %875 = arith.cmpi slt, %860, %715 : vector<1x1xi32>
    %876 = arith.extui %861 : vector<1x1xi1> to vector<1x1xi32>
    %877 = arith.extui %862 : vector<1x1xi1> to vector<1x1xi32>
    %878 = arith.extui %863 : vector<1x1xi1> to vector<1x1xi32>
    %879 = arith.extui %864 : vector<1x1xi1> to vector<1x1xi32>
    %880 = arith.extui %865 : vector<1x1xi1> to vector<1x1xi32>
    %881 = arith.extui %866 : vector<1x1xi1> to vector<1x1xi32>
    %882 = arith.extui %867 : vector<1x1xi1> to vector<1x1xi32>
    %883 = arith.extui %868 : vector<1x1xi1> to vector<1x1xi32>
    %884 = arith.extui %869 : vector<1x1xi1> to vector<1x1xi32>
    %885 = arith.extui %870 : vector<1x1xi1> to vector<1x1xi32>
    %886 = arith.extui %871 : vector<1x1xi1> to vector<1x1xi32>
    %887 = arith.extui %872 : vector<1x1xi1> to vector<1x1xi32>
    %888 = arith.extui %873 : vector<1x1xi1> to vector<1x1xi32>
    %889 = arith.extui %874 : vector<1x1xi1> to vector<1x1xi32>
    %890 = arith.extui %875 : vector<1x1xi1> to vector<1x1xi32>
    %891 = arith.addi %876, %877 : vector<1x1xi32>
    %892 = arith.addi %878, %879 : vector<1x1xi32>
    %893 = arith.addi %880, %881 : vector<1x1xi32>
    %894 = arith.addi %882, %883 : vector<1x1xi32>
    %895 = arith.addi %884, %885 : vector<1x1xi32>
    %896 = arith.addi %886, %887 : vector<1x1xi32>
    %897 = arith.addi %888, %889 : vector<1x1xi32>
    %898 = arith.addi %891, %892 : vector<1x1xi32>
    %899 = arith.addi %893, %894 : vector<1x1xi32>
    %900 = arith.addi %895, %896 : vector<1x1xi32>
    %901 = arith.addi %897, %890 : vector<1x1xi32>
    %902 = arith.addi %898, %899 : vector<1x1xi32>
    %903 = arith.addi %900, %901 : vector<1x1xi32>
    %904 = arith.addi %902, %903 : vector<1x1xi32>
    %c0_i32_162 = arith.constant 0 : i32
    %905 = vector.broadcast %c0_i32_162 : i32 to vector<1x1xi32>
    %906 = arith.select %861, %734, %905 : vector<1x1xi1>, vector<1x1xi32>
    %c0_i32_163 = arith.constant 0 : i32
    %907 = vector.broadcast %c0_i32_163 : i32 to vector<1x1xi32>
    %908 = arith.select %862, %743, %907 : vector<1x1xi1>, vector<1x1xi32>
    %c0_i32_164 = arith.constant 0 : i32
    %909 = vector.broadcast %c0_i32_164 : i32 to vector<1x1xi32>
    %910 = arith.select %863, %752, %909 : vector<1x1xi1>, vector<1x1xi32>
    %c0_i32_165 = arith.constant 0 : i32
    %911 = vector.broadcast %c0_i32_165 : i32 to vector<1x1xi32>
    %912 = arith.select %864, %761, %911 : vector<1x1xi1>, vector<1x1xi32>
    %c0_i32_166 = arith.constant 0 : i32
    %913 = vector.broadcast %c0_i32_166 : i32 to vector<1x1xi32>
    %914 = arith.select %865, %770, %913 : vector<1x1xi1>, vector<1x1xi32>
    %c0_i32_167 = arith.constant 0 : i32
    %915 = vector.broadcast %c0_i32_167 : i32 to vector<1x1xi32>
    %916 = arith.select %866, %779, %915 : vector<1x1xi1>, vector<1x1xi32>
    %c0_i32_168 = arith.constant 0 : i32
    %917 = vector.broadcast %c0_i32_168 : i32 to vector<1x1xi32>
    %918 = arith.select %867, %788, %917 : vector<1x1xi1>, vector<1x1xi32>
    %c0_i32_169 = arith.constant 0 : i32
    %919 = vector.broadcast %c0_i32_169 : i32 to vector<1x1xi32>
    %920 = arith.select %868, %797, %919 : vector<1x1xi1>, vector<1x1xi32>
    %c0_i32_170 = arith.constant 0 : i32
    %921 = vector.broadcast %c0_i32_170 : i32 to vector<1x1xi32>
    %922 = arith.select %869, %806, %921 : vector<1x1xi1>, vector<1x1xi32>
    %c0_i32_171 = arith.constant 0 : i32
    %923 = vector.broadcast %c0_i32_171 : i32 to vector<1x1xi32>
    %924 = arith.select %870, %815, %923 : vector<1x1xi1>, vector<1x1xi32>
    %c0_i32_172 = arith.constant 0 : i32
    %925 = vector.broadcast %c0_i32_172 : i32 to vector<1x1xi32>
    %926 = arith.select %871, %824, %925 : vector<1x1xi1>, vector<1x1xi32>
    %c0_i32_173 = arith.constant 0 : i32
    %927 = vector.broadcast %c0_i32_173 : i32 to vector<1x1xi32>
    %928 = arith.select %872, %833, %927 : vector<1x1xi1>, vector<1x1xi32>
    %c0_i32_174 = arith.constant 0 : i32
    %929 = vector.broadcast %c0_i32_174 : i32 to vector<1x1xi32>
    %930 = arith.select %873, %842, %929 : vector<1x1xi1>, vector<1x1xi32>
    %c0_i32_175 = arith.constant 0 : i32
    %931 = vector.broadcast %c0_i32_175 : i32 to vector<1x1xi32>
    %932 = arith.select %874, %851, %931 : vector<1x1xi1>, vector<1x1xi32>
    %c0_i32_176 = arith.constant 0 : i32
    %933 = vector.broadcast %c0_i32_176 : i32 to vector<1x1xi32>
    %934 = arith.select %875, %860, %933 : vector<1x1xi1>, vector<1x1xi32>
    %935 = arith.maxsi %906, %908 : vector<1x1xi32>
    %936 = arith.maxsi %910, %912 : vector<1x1xi32>
    %937 = arith.maxsi %914, %916 : vector<1x1xi32>
    %938 = arith.maxsi %918, %920 : vector<1x1xi32>
    %939 = arith.maxsi %922, %924 : vector<1x1xi32>
    %940 = arith.maxsi %926, %928 : vector<1x1xi32>
    %941 = arith.maxsi %930, %932 : vector<1x1xi32>
    %942 = arith.maxsi %935, %936 : vector<1x1xi32>
    %943 = arith.maxsi %937, %938 : vector<1x1xi32>
    %944 = arith.maxsi %939, %940 : vector<1x1xi32>
    %945 = arith.maxsi %941, %934 : vector<1x1xi32>
    %946 = arith.maxsi %942, %943 : vector<1x1xi32>
    %947 = arith.maxsi %944, %945 : vector<1x1xi32>
    %948 = arith.maxsi %946, %947 : vector<1x1xi32>
    %949 = arith.subi %715, %948 : vector<1x1xi32>
    %c16_i32_177 = arith.constant 16 : i32
    %950 = vector.broadcast %c16_i32_177 : i32 to vector<1x1xi32>
    %951 = arith.shli %904, %950 : vector<1x1xi32>
    %952 = arith.ori %718, %951 : vector<1x1xi32>
    %953 = vector.broadcast %904 : vector<1x1xi32> to vector<8x2xi32>
    %954 = arith.cmpi eq, %725, %953 : vector<8x2xi32>
    %955 = arith.andi %721, %954 : vector<8x2xi1>
    %c12_i32_178 = arith.constant 12 : i32
    %956 = vector.broadcast %c12_i32_178 : i32 to vector<8x2xi32>
    %957 = arith.shrsi %10, %956 : vector<8x2xi32>
    %c15_i32_179 = arith.constant 15 : i32
    %958 = vector.broadcast %c15_i32_179 : i32 to vector<8x2xi32>
    %959 = arith.andi %957, %958 : vector<8x2xi32>
    %c0_i32_180 = arith.constant 0 : i32
    %960 = vector.broadcast %c0_i32_180 : i32 to vector<8x2xi32>
    %961 = arith.cmpi sle, %959, %960 : vector<8x2xi32>
    %962 = arith.andi %955, %961 : vector<8x2xi1>
    %963 = arith.extui %962 : vector<8x2xi1> to vector<8x2xi32>
    %964 = vector.shape_cast %963 : vector<8x2xi32> to vector<1x8x2xi32>
    %cst_181 = arith.constant dense<0> : vector<1xi32>
    %965 = vector.multi_reduction <add>, %964, %cst_181 [1, 2] : vector<1x8x2xi32> to vector<1xi32>
    %966 = vector.shape_cast %965 : vector<1xi32> to vector<1x1x1xi32>
    %967 = vector.extract %966[0, 0, 0] : i32 from vector<1x1x1xi32>
    %968 = vector.broadcast %967 : i32 to vector<1x1xi32>
    %c1_i32_182 = arith.constant 1 : i32
    %969 = vector.broadcast %c1_i32_182 : i32 to vector<8x2xi32>
    %970 = arith.cmpi sle, %959, %969 : vector<8x2xi32>
    %971 = arith.andi %955, %970 : vector<8x2xi1>
    %972 = arith.extui %971 : vector<8x2xi1> to vector<8x2xi32>
    %973 = vector.shape_cast %972 : vector<8x2xi32> to vector<1x8x2xi32>
    %cst_183 = arith.constant dense<0> : vector<1xi32>
    %974 = vector.multi_reduction <add>, %973, %cst_183 [1, 2] : vector<1x8x2xi32> to vector<1xi32>
    %975 = vector.shape_cast %974 : vector<1xi32> to vector<1x1x1xi32>
    %976 = vector.extract %975[0, 0, 0] : i32 from vector<1x1x1xi32>
    %977 = vector.broadcast %976 : i32 to vector<1x1xi32>
    %c2_i32_184 = arith.constant 2 : i32
    %978 = vector.broadcast %c2_i32_184 : i32 to vector<8x2xi32>
    %979 = arith.cmpi sle, %959, %978 : vector<8x2xi32>
    %980 = arith.andi %955, %979 : vector<8x2xi1>
    %981 = arith.extui %980 : vector<8x2xi1> to vector<8x2xi32>
    %982 = vector.shape_cast %981 : vector<8x2xi32> to vector<1x8x2xi32>
    %cst_185 = arith.constant dense<0> : vector<1xi32>
    %983 = vector.multi_reduction <add>, %982, %cst_185 [1, 2] : vector<1x8x2xi32> to vector<1xi32>
    %984 = vector.shape_cast %983 : vector<1xi32> to vector<1x1x1xi32>
    %985 = vector.extract %984[0, 0, 0] : i32 from vector<1x1x1xi32>
    %986 = vector.broadcast %985 : i32 to vector<1x1xi32>
    %c3_i32_186 = arith.constant 3 : i32
    %987 = vector.broadcast %c3_i32_186 : i32 to vector<8x2xi32>
    %988 = arith.cmpi sle, %959, %987 : vector<8x2xi32>
    %989 = arith.andi %955, %988 : vector<8x2xi1>
    %990 = arith.extui %989 : vector<8x2xi1> to vector<8x2xi32>
    %991 = vector.shape_cast %990 : vector<8x2xi32> to vector<1x8x2xi32>
    %cst_187 = arith.constant dense<0> : vector<1xi32>
    %992 = vector.multi_reduction <add>, %991, %cst_187 [1, 2] : vector<1x8x2xi32> to vector<1xi32>
    %993 = vector.shape_cast %992 : vector<1xi32> to vector<1x1x1xi32>
    %994 = vector.extract %993[0, 0, 0] : i32 from vector<1x1x1xi32>
    %995 = vector.broadcast %994 : i32 to vector<1x1xi32>
    %c4_i32_188 = arith.constant 4 : i32
    %996 = vector.broadcast %c4_i32_188 : i32 to vector<8x2xi32>
    %997 = arith.cmpi sle, %959, %996 : vector<8x2xi32>
    %998 = arith.andi %955, %997 : vector<8x2xi1>
    %999 = arith.extui %998 : vector<8x2xi1> to vector<8x2xi32>
    %1000 = vector.shape_cast %999 : vector<8x2xi32> to vector<1x8x2xi32>
    %cst_189 = arith.constant dense<0> : vector<1xi32>
    %1001 = vector.multi_reduction <add>, %1000, %cst_189 [1, 2] : vector<1x8x2xi32> to vector<1xi32>
    %1002 = vector.shape_cast %1001 : vector<1xi32> to vector<1x1x1xi32>
    %1003 = vector.extract %1002[0, 0, 0] : i32 from vector<1x1x1xi32>
    %1004 = vector.broadcast %1003 : i32 to vector<1x1xi32>
    %c5_i32_190 = arith.constant 5 : i32
    %1005 = vector.broadcast %c5_i32_190 : i32 to vector<8x2xi32>
    %1006 = arith.cmpi sle, %959, %1005 : vector<8x2xi32>
    %1007 = arith.andi %955, %1006 : vector<8x2xi1>
    %1008 = arith.extui %1007 : vector<8x2xi1> to vector<8x2xi32>
    %1009 = vector.shape_cast %1008 : vector<8x2xi32> to vector<1x8x2xi32>
    %cst_191 = arith.constant dense<0> : vector<1xi32>
    %1010 = vector.multi_reduction <add>, %1009, %cst_191 [1, 2] : vector<1x8x2xi32> to vector<1xi32>
    %1011 = vector.shape_cast %1010 : vector<1xi32> to vector<1x1x1xi32>
    %1012 = vector.extract %1011[0, 0, 0] : i32 from vector<1x1x1xi32>
    %1013 = vector.broadcast %1012 : i32 to vector<1x1xi32>
    %c6_i32_192 = arith.constant 6 : i32
    %1014 = vector.broadcast %c6_i32_192 : i32 to vector<8x2xi32>
    %1015 = arith.cmpi sle, %959, %1014 : vector<8x2xi32>
    %1016 = arith.andi %955, %1015 : vector<8x2xi1>
    %1017 = arith.extui %1016 : vector<8x2xi1> to vector<8x2xi32>
    %1018 = vector.shape_cast %1017 : vector<8x2xi32> to vector<1x8x2xi32>
    %cst_193 = arith.constant dense<0> : vector<1xi32>
    %1019 = vector.multi_reduction <add>, %1018, %cst_193 [1, 2] : vector<1x8x2xi32> to vector<1xi32>
    %1020 = vector.shape_cast %1019 : vector<1xi32> to vector<1x1x1xi32>
    %1021 = vector.extract %1020[0, 0, 0] : i32 from vector<1x1x1xi32>
    %1022 = vector.broadcast %1021 : i32 to vector<1x1xi32>
    %c7_i32_194 = arith.constant 7 : i32
    %1023 = vector.broadcast %c7_i32_194 : i32 to vector<8x2xi32>
    %1024 = arith.cmpi sle, %959, %1023 : vector<8x2xi32>
    %1025 = arith.andi %955, %1024 : vector<8x2xi1>
    %1026 = arith.extui %1025 : vector<8x2xi1> to vector<8x2xi32>
    %1027 = vector.shape_cast %1026 : vector<8x2xi32> to vector<1x8x2xi32>
    %cst_195 = arith.constant dense<0> : vector<1xi32>
    %1028 = vector.multi_reduction <add>, %1027, %cst_195 [1, 2] : vector<1x8x2xi32> to vector<1xi32>
    %1029 = vector.shape_cast %1028 : vector<1xi32> to vector<1x1x1xi32>
    %1030 = vector.extract %1029[0, 0, 0] : i32 from vector<1x1x1xi32>
    %1031 = vector.broadcast %1030 : i32 to vector<1x1xi32>
    %c8_i32_196 = arith.constant 8 : i32
    %1032 = vector.broadcast %c8_i32_196 : i32 to vector<8x2xi32>
    %1033 = arith.cmpi sle, %959, %1032 : vector<8x2xi32>
    %1034 = arith.andi %955, %1033 : vector<8x2xi1>
    %1035 = arith.extui %1034 : vector<8x2xi1> to vector<8x2xi32>
    %1036 = vector.shape_cast %1035 : vector<8x2xi32> to vector<1x8x2xi32>
    %cst_197 = arith.constant dense<0> : vector<1xi32>
    %1037 = vector.multi_reduction <add>, %1036, %cst_197 [1, 2] : vector<1x8x2xi32> to vector<1xi32>
    %1038 = vector.shape_cast %1037 : vector<1xi32> to vector<1x1x1xi32>
    %1039 = vector.extract %1038[0, 0, 0] : i32 from vector<1x1x1xi32>
    %1040 = vector.broadcast %1039 : i32 to vector<1x1xi32>
    %c9_i32_198 = arith.constant 9 : i32
    %1041 = vector.broadcast %c9_i32_198 : i32 to vector<8x2xi32>
    %1042 = arith.cmpi sle, %959, %1041 : vector<8x2xi32>
    %1043 = arith.andi %955, %1042 : vector<8x2xi1>
    %1044 = arith.extui %1043 : vector<8x2xi1> to vector<8x2xi32>
    %1045 = vector.shape_cast %1044 : vector<8x2xi32> to vector<1x8x2xi32>
    %cst_199 = arith.constant dense<0> : vector<1xi32>
    %1046 = vector.multi_reduction <add>, %1045, %cst_199 [1, 2] : vector<1x8x2xi32> to vector<1xi32>
    %1047 = vector.shape_cast %1046 : vector<1xi32> to vector<1x1x1xi32>
    %1048 = vector.extract %1047[0, 0, 0] : i32 from vector<1x1x1xi32>
    %1049 = vector.broadcast %1048 : i32 to vector<1x1xi32>
    %c10_i32_200 = arith.constant 10 : i32
    %1050 = vector.broadcast %c10_i32_200 : i32 to vector<8x2xi32>
    %1051 = arith.cmpi sle, %959, %1050 : vector<8x2xi32>
    %1052 = arith.andi %955, %1051 : vector<8x2xi1>
    %1053 = arith.extui %1052 : vector<8x2xi1> to vector<8x2xi32>
    %1054 = vector.shape_cast %1053 : vector<8x2xi32> to vector<1x8x2xi32>
    %cst_201 = arith.constant dense<0> : vector<1xi32>
    %1055 = vector.multi_reduction <add>, %1054, %cst_201 [1, 2] : vector<1x8x2xi32> to vector<1xi32>
    %1056 = vector.shape_cast %1055 : vector<1xi32> to vector<1x1x1xi32>
    %1057 = vector.extract %1056[0, 0, 0] : i32 from vector<1x1x1xi32>
    %1058 = vector.broadcast %1057 : i32 to vector<1x1xi32>
    %c11_i32_202 = arith.constant 11 : i32
    %1059 = vector.broadcast %c11_i32_202 : i32 to vector<8x2xi32>
    %1060 = arith.cmpi sle, %959, %1059 : vector<8x2xi32>
    %1061 = arith.andi %955, %1060 : vector<8x2xi1>
    %1062 = arith.extui %1061 : vector<8x2xi1> to vector<8x2xi32>
    %1063 = vector.shape_cast %1062 : vector<8x2xi32> to vector<1x8x2xi32>
    %cst_203 = arith.constant dense<0> : vector<1xi32>
    %1064 = vector.multi_reduction <add>, %1063, %cst_203 [1, 2] : vector<1x8x2xi32> to vector<1xi32>
    %1065 = vector.shape_cast %1064 : vector<1xi32> to vector<1x1x1xi32>
    %1066 = vector.extract %1065[0, 0, 0] : i32 from vector<1x1x1xi32>
    %1067 = vector.broadcast %1066 : i32 to vector<1x1xi32>
    %c12_i32_204 = arith.constant 12 : i32
    %1068 = vector.broadcast %c12_i32_204 : i32 to vector<8x2xi32>
    %1069 = arith.cmpi sle, %959, %1068 : vector<8x2xi32>
    %1070 = arith.andi %955, %1069 : vector<8x2xi1>
    %1071 = arith.extui %1070 : vector<8x2xi1> to vector<8x2xi32>
    %1072 = vector.shape_cast %1071 : vector<8x2xi32> to vector<1x8x2xi32>
    %cst_205 = arith.constant dense<0> : vector<1xi32>
    %1073 = vector.multi_reduction <add>, %1072, %cst_205 [1, 2] : vector<1x8x2xi32> to vector<1xi32>
    %1074 = vector.shape_cast %1073 : vector<1xi32> to vector<1x1x1xi32>
    %1075 = vector.extract %1074[0, 0, 0] : i32 from vector<1x1x1xi32>
    %1076 = vector.broadcast %1075 : i32 to vector<1x1xi32>
    %c13_i32_206 = arith.constant 13 : i32
    %1077 = vector.broadcast %c13_i32_206 : i32 to vector<8x2xi32>
    %1078 = arith.cmpi sle, %959, %1077 : vector<8x2xi32>
    %1079 = arith.andi %955, %1078 : vector<8x2xi1>
    %1080 = arith.extui %1079 : vector<8x2xi1> to vector<8x2xi32>
    %1081 = vector.shape_cast %1080 : vector<8x2xi32> to vector<1x8x2xi32>
    %cst_207 = arith.constant dense<0> : vector<1xi32>
    %1082 = vector.multi_reduction <add>, %1081, %cst_207 [1, 2] : vector<1x8x2xi32> to vector<1xi32>
    %1083 = vector.shape_cast %1082 : vector<1xi32> to vector<1x1x1xi32>
    %1084 = vector.extract %1083[0, 0, 0] : i32 from vector<1x1x1xi32>
    %1085 = vector.broadcast %1084 : i32 to vector<1x1xi32>
    %c14_i32_208 = arith.constant 14 : i32
    %1086 = vector.broadcast %c14_i32_208 : i32 to vector<8x2xi32>
    %1087 = arith.cmpi sle, %959, %1086 : vector<8x2xi32>
    %1088 = arith.andi %955, %1087 : vector<8x2xi1>
    %1089 = arith.extui %1088 : vector<8x2xi1> to vector<8x2xi32>
    %1090 = vector.shape_cast %1089 : vector<8x2xi32> to vector<1x8x2xi32>
    %cst_209 = arith.constant dense<0> : vector<1xi32>
    %1091 = vector.multi_reduction <add>, %1090, %cst_209 [1, 2] : vector<1x8x2xi32> to vector<1xi32>
    %1092 = vector.shape_cast %1091 : vector<1xi32> to vector<1x1x1xi32>
    %1093 = vector.extract %1092[0, 0, 0] : i32 from vector<1x1x1xi32>
    %1094 = vector.broadcast %1093 : i32 to vector<1x1xi32>
    %1095 = arith.cmpi slt, %968, %949 : vector<1x1xi32>
    %1096 = arith.cmpi slt, %977, %949 : vector<1x1xi32>
    %1097 = arith.cmpi slt, %986, %949 : vector<1x1xi32>
    %1098 = arith.cmpi slt, %995, %949 : vector<1x1xi32>
    %1099 = arith.cmpi slt, %1004, %949 : vector<1x1xi32>
    %1100 = arith.cmpi slt, %1013, %949 : vector<1x1xi32>
    %1101 = arith.cmpi slt, %1022, %949 : vector<1x1xi32>
    %1102 = arith.cmpi slt, %1031, %949 : vector<1x1xi32>
    %1103 = arith.cmpi slt, %1040, %949 : vector<1x1xi32>
    %1104 = arith.cmpi slt, %1049, %949 : vector<1x1xi32>
    %1105 = arith.cmpi slt, %1058, %949 : vector<1x1xi32>
    %1106 = arith.cmpi slt, %1067, %949 : vector<1x1xi32>
    %1107 = arith.cmpi slt, %1076, %949 : vector<1x1xi32>
    %1108 = arith.cmpi slt, %1085, %949 : vector<1x1xi32>
    %1109 = arith.cmpi slt, %1094, %949 : vector<1x1xi32>
    %1110 = arith.extui %1095 : vector<1x1xi1> to vector<1x1xi32>
    %1111 = arith.extui %1096 : vector<1x1xi1> to vector<1x1xi32>
    %1112 = arith.extui %1097 : vector<1x1xi1> to vector<1x1xi32>
    %1113 = arith.extui %1098 : vector<1x1xi1> to vector<1x1xi32>
    %1114 = arith.extui %1099 : vector<1x1xi1> to vector<1x1xi32>
    %1115 = arith.extui %1100 : vector<1x1xi1> to vector<1x1xi32>
    %1116 = arith.extui %1101 : vector<1x1xi1> to vector<1x1xi32>
    %1117 = arith.extui %1102 : vector<1x1xi1> to vector<1x1xi32>
    %1118 = arith.extui %1103 : vector<1x1xi1> to vector<1x1xi32>
    %1119 = arith.extui %1104 : vector<1x1xi1> to vector<1x1xi32>
    %1120 = arith.extui %1105 : vector<1x1xi1> to vector<1x1xi32>
    %1121 = arith.extui %1106 : vector<1x1xi1> to vector<1x1xi32>
    %1122 = arith.extui %1107 : vector<1x1xi1> to vector<1x1xi32>
    %1123 = arith.extui %1108 : vector<1x1xi1> to vector<1x1xi32>
    %1124 = arith.extui %1109 : vector<1x1xi1> to vector<1x1xi32>
    %1125 = arith.addi %1110, %1111 : vector<1x1xi32>
    %1126 = arith.addi %1112, %1113 : vector<1x1xi32>
    %1127 = arith.addi %1114, %1115 : vector<1x1xi32>
    %1128 = arith.addi %1116, %1117 : vector<1x1xi32>
    %1129 = arith.addi %1118, %1119 : vector<1x1xi32>
    %1130 = arith.addi %1120, %1121 : vector<1x1xi32>
    %1131 = arith.addi %1122, %1123 : vector<1x1xi32>
    %1132 = arith.addi %1125, %1126 : vector<1x1xi32>
    %1133 = arith.addi %1127, %1128 : vector<1x1xi32>
    %1134 = arith.addi %1129, %1130 : vector<1x1xi32>
    %1135 = arith.addi %1131, %1124 : vector<1x1xi32>
    %1136 = arith.addi %1132, %1133 : vector<1x1xi32>
    %1137 = arith.addi %1134, %1135 : vector<1x1xi32>
    %1138 = arith.addi %1136, %1137 : vector<1x1xi32>
    %c0_i32_210 = arith.constant 0 : i32
    %1139 = vector.broadcast %c0_i32_210 : i32 to vector<1x1xi32>
    %1140 = arith.select %1095, %968, %1139 : vector<1x1xi1>, vector<1x1xi32>
    %c0_i32_211 = arith.constant 0 : i32
    %1141 = vector.broadcast %c0_i32_211 : i32 to vector<1x1xi32>
    %1142 = arith.select %1096, %977, %1141 : vector<1x1xi1>, vector<1x1xi32>
    %c0_i32_212 = arith.constant 0 : i32
    %1143 = vector.broadcast %c0_i32_212 : i32 to vector<1x1xi32>
    %1144 = arith.select %1097, %986, %1143 : vector<1x1xi1>, vector<1x1xi32>
    %c0_i32_213 = arith.constant 0 : i32
    %1145 = vector.broadcast %c0_i32_213 : i32 to vector<1x1xi32>
    %1146 = arith.select %1098, %995, %1145 : vector<1x1xi1>, vector<1x1xi32>
    %c0_i32_214 = arith.constant 0 : i32
    %1147 = vector.broadcast %c0_i32_214 : i32 to vector<1x1xi32>
    %1148 = arith.select %1099, %1004, %1147 : vector<1x1xi1>, vector<1x1xi32>
    %c0_i32_215 = arith.constant 0 : i32
    %1149 = vector.broadcast %c0_i32_215 : i32 to vector<1x1xi32>
    %1150 = arith.select %1100, %1013, %1149 : vector<1x1xi1>, vector<1x1xi32>
    %c0_i32_216 = arith.constant 0 : i32
    %1151 = vector.broadcast %c0_i32_216 : i32 to vector<1x1xi32>
    %1152 = arith.select %1101, %1022, %1151 : vector<1x1xi1>, vector<1x1xi32>
    %c0_i32_217 = arith.constant 0 : i32
    %1153 = vector.broadcast %c0_i32_217 : i32 to vector<1x1xi32>
    %1154 = arith.select %1102, %1031, %1153 : vector<1x1xi1>, vector<1x1xi32>
    %c0_i32_218 = arith.constant 0 : i32
    %1155 = vector.broadcast %c0_i32_218 : i32 to vector<1x1xi32>
    %1156 = arith.select %1103, %1040, %1155 : vector<1x1xi1>, vector<1x1xi32>
    %c0_i32_219 = arith.constant 0 : i32
    %1157 = vector.broadcast %c0_i32_219 : i32 to vector<1x1xi32>
    %1158 = arith.select %1104, %1049, %1157 : vector<1x1xi1>, vector<1x1xi32>
    %c0_i32_220 = arith.constant 0 : i32
    %1159 = vector.broadcast %c0_i32_220 : i32 to vector<1x1xi32>
    %1160 = arith.select %1105, %1058, %1159 : vector<1x1xi1>, vector<1x1xi32>
    %c0_i32_221 = arith.constant 0 : i32
    %1161 = vector.broadcast %c0_i32_221 : i32 to vector<1x1xi32>
    %1162 = arith.select %1106, %1067, %1161 : vector<1x1xi1>, vector<1x1xi32>
    %c0_i32_222 = arith.constant 0 : i32
    %1163 = vector.broadcast %c0_i32_222 : i32 to vector<1x1xi32>
    %1164 = arith.select %1107, %1076, %1163 : vector<1x1xi1>, vector<1x1xi32>
    %c0_i32_223 = arith.constant 0 : i32
    %1165 = vector.broadcast %c0_i32_223 : i32 to vector<1x1xi32>
    %1166 = arith.select %1108, %1085, %1165 : vector<1x1xi1>, vector<1x1xi32>
    %c0_i32_224 = arith.constant 0 : i32
    %1167 = vector.broadcast %c0_i32_224 : i32 to vector<1x1xi32>
    %1168 = arith.select %1109, %1094, %1167 : vector<1x1xi1>, vector<1x1xi32>
    %1169 = arith.maxsi %1140, %1142 : vector<1x1xi32>
    %1170 = arith.maxsi %1144, %1146 : vector<1x1xi32>
    %1171 = arith.maxsi %1148, %1150 : vector<1x1xi32>
    %1172 = arith.maxsi %1152, %1154 : vector<1x1xi32>
    %1173 = arith.maxsi %1156, %1158 : vector<1x1xi32>
    %1174 = arith.maxsi %1160, %1162 : vector<1x1xi32>
    %1175 = arith.maxsi %1164, %1166 : vector<1x1xi32>
    %1176 = arith.maxsi %1169, %1170 : vector<1x1xi32>
    %1177 = arith.maxsi %1171, %1172 : vector<1x1xi32>
    %1178 = arith.maxsi %1173, %1174 : vector<1x1xi32>
    %1179 = arith.maxsi %1175, %1168 : vector<1x1xi32>
    %1180 = arith.maxsi %1176, %1177 : vector<1x1xi32>
    %1181 = arith.maxsi %1178, %1179 : vector<1x1xi32>
    %1182 = arith.maxsi %1180, %1181 : vector<1x1xi32>
    %1183 = arith.subi %949, %1182 : vector<1x1xi32>
    %c12_i32_225 = arith.constant 12 : i32
    %1184 = vector.broadcast %c12_i32_225 : i32 to vector<1x1xi32>
    %1185 = arith.shli %1138, %1184 : vector<1x1xi32>
    %1186 = arith.ori %952, %1185 : vector<1x1xi32>
    %1187 = vector.broadcast %1138 : vector<1x1xi32> to vector<8x2xi32>
    %1188 = arith.cmpi eq, %959, %1187 : vector<8x2xi32>
    %1189 = arith.andi %955, %1188 : vector<8x2xi1>
    %c8_i32_226 = arith.constant 8 : i32
    %1190 = vector.broadcast %c8_i32_226 : i32 to vector<8x2xi32>
    %1191 = arith.shrsi %10, %1190 : vector<8x2xi32>
    %c15_i32_227 = arith.constant 15 : i32
    %1192 = vector.broadcast %c15_i32_227 : i32 to vector<8x2xi32>
    %1193 = arith.andi %1191, %1192 : vector<8x2xi32>
    %c0_i32_228 = arith.constant 0 : i32
    %1194 = vector.broadcast %c0_i32_228 : i32 to vector<8x2xi32>
    %1195 = arith.cmpi sle, %1193, %1194 : vector<8x2xi32>
    %1196 = arith.andi %1189, %1195 : vector<8x2xi1>
    %1197 = arith.extui %1196 : vector<8x2xi1> to vector<8x2xi32>
    %1198 = vector.shape_cast %1197 : vector<8x2xi32> to vector<1x8x2xi32>
    %cst_229 = arith.constant dense<0> : vector<1xi32>
    %1199 = vector.multi_reduction <add>, %1198, %cst_229 [1, 2] : vector<1x8x2xi32> to vector<1xi32>
    %1200 = vector.shape_cast %1199 : vector<1xi32> to vector<1x1x1xi32>
    %1201 = vector.extract %1200[0, 0, 0] : i32 from vector<1x1x1xi32>
    %1202 = vector.broadcast %1201 : i32 to vector<1x1xi32>
    %c1_i32_230 = arith.constant 1 : i32
    %1203 = vector.broadcast %c1_i32_230 : i32 to vector<8x2xi32>
    %1204 = arith.cmpi sle, %1193, %1203 : vector<8x2xi32>
    %1205 = arith.andi %1189, %1204 : vector<8x2xi1>
    %1206 = arith.extui %1205 : vector<8x2xi1> to vector<8x2xi32>
    %1207 = vector.shape_cast %1206 : vector<8x2xi32> to vector<1x8x2xi32>
    %cst_231 = arith.constant dense<0> : vector<1xi32>
    %1208 = vector.multi_reduction <add>, %1207, %cst_231 [1, 2] : vector<1x8x2xi32> to vector<1xi32>
    %1209 = vector.shape_cast %1208 : vector<1xi32> to vector<1x1x1xi32>
    %1210 = vector.extract %1209[0, 0, 0] : i32 from vector<1x1x1xi32>
    %1211 = vector.broadcast %1210 : i32 to vector<1x1xi32>
    %c2_i32_232 = arith.constant 2 : i32
    %1212 = vector.broadcast %c2_i32_232 : i32 to vector<8x2xi32>
    %1213 = arith.cmpi sle, %1193, %1212 : vector<8x2xi32>
    %1214 = arith.andi %1189, %1213 : vector<8x2xi1>
    %1215 = arith.extui %1214 : vector<8x2xi1> to vector<8x2xi32>
    %1216 = vector.shape_cast %1215 : vector<8x2xi32> to vector<1x8x2xi32>
    %cst_233 = arith.constant dense<0> : vector<1xi32>
    %1217 = vector.multi_reduction <add>, %1216, %cst_233 [1, 2] : vector<1x8x2xi32> to vector<1xi32>
    %1218 = vector.shape_cast %1217 : vector<1xi32> to vector<1x1x1xi32>
    %1219 = vector.extract %1218[0, 0, 0] : i32 from vector<1x1x1xi32>
    %1220 = vector.broadcast %1219 : i32 to vector<1x1xi32>
    %c3_i32_234 = arith.constant 3 : i32
    %1221 = vector.broadcast %c3_i32_234 : i32 to vector<8x2xi32>
    %1222 = arith.cmpi sle, %1193, %1221 : vector<8x2xi32>
    %1223 = arith.andi %1189, %1222 : vector<8x2xi1>
    %1224 = arith.extui %1223 : vector<8x2xi1> to vector<8x2xi32>
    %1225 = vector.shape_cast %1224 : vector<8x2xi32> to vector<1x8x2xi32>
    %cst_235 = arith.constant dense<0> : vector<1xi32>
    %1226 = vector.multi_reduction <add>, %1225, %cst_235 [1, 2] : vector<1x8x2xi32> to vector<1xi32>
    %1227 = vector.shape_cast %1226 : vector<1xi32> to vector<1x1x1xi32>
    %1228 = vector.extract %1227[0, 0, 0] : i32 from vector<1x1x1xi32>
    %1229 = vector.broadcast %1228 : i32 to vector<1x1xi32>
    %c4_i32_236 = arith.constant 4 : i32
    %1230 = vector.broadcast %c4_i32_236 : i32 to vector<8x2xi32>
    %1231 = arith.cmpi sle, %1193, %1230 : vector<8x2xi32>
    %1232 = arith.andi %1189, %1231 : vector<8x2xi1>
    %1233 = arith.extui %1232 : vector<8x2xi1> to vector<8x2xi32>
    %1234 = vector.shape_cast %1233 : vector<8x2xi32> to vector<1x8x2xi32>
    %cst_237 = arith.constant dense<0> : vector<1xi32>
    %1235 = vector.multi_reduction <add>, %1234, %cst_237 [1, 2] : vector<1x8x2xi32> to vector<1xi32>
    %1236 = vector.shape_cast %1235 : vector<1xi32> to vector<1x1x1xi32>
    %1237 = vector.extract %1236[0, 0, 0] : i32 from vector<1x1x1xi32>
    %1238 = vector.broadcast %1237 : i32 to vector<1x1xi32>
    %c5_i32_238 = arith.constant 5 : i32
    %1239 = vector.broadcast %c5_i32_238 : i32 to vector<8x2xi32>
    %1240 = arith.cmpi sle, %1193, %1239 : vector<8x2xi32>
    %1241 = arith.andi %1189, %1240 : vector<8x2xi1>
    %1242 = arith.extui %1241 : vector<8x2xi1> to vector<8x2xi32>
    %1243 = vector.shape_cast %1242 : vector<8x2xi32> to vector<1x8x2xi32>
    %cst_239 = arith.constant dense<0> : vector<1xi32>
    %1244 = vector.multi_reduction <add>, %1243, %cst_239 [1, 2] : vector<1x8x2xi32> to vector<1xi32>
    %1245 = vector.shape_cast %1244 : vector<1xi32> to vector<1x1x1xi32>
    %1246 = vector.extract %1245[0, 0, 0] : i32 from vector<1x1x1xi32>
    %1247 = vector.broadcast %1246 : i32 to vector<1x1xi32>
    %c6_i32_240 = arith.constant 6 : i32
    %1248 = vector.broadcast %c6_i32_240 : i32 to vector<8x2xi32>
    %1249 = arith.cmpi sle, %1193, %1248 : vector<8x2xi32>
    %1250 = arith.andi %1189, %1249 : vector<8x2xi1>
    %1251 = arith.extui %1250 : vector<8x2xi1> to vector<8x2xi32>
    %1252 = vector.shape_cast %1251 : vector<8x2xi32> to vector<1x8x2xi32>
    %cst_241 = arith.constant dense<0> : vector<1xi32>
    %1253 = vector.multi_reduction <add>, %1252, %cst_241 [1, 2] : vector<1x8x2xi32> to vector<1xi32>
    %1254 = vector.shape_cast %1253 : vector<1xi32> to vector<1x1x1xi32>
    %1255 = vector.extract %1254[0, 0, 0] : i32 from vector<1x1x1xi32>
    %1256 = vector.broadcast %1255 : i32 to vector<1x1xi32>
    %c7_i32_242 = arith.constant 7 : i32
    %1257 = vector.broadcast %c7_i32_242 : i32 to vector<8x2xi32>
    %1258 = arith.cmpi sle, %1193, %1257 : vector<8x2xi32>
    %1259 = arith.andi %1189, %1258 : vector<8x2xi1>
    %1260 = arith.extui %1259 : vector<8x2xi1> to vector<8x2xi32>
    %1261 = vector.shape_cast %1260 : vector<8x2xi32> to vector<1x8x2xi32>
    %cst_243 = arith.constant dense<0> : vector<1xi32>
    %1262 = vector.multi_reduction <add>, %1261, %cst_243 [1, 2] : vector<1x8x2xi32> to vector<1xi32>
    %1263 = vector.shape_cast %1262 : vector<1xi32> to vector<1x1x1xi32>
    %1264 = vector.extract %1263[0, 0, 0] : i32 from vector<1x1x1xi32>
    %1265 = vector.broadcast %1264 : i32 to vector<1x1xi32>
    %c8_i32_244 = arith.constant 8 : i32
    %1266 = vector.broadcast %c8_i32_244 : i32 to vector<8x2xi32>
    %1267 = arith.cmpi sle, %1193, %1266 : vector<8x2xi32>
    %1268 = arith.andi %1189, %1267 : vector<8x2xi1>
    %1269 = arith.extui %1268 : vector<8x2xi1> to vector<8x2xi32>
    %1270 = vector.shape_cast %1269 : vector<8x2xi32> to vector<1x8x2xi32>
    %cst_245 = arith.constant dense<0> : vector<1xi32>
    %1271 = vector.multi_reduction <add>, %1270, %cst_245 [1, 2] : vector<1x8x2xi32> to vector<1xi32>
    %1272 = vector.shape_cast %1271 : vector<1xi32> to vector<1x1x1xi32>
    %1273 = vector.extract %1272[0, 0, 0] : i32 from vector<1x1x1xi32>
    %1274 = vector.broadcast %1273 : i32 to vector<1x1xi32>
    %c9_i32_246 = arith.constant 9 : i32
    %1275 = vector.broadcast %c9_i32_246 : i32 to vector<8x2xi32>
    %1276 = arith.cmpi sle, %1193, %1275 : vector<8x2xi32>
    %1277 = arith.andi %1189, %1276 : vector<8x2xi1>
    %1278 = arith.extui %1277 : vector<8x2xi1> to vector<8x2xi32>
    %1279 = vector.shape_cast %1278 : vector<8x2xi32> to vector<1x8x2xi32>
    %cst_247 = arith.constant dense<0> : vector<1xi32>
    %1280 = vector.multi_reduction <add>, %1279, %cst_247 [1, 2] : vector<1x8x2xi32> to vector<1xi32>
    %1281 = vector.shape_cast %1280 : vector<1xi32> to vector<1x1x1xi32>
    %1282 = vector.extract %1281[0, 0, 0] : i32 from vector<1x1x1xi32>
    %1283 = vector.broadcast %1282 : i32 to vector<1x1xi32>
    %c10_i32_248 = arith.constant 10 : i32
    %1284 = vector.broadcast %c10_i32_248 : i32 to vector<8x2xi32>
    %1285 = arith.cmpi sle, %1193, %1284 : vector<8x2xi32>
    %1286 = arith.andi %1189, %1285 : vector<8x2xi1>
    %1287 = arith.extui %1286 : vector<8x2xi1> to vector<8x2xi32>
    %1288 = vector.shape_cast %1287 : vector<8x2xi32> to vector<1x8x2xi32>
    %cst_249 = arith.constant dense<0> : vector<1xi32>
    %1289 = vector.multi_reduction <add>, %1288, %cst_249 [1, 2] : vector<1x8x2xi32> to vector<1xi32>
    %1290 = vector.shape_cast %1289 : vector<1xi32> to vector<1x1x1xi32>
    %1291 = vector.extract %1290[0, 0, 0] : i32 from vector<1x1x1xi32>
    %1292 = vector.broadcast %1291 : i32 to vector<1x1xi32>
    %c11_i32_250 = arith.constant 11 : i32
    %1293 = vector.broadcast %c11_i32_250 : i32 to vector<8x2xi32>
    %1294 = arith.cmpi sle, %1193, %1293 : vector<8x2xi32>
    %1295 = arith.andi %1189, %1294 : vector<8x2xi1>
    %1296 = arith.extui %1295 : vector<8x2xi1> to vector<8x2xi32>
    %1297 = vector.shape_cast %1296 : vector<8x2xi32> to vector<1x8x2xi32>
    %cst_251 = arith.constant dense<0> : vector<1xi32>
    %1298 = vector.multi_reduction <add>, %1297, %cst_251 [1, 2] : vector<1x8x2xi32> to vector<1xi32>
    %1299 = vector.shape_cast %1298 : vector<1xi32> to vector<1x1x1xi32>
    %1300 = vector.extract %1299[0, 0, 0] : i32 from vector<1x1x1xi32>
    %1301 = vector.broadcast %1300 : i32 to vector<1x1xi32>
    %c12_i32_252 = arith.constant 12 : i32
    %1302 = vector.broadcast %c12_i32_252 : i32 to vector<8x2xi32>
    %1303 = arith.cmpi sle, %1193, %1302 : vector<8x2xi32>
    %1304 = arith.andi %1189, %1303 : vector<8x2xi1>
    %1305 = arith.extui %1304 : vector<8x2xi1> to vector<8x2xi32>
    %1306 = vector.shape_cast %1305 : vector<8x2xi32> to vector<1x8x2xi32>
    %cst_253 = arith.constant dense<0> : vector<1xi32>
    %1307 = vector.multi_reduction <add>, %1306, %cst_253 [1, 2] : vector<1x8x2xi32> to vector<1xi32>
    %1308 = vector.shape_cast %1307 : vector<1xi32> to vector<1x1x1xi32>
    %1309 = vector.extract %1308[0, 0, 0] : i32 from vector<1x1x1xi32>
    %1310 = vector.broadcast %1309 : i32 to vector<1x1xi32>
    %c13_i32_254 = arith.constant 13 : i32
    %1311 = vector.broadcast %c13_i32_254 : i32 to vector<8x2xi32>
    %1312 = arith.cmpi sle, %1193, %1311 : vector<8x2xi32>
    %1313 = arith.andi %1189, %1312 : vector<8x2xi1>
    %1314 = arith.extui %1313 : vector<8x2xi1> to vector<8x2xi32>
    %1315 = vector.shape_cast %1314 : vector<8x2xi32> to vector<1x8x2xi32>
    %cst_255 = arith.constant dense<0> : vector<1xi32>
    %1316 = vector.multi_reduction <add>, %1315, %cst_255 [1, 2] : vector<1x8x2xi32> to vector<1xi32>
    %1317 = vector.shape_cast %1316 : vector<1xi32> to vector<1x1x1xi32>
    %1318 = vector.extract %1317[0, 0, 0] : i32 from vector<1x1x1xi32>
    %1319 = vector.broadcast %1318 : i32 to vector<1x1xi32>
    %c14_i32_256 = arith.constant 14 : i32
    %1320 = vector.broadcast %c14_i32_256 : i32 to vector<8x2xi32>
    %1321 = arith.cmpi sle, %1193, %1320 : vector<8x2xi32>
    %1322 = arith.andi %1189, %1321 : vector<8x2xi1>
    %1323 = arith.extui %1322 : vector<8x2xi1> to vector<8x2xi32>
    %1324 = vector.shape_cast %1323 : vector<8x2xi32> to vector<1x8x2xi32>
    %cst_257 = arith.constant dense<0> : vector<1xi32>
    %1325 = vector.multi_reduction <add>, %1324, %cst_257 [1, 2] : vector<1x8x2xi32> to vector<1xi32>
    %1326 = vector.shape_cast %1325 : vector<1xi32> to vector<1x1x1xi32>
    %1327 = vector.extract %1326[0, 0, 0] : i32 from vector<1x1x1xi32>
    %1328 = vector.broadcast %1327 : i32 to vector<1x1xi32>
    %1329 = arith.cmpi slt, %1202, %1183 : vector<1x1xi32>
    %1330 = arith.cmpi slt, %1211, %1183 : vector<1x1xi32>
    %1331 = arith.cmpi slt, %1220, %1183 : vector<1x1xi32>
    %1332 = arith.cmpi slt, %1229, %1183 : vector<1x1xi32>
    %1333 = arith.cmpi slt, %1238, %1183 : vector<1x1xi32>
    %1334 = arith.cmpi slt, %1247, %1183 : vector<1x1xi32>
    %1335 = arith.cmpi slt, %1256, %1183 : vector<1x1xi32>
    %1336 = arith.cmpi slt, %1265, %1183 : vector<1x1xi32>
    %1337 = arith.cmpi slt, %1274, %1183 : vector<1x1xi32>
    %1338 = arith.cmpi slt, %1283, %1183 : vector<1x1xi32>
    %1339 = arith.cmpi slt, %1292, %1183 : vector<1x1xi32>
    %1340 = arith.cmpi slt, %1301, %1183 : vector<1x1xi32>
    %1341 = arith.cmpi slt, %1310, %1183 : vector<1x1xi32>
    %1342 = arith.cmpi slt, %1319, %1183 : vector<1x1xi32>
    %1343 = arith.cmpi slt, %1328, %1183 : vector<1x1xi32>
    %1344 = arith.extui %1329 : vector<1x1xi1> to vector<1x1xi32>
    %1345 = arith.extui %1330 : vector<1x1xi1> to vector<1x1xi32>
    %1346 = arith.extui %1331 : vector<1x1xi1> to vector<1x1xi32>
    %1347 = arith.extui %1332 : vector<1x1xi1> to vector<1x1xi32>
    %1348 = arith.extui %1333 : vector<1x1xi1> to vector<1x1xi32>
    %1349 = arith.extui %1334 : vector<1x1xi1> to vector<1x1xi32>
    %1350 = arith.extui %1335 : vector<1x1xi1> to vector<1x1xi32>
    %1351 = arith.extui %1336 : vector<1x1xi1> to vector<1x1xi32>
    %1352 = arith.extui %1337 : vector<1x1xi1> to vector<1x1xi32>
    %1353 = arith.extui %1338 : vector<1x1xi1> to vector<1x1xi32>
    %1354 = arith.extui %1339 : vector<1x1xi1> to vector<1x1xi32>
    %1355 = arith.extui %1340 : vector<1x1xi1> to vector<1x1xi32>
    %1356 = arith.extui %1341 : vector<1x1xi1> to vector<1x1xi32>
    %1357 = arith.extui %1342 : vector<1x1xi1> to vector<1x1xi32>
    %1358 = arith.extui %1343 : vector<1x1xi1> to vector<1x1xi32>
    %1359 = arith.addi %1344, %1345 : vector<1x1xi32>
    %1360 = arith.addi %1346, %1347 : vector<1x1xi32>
    %1361 = arith.addi %1348, %1349 : vector<1x1xi32>
    %1362 = arith.addi %1350, %1351 : vector<1x1xi32>
    %1363 = arith.addi %1352, %1353 : vector<1x1xi32>
    %1364 = arith.addi %1354, %1355 : vector<1x1xi32>
    %1365 = arith.addi %1356, %1357 : vector<1x1xi32>
    %1366 = arith.addi %1359, %1360 : vector<1x1xi32>
    %1367 = arith.addi %1361, %1362 : vector<1x1xi32>
    %1368 = arith.addi %1363, %1364 : vector<1x1xi32>
    %1369 = arith.addi %1365, %1358 : vector<1x1xi32>
    %1370 = arith.addi %1366, %1367 : vector<1x1xi32>
    %1371 = arith.addi %1368, %1369 : vector<1x1xi32>
    %1372 = arith.addi %1370, %1371 : vector<1x1xi32>
    %c0_i32_258 = arith.constant 0 : i32
    %1373 = vector.broadcast %c0_i32_258 : i32 to vector<1x1xi32>
    %1374 = arith.select %1329, %1202, %1373 : vector<1x1xi1>, vector<1x1xi32>
    %c0_i32_259 = arith.constant 0 : i32
    %1375 = vector.broadcast %c0_i32_259 : i32 to vector<1x1xi32>
    %1376 = arith.select %1330, %1211, %1375 : vector<1x1xi1>, vector<1x1xi32>
    %c0_i32_260 = arith.constant 0 : i32
    %1377 = vector.broadcast %c0_i32_260 : i32 to vector<1x1xi32>
    %1378 = arith.select %1331, %1220, %1377 : vector<1x1xi1>, vector<1x1xi32>
    %c0_i32_261 = arith.constant 0 : i32
    %1379 = vector.broadcast %c0_i32_261 : i32 to vector<1x1xi32>
    %1380 = arith.select %1332, %1229, %1379 : vector<1x1xi1>, vector<1x1xi32>
    %c0_i32_262 = arith.constant 0 : i32
    %1381 = vector.broadcast %c0_i32_262 : i32 to vector<1x1xi32>
    %1382 = arith.select %1333, %1238, %1381 : vector<1x1xi1>, vector<1x1xi32>
    %c0_i32_263 = arith.constant 0 : i32
    %1383 = vector.broadcast %c0_i32_263 : i32 to vector<1x1xi32>
    %1384 = arith.select %1334, %1247, %1383 : vector<1x1xi1>, vector<1x1xi32>
    %c0_i32_264 = arith.constant 0 : i32
    %1385 = vector.broadcast %c0_i32_264 : i32 to vector<1x1xi32>
    %1386 = arith.select %1335, %1256, %1385 : vector<1x1xi1>, vector<1x1xi32>
    %c0_i32_265 = arith.constant 0 : i32
    %1387 = vector.broadcast %c0_i32_265 : i32 to vector<1x1xi32>
    %1388 = arith.select %1336, %1265, %1387 : vector<1x1xi1>, vector<1x1xi32>
    %c0_i32_266 = arith.constant 0 : i32
    %1389 = vector.broadcast %c0_i32_266 : i32 to vector<1x1xi32>
    %1390 = arith.select %1337, %1274, %1389 : vector<1x1xi1>, vector<1x1xi32>
    %c0_i32_267 = arith.constant 0 : i32
    %1391 = vector.broadcast %c0_i32_267 : i32 to vector<1x1xi32>
    %1392 = arith.select %1338, %1283, %1391 : vector<1x1xi1>, vector<1x1xi32>
    %c0_i32_268 = arith.constant 0 : i32
    %1393 = vector.broadcast %c0_i32_268 : i32 to vector<1x1xi32>
    %1394 = arith.select %1339, %1292, %1393 : vector<1x1xi1>, vector<1x1xi32>
    %c0_i32_269 = arith.constant 0 : i32
    %1395 = vector.broadcast %c0_i32_269 : i32 to vector<1x1xi32>
    %1396 = arith.select %1340, %1301, %1395 : vector<1x1xi1>, vector<1x1xi32>
    %c0_i32_270 = arith.constant 0 : i32
    %1397 = vector.broadcast %c0_i32_270 : i32 to vector<1x1xi32>
    %1398 = arith.select %1341, %1310, %1397 : vector<1x1xi1>, vector<1x1xi32>
    %c0_i32_271 = arith.constant 0 : i32
    %1399 = vector.broadcast %c0_i32_271 : i32 to vector<1x1xi32>
    %1400 = arith.select %1342, %1319, %1399 : vector<1x1xi1>, vector<1x1xi32>
    %c0_i32_272 = arith.constant 0 : i32
    %1401 = vector.broadcast %c0_i32_272 : i32 to vector<1x1xi32>
    %1402 = arith.select %1343, %1328, %1401 : vector<1x1xi1>, vector<1x1xi32>
    %1403 = arith.maxsi %1374, %1376 : vector<1x1xi32>
    %1404 = arith.maxsi %1378, %1380 : vector<1x1xi32>
    %1405 = arith.maxsi %1382, %1384 : vector<1x1xi32>
    %1406 = arith.maxsi %1386, %1388 : vector<1x1xi32>
    %1407 = arith.maxsi %1390, %1392 : vector<1x1xi32>
    %1408 = arith.maxsi %1394, %1396 : vector<1x1xi32>
    %1409 = arith.maxsi %1398, %1400 : vector<1x1xi32>
    %1410 = arith.maxsi %1403, %1404 : vector<1x1xi32>
    %1411 = arith.maxsi %1405, %1406 : vector<1x1xi32>
    %1412 = arith.maxsi %1407, %1408 : vector<1x1xi32>
    %1413 = arith.maxsi %1409, %1402 : vector<1x1xi32>
    %1414 = arith.maxsi %1410, %1411 : vector<1x1xi32>
    %1415 = arith.maxsi %1412, %1413 : vector<1x1xi32>
    %1416 = arith.maxsi %1414, %1415 : vector<1x1xi32>
    %1417 = arith.subi %1183, %1416 : vector<1x1xi32>
    %c8_i32_273 = arith.constant 8 : i32
    %1418 = vector.broadcast %c8_i32_273 : i32 to vector<1x1xi32>
    %1419 = arith.shli %1372, %1418 : vector<1x1xi32>
    %1420 = arith.ori %1186, %1419 : vector<1x1xi32>
    %1421 = vector.broadcast %1372 : vector<1x1xi32> to vector<8x2xi32>
    %1422 = arith.cmpi eq, %1193, %1421 : vector<8x2xi32>
    %1423 = arith.andi %1189, %1422 : vector<8x2xi1>
    %c4_i32_274 = arith.constant 4 : i32
    %1424 = vector.broadcast %c4_i32_274 : i32 to vector<8x2xi32>
    %1425 = arith.shrsi %10, %1424 : vector<8x2xi32>
    %c15_i32_275 = arith.constant 15 : i32
    %1426 = vector.broadcast %c15_i32_275 : i32 to vector<8x2xi32>
    %1427 = arith.andi %1425, %1426 : vector<8x2xi32>
    %c0_i32_276 = arith.constant 0 : i32
    %1428 = vector.broadcast %c0_i32_276 : i32 to vector<8x2xi32>
    %1429 = arith.cmpi sle, %1427, %1428 : vector<8x2xi32>
    %1430 = arith.andi %1423, %1429 : vector<8x2xi1>
    %1431 = arith.extui %1430 : vector<8x2xi1> to vector<8x2xi32>
    %1432 = vector.shape_cast %1431 : vector<8x2xi32> to vector<1x8x2xi32>
    %cst_277 = arith.constant dense<0> : vector<1xi32>
    %1433 = vector.multi_reduction <add>, %1432, %cst_277 [1, 2] : vector<1x8x2xi32> to vector<1xi32>
    %1434 = vector.shape_cast %1433 : vector<1xi32> to vector<1x1x1xi32>
    %1435 = vector.extract %1434[0, 0, 0] : i32 from vector<1x1x1xi32>
    %1436 = vector.broadcast %1435 : i32 to vector<1x1xi32>
    %c1_i32_278 = arith.constant 1 : i32
    %1437 = vector.broadcast %c1_i32_278 : i32 to vector<8x2xi32>
    %1438 = arith.cmpi sle, %1427, %1437 : vector<8x2xi32>
    %1439 = arith.andi %1423, %1438 : vector<8x2xi1>
    %1440 = arith.extui %1439 : vector<8x2xi1> to vector<8x2xi32>
    %1441 = vector.shape_cast %1440 : vector<8x2xi32> to vector<1x8x2xi32>
    %cst_279 = arith.constant dense<0> : vector<1xi32>
    %1442 = vector.multi_reduction <add>, %1441, %cst_279 [1, 2] : vector<1x8x2xi32> to vector<1xi32>
    %1443 = vector.shape_cast %1442 : vector<1xi32> to vector<1x1x1xi32>
    %1444 = vector.extract %1443[0, 0, 0] : i32 from vector<1x1x1xi32>
    %1445 = vector.broadcast %1444 : i32 to vector<1x1xi32>
    %c2_i32_280 = arith.constant 2 : i32
    %1446 = vector.broadcast %c2_i32_280 : i32 to vector<8x2xi32>
    %1447 = arith.cmpi sle, %1427, %1446 : vector<8x2xi32>
    %1448 = arith.andi %1423, %1447 : vector<8x2xi1>
    %1449 = arith.extui %1448 : vector<8x2xi1> to vector<8x2xi32>
    %1450 = vector.shape_cast %1449 : vector<8x2xi32> to vector<1x8x2xi32>
    %cst_281 = arith.constant dense<0> : vector<1xi32>
    %1451 = vector.multi_reduction <add>, %1450, %cst_281 [1, 2] : vector<1x8x2xi32> to vector<1xi32>
    %1452 = vector.shape_cast %1451 : vector<1xi32> to vector<1x1x1xi32>
    %1453 = vector.extract %1452[0, 0, 0] : i32 from vector<1x1x1xi32>
    %1454 = vector.broadcast %1453 : i32 to vector<1x1xi32>
    %c3_i32_282 = arith.constant 3 : i32
    %1455 = vector.broadcast %c3_i32_282 : i32 to vector<8x2xi32>
    %1456 = arith.cmpi sle, %1427, %1455 : vector<8x2xi32>
    %1457 = arith.andi %1423, %1456 : vector<8x2xi1>
    %1458 = arith.extui %1457 : vector<8x2xi1> to vector<8x2xi32>
    %1459 = vector.shape_cast %1458 : vector<8x2xi32> to vector<1x8x2xi32>
    %cst_283 = arith.constant dense<0> : vector<1xi32>
    %1460 = vector.multi_reduction <add>, %1459, %cst_283 [1, 2] : vector<1x8x2xi32> to vector<1xi32>
    %1461 = vector.shape_cast %1460 : vector<1xi32> to vector<1x1x1xi32>
    %1462 = vector.extract %1461[0, 0, 0] : i32 from vector<1x1x1xi32>
    %1463 = vector.broadcast %1462 : i32 to vector<1x1xi32>
    %c4_i32_284 = arith.constant 4 : i32
    %1464 = vector.broadcast %c4_i32_284 : i32 to vector<8x2xi32>
    %1465 = arith.cmpi sle, %1427, %1464 : vector<8x2xi32>
    %1466 = arith.andi %1423, %1465 : vector<8x2xi1>
    %1467 = arith.extui %1466 : vector<8x2xi1> to vector<8x2xi32>
    %1468 = vector.shape_cast %1467 : vector<8x2xi32> to vector<1x8x2xi32>
    %cst_285 = arith.constant dense<0> : vector<1xi32>
    %1469 = vector.multi_reduction <add>, %1468, %cst_285 [1, 2] : vector<1x8x2xi32> to vector<1xi32>
    %1470 = vector.shape_cast %1469 : vector<1xi32> to vector<1x1x1xi32>
    %1471 = vector.extract %1470[0, 0, 0] : i32 from vector<1x1x1xi32>
    %1472 = vector.broadcast %1471 : i32 to vector<1x1xi32>
    %c5_i32_286 = arith.constant 5 : i32
    %1473 = vector.broadcast %c5_i32_286 : i32 to vector<8x2xi32>
    %1474 = arith.cmpi sle, %1427, %1473 : vector<8x2xi32>
    %1475 = arith.andi %1423, %1474 : vector<8x2xi1>
    %1476 = arith.extui %1475 : vector<8x2xi1> to vector<8x2xi32>
    %1477 = vector.shape_cast %1476 : vector<8x2xi32> to vector<1x8x2xi32>
    %cst_287 = arith.constant dense<0> : vector<1xi32>
    %1478 = vector.multi_reduction <add>, %1477, %cst_287 [1, 2] : vector<1x8x2xi32> to vector<1xi32>
    %1479 = vector.shape_cast %1478 : vector<1xi32> to vector<1x1x1xi32>
    %1480 = vector.extract %1479[0, 0, 0] : i32 from vector<1x1x1xi32>
    %1481 = vector.broadcast %1480 : i32 to vector<1x1xi32>
    %c6_i32_288 = arith.constant 6 : i32
    %1482 = vector.broadcast %c6_i32_288 : i32 to vector<8x2xi32>
    %1483 = arith.cmpi sle, %1427, %1482 : vector<8x2xi32>
    %1484 = arith.andi %1423, %1483 : vector<8x2xi1>
    %1485 = arith.extui %1484 : vector<8x2xi1> to vector<8x2xi32>
    %1486 = vector.shape_cast %1485 : vector<8x2xi32> to vector<1x8x2xi32>
    %cst_289 = arith.constant dense<0> : vector<1xi32>
    %1487 = vector.multi_reduction <add>, %1486, %cst_289 [1, 2] : vector<1x8x2xi32> to vector<1xi32>
    %1488 = vector.shape_cast %1487 : vector<1xi32> to vector<1x1x1xi32>
    %1489 = vector.extract %1488[0, 0, 0] : i32 from vector<1x1x1xi32>
    %1490 = vector.broadcast %1489 : i32 to vector<1x1xi32>
    %c7_i32_290 = arith.constant 7 : i32
    %1491 = vector.broadcast %c7_i32_290 : i32 to vector<8x2xi32>
    %1492 = arith.cmpi sle, %1427, %1491 : vector<8x2xi32>
    %1493 = arith.andi %1423, %1492 : vector<8x2xi1>
    %1494 = arith.extui %1493 : vector<8x2xi1> to vector<8x2xi32>
    %1495 = vector.shape_cast %1494 : vector<8x2xi32> to vector<1x8x2xi32>
    %cst_291 = arith.constant dense<0> : vector<1xi32>
    %1496 = vector.multi_reduction <add>, %1495, %cst_291 [1, 2] : vector<1x8x2xi32> to vector<1xi32>
    %1497 = vector.shape_cast %1496 : vector<1xi32> to vector<1x1x1xi32>
    %1498 = vector.extract %1497[0, 0, 0] : i32 from vector<1x1x1xi32>
    %1499 = vector.broadcast %1498 : i32 to vector<1x1xi32>
    %c8_i32_292 = arith.constant 8 : i32
    %1500 = vector.broadcast %c8_i32_292 : i32 to vector<8x2xi32>
    %1501 = arith.cmpi sle, %1427, %1500 : vector<8x2xi32>
    %1502 = arith.andi %1423, %1501 : vector<8x2xi1>
    %1503 = arith.extui %1502 : vector<8x2xi1> to vector<8x2xi32>
    %1504 = vector.shape_cast %1503 : vector<8x2xi32> to vector<1x8x2xi32>
    %cst_293 = arith.constant dense<0> : vector<1xi32>
    %1505 = vector.multi_reduction <add>, %1504, %cst_293 [1, 2] : vector<1x8x2xi32> to vector<1xi32>
    %1506 = vector.shape_cast %1505 : vector<1xi32> to vector<1x1x1xi32>
    %1507 = vector.extract %1506[0, 0, 0] : i32 from vector<1x1x1xi32>
    %1508 = vector.broadcast %1507 : i32 to vector<1x1xi32>
    %c9_i32_294 = arith.constant 9 : i32
    %1509 = vector.broadcast %c9_i32_294 : i32 to vector<8x2xi32>
    %1510 = arith.cmpi sle, %1427, %1509 : vector<8x2xi32>
    %1511 = arith.andi %1423, %1510 : vector<8x2xi1>
    %1512 = arith.extui %1511 : vector<8x2xi1> to vector<8x2xi32>
    %1513 = vector.shape_cast %1512 : vector<8x2xi32> to vector<1x8x2xi32>
    %cst_295 = arith.constant dense<0> : vector<1xi32>
    %1514 = vector.multi_reduction <add>, %1513, %cst_295 [1, 2] : vector<1x8x2xi32> to vector<1xi32>
    %1515 = vector.shape_cast %1514 : vector<1xi32> to vector<1x1x1xi32>
    %1516 = vector.extract %1515[0, 0, 0] : i32 from vector<1x1x1xi32>
    %1517 = vector.broadcast %1516 : i32 to vector<1x1xi32>
    %c10_i32_296 = arith.constant 10 : i32
    %1518 = vector.broadcast %c10_i32_296 : i32 to vector<8x2xi32>
    %1519 = arith.cmpi sle, %1427, %1518 : vector<8x2xi32>
    %1520 = arith.andi %1423, %1519 : vector<8x2xi1>
    %1521 = arith.extui %1520 : vector<8x2xi1> to vector<8x2xi32>
    %1522 = vector.shape_cast %1521 : vector<8x2xi32> to vector<1x8x2xi32>
    %cst_297 = arith.constant dense<0> : vector<1xi32>
    %1523 = vector.multi_reduction <add>, %1522, %cst_297 [1, 2] : vector<1x8x2xi32> to vector<1xi32>
    %1524 = vector.shape_cast %1523 : vector<1xi32> to vector<1x1x1xi32>
    %1525 = vector.extract %1524[0, 0, 0] : i32 from vector<1x1x1xi32>
    %1526 = vector.broadcast %1525 : i32 to vector<1x1xi32>
    %c11_i32_298 = arith.constant 11 : i32
    %1527 = vector.broadcast %c11_i32_298 : i32 to vector<8x2xi32>
    %1528 = arith.cmpi sle, %1427, %1527 : vector<8x2xi32>
    %1529 = arith.andi %1423, %1528 : vector<8x2xi1>
    %1530 = arith.extui %1529 : vector<8x2xi1> to vector<8x2xi32>
    %1531 = vector.shape_cast %1530 : vector<8x2xi32> to vector<1x8x2xi32>
    %cst_299 = arith.constant dense<0> : vector<1xi32>
    %1532 = vector.multi_reduction <add>, %1531, %cst_299 [1, 2] : vector<1x8x2xi32> to vector<1xi32>
    %1533 = vector.shape_cast %1532 : vector<1xi32> to vector<1x1x1xi32>
    %1534 = vector.extract %1533[0, 0, 0] : i32 from vector<1x1x1xi32>
    %1535 = vector.broadcast %1534 : i32 to vector<1x1xi32>
    %c12_i32_300 = arith.constant 12 : i32
    %1536 = vector.broadcast %c12_i32_300 : i32 to vector<8x2xi32>
    %1537 = arith.cmpi sle, %1427, %1536 : vector<8x2xi32>
    %1538 = arith.andi %1423, %1537 : vector<8x2xi1>
    %1539 = arith.extui %1538 : vector<8x2xi1> to vector<8x2xi32>
    %1540 = vector.shape_cast %1539 : vector<8x2xi32> to vector<1x8x2xi32>
    %cst_301 = arith.constant dense<0> : vector<1xi32>
    %1541 = vector.multi_reduction <add>, %1540, %cst_301 [1, 2] : vector<1x8x2xi32> to vector<1xi32>
    %1542 = vector.shape_cast %1541 : vector<1xi32> to vector<1x1x1xi32>
    %1543 = vector.extract %1542[0, 0, 0] : i32 from vector<1x1x1xi32>
    %1544 = vector.broadcast %1543 : i32 to vector<1x1xi32>
    %c13_i32_302 = arith.constant 13 : i32
    %1545 = vector.broadcast %c13_i32_302 : i32 to vector<8x2xi32>
    %1546 = arith.cmpi sle, %1427, %1545 : vector<8x2xi32>
    %1547 = arith.andi %1423, %1546 : vector<8x2xi1>
    %1548 = arith.extui %1547 : vector<8x2xi1> to vector<8x2xi32>
    %1549 = vector.shape_cast %1548 : vector<8x2xi32> to vector<1x8x2xi32>
    %cst_303 = arith.constant dense<0> : vector<1xi32>
    %1550 = vector.multi_reduction <add>, %1549, %cst_303 [1, 2] : vector<1x8x2xi32> to vector<1xi32>
    %1551 = vector.shape_cast %1550 : vector<1xi32> to vector<1x1x1xi32>
    %1552 = vector.extract %1551[0, 0, 0] : i32 from vector<1x1x1xi32>
    %1553 = vector.broadcast %1552 : i32 to vector<1x1xi32>
    %c14_i32_304 = arith.constant 14 : i32
    %1554 = vector.broadcast %c14_i32_304 : i32 to vector<8x2xi32>
    %1555 = arith.cmpi sle, %1427, %1554 : vector<8x2xi32>
    %1556 = arith.andi %1423, %1555 : vector<8x2xi1>
    %1557 = arith.extui %1556 : vector<8x2xi1> to vector<8x2xi32>
    %1558 = vector.shape_cast %1557 : vector<8x2xi32> to vector<1x8x2xi32>
    %cst_305 = arith.constant dense<0> : vector<1xi32>
    %1559 = vector.multi_reduction <add>, %1558, %cst_305 [1, 2] : vector<1x8x2xi32> to vector<1xi32>
    %1560 = vector.shape_cast %1559 : vector<1xi32> to vector<1x1x1xi32>
    %1561 = vector.extract %1560[0, 0, 0] : i32 from vector<1x1x1xi32>
    %1562 = vector.broadcast %1561 : i32 to vector<1x1xi32>
    %1563 = arith.cmpi slt, %1436, %1417 : vector<1x1xi32>
    %1564 = arith.cmpi slt, %1445, %1417 : vector<1x1xi32>
    %1565 = arith.cmpi slt, %1454, %1417 : vector<1x1xi32>
    %1566 = arith.cmpi slt, %1463, %1417 : vector<1x1xi32>
    %1567 = arith.cmpi slt, %1472, %1417 : vector<1x1xi32>
    %1568 = arith.cmpi slt, %1481, %1417 : vector<1x1xi32>
    %1569 = arith.cmpi slt, %1490, %1417 : vector<1x1xi32>
    %1570 = arith.cmpi slt, %1499, %1417 : vector<1x1xi32>
    %1571 = arith.cmpi slt, %1508, %1417 : vector<1x1xi32>
    %1572 = arith.cmpi slt, %1517, %1417 : vector<1x1xi32>
    %1573 = arith.cmpi slt, %1526, %1417 : vector<1x1xi32>
    %1574 = arith.cmpi slt, %1535, %1417 : vector<1x1xi32>
    %1575 = arith.cmpi slt, %1544, %1417 : vector<1x1xi32>
    %1576 = arith.cmpi slt, %1553, %1417 : vector<1x1xi32>
    %1577 = arith.cmpi slt, %1562, %1417 : vector<1x1xi32>
    %1578 = arith.extui %1563 : vector<1x1xi1> to vector<1x1xi32>
    %1579 = arith.extui %1564 : vector<1x1xi1> to vector<1x1xi32>
    %1580 = arith.extui %1565 : vector<1x1xi1> to vector<1x1xi32>
    %1581 = arith.extui %1566 : vector<1x1xi1> to vector<1x1xi32>
    %1582 = arith.extui %1567 : vector<1x1xi1> to vector<1x1xi32>
    %1583 = arith.extui %1568 : vector<1x1xi1> to vector<1x1xi32>
    %1584 = arith.extui %1569 : vector<1x1xi1> to vector<1x1xi32>
    %1585 = arith.extui %1570 : vector<1x1xi1> to vector<1x1xi32>
    %1586 = arith.extui %1571 : vector<1x1xi1> to vector<1x1xi32>
    %1587 = arith.extui %1572 : vector<1x1xi1> to vector<1x1xi32>
    %1588 = arith.extui %1573 : vector<1x1xi1> to vector<1x1xi32>
    %1589 = arith.extui %1574 : vector<1x1xi1> to vector<1x1xi32>
    %1590 = arith.extui %1575 : vector<1x1xi1> to vector<1x1xi32>
    %1591 = arith.extui %1576 : vector<1x1xi1> to vector<1x1xi32>
    %1592 = arith.extui %1577 : vector<1x1xi1> to vector<1x1xi32>
    %1593 = arith.addi %1578, %1579 : vector<1x1xi32>
    %1594 = arith.addi %1580, %1581 : vector<1x1xi32>
    %1595 = arith.addi %1582, %1583 : vector<1x1xi32>
    %1596 = arith.addi %1584, %1585 : vector<1x1xi32>
    %1597 = arith.addi %1586, %1587 : vector<1x1xi32>
    %1598 = arith.addi %1588, %1589 : vector<1x1xi32>
    %1599 = arith.addi %1590, %1591 : vector<1x1xi32>
    %1600 = arith.addi %1593, %1594 : vector<1x1xi32>
    %1601 = arith.addi %1595, %1596 : vector<1x1xi32>
    %1602 = arith.addi %1597, %1598 : vector<1x1xi32>
    %1603 = arith.addi %1599, %1592 : vector<1x1xi32>
    %1604 = arith.addi %1600, %1601 : vector<1x1xi32>
    %1605 = arith.addi %1602, %1603 : vector<1x1xi32>
    %1606 = arith.addi %1604, %1605 : vector<1x1xi32>
    %c0_i32_306 = arith.constant 0 : i32
    %1607 = vector.broadcast %c0_i32_306 : i32 to vector<1x1xi32>
    %1608 = arith.select %1563, %1436, %1607 : vector<1x1xi1>, vector<1x1xi32>
    %c0_i32_307 = arith.constant 0 : i32
    %1609 = vector.broadcast %c0_i32_307 : i32 to vector<1x1xi32>
    %1610 = arith.select %1564, %1445, %1609 : vector<1x1xi1>, vector<1x1xi32>
    %c0_i32_308 = arith.constant 0 : i32
    %1611 = vector.broadcast %c0_i32_308 : i32 to vector<1x1xi32>
    %1612 = arith.select %1565, %1454, %1611 : vector<1x1xi1>, vector<1x1xi32>
    %c0_i32_309 = arith.constant 0 : i32
    %1613 = vector.broadcast %c0_i32_309 : i32 to vector<1x1xi32>
    %1614 = arith.select %1566, %1463, %1613 : vector<1x1xi1>, vector<1x1xi32>
    %c0_i32_310 = arith.constant 0 : i32
    %1615 = vector.broadcast %c0_i32_310 : i32 to vector<1x1xi32>
    %1616 = arith.select %1567, %1472, %1615 : vector<1x1xi1>, vector<1x1xi32>
    %c0_i32_311 = arith.constant 0 : i32
    %1617 = vector.broadcast %c0_i32_311 : i32 to vector<1x1xi32>
    %1618 = arith.select %1568, %1481, %1617 : vector<1x1xi1>, vector<1x1xi32>
    %c0_i32_312 = arith.constant 0 : i32
    %1619 = vector.broadcast %c0_i32_312 : i32 to vector<1x1xi32>
    %1620 = arith.select %1569, %1490, %1619 : vector<1x1xi1>, vector<1x1xi32>
    %c0_i32_313 = arith.constant 0 : i32
    %1621 = vector.broadcast %c0_i32_313 : i32 to vector<1x1xi32>
    %1622 = arith.select %1570, %1499, %1621 : vector<1x1xi1>, vector<1x1xi32>
    %c0_i32_314 = arith.constant 0 : i32
    %1623 = vector.broadcast %c0_i32_314 : i32 to vector<1x1xi32>
    %1624 = arith.select %1571, %1508, %1623 : vector<1x1xi1>, vector<1x1xi32>
    %c0_i32_315 = arith.constant 0 : i32
    %1625 = vector.broadcast %c0_i32_315 : i32 to vector<1x1xi32>
    %1626 = arith.select %1572, %1517, %1625 : vector<1x1xi1>, vector<1x1xi32>
    %c0_i32_316 = arith.constant 0 : i32
    %1627 = vector.broadcast %c0_i32_316 : i32 to vector<1x1xi32>
    %1628 = arith.select %1573, %1526, %1627 : vector<1x1xi1>, vector<1x1xi32>
    %c0_i32_317 = arith.constant 0 : i32
    %1629 = vector.broadcast %c0_i32_317 : i32 to vector<1x1xi32>
    %1630 = arith.select %1574, %1535, %1629 : vector<1x1xi1>, vector<1x1xi32>
    %c0_i32_318 = arith.constant 0 : i32
    %1631 = vector.broadcast %c0_i32_318 : i32 to vector<1x1xi32>
    %1632 = arith.select %1575, %1544, %1631 : vector<1x1xi1>, vector<1x1xi32>
    %c0_i32_319 = arith.constant 0 : i32
    %1633 = vector.broadcast %c0_i32_319 : i32 to vector<1x1xi32>
    %1634 = arith.select %1576, %1553, %1633 : vector<1x1xi1>, vector<1x1xi32>
    %c0_i32_320 = arith.constant 0 : i32
    %1635 = vector.broadcast %c0_i32_320 : i32 to vector<1x1xi32>
    %1636 = arith.select %1577, %1562, %1635 : vector<1x1xi1>, vector<1x1xi32>
    %1637 = arith.maxsi %1608, %1610 : vector<1x1xi32>
    %1638 = arith.maxsi %1612, %1614 : vector<1x1xi32>
    %1639 = arith.maxsi %1616, %1618 : vector<1x1xi32>
    %1640 = arith.maxsi %1620, %1622 : vector<1x1xi32>
    %1641 = arith.maxsi %1624, %1626 : vector<1x1xi32>
    %1642 = arith.maxsi %1628, %1630 : vector<1x1xi32>
    %1643 = arith.maxsi %1632, %1634 : vector<1x1xi32>
    %1644 = arith.maxsi %1637, %1638 : vector<1x1xi32>
    %1645 = arith.maxsi %1639, %1640 : vector<1x1xi32>
    %1646 = arith.maxsi %1641, %1642 : vector<1x1xi32>
    %1647 = arith.maxsi %1643, %1636 : vector<1x1xi32>
    %1648 = arith.maxsi %1644, %1645 : vector<1x1xi32>
    %1649 = arith.maxsi %1646, %1647 : vector<1x1xi32>
    %1650 = arith.maxsi %1648, %1649 : vector<1x1xi32>
    %1651 = arith.subi %1417, %1650 : vector<1x1xi32>
    %c4_i32_321 = arith.constant 4 : i32
    %1652 = vector.broadcast %c4_i32_321 : i32 to vector<1x1xi32>
    %1653 = arith.shli %1606, %1652 : vector<1x1xi32>
    %1654 = arith.ori %1420, %1653 : vector<1x1xi32>
    %1655 = vector.broadcast %1606 : vector<1x1xi32> to vector<8x2xi32>
    %1656 = arith.cmpi eq, %1427, %1655 : vector<8x2xi32>
    %1657 = arith.andi %1423, %1656 : vector<8x2xi1>
    %c0_i32_322 = arith.constant 0 : i32
    %1658 = vector.broadcast %c0_i32_322 : i32 to vector<8x2xi32>
    %1659 = arith.shrsi %10, %1658 : vector<8x2xi32>
    %c15_i32_323 = arith.constant 15 : i32
    %1660 = vector.broadcast %c15_i32_323 : i32 to vector<8x2xi32>
    %1661 = arith.andi %1659, %1660 : vector<8x2xi32>
    %c0_i32_324 = arith.constant 0 : i32
    %1662 = vector.broadcast %c0_i32_324 : i32 to vector<8x2xi32>
    %1663 = arith.cmpi sle, %1661, %1662 : vector<8x2xi32>
    %1664 = arith.andi %1657, %1663 : vector<8x2xi1>
    %1665 = arith.extui %1664 : vector<8x2xi1> to vector<8x2xi32>
    %1666 = vector.shape_cast %1665 : vector<8x2xi32> to vector<1x8x2xi32>
    %cst_325 = arith.constant dense<0> : vector<1xi32>
    %1667 = vector.multi_reduction <add>, %1666, %cst_325 [1, 2] : vector<1x8x2xi32> to vector<1xi32>
    %1668 = vector.shape_cast %1667 : vector<1xi32> to vector<1x1x1xi32>
    %1669 = vector.extract %1668[0, 0, 0] : i32 from vector<1x1x1xi32>
    %1670 = vector.broadcast %1669 : i32 to vector<1x1xi32>
    %c1_i32_326 = arith.constant 1 : i32
    %1671 = vector.broadcast %c1_i32_326 : i32 to vector<8x2xi32>
    %1672 = arith.cmpi sle, %1661, %1671 : vector<8x2xi32>
    %1673 = arith.andi %1657, %1672 : vector<8x2xi1>
    %1674 = arith.extui %1673 : vector<8x2xi1> to vector<8x2xi32>
    %1675 = vector.shape_cast %1674 : vector<8x2xi32> to vector<1x8x2xi32>
    %cst_327 = arith.constant dense<0> : vector<1xi32>
    %1676 = vector.multi_reduction <add>, %1675, %cst_327 [1, 2] : vector<1x8x2xi32> to vector<1xi32>
    %1677 = vector.shape_cast %1676 : vector<1xi32> to vector<1x1x1xi32>
    %1678 = vector.extract %1677[0, 0, 0] : i32 from vector<1x1x1xi32>
    %1679 = vector.broadcast %1678 : i32 to vector<1x1xi32>
    %c2_i32_328 = arith.constant 2 : i32
    %1680 = vector.broadcast %c2_i32_328 : i32 to vector<8x2xi32>
    %1681 = arith.cmpi sle, %1661, %1680 : vector<8x2xi32>
    %1682 = arith.andi %1657, %1681 : vector<8x2xi1>
    %1683 = arith.extui %1682 : vector<8x2xi1> to vector<8x2xi32>
    %1684 = vector.shape_cast %1683 : vector<8x2xi32> to vector<1x8x2xi32>
    %cst_329 = arith.constant dense<0> : vector<1xi32>
    %1685 = vector.multi_reduction <add>, %1684, %cst_329 [1, 2] : vector<1x8x2xi32> to vector<1xi32>
    %1686 = vector.shape_cast %1685 : vector<1xi32> to vector<1x1x1xi32>
    %1687 = vector.extract %1686[0, 0, 0] : i32 from vector<1x1x1xi32>
    %1688 = vector.broadcast %1687 : i32 to vector<1x1xi32>
    %c3_i32_330 = arith.constant 3 : i32
    %1689 = vector.broadcast %c3_i32_330 : i32 to vector<8x2xi32>
    %1690 = arith.cmpi sle, %1661, %1689 : vector<8x2xi32>
    %1691 = arith.andi %1657, %1690 : vector<8x2xi1>
    %1692 = arith.extui %1691 : vector<8x2xi1> to vector<8x2xi32>
    %1693 = vector.shape_cast %1692 : vector<8x2xi32> to vector<1x8x2xi32>
    %cst_331 = arith.constant dense<0> : vector<1xi32>
    %1694 = vector.multi_reduction <add>, %1693, %cst_331 [1, 2] : vector<1x8x2xi32> to vector<1xi32>
    %1695 = vector.shape_cast %1694 : vector<1xi32> to vector<1x1x1xi32>
    %1696 = vector.extract %1695[0, 0, 0] : i32 from vector<1x1x1xi32>
    %1697 = vector.broadcast %1696 : i32 to vector<1x1xi32>
    %c4_i32_332 = arith.constant 4 : i32
    %1698 = vector.broadcast %c4_i32_332 : i32 to vector<8x2xi32>
    %1699 = arith.cmpi sle, %1661, %1698 : vector<8x2xi32>
    %1700 = arith.andi %1657, %1699 : vector<8x2xi1>
    %1701 = arith.extui %1700 : vector<8x2xi1> to vector<8x2xi32>
    %1702 = vector.shape_cast %1701 : vector<8x2xi32> to vector<1x8x2xi32>
    %cst_333 = arith.constant dense<0> : vector<1xi32>
    %1703 = vector.multi_reduction <add>, %1702, %cst_333 [1, 2] : vector<1x8x2xi32> to vector<1xi32>
    %1704 = vector.shape_cast %1703 : vector<1xi32> to vector<1x1x1xi32>
    %1705 = vector.extract %1704[0, 0, 0] : i32 from vector<1x1x1xi32>
    %1706 = vector.broadcast %1705 : i32 to vector<1x1xi32>
    %c5_i32_334 = arith.constant 5 : i32
    %1707 = vector.broadcast %c5_i32_334 : i32 to vector<8x2xi32>
    %1708 = arith.cmpi sle, %1661, %1707 : vector<8x2xi32>
    %1709 = arith.andi %1657, %1708 : vector<8x2xi1>
    %1710 = arith.extui %1709 : vector<8x2xi1> to vector<8x2xi32>
    %1711 = vector.shape_cast %1710 : vector<8x2xi32> to vector<1x8x2xi32>
    %cst_335 = arith.constant dense<0> : vector<1xi32>
    %1712 = vector.multi_reduction <add>, %1711, %cst_335 [1, 2] : vector<1x8x2xi32> to vector<1xi32>
    %1713 = vector.shape_cast %1712 : vector<1xi32> to vector<1x1x1xi32>
    %1714 = vector.extract %1713[0, 0, 0] : i32 from vector<1x1x1xi32>
    %1715 = vector.broadcast %1714 : i32 to vector<1x1xi32>
    %c6_i32_336 = arith.constant 6 : i32
    %1716 = vector.broadcast %c6_i32_336 : i32 to vector<8x2xi32>
    %1717 = arith.cmpi sle, %1661, %1716 : vector<8x2xi32>
    %1718 = arith.andi %1657, %1717 : vector<8x2xi1>
    %1719 = arith.extui %1718 : vector<8x2xi1> to vector<8x2xi32>
    %1720 = vector.shape_cast %1719 : vector<8x2xi32> to vector<1x8x2xi32>
    %cst_337 = arith.constant dense<0> : vector<1xi32>
    %1721 = vector.multi_reduction <add>, %1720, %cst_337 [1, 2] : vector<1x8x2xi32> to vector<1xi32>
    %1722 = vector.shape_cast %1721 : vector<1xi32> to vector<1x1x1xi32>
    %1723 = vector.extract %1722[0, 0, 0] : i32 from vector<1x1x1xi32>
    %1724 = vector.broadcast %1723 : i32 to vector<1x1xi32>
    %c7_i32_338 = arith.constant 7 : i32
    %1725 = vector.broadcast %c7_i32_338 : i32 to vector<8x2xi32>
    %1726 = arith.cmpi sle, %1661, %1725 : vector<8x2xi32>
    %1727 = arith.andi %1657, %1726 : vector<8x2xi1>
    %1728 = arith.extui %1727 : vector<8x2xi1> to vector<8x2xi32>
    %1729 = vector.shape_cast %1728 : vector<8x2xi32> to vector<1x8x2xi32>
    %cst_339 = arith.constant dense<0> : vector<1xi32>
    %1730 = vector.multi_reduction <add>, %1729, %cst_339 [1, 2] : vector<1x8x2xi32> to vector<1xi32>
    %1731 = vector.shape_cast %1730 : vector<1xi32> to vector<1x1x1xi32>
    %1732 = vector.extract %1731[0, 0, 0] : i32 from vector<1x1x1xi32>
    %1733 = vector.broadcast %1732 : i32 to vector<1x1xi32>
    %c8_i32_340 = arith.constant 8 : i32
    %1734 = vector.broadcast %c8_i32_340 : i32 to vector<8x2xi32>
    %1735 = arith.cmpi sle, %1661, %1734 : vector<8x2xi32>
    %1736 = arith.andi %1657, %1735 : vector<8x2xi1>
    %1737 = arith.extui %1736 : vector<8x2xi1> to vector<8x2xi32>
    %1738 = vector.shape_cast %1737 : vector<8x2xi32> to vector<1x8x2xi32>
    %cst_341 = arith.constant dense<0> : vector<1xi32>
    %1739 = vector.multi_reduction <add>, %1738, %cst_341 [1, 2] : vector<1x8x2xi32> to vector<1xi32>
    %1740 = vector.shape_cast %1739 : vector<1xi32> to vector<1x1x1xi32>
    %1741 = vector.extract %1740[0, 0, 0] : i32 from vector<1x1x1xi32>
    %1742 = vector.broadcast %1741 : i32 to vector<1x1xi32>
    %c9_i32_342 = arith.constant 9 : i32
    %1743 = vector.broadcast %c9_i32_342 : i32 to vector<8x2xi32>
    %1744 = arith.cmpi sle, %1661, %1743 : vector<8x2xi32>
    %1745 = arith.andi %1657, %1744 : vector<8x2xi1>
    %1746 = arith.extui %1745 : vector<8x2xi1> to vector<8x2xi32>
    %1747 = vector.shape_cast %1746 : vector<8x2xi32> to vector<1x8x2xi32>
    %cst_343 = arith.constant dense<0> : vector<1xi32>
    %1748 = vector.multi_reduction <add>, %1747, %cst_343 [1, 2] : vector<1x8x2xi32> to vector<1xi32>
    %1749 = vector.shape_cast %1748 : vector<1xi32> to vector<1x1x1xi32>
    %1750 = vector.extract %1749[0, 0, 0] : i32 from vector<1x1x1xi32>
    %1751 = vector.broadcast %1750 : i32 to vector<1x1xi32>
    %c10_i32_344 = arith.constant 10 : i32
    %1752 = vector.broadcast %c10_i32_344 : i32 to vector<8x2xi32>
    %1753 = arith.cmpi sle, %1661, %1752 : vector<8x2xi32>
    %1754 = arith.andi %1657, %1753 : vector<8x2xi1>
    %1755 = arith.extui %1754 : vector<8x2xi1> to vector<8x2xi32>
    %1756 = vector.shape_cast %1755 : vector<8x2xi32> to vector<1x8x2xi32>
    %cst_345 = arith.constant dense<0> : vector<1xi32>
    %1757 = vector.multi_reduction <add>, %1756, %cst_345 [1, 2] : vector<1x8x2xi32> to vector<1xi32>
    %1758 = vector.shape_cast %1757 : vector<1xi32> to vector<1x1x1xi32>
    %1759 = vector.extract %1758[0, 0, 0] : i32 from vector<1x1x1xi32>
    %1760 = vector.broadcast %1759 : i32 to vector<1x1xi32>
    %c11_i32_346 = arith.constant 11 : i32
    %1761 = vector.broadcast %c11_i32_346 : i32 to vector<8x2xi32>
    %1762 = arith.cmpi sle, %1661, %1761 : vector<8x2xi32>
    %1763 = arith.andi %1657, %1762 : vector<8x2xi1>
    %1764 = arith.extui %1763 : vector<8x2xi1> to vector<8x2xi32>
    %1765 = vector.shape_cast %1764 : vector<8x2xi32> to vector<1x8x2xi32>
    %cst_347 = arith.constant dense<0> : vector<1xi32>
    %1766 = vector.multi_reduction <add>, %1765, %cst_347 [1, 2] : vector<1x8x2xi32> to vector<1xi32>
    %1767 = vector.shape_cast %1766 : vector<1xi32> to vector<1x1x1xi32>
    %1768 = vector.extract %1767[0, 0, 0] : i32 from vector<1x1x1xi32>
    %1769 = vector.broadcast %1768 : i32 to vector<1x1xi32>
    %c12_i32_348 = arith.constant 12 : i32
    %1770 = vector.broadcast %c12_i32_348 : i32 to vector<8x2xi32>
    %1771 = arith.cmpi sle, %1661, %1770 : vector<8x2xi32>
    %1772 = arith.andi %1657, %1771 : vector<8x2xi1>
    %1773 = arith.extui %1772 : vector<8x2xi1> to vector<8x2xi32>
    %1774 = vector.shape_cast %1773 : vector<8x2xi32> to vector<1x8x2xi32>
    %cst_349 = arith.constant dense<0> : vector<1xi32>
    %1775 = vector.multi_reduction <add>, %1774, %cst_349 [1, 2] : vector<1x8x2xi32> to vector<1xi32>
    %1776 = vector.shape_cast %1775 : vector<1xi32> to vector<1x1x1xi32>
    %1777 = vector.extract %1776[0, 0, 0] : i32 from vector<1x1x1xi32>
    %1778 = vector.broadcast %1777 : i32 to vector<1x1xi32>
    %c13_i32_350 = arith.constant 13 : i32
    %1779 = vector.broadcast %c13_i32_350 : i32 to vector<8x2xi32>
    %1780 = arith.cmpi sle, %1661, %1779 : vector<8x2xi32>
    %1781 = arith.andi %1657, %1780 : vector<8x2xi1>
    %1782 = arith.extui %1781 : vector<8x2xi1> to vector<8x2xi32>
    %1783 = vector.shape_cast %1782 : vector<8x2xi32> to vector<1x8x2xi32>
    %cst_351 = arith.constant dense<0> : vector<1xi32>
    %1784 = vector.multi_reduction <add>, %1783, %cst_351 [1, 2] : vector<1x8x2xi32> to vector<1xi32>
    %1785 = vector.shape_cast %1784 : vector<1xi32> to vector<1x1x1xi32>
    %1786 = vector.extract %1785[0, 0, 0] : i32 from vector<1x1x1xi32>
    %1787 = vector.broadcast %1786 : i32 to vector<1x1xi32>
    %c14_i32_352 = arith.constant 14 : i32
    %1788 = vector.broadcast %c14_i32_352 : i32 to vector<8x2xi32>
    %1789 = arith.cmpi sle, %1661, %1788 : vector<8x2xi32>
    %1790 = arith.andi %1657, %1789 : vector<8x2xi1>
    %1791 = arith.extui %1790 : vector<8x2xi1> to vector<8x2xi32>
    %1792 = vector.shape_cast %1791 : vector<8x2xi32> to vector<1x8x2xi32>
    %cst_353 = arith.constant dense<0> : vector<1xi32>
    %1793 = vector.multi_reduction <add>, %1792, %cst_353 [1, 2] : vector<1x8x2xi32> to vector<1xi32>
    %1794 = vector.shape_cast %1793 : vector<1xi32> to vector<1x1x1xi32>
    %1795 = vector.extract %1794[0, 0, 0] : i32 from vector<1x1x1xi32>
    %1796 = vector.broadcast %1795 : i32 to vector<1x1xi32>
    %1797 = arith.cmpi slt, %1670, %1651 : vector<1x1xi32>
    %1798 = arith.cmpi slt, %1679, %1651 : vector<1x1xi32>
    %1799 = arith.cmpi slt, %1688, %1651 : vector<1x1xi32>
    %1800 = arith.cmpi slt, %1697, %1651 : vector<1x1xi32>
    %1801 = arith.cmpi slt, %1706, %1651 : vector<1x1xi32>
    %1802 = arith.cmpi slt, %1715, %1651 : vector<1x1xi32>
    %1803 = arith.cmpi slt, %1724, %1651 : vector<1x1xi32>
    %1804 = arith.cmpi slt, %1733, %1651 : vector<1x1xi32>
    %1805 = arith.cmpi slt, %1742, %1651 : vector<1x1xi32>
    %1806 = arith.cmpi slt, %1751, %1651 : vector<1x1xi32>
    %1807 = arith.cmpi slt, %1760, %1651 : vector<1x1xi32>
    %1808 = arith.cmpi slt, %1769, %1651 : vector<1x1xi32>
    %1809 = arith.cmpi slt, %1778, %1651 : vector<1x1xi32>
    %1810 = arith.cmpi slt, %1787, %1651 : vector<1x1xi32>
    %1811 = arith.cmpi slt, %1796, %1651 : vector<1x1xi32>
    %1812 = arith.extui %1797 : vector<1x1xi1> to vector<1x1xi32>
    %1813 = arith.extui %1798 : vector<1x1xi1> to vector<1x1xi32>
    %1814 = arith.extui %1799 : vector<1x1xi1> to vector<1x1xi32>
    %1815 = arith.extui %1800 : vector<1x1xi1> to vector<1x1xi32>
    %1816 = arith.extui %1801 : vector<1x1xi1> to vector<1x1xi32>
    %1817 = arith.extui %1802 : vector<1x1xi1> to vector<1x1xi32>
    %1818 = arith.extui %1803 : vector<1x1xi1> to vector<1x1xi32>
    %1819 = arith.extui %1804 : vector<1x1xi1> to vector<1x1xi32>
    %1820 = arith.extui %1805 : vector<1x1xi1> to vector<1x1xi32>
    %1821 = arith.extui %1806 : vector<1x1xi1> to vector<1x1xi32>
    %1822 = arith.extui %1807 : vector<1x1xi1> to vector<1x1xi32>
    %1823 = arith.extui %1808 : vector<1x1xi1> to vector<1x1xi32>
    %1824 = arith.extui %1809 : vector<1x1xi1> to vector<1x1xi32>
    %1825 = arith.extui %1810 : vector<1x1xi1> to vector<1x1xi32>
    %1826 = arith.extui %1811 : vector<1x1xi1> to vector<1x1xi32>
    %1827 = arith.addi %1812, %1813 : vector<1x1xi32>
    %1828 = arith.addi %1814, %1815 : vector<1x1xi32>
    %1829 = arith.addi %1816, %1817 : vector<1x1xi32>
    %1830 = arith.addi %1818, %1819 : vector<1x1xi32>
    %1831 = arith.addi %1820, %1821 : vector<1x1xi32>
    %1832 = arith.addi %1822, %1823 : vector<1x1xi32>
    %1833 = arith.addi %1824, %1825 : vector<1x1xi32>
    %1834 = arith.addi %1827, %1828 : vector<1x1xi32>
    %1835 = arith.addi %1829, %1830 : vector<1x1xi32>
    %1836 = arith.addi %1831, %1832 : vector<1x1xi32>
    %1837 = arith.addi %1833, %1826 : vector<1x1xi32>
    %1838 = arith.addi %1834, %1835 : vector<1x1xi32>
    %1839 = arith.addi %1836, %1837 : vector<1x1xi32>
    %1840 = arith.addi %1838, %1839 : vector<1x1xi32>
    %c0_i32_354 = arith.constant 0 : i32
    %1841 = vector.broadcast %c0_i32_354 : i32 to vector<1x1xi32>
    %1842 = arith.shli %1840, %1841 : vector<1x1xi32>
    %1843 = arith.ori %1654, %1842 : vector<1x1xi32>
    %c0_i32_355 = arith.constant 0 : i32
    %1844 = vector.broadcast %c0_i32_355 : i32 to vector<1x1xi32>
    %1845 = arith.cmpi slt, %1843, %1844 : vector<1x1xi32>
    %c-2147483648_i32_356 = arith.constant -2147483648 : i32
    %1846 = vector.broadcast %c-2147483648_i32_356 : i32 to vector<1x1xi32>
    %1847 = arith.xori %1843, %1846 : vector<1x1xi32>
    %cst_357 = arith.constant dense<-1> : vector<1x1xi32>
    %1848 = arith.xori %1843, %cst_357 : vector<1x1xi32>
    %1849 = arith.select %1845, %1847, %1848 : vector<1x1xi1>, vector<1x1xi32>
    %1850 = tpu.bitcast %1849 : vector<1x1xi32> -> vector<1x1xf32>
    %c0_358 = arith.constant 0 : index
    %c0_359 = arith.constant 0 : index
    %c0_360 = arith.constant 0 : index
    %1851 = vector.load %arg3[%c0_358, %c0_359, %c0_360] : memref<1x1x1xf32, #tpu.memory_space<vmem>>, vector<1x1x1xf32>
    %1852 = vector.shape_cast %1851 : vector<1x1x1xf32> to vector<1x1xf32>
    %1853 = vector.shape_cast %1850 : vector<1x1xf32> to vector<1x1x1xf32>
    tpu.vector_store %arg3[%c0_358, %c0_359, %c0_360], %1853 {strides = array<i32>} : memref<1x1x1xf32, #tpu.memory_space<vmem>>, vector<1x1x1xf32>,
    %1854 = vector.broadcast %1850 : vector<1x1xf32> to vector<8x2xf32>
    %1855 = arith.cmpf ogt, %3, %1854 : vector<8x2xf32>
    %1856 = arith.extui %1855 : vector<8x2xi1> to vector<8x2xi32>
    %c0_361 = arith.constant 0 : index
    %c0_362 = arith.constant 0 : index
    %c0_363 = arith.constant 0 : index
    %1857 = vector.load %arg4[%c0_361, %c0_362, %c0_363] : memref<1x8x2xi32, #tpu.memory_space<vmem>>, vector<1x8x2xi32>
    %1858 = vector.shape_cast %1857 : vector<1x8x2xi32> to vector<8x2xi32>
    %1859 = vector.shape_cast %1856 : vector<8x2xi32> to vector<1x8x2xi32>
    tpu.vector_store %arg4[%c0_361, %c0_362, %c0_363], %1859 {strides = array<i32>} : memref<1x8x2xi32, #tpu.memory_space<vmem>>, vector<1x8x2xi32>,
    return
  }
  func.func @transform_0(%arg0: i32, %arg1: memref<1xi32, #tpu.memory_space<smem>>) -> (i32, i32, i32) {
    %c0_i32 = arith.constant 0 : i32
    %c0_i32_0 = arith.constant 0 : i32
    %c0_i32_1 = arith.constant 0 : i32
    return %arg0, %c0_i32, %c0_i32_0 : i32, i32, i32
  }
  func.func @transform_1(%arg0: i32, %arg1: memref<1xi32, #tpu.memory_space<smem>>) -> (i32, i32, i32) {
    %c0_i32 = arith.constant 0 : i32
    %c0_i32_0 = arith.constant 0 : i32
    %c0_i32_1 = arith.constant 0 : i32
    return %arg0, %c0_i32, %c0_i32_0 : i32, i32, i32
  }
  func.func @transform_2(%arg0: i32, %arg1: memref<1xi32, #tpu.memory_space<smem>>) -> (i32, i32, i32) {
    %c0_i32 = arith.constant 0 : i32
    %c0_i32_0 = arith.constant 0 : i32
    %c0_i32_1 = arith.constant 0 : i32
    return %arg0, %c0_i32, %c0_i32_0 : i32, i32, i32
  }
}

</mosaic_0001>

<bundles_post_ra>
// kernel: tpu_custom_call.1
= control target key start
LH: loop header
LB: loop body
LE: loop exit
PB: predicated region body
PF: predicated region fallthrough
CT: control target
= control target key end

     0   :  { %v20_v1 = vlaneseq  ;;  %s6147_s0 = inlined_call_operand.<no memory space> [shape: s32[1], index: 0, kind: input, shape index: {}]   ;;  %s6148_s1 = inlined_call_operand.vmem [shape: f32[1,8,2], index: 1, kind: input, shape index: {}]   ;;  %s6149_s2 = inlined_call_operand.hbm [shape: f32[1,1,1], index: 2, kind: output, shape index: {0}]   ;;  %s6150_s3 = inlined_call_operand.vmem [shape: s32[1,8,2], index: 3, kind: output, shape index: {1}]  }
   0x1   :  { %v14_v0 = vld [vmem:[%s6148_s1] sm:$0xff] }
   0x2   :  { %10 = vsyncpa [#allocation5], 0  ;;  %vm16_vm0 = vcmp.lt.s32.totalorder %v14_v0, 0  ;;  %v17_v2 = vxor.u32 4294967295, %v14_v0  ;;  %v18_v3 = vxor.u32 2147483648, %v14_v0  ;;  %v21_v4 = vshrl.u32 %v20_v1, 7 }
   0x3   :  { %v24_v5 = vand.u32 127, %v20_v1  ;;  %vm33_vm4 = vcmask 15360   ;;  %v3912_v10 = vmov 0  }
   0x4   :  { %v3937_v6 = vsel %vm16_vm0, %v17_v2, %v18_v3  ;;  %v22_v7 = vmul.u32 2, %v21_v4 }
   0x5   :  { %v3940_v8 = vshrl.u32 %v3937_v6, 28 }
   0x6   :  { %v3942_v9 = vadd.s32 %v24_v5, %v22_v7 }
   0x7   :  { %vm127_vm1 = vcmp.le.s32.totalorder %v3940_v8, 4  ;;  %vm79_vm2 = vcmp.le.s32.totalorder %v3940_v8, 2  ;;  %vm30_vm5 = vcmp.le.s32.totalorder %v3940_v8, 0  ;;  %vm151_vm7 = vcmp.le.s32.totalorder %v3940_v8, 5 }
   0x8   :  { %vm26_vm3 = vcmp.lt.s32.totalorder %v3942_v9, 12  ;;  %vm103_vm9 = vcmp.le.s32.totalorder %v3940_v8, 3  ;;  %vm55_vm11 = vcmp.le.s32.totalorder %v3940_v8, 1  ;;  %vm223_vm12 = vcmp.le.s32.totalorder %v3940_v8, 8 }
   0x9   :  { %vm128_vm6 = vmand %vm26_vm3, %vm127_vm1  ;;  %vm199_vm14 = vcmp.le.s32.totalorder %v3940_v8, 7  ;;  %vm175_vm0 = vcmp.le.s32.totalorder %v3940_v8, 6 }
   0xa   :  { %v129_v11 = vsel %vm128_vm6, 1, %v3912_v10  ;;  %vm80_vm8 = vmand %vm26_vm3, %vm79_vm2 }
   0xb   :  { %v3956_v12 = vsel %vm33_vm4, %v129_v11, 0  ;;  %v81_v13 = vsel %vm80_vm8, 1, %v3912_v10  ;;  %vm31_vm10 = vmand %vm26_vm3, %vm30_vm5  ;;  %vm271_vm8 = vcmp.le.s32.totalorder %v3940_v8, 10 }
   0xc   :  { %v132_v14 = vshrl.u32 %v3956_v12, 16  ;;  %v3965_v15 = vsel %vm33_vm4, %v81_v13, 0  ;;  %v32_v16 = vsel %vm31_vm10, 1, %v3912_v10  ;;  %vm152_vm13 = vmand %vm26_vm3, %vm151_vm7  ;;  %vm295_vm7 = vcmp.le.s32.totalorder %v3940_v8, 11 }
   0xd   :  { %v84_v17 = vshrl.u32 %v3965_v15, 16  ;;  %v3973_v18 = vsel %vm33_vm4, %v32_v16, 0  ;;  %v153_v19 = vsel %vm152_vm13, 1, %v3912_v10  ;;  %vm104_vm15 = vmand %vm26_vm3, %vm103_vm9  ;;  %vm247_vm9 = vcmp.le.s32.totalorder %v3940_v8, 9 }
   0xe   :  { %v134_v20 = vcvt.s32.f32 %v132_v14  ;;  %v36_v21 = vshrl.u32 %v3973_v18, 16  ;;  %v3981_v22 = vsel %vm33_vm4, %v153_v19, 0  ;;  %v105_v23 = vsel %vm104_vm15, 1, %v3912_v10  ;;  %vm56_vm1 = vmand %vm26_vm3, %vm55_vm11 }
   0xf   :  { %v86_v24 = vcvt.s32.f32 %v84_v17  ;;  %v3989_v25 = vsel %vm33_vm4, %v105_v23, 0  ;;  %v57_v26 = vsel %vm56_vm1, 1, %v3912_v10  ;;  %vm224_vm2 = vmand %vm26_vm3, %vm223_vm12  ;;  %v156_v28 = vshrl.u32 %v3981_v22, 16 }
  0x10   :  { %137 = vadd.xlane.f32.xlu2 %v134_v20  ;;  %v38_v27 = vcvt.s32.f32 %v36_v21  ;;  %v3998_v29 = vsel %vm33_vm4, %v57_v26, 0  ;;  %vm200_vm5 = vmand %vm26_vm3, %vm199_vm14  ;;  %v108_v30 = vshrl.u32 %v3989_v25, 16  ;;  %v225_v32 = vsel %vm224_vm2, 1, %v3912_v10 }
  0x11   :  { %89 = vadd.xlane.f32.xlu1 %v86_v24  ;;  %vm176_vm6 = vmand %vm26_vm3, %vm175_vm0  ;;  %v60_v31 = vshrl.u32 %v3998_v29, 16  ;;  %v201_v33 = vsel %vm200_vm5, 1, %v3912_v10  ;;  %v158_v34 = vcvt.s32.f32 %v156_v28  ;;  %v4015_v37 = vsel %vm33_vm4, %v225_v32, 0 }
  0x12   :  { %41 = vadd.xlane.f32.xlu0 %v38_v27  ;;  %v177_v35 = vsel %vm176_vm6, 1, %v3912_v10  ;;  %v110_v36 = vcvt.s32.f32 %v108_v30  ;;  %v4019_v39 = vsel %vm33_vm4, %v201_v33, 0  ;;  %vm296_vm10 = vmand %vm26_vm3, %vm295_vm7  ;;  %v228_v41 = vshrl.u32 %v4015_v37, 16 }
  0x13   :  { %v62_v38 = vcvt.s32.f32 %v60_v31  ;;  %v178_v40 = vsel %vm33_vm4, %v177_v35, 0  ;;  %vm272_vm11 = vmand %vm26_vm3, %vm271_vm8  ;;  %v204_v42 = vshrl.u32 %v4019_v39, 16  ;;  %v297_v44 = vsel %vm296_vm10, 1, %v3912_v10 }
  0x14   :  { %vm248_vm12 = vmand %vm26_vm3, %vm247_vm9  ;;  %v180_v43 = vshrl.u32 %v178_v40, 16  ;;  %v273_v45 = vsel %vm272_vm11, 1, %v3912_v10  ;;  %v230_v46 = vcvt.s32.f32 %v228_v41  ;;  %v4035_v49 = vsel %vm33_vm4, %v297_v44, 0 }
  0x15   :  { %v249_v47 = vsel %vm248_vm12, 1, %v3912_v10  ;;  %v206_v48 = vcvt.s32.f32 %v204_v42  ;;  %vm343_vm13 = vcmp.le.s32.totalorder %v3940_v8, 13  ;;  %v4039_v51 = vsel %vm33_vm4, %v273_v45, 0 }
  0x16   :  { %v182_v50 = vcvt.s32.f32 %v180_v43  ;;  %vm319_vm14 = vcmp.le.s32.totalorder %v3940_v8, 12  ;;  %v250_v52 = vsel %vm33_vm4, %v249_v47, 0  ;;  %v300_v53 = vshrl.u32 %v4035_v49, 16  ;;  %vm344_vm15 = vmand %vm26_vm3, %vm343_vm13 }
  0x17   :  { %v276_v54 = vshrl.u32 %v4039_v51, 16  ;;  %vm320_vm0 = vmand %vm26_vm3, %vm319_vm14  ;;  %v252_v55 = vshrl.u32 %v250_v52, 16  ;;  %v345_v56 = vsel %vm344_vm15, 1, %v3912_v10  ;;  %v35_v63 = vand.u32 65535, %v3973_v18 }
  0x18   :  { %161 = vadd.xlane.f32.xlu2 %v158_v34  ;;  %v302_v57 = vcvt.s32.f32 %v300_v53  ;;  %v321_v58 = vsel %vm320_vm0, 1, %v3912_v10  ;;  %v346_v61 = vsel %vm33_vm4, %v345_v56, 0  ;;  %v107_v5 = vand.u32 65535, %v3989_v25 }
  0x19   :  { %113 = vadd.xlane.f32.xlu1 %v110_v36  ;;  %v278_v59 = vcvt.s32.f32 %v276_v54  ;;  %v254_v60 = vcvt.s32.f32 %v252_v55  ;;  %v322_v62 = vsel %vm33_vm4, %v321_v58, 0  ;;  %v348_v0 = vshrl.u32 %v346_v61, 16 }
  0x1a   :  { %65 = vadd.xlane.f32.xlu0 %v62_v38  ;;  %v324_v1 = vshrl.u32 %v322_v62, 16  ;;  %v37_v2 = vcvt.s32.f32 %v35_v63  ;;  %v83_v7 = vand.u32 65535, %v3965_v15  ;;  %v59_v11 = vand.u32 65535, %v3998_v29 }
  0x1b   :  { %v350_v3 = vcvt.s32.f32 %v348_v0  ;;  %v109_v13 = vcvt.s32.f32 %v107_v5  ;;  %v179_v17 = vand.u32 65535, %v178_v40  ;;  %v155_v18 = vand.u32 65535, %v3981_v22 }
  0x1c   :  { %v326_v4 = vcvt.s32.f32 %v324_v1  ;;  %v85_v14 = vcvt.s32.f32 %v83_v7  ;;  %v61_v16 = vcvt.s32.f32 %v59_v11  ;;  %v131_v19 = vand.u32 65535, %v3956_v12 }
  0x1d   :  { %v181_v20 = vcvt.s32.f32 %v179_v17  ;;  %v157_v21 = vcvt.s32.f32 %v155_v18  ;;  %v251_v24 = vand.u32 65535, %v250_v52  ;;  %v227_v15 = vand.u32 65535, %v4015_v37 }
  0x1e   :  { %v133_v23 = vcvt.s32.f32 %v131_v19  ;;  %v203_v25 = vand.u32 65535, %v4019_v39  ;;  %vm367_vm1 = vcmp.le.s32.totalorder %v3940_v8, 14  ;;  %v323_v22 = vand.u32 65535, %v322_v62 }
  0x1f   :  { %v253_v26 = vcvt.s32.f32 %v251_v24  ;;  %v229_v27 = vcvt.s32.f32 %v227_v15  ;;  %vm368_vm2 = vmand %vm26_vm3, %vm367_vm1  ;;  %v299_v12 = vand.u32 65535, %v4035_v49  ;;  %v275_v29 = vand.u32 65535, %v4039_v51 }
  0x20   :  { %233 = vadd.xlane.f32.xlu2 %v230_v46  ;;  %v205_v28 = vcvt.s32.f32 %v203_v25  ;;  %v369_v30 = vsel %vm368_vm2, 1, %v3912_v10  ;;  %v325_v31 = vcvt.s32.f32 %v323_v22  ;;  %v347_v37 = vand.u32 65535, %v346_v61 }
  0x21   :  { %209 = vadd.xlane.f32.xlu1 %v206_v48  ;;  %v301_v32 = vcvt.s32.f32 %v299_v12  ;;  %v277_v33 = vcvt.s32.f32 %v275_v29  ;;  %v370_v34 = vsel %vm33_vm4, %v369_v30, 0 }
  0x22   :  { %185 = vadd.xlane.f32.xlu0 %v182_v50  ;;  %v371_v35 = vand.u32 65535, %v370_v34  ;;  %v372_v36 = vshrl.u32 %v370_v34, 16  ;;  %v349_v40 = vcvt.s32.f32 %v347_v37 }
  0x24   :  { %v373_v38 = vcvt.s32.f32 %v371_v35  ;;  %v374_v39 = vcvt.s32.f32 %v372_v36 }
  0x28   :  { %305 = vadd.xlane.f32.xlu2 %v302_v57 }
  0x29   :  { %281 = vadd.xlane.f32.xlu1 %v278_v59 }
  0x2a   :  { %257 = vadd.xlane.f32.xlu0 %v254_v60 }
  0x30   :  { %39 = vadd.xlane.f32.xlu2 %v37_v2 }
  0x31   :  { %353 = vadd.xlane.f32.xlu1 %v350_v3 }
  0x32   :  { %329 = vadd.xlane.f32.xlu0 %v326_v4 }
  0x38   :  { %111 = vadd.xlane.f32.xlu2 %v109_v13 }
  0x39   :  { %87 = vadd.xlane.f32.xlu1 %v85_v14 }
  0x3a   :  { %63 = vadd.xlane.f32.xlu0 %v61_v16 }
  0x40   :  { %183 = vadd.xlane.f32.xlu2 %v181_v20 }
  0x41   :  { %159 = vadd.xlane.f32.xlu1 %v157_v21 }
  0x42   :  { %135 = vadd.xlane.f32.xlu0 %v133_v23 }
  0x48   :  { %255 = vadd.xlane.f32.xlu2 %v253_v26 }
  0x49   :  { %231 = vadd.xlane.f32.xlu1 %v229_v27 }
  0x4a   :  { %207 = vadd.xlane.f32.xlu0 %v205_v28 }
  0x50   :  { %327 = vadd.xlane.f32.xlu2 %v325_v31 }
  0x51   :  { %303 = vadd.xlane.f32.xlu1 %v301_v32 }
  0x52   :  { %279 = vadd.xlane.f32.xlu0 %v277_v33 }
  0x58   :  { %375 = vadd.xlane.f32.xlu2 %v373_v38 }
  0x59   :  { %377 = vadd.xlane.f32.xlu1 %v374_v39 }
  0x5a   :  { %351 = vadd.xlane.f32.xlu0 %v349_v40 }
  0x83   :  { %v138_v41 = vpop.xlane.xlu2 %137 }
  0x84   :  { %v90_v42 = vpop.xlane.xlu1 %89  ;;  %v140_v15 = vcvt.f32.s32 %v138_v41 }
  0x85   :  { %v42_v43 = vpop.xlane.xlu0 %41  ;;  %v92_v62 = vcvt.f32.s32 %v90_v42 }
  0x86   :  { %v44_v53 = vcvt.f32.s32 %v42_v43  ;;  %v141_v35 = vshll.u32 %v140_v15, 16 }
  0x87   :  { %v93_v7 = vshll.u32 %v92_v62, 16 }
  0x88   :  { %v45_v55 = vshll.u32 %v44_v53, 16 }
  0x8b   :  { %v162_v44 = vpop.xlane.xlu2 %161 }
  0x8c   :  { %v114_v45 = vpop.xlane.xlu1 %113  ;;  %v164_v25 = vcvt.f32.s32 %v162_v44 }
  0x8d   :  { %v66_v46 = vpop.xlane.xlu0 %65  ;;  %v116_v60 = vcvt.f32.s32 %v114_v45 }
  0x8e   :  { %v68_v63 = vcvt.f32.s32 %v66_v46  ;;  %v165_v36 = vshll.u32 %v164_v25, 16 }
  0x8f   :  { %v117_v2 = vshll.u32 %v116_v60, 16 }
  0x90   :  { %v69_v14 = vshll.u32 %v68_v63, 16 }
  0x93   :  { %v4068_v47 = vpop.xlane.xlu2 %233 }
  0x94   :  { %v4070_v48 = vpop.xlane.xlu1 %209 }
  0x95   :  { %v186_v49 = vpop.xlane.xlu0 %185 }
  0x96   :  { %v188_v20 = vcvt.f32.s32 %v186_v49 }
  0x98   :  { %v189_v30 = vshll.u32 %v188_v20, 16 }
  0x9b   :  { %v4072_v50 = vpop.xlane.xlu2 %305 }
  0x9c   :  { %v4074_v51 = vpop.xlane.xlu1 %281 }
  0x9d   :  { %v4076_v52 = vpop.xlane.xlu0 %257 }
  0x9e   :  { %v260_v44 = vcvt.f32.s32 %v4076_v52 }
  0xa3   :  { %v40_v54 = vpop.xlane.xlu2 %39 }
  0xa4   :  { %v4078_v56 = vpop.xlane.xlu1 %353  ;;  %v43_v57 = vcvt.f32.s32 %v40_v54 }
  0xa5   :  { %v4080_v58 = vpop.xlane.xlu0 %329 }
  0xa6   :  { %v46_v59 = vadd.s32 %v45_v55, %v43_v57  ;;  %v236_v57 = vcvt.f32.s32 %v4068_v47 }
  0xa8   :  { %v47_v61 = vrot.slane %v46_v59, 4 }
  0xaa   :  { %v48_v0 = vadd.s32 %v47_v61, %v46_v59  ;;  %v212_v59 = vcvt.f32.s32 %v4070_v48 }
  0xab   :  { %v112_v1 = vpop.xlane.xlu2 %111 }
  0xac   :  { %v88_v3 = vpop.xlane.xlu1 %87  ;;  %v115_v4 = vcvt.f32.s32 %v112_v1  ;;  %v49_v5 = vrot.slane %v48_v0, 2  ;;  %v261_v1 = vshll.u32 %v260_v44, 16 }
  0xad   :  { %v91_v11 = vcvt.f32.s32 %v88_v3  ;;  %v64_v13 = vpop.xlane.xlu0 %63 }
  0xae   :  { %v67_v16 = vcvt.f32.s32 %v64_v13  ;;  %v118_v17 = vadd.s32 %v117_v2, %v115_v4  ;;  %v50_v18 = vadd.s32 %v49_v5, %v48_v0 }
  0xaf   :  { %v94_v19 = vadd.s32 %v93_v7, %v91_v11 }
  0xb0   :  { %v70_v21 = vadd.s32 %v69_v14, %v67_v16  ;;  %v119_v23 = vrot.slane %v118_v17, 4  ;;  %v51_v24 = vrot.slane %v50_v18, 1  ;;  %v237_v16 = vshll.u32 %v236_v57, 16 }
  0xb1   :  { %v95_v26 = vrot.slane %v94_v19, 4 }
  0xb2   :  { %v71_v27 = vrot.slane %v70_v21, 4  ;;  %v52_v28 = vadd.s32 %v51_v24, %v50_v18  ;;  %v120_v22 = vadd.s32 %v119_v23, %v118_v17  ;;  %v213_v17 = vshll.u32 %v212_v59, 16 }
  0xb3   :  { %v184_v12 = vpop.xlane.xlu2 %183  ;;  %v96_v29 = vadd.s32 %v95_v26, %v94_v19  ;;  %v332_v24 = vcvt.f32.s32 %v4080_v58 }
  0xb4   :  { %v160_v31 = vpop.xlane.xlu1 %159  ;;  %v187_v32 = vcvt.f32.s32 %v184_v12  ;;  %3643 = vpush %v52_v28  ;;  %v72_v33 = vadd.s32 %v71_v27, %v70_v21  ;;  %v121_v34 = vrot.slane %v120_v22, 2  ;;  %v308_v12 = vcvt.f32.s32 %v4072_v50 }
  0xb5   :  { %v163_v37 = vcvt.f32.s32 %v160_v31  ;;  %v136_v38 = vpop.xlane.xlu0 %135  ;;  %v97_v39 = vrot.slane %v96_v29, 2 }
  0xb6   :  { %v139_v40 = vcvt.f32.s32 %v136_v38  ;;  %v190_v41 = vadd.s32 %v189_v30, %v187_v32  ;;  %v73_v42 = vrot.slane %v72_v33, 2  ;;  %v122_v43 = vadd.s32 %v121_v34, %v120_v22 }
  0xb7   :  { %v166_v45 = vadd.s32 %v165_v36, %v163_v37  ;;  %v98_v46 = vadd.s32 %v97_v39, %v96_v29  ;;  %v284_v29 = vcvt.f32.s32 %v4074_v51  ;;  %v309_v44 = vshll.u32 %v308_v12, 16 }
  0xb8   :  { %v142_v49 = vadd.s32 %v141_v35, %v139_v40  ;;  %v191_v53 = vrot.slane %v190_v41, 4  ;;  %v74_v54 = vadd.s32 %v73_v42, %v72_v33  ;;  %v123_v55 = vrot.slane %v122_v43, 1 }
  0xb9   :  { %v167_v60 = vrot.slane %v166_v45, 4  ;;  %v99_v61 = vrot.slane %v98_v46, 1  ;;  %v333_v35 = vshll.u32 %v332_v24, 16 }
  0xba   :  { %v143_v62 = vrot.slane %v142_v49, 4  ;;  %v75_v63 = vrot.slane %v74_v54, 1  ;;  %v192_v0 = vadd.s32 %v191_v53, %v190_v41  ;;  %v124_v4 = vadd.s32 %v123_v55, %v122_v43 }
  0xbb   :  { %v256_v2 = vpop.xlane.xlu2 %255  ;;  %v100_v3 = vadd.s32 %v99_v61, %v98_v46  ;;  %v168_v52 = vadd.s32 %v167_v60, %v166_v45  ;;  %v285_v45 = vshll.u32 %v284_v29, 16 }
  0xbc   :  { %v232_v5 = vpop.xlane.xlu1 %231  ;;  %v259_v7 = vcvt.f32.s32 %v256_v2  ;;  %v76_v11 = vadd.s32 %v75_v63, %v74_v54  ;;  %v144_v13 = vadd.s32 %v143_v62, %v142_v49  ;;  %v193_v14 = vrot.slane %v192_v0, 2 }
  0xbd   :  { %v235_v47 = vcvt.f32.s32 %v232_v5  ;;  %v208_v18 = vpop.xlane.xlu0 %207  ;;  %v169_v48 = vrot.slane %v168_v52, 2  ;;  %v356_v2 = vcvt.f32.s32 %v4078_v56 }
  0xbe   :  { %v211_v19 = vcvt.f32.s32 %v208_v18  ;;  %v262_v20 = vadd.s32 %v261_v1, %v259_v7  ;;  %3645 = vpush %v76_v11  ;;  %v145_v21 = vrot.slane %v144_v13, 2  ;;  %v194_v23 = vadd.s32 %v193_v14, %v192_v0 }
  0xbf   :  { %v238_v15 = vadd.s32 %v237_v16, %v235_v47  ;;  %3647 = vpush %v100_v3  ;;  %v170_v25 = vadd.s32 %v169_v48, %v168_v52 }
  0xc0   :  { %v214_v26 = vadd.s32 %v213_v17, %v211_v19  ;;  %v263_v27 = vrot.slane %v262_v20, 4  ;;  %3649 = vpush %v124_v4  ;;  %v146_v28 = vadd.s32 %v145_v21, %v144_v13  ;;  %v195_v22 = vrot.slane %v194_v23, 1 }
  0xc1   :  { %v239_v30 = vrot.slane %v238_v15, 4  ;;  %v171_v31 = vrot.slane %v170_v25, 1  ;;  %v357_v21 = vshll.u32 %v356_v2, 16 }
  0xc2   :  { %v215_v32 = vrot.slane %v214_v26, 4  ;;  %v147_v33 = vrot.slane %v146_v28, 1  ;;  %v264_v34 = vadd.s32 %v263_v27, %v262_v20  ;;  %v196_v37 = vadd.s32 %v195_v22, %v194_v23 }
  0xc3   :  { %v328_v36 = vpop.xlane.xlu2 %327  ;;  %v172_v58 = vadd.s32 %v171_v31, %v170_v25  ;;  %v240_v38 = vadd.s32 %v239_v30, %v238_v15 }
  0xc4   :  { %v304_v39 = vpop.xlane.xlu1 %303  ;;  %v331_v40 = vcvt.f32.s32 %v328_v36  ;;  %v148_v41 = vadd.s32 %v147_v33, %v146_v28  ;;  %v216_v42 = vadd.s32 %v215_v32, %v214_v26  ;;  %v265_v43 = vrot.slane %v264_v34, 2 }
  0xc5   :  { %v307_v50 = vcvt.f32.s32 %v304_v39  ;;  %v280_v46 = vpop.xlane.xlu0 %279  ;;  %v241_v51 = vrot.slane %v240_v38, 2 }
  0xc6   :  { %v283_v49 = vcvt.f32.s32 %v280_v46  ;;  %v334_v53 = vadd.s32 %v333_v35, %v331_v40  ;;  %3651 = vpush %v148_v41  ;;  %v217_v54 = vrot.slane %v216_v42, 2  ;;  %v266_v55 = vadd.s32 %v265_v43, %v264_v34 }
  0xc7   :  { %v310_v57 = vadd.s32 %v309_v44, %v307_v50  ;;  %3653 = vpush %v172_v58  ;;  %v242_v59 = vadd.s32 %v241_v51, %v240_v38  ;;  %v4092_v44 = vstv %s6147_s0 }
  0xc8   :  { %v286_v60 = vadd.s32 %v285_v45, %v283_v49  ;;  %v335_v61 = vrot.slane %v334_v53, 4  ;;  %3655 = vpush %v196_v37  ;;  %v218_v62 = vadd.s32 %v217_v54, %v216_v42  ;;  %v267_v63 = vrot.slane %v266_v55, 1 }
  0xc9   :  { %v311_v0 = vrot.slane %v310_v57, 4  ;;  %v243_v1 = vrot.slane %v242_v59, 1 }
  0xca   :  { %v287_v3 = vrot.slane %v286_v60, 4  ;;  %v219_v4 = vrot.slane %v218_v62, 1  ;;  %v336_v52 = vadd.s32 %v335_v61, %v334_v53  ;;  %v268_v16 = vadd.s32 %v267_v63, %v266_v55 }
  0xcb   :  { %v244_v5 = vadd.s32 %v243_v1, %v242_v59  ;;  %v376_v7 = vpop.xlane.xlu2 %375  ;;  %v312_v11 = vadd.s32 %v311_v0, %v310_v57 }
  0xcc   :  { %v378_v13 = vpop.xlane.xlu1 %377  ;;  %v220_v14 = vadd.s32 %v219_v4, %v218_v62  ;;  %v288_v17 = vadd.s32 %v287_v3, %v286_v60  ;;  %v337_v47 = vrot.slane %v336_v52, 2  ;;  %v379_v19 = vcvt.f32.s32 %v376_v7 }
  0xcd   :  { %v380_v18 = vcvt.f32.s32 %v378_v13  ;;  %v352_v48 = vpop.xlane.xlu0 %351  ;;  %v313_v20 = vrot.slane %v312_v11, 2 }
  0xce   :  { %v355_v23 = vcvt.f32.s32 %v352_v48  ;;  %3657 = vpush %v220_v14  ;;  %v289_v24 = vrot.slane %v288_v17, 2  ;;  %v338_v56 = vadd.s32 %v337_v47, %v336_v52 }
  0xcf   :  { %v381_v15 = vshll.u32 %v380_v18, 16  ;;  %3659 = vpush %v244_v5  ;;  %v314_v25 = vadd.s32 %v313_v20, %v312_v11 }
  0xd0   :  { %v358_v26 = vadd.s32 %v357_v21, %v355_v23  ;;  %3661 = vpush %v268_v16  ;;  %v290_v27 = vadd.s32 %v289_v24, %v288_v17  ;;  %v339_v28 = vrot.slane %v338_v56, 1 }
  0xd1   :  { %v382_v22 = vadd.s32 %v381_v15, %v379_v19  ;;  %v315_v12 = vrot.slane %v314_v25, 1 }
  0xd2   :  { %v359_v29 = vrot.slane %v358_v26, 4  ;;  %v291_v30 = vrot.slane %v290_v27, 1  ;;  %v340_v34 = vadd.s32 %v339_v28, %v338_v56 }
  0xd3   :  { %v383_v31 = vrot.slane %v382_v22, 4  ;;  %v316_v32 = vadd.s32 %v315_v12, %v314_v25 }
  0xd4   :  { %v292_v33 = vadd.s32 %v291_v30, %v290_v27  ;;  %v360_v35 = vadd.s32 %v359_v29, %v358_v26 }
  0xd5   :  { %v384_v36 = vadd.s32 %v383_v31, %v382_v22 }
  0xd6   :  { %3663 = vpush %v292_v33  ;;  %v361_v58 = vrot.slane %v360_v35, 2 }
  0xd7   :  { %3665 = vpush %v316_v32  ;;  %v385_v37 = vrot.slane %v384_v36, 2 }
  0xd8   :  { %3667 = vpush %v340_v34  ;;  %v362_v38 = vadd.s32 %v361_v58, %v360_v35 }
  0xd9   :  { %v386_v39 = vadd.s32 %v385_v37, %v384_v36 }
  0xda   :  { %v363_v40 = vrot.slane %v362_v38, 1 }
  0xdb   :  { %v387_v41 = vrot.slane %v386_v39, 1 }
  0xdc   :  { %v364_v42 = vadd.s32 %v363_v40, %v362_v38 }
  0xdd   :  { %v388_v43 = vadd.s32 %v387_v41, %v386_v39 }
  0xde   :  { %3669 = vpush %v364_v42 }
  0xdf   :  { %3671 = vpush %v388_v43 }
  0xe5   :  { %s3644_s16 = spop %3643 }
  0xe6   :  { %v54_v45 = vstv %s3644_s16 }
  0xe7   :  { %vm4095_vm5 = vcmp.lt.s32.totalorder %v54_v45, %v4092_v44 }
  0xe8   :  { %v435_v46 = vsel %vm4095_vm5, %v54_v45, 0  ;;  %v406_v25 = vsel %vm4095_vm5, 1, %v3912_v10 }
  0xef   :  { %s3646_s17 = spop %3645 }
  0xf0   :  { %v78_v51 = vstv %s3646_s17  ;;  %s3648_s18 = spop %3647 }
  0xf1   :  { %vm4102_vm6 = vcmp.lt.s32.totalorder %v78_v51, %v4092_v44  ;;  %v102_v53 = vstv %s3648_s18  ;;  %s3650_s0 = spop %3649 }
  0xf2   :  { %v436_v54 = vsel %vm4102_vm6, %v78_v51, 0  ;;  %vm4109_vm7 = vcmp.lt.s32.totalorder %v102_v53, %v4092_v44  ;;  %v126_v57 = vstv %s3650_s0  ;;  %v407_v34 = vsel %vm4102_vm6, 1, %v3912_v10 }
  0xf3   :  { %vm450_vm8 = vcmp.gt.s32.totalorder %v435_v46, %v436_v54  ;;  %v437_v59 = vsel %vm4109_vm7, %v102_v53, 0  ;;  %vm4116_vm9 = vcmp.lt.s32.totalorder %v126_v57, %v4092_v44  ;;  %v408_v37 = vsel %vm4109_vm7, 1, %v3912_v10 }
  0xf4   :  { %v451_v60 = vsel %vm450_vm8, %v435_v46, %v436_v54  ;;  %v438_v62 = vsel %vm4116_vm9, %v126_v57, 0  ;;  %v409_v40 = vsel %vm4116_vm9, 1, %v3912_v10  ;;  %v421_v51 = vadd.s32 %v407_v34, %v406_v25 }
  0xf5   :  { %vm452_vm10 = vcmp.gt.s32.totalorder %v437_v59, %v438_v62  ;;  %v422_v53 = vadd.s32 %v409_v40, %v408_v37  ;;  %v482_v57 = vshra.s32 %v3937_v6, 24 }
  0xf6   :  { %v453_v63 = vsel %vm452_vm10, %v437_v59, %v438_v62 }
  0xf7   :  { %s3652_s19 = spop %3651  ;;  %vm464_vm11 = vcmp.gt.s32.totalorder %v451_v60, %v453_v63  ;;  %v428_v52 = vadd.s32 %v422_v53, %v421_v51 }
  0xf8   :  { %v150_v0 = vstv %s3652_s19  ;;  %s3654_s20 = spop %3653  ;;  %v465_v1 = vsel %vm464_vm11, %v451_v60, %v453_v63 }
  0xf9   :  { %vm4123_vm12 = vcmp.lt.s32.totalorder %v150_v0, %v4092_v44  ;;  %v174_v3 = vstv %s3654_s20  ;;  %s3656_s21 = spop %3655 }
  0xfa   :  { %v439_v4 = vsel %vm4123_vm12, %v150_v0, 0  ;;  %vm4130_vm13 = vcmp.lt.s32.totalorder %v174_v3, %v4092_v44  ;;  %v198_v5 = vstv %s3656_s21  ;;  %v410_v28 = vsel %vm4123_vm12, 1, %v3912_v10 }
  0xfb   :  { %v440_v7 = vsel %vm4130_vm13, %v174_v3, 0  ;;  %vm4137_vm14 = vcmp.lt.s32.totalorder %v198_v5, %v4092_v44  ;;  %v411_v30 = vsel %vm4130_vm13, 1, %v3912_v10 }
  0xfc   :  { %vm454_vm15 = vcmp.gt.s32.totalorder %v439_v4, %v440_v7  ;;  %v441_v13 = vsel %vm4137_vm14, %v198_v5, 0  ;;  %v412_v35 = vsel %vm4137_vm14, 1, %v3912_v10  ;;  %v423_v41 = vadd.s32 %v411_v30, %v410_v28 }
  0xfd   :  { %v455_v14 = vsel %vm454_vm15, %v439_v4, %v440_v7 }
  0xff   :  { %s3658_s22 = spop %3657 }
 0x100   :  { %v222_v16 = vstv %s3658_s22  ;;  %s3660_s23 = spop %3659 }
 0x101   :  { %vm4144_vm0 = vcmp.lt.s32.totalorder %v222_v16, %v4092_v44  ;;  %v246_v47 = vstv %s3660_s23  ;;  %s3662_s24 = spop %3661 }
 0x102   :  { %v442_v18 = vsel %vm4144_vm0, %v222_v16, 0  ;;  %vm4151_vm1 = vcmp.lt.s32.totalorder %v246_v47, %v4092_v44  ;;  %v270_v19 = vstv %s3662_s24  ;;  %v413_v22 = vsel %vm4144_vm0, 1, %v3912_v10 }
 0x103   :  { %vm456_vm2 = vcmp.gt.s32.totalorder %v441_v13, %v442_v18  ;;  %v443_v20 = vsel %vm4151_vm1, %v246_v47, 0  ;;  %vm4158_vm8 = vcmp.lt.s32.totalorder %v270_v19, %v4092_v44  ;;  %v424_v38 = vadd.s32 %v413_v22, %v412_v35 }
 0x104   :  { %v457_v21 = vsel %vm456_vm2, %v441_v13, %v442_v18  ;;  %v444_v24 = vsel %vm4158_vm8, %v270_v19, 0  ;;  %v414_v42 = vsel %vm4151_vm1, 1, %v3912_v10  ;;  %v415_v45 = vsel %vm4158_vm8, 1, %v3912_v10 }
 0x105   :  { %vm466_vm10 = vcmp.gt.s32.totalorder %v455_v14, %v457_v21  ;;  %vm458_vm11 = vcmp.gt.s32.totalorder %v443_v20, %v444_v24  ;;  %v429_v54 = vadd.s32 %v424_v38, %v423_v41  ;;  %v425_v59 = vadd.s32 %v415_v45, %v414_v42 }
 0x106   :  { %v467_v56 = vsel %vm466_vm10, %v455_v14, %v457_v21  ;;  %v459_v15 = vsel %vm458_vm11, %v443_v20, %v444_v24  ;;  %v4229_v13 = vand.u32 15, %v482_v57 }
 0x107   :  { %vm472_vm15 = vcmp.gt.s32.totalorder %v465_v1, %v467_v56  ;;  %s3664_s25 = spop %3663  ;;  %v432_v14 = vadd.s32 %v429_v54, %v428_v52 }
 0x108   :  { %v294_v26 = vstv %s3664_s25  ;;  %s3666_s26 = spop %3665  ;;  %v473_v27 = vsel %vm472_vm15, %v465_v1, %v467_v56  ;;  %vm532_vm10 = vcmp.le.s32.totalorder %v4229_v13, 2  ;;  %vm508_vm15 = vcmp.le.s32.totalorder %v4229_v13, 1 }
 0x109   :  { %vm4174_vm2 = vcmp.lt.s32.totalorder %v294_v26, %v4092_v44  ;;  %v318_v29 = vstv %s3666_s26  ;;  %s3668_s27 = spop %3667 }
 0x10a   :  { %v445_v31 = vsel %vm4174_vm2, %v294_v26, 0  ;;  %vm4184_vm5 = vcmp.lt.s32.totalorder %v318_v29, %v4092_v44  ;;  %v342_v33 = vstv %s3668_s27  ;;  %v416_v50 = vsel %vm4174_vm2, 1, %v3912_v10 }
 0x10b   :  { %v446_v36 = vsel %vm4184_vm5, %v318_v29, 0  ;;  %vm4197_vm12 = vcmp.lt.s32.totalorder %v342_v33, %v4092_v44  ;;  %v417_v46 = vsel %vm4184_vm5, 1, %v3912_v10  ;;  %vm484_vm5 = vcmp.le.s32.totalorder %v4229_v13, 0 }
 0x10c   :  { %vm460_vm13 = vcmp.gt.s32.totalorder %v445_v31, %v446_v36  ;;  %v447_v39 = vsel %vm4197_vm12, %v342_v33, 0  ;;  %v426_v60 = vadd.s32 %v417_v46, %v416_v50  ;;  %v418_v62 = vsel %vm4197_vm12, 1, %v3912_v10 }
 0x10d   :  { %v461_v43 = vsel %vm460_vm13, %v445_v31, %v446_v36  ;;  %vm604_vm13 = vcmp.le.s32.totalorder %v4229_v13, 5 }
 0x10e   :  { %vm468_vm6 = vcmp.gt.s32.totalorder %v459_v15, %v461_v43  ;;  %v430_v5 = vadd.s32 %v426_v60, %v425_v59 }
 0x10f   :  { %s3670_s28 = spop %3669  ;;  %v469_v49 = vsel %vm468_vm6, %v459_v15, %v461_v43 }
 0x110   :  { %v366_v55 = vstv %s3670_s28  ;;  %s3672_s29 = spop %3671 }
 0x111   :  { %vm404_vm7 = vcmp.lt.s32.totalorder %v366_v55, %v4092_v44  ;;  %v390_v61 = vstv %s3672_s29 }
 0x112   :  { %v419_v63 = vsel %vm404_vm7, 1, %v3912_v10  ;;  %v448_v0 = vsel %vm404_vm7, %v366_v55, 0  ;;  %vm405_vm9 = vcmp.lt.s32.totalorder %v390_v61, %v4092_v44  ;;  %vm580_vm7 = vcmp.le.s32.totalorder %v4229_v13, 4 }
 0x113   :  { %v427_v1 = vadd.s32 %v419_v63, %v418_v62  ;;  %vm462_vm14 = vcmp.gt.s32.totalorder %v447_v39, %v448_v0  ;;  %v420_v2 = vsel %vm405_vm9, 1, %v3912_v10  ;;  %v449_v3 = vsel %vm405_vm9, %v390_v61, 0 }
 0x114   :  { %v463_v4 = vsel %vm462_vm14, %v447_v39, %v448_v0  ;;  %vm556_vm9 = vcmp.le.s32.totalorder %v4229_v13, 3 }
 0x115   :  { %v431_v7 = vadd.s32 %v427_v1, %v420_v2  ;;  %vm470_vm0 = vcmp.gt.s32.totalorder %v463_v4, %v449_v3 }
 0x116   :  { %v471_v11 = vsel %vm470_vm0, %v463_v4, %v449_v3 }
 0x117   :  { %v433_v16 = vadd.s32 %v431_v7, %v430_v5  ;;  %vm474_vm1 = vcmp.gt.s32.totalorder %v469_v49, %v471_v11 }
 0x118   :  { %v475_v17 = vsel %vm474_vm1, %v469_v49, %v471_v11 }
 0x119   :  { %v4231_v47 = vadd.s32 %v433_v16, %v432_v14  ;;  %vm476_vm8 = vcmp.gt.s32.totalorder %v473_v27, %v475_v17 }
 0x11a   :  { %v477_v18 = vsel %vm476_vm8, %v473_v27, %v475_v17  ;;  %vm676_vm8 = vcmp.le.s32.totalorder %v4229_v13, 8 }
 0x11b   :  { %v4235_v48 = vsub.s32 %v4092_v44, %v477_v18  ;;  %vm480_vm11 = vcmp.eq.s32.totalorder %v3940_v8, %v4231_v47 }
 0x11c   :  { %vm4242_vm2 = vmand %vm26_vm3, %vm480_vm11  ;;  %vm628_vm11 = vcmp.le.s32.totalorder %v4229_v13, 6 }
 0x11d   :  { %vm533_vm12 = vmand %vm4242_vm2, %vm532_vm10  ;;  %vm652_vm10 = vcmp.le.s32.totalorder %v4229_v13, 7 }
 0x11e   :  { %v534_v44 = vsel %vm533_vm12, 1, %v3912_v10  ;;  %vm509_vm6 = vmand %vm4242_vm2, %vm508_vm15 }
 0x11f   :  { %v4255_v8 = vsel %vm33_vm4, %v534_v44, 0  ;;  %v510_v9 = vsel %vm509_vm6, 1, %v3912_v10  ;;  %vm485_vm3 = vmand %vm4242_vm2, %vm484_vm5  ;;  %vm724_vm6 = vcmp.le.s32.totalorder %v4229_v13, 10 }
 0x120   :  { %v537_v20 = vshrl.u32 %v4255_v8, 16  ;;  %v4263_v21 = vsel %vm33_vm4, %v510_v9, 0  ;;  %v486_v23 = vsel %vm485_vm3, 1, %v3912_v10  ;;  %vm605_vm14 = vmand %vm4242_vm2, %vm604_vm13  ;;  %vm748_vm13 = vcmp.le.s32.totalorder %v4229_v13, 11 }
 0x121   :  { %v513_v24 = vshrl.u32 %v4263_v21, 16  ;;  %v4270_v56 = vsel %vm33_vm4, %v486_v23, 0  ;;  %v606_v15 = vsel %vm605_vm14, 1, %v3912_v10  ;;  %vm581_vm0 = vmand %vm4242_vm2, %vm580_vm7  ;;  %vm700_vm7 = vcmp.le.s32.totalorder %v4229_v13, 9 }
 0x122   :  { %v539_v25 = vcvt.s32.f32 %v537_v20  ;;  %v489_v26 = vshrl.u32 %v4270_v56, 16  ;;  %v582_v27 = vsel %vm581_vm0, 1, %v3912_v10  ;;  %vm557_vm1 = vmand %vm4242_vm2, %vm556_vm9  ;;  %v4281_v22 = vsel %vm33_vm4, %v606_v15, 0 }
 0x123   :  { %v515_v28 = vcvt.s32.f32 %v513_v24  ;;  %v558_v12 = vsel %vm557_vm1, 1, %v3912_v10  ;;  %v4286_v30 = vsel %vm33_vm4, %v582_v27, 0  ;;  %vm677_vm15 = vmand %vm4242_vm2, %vm676_vm8  ;;  %v609_v32 = vshrl.u32 %v4281_v22, 16 }
 0x124   :  { %542 = vadd.xlane.f32.xlu2 %v539_v25  ;;  %v491_v29 = vcvt.s32.f32 %v489_v26  ;;  %v4290_v31 = vsel %vm33_vm4, %v558_v12, 0  ;;  %vm653_vm5 = vmand %vm4242_vm2, %vm652_vm10  ;;  %v585_v33 = vshrl.u32 %v4286_v30, 16  ;;  %v678_v35 = vsel %vm677_vm15, 1, %v3912_v10 }
 0x125   :  { %518 = vadd.xlane.f32.xlu1 %v515_v28  ;;  %vm629_vm12 = vmand %vm4242_vm2, %vm628_vm11  ;;  %v561_v34 = vshrl.u32 %v4290_v31, 16  ;;  %v654_v36 = vsel %vm653_vm5, 1, %v3912_v10  ;;  %v611_v58 = vcvt.s32.f32 %v609_v32  ;;  %v4306_v39 = vsel %vm33_vm4, %v678_v35, 0 }
 0x126   :  { %494 = vadd.xlane.f32.xlu0 %v491_v29  ;;  %v630_v37 = vsel %vm629_vm12, 1, %v3912_v10  ;;  %v587_v38 = vcvt.s32.f32 %v585_v33  ;;  %v4310_v41 = vsel %vm33_vm4, %v654_v36, 0  ;;  %vm749_vm3 = vmand %vm4242_vm2, %vm748_vm13  ;;  %v681_v43 = vshrl.u32 %v4306_v39, 16 }
 0x127   :  { %v563_v40 = vcvt.s32.f32 %v561_v34  ;;  %v631_v42 = vsel %vm33_vm4, %v630_v37, 0  ;;  %vm725_vm9 = vmand %vm4242_vm2, %vm724_vm6  ;;  %v657_v45 = vshrl.u32 %v4310_v41, 16  ;;  %v750_v46 = vsel %vm749_vm3, 1, %v3912_v10 }
 0x128   :  { %vm701_vm14 = vmand %vm4242_vm2, %vm700_vm7  ;;  %v633_v50 = vshrl.u32 %v631_v42, 16  ;;  %v726_v51 = vsel %vm725_vm9, 1, %v3912_v10  ;;  %v683_v49 = vcvt.s32.f32 %v681_v43  ;;  %v4326_v55 = vsel %vm33_vm4, %v750_v46, 0 }
 0x129   :  { %v702_v53 = vsel %vm701_vm14, 1, %v3912_v10  ;;  %v659_v54 = vcvt.s32.f32 %v657_v45  ;;  %vm796_vm0 = vcmp.le.s32.totalorder %v4229_v13, 13  ;;  %v4330_v59 = vsel %vm33_vm4, %v726_v51, 0 }
 0x12a   :  { %v635_v57 = vcvt.s32.f32 %v633_v50  ;;  %vm772_vm1 = vcmp.le.s32.totalorder %v4229_v13, 12  ;;  %v703_v60 = vsel %vm33_vm4, %v702_v53, 0  ;;  %v753_v61 = vshrl.u32 %v4326_v55, 16  ;;  %vm797_vm8 = vmand %vm4242_vm2, %vm796_vm0 }
 0x12b   :  { %v729_v62 = vshrl.u32 %v4330_v59, 16  ;;  %vm773_vm10 = vmand %vm4242_vm2, %vm772_vm1  ;;  %v705_v63 = vshrl.u32 %v703_v60, 16  ;;  %v798_v0 = vsel %vm797_vm8, 1, %v3912_v10  ;;  %v488_v7 = vand.u32 65535, %v4270_v56 }
 0x12c   :  { %614 = vadd.xlane.f32.xlu2 %v611_v58  ;;  %v755_v1 = vcvt.s32.f32 %v753_v61  ;;  %v774_v2 = vsel %vm773_vm10, 1, %v3912_v10  ;;  %v799_v52 = vsel %vm33_vm4, %v798_v0, 0  ;;  %v560_v44 = vand.u32 65535, %v4290_v31 }
 0x12d   :  { %590 = vadd.xlane.f32.xlu1 %v587_v38  ;;  %v731_v3 = vcvt.s32.f32 %v729_v62  ;;  %v707_v4 = vcvt.s32.f32 %v705_v63  ;;  %v775_v5 = vsel %vm33_vm4, %v774_v2, 0  ;;  %v801_v11 = vshrl.u32 %v799_v52, 16 }
 0x12e   :  { %566 = vadd.xlane.f32.xlu0 %v563_v40  ;;  %v777_v14 = vshrl.u32 %v775_v5, 16  ;;  %v490_v16 = vcvt.s32.f32 %v488_v7  ;;  %v536_v9 = vand.u32 65535, %v4255_v8  ;;  %v512_v20 = vand.u32 65535, %v4263_v21 }
 0x12f   :  { %v803_v17 = vcvt.s32.f32 %v801_v11  ;;  %v562_v23 = vcvt.s32.f32 %v560_v44  ;;  %v632_v56 = vand.u32 65535, %v631_v42  ;;  %v608_v25 = vand.u32 65535, %v4281_v22 }
 0x130   :  { %v779_v18 = vcvt.s32.f32 %v777_v14  ;;  %v538_v24 = vcvt.s32.f32 %v536_v9  ;;  %v514_v15 = vcvt.s32.f32 %v512_v20  ;;  %v584_v26 = vand.u32 65535, %v4286_v30 }
 0x131   :  { %v634_v27 = vcvt.s32.f32 %v632_v56  ;;  %v610_v28 = vcvt.s32.f32 %v608_v25  ;;  %v704_v8 = vand.u32 65535, %v703_v60  ;;  %v680_v21 = vand.u32 65535, %v4306_v39 }
 0x132   :  { %v586_v12 = vcvt.s32.f32 %v584_v26  ;;  %v656_v29 = vand.u32 65535, %v4310_v41  ;;  %vm820_vm11 = vcmp.le.s32.totalorder %v4229_v13, 14  ;;  %v776_v22 = vand.u32 65535, %v775_v5 }
 0x133   :  { %v706_v31 = vcvt.s32.f32 %v704_v8  ;;  %v682_v32 = vcvt.s32.f32 %v680_v21  ;;  %vm821_vm15 = vmand %vm4242_vm2, %vm820_vm11  ;;  %v752_v30 = vand.u32 65535, %v4326_v55  ;;  %v728_v34 = vand.u32 65535, %v4330_v59 }
 0x134   :  { %686 = vadd.xlane.f32.xlu2 %v683_v49  ;;  %v658_v33 = vcvt.s32.f32 %v656_v29  ;;  %v822_v35 = vsel %vm821_vm15, 1, %v3912_v10  ;;  %v778_v36 = vcvt.s32.f32 %v776_v22  ;;  %v800_v41 = vand.u32 65535, %v799_v52 }
 0x135   :  { %662 = vadd.xlane.f32.xlu1 %v659_v54  ;;  %v754_v58 = vcvt.s32.f32 %v752_v30  ;;  %v823_v37 = vsel %vm33_vm4, %v822_v35, 0  ;;  %v730_v38 = vcvt.s32.f32 %v728_v34 }
 0x136   :  { %638 = vadd.xlane.f32.xlu0 %v635_v57  ;;  %v824_v39 = vand.u32 65535, %v823_v37  ;;  %v825_v40 = vshrl.u32 %v823_v37, 16  ;;  %v802_v45 = vcvt.s32.f32 %v800_v41 }
 0x138   :  { %v826_v42 = vcvt.s32.f32 %v824_v39  ;;  %v827_v43 = vcvt.s32.f32 %v825_v40 }
 0x13c   :  { %758 = vadd.xlane.f32.xlu2 %v755_v1 }
 0x13d   :  { %734 = vadd.xlane.f32.xlu1 %v731_v3 }
 0x13e   :  { %710 = vadd.xlane.f32.xlu0 %v707_v4 }
 0x144   :  { %492 = vadd.xlane.f32.xlu2 %v490_v16 }
 0x145   :  { %806 = vadd.xlane.f32.xlu1 %v803_v17 }
 0x146   :  { %782 = vadd.xlane.f32.xlu0 %v779_v18 }
 0x14c   :  { %564 = vadd.xlane.f32.xlu2 %v562_v23 }
 0x14d   :  { %540 = vadd.xlane.f32.xlu1 %v538_v24 }
 0x14e   :  { %516 = vadd.xlane.f32.xlu0 %v514_v15 }
 0x154   :  { %636 = vadd.xlane.f32.xlu2 %v634_v27 }
 0x155   :  { %612 = vadd.xlane.f32.xlu1 %v610_v28 }
 0x156   :  { %588 = vadd.xlane.f32.xlu0 %v586_v12 }
 0x15c   :  { %708 = vadd.xlane.f32.xlu2 %v706_v31 }
 0x15d   :  { %684 = vadd.xlane.f32.xlu1 %v682_v32 }
 0x15e   :  { %660 = vadd.xlane.f32.xlu0 %v658_v33 }
 0x164   :  { %780 = vadd.xlane.f32.xlu2 %v778_v36 }
 0x165   :  { %756 = vadd.xlane.f32.xlu1 %v754_v58 }
 0x166   :  { %732 = vadd.xlane.f32.xlu0 %v730_v38 }
 0x16c   :  { %828 = vadd.xlane.f32.xlu2 %v826_v42 }
 0x16d   :  { %830 = vadd.xlane.f32.xlu1 %v827_v43 }
 0x16e   :  { %804 = vadd.xlane.f32.xlu0 %v802_v45 }
 0x197   :  { %v543_v50 = vpop.xlane.xlu2 %542 }
 0x198   :  { %v519_v46 = vpop.xlane.xlu1 %518  ;;  %v545_v11 = vcvt.f32.s32 %v543_v50 }
 0x199   :  { %v495_v51 = vpop.xlane.xlu0 %494  ;;  %v521_v14 = vcvt.f32.s32 %v519_v46 }
 0x19a   :  { %v497_v63 = vcvt.f32.s32 %v495_v51  ;;  %v546_v23 = vshll.u32 %v545_v11, 16 }
 0x19b   :  { %v522_v56 = vshll.u32 %v521_v14, 16 }
 0x19c   :  { %v498_v1 = vshll.u32 %v497_v63, 16 }
 0x19f   :  { %v615_v49 = vpop.xlane.xlu2 %614 }
 0x1a0   :  { %v591_v53 = vpop.xlane.xlu1 %590  ;;  %v617_v31 = vcvt.f32.s32 %v615_v49 }
 0x1a1   :  { %v567_v54 = vpop.xlane.xlu0 %566  ;;  %v593_v32 = vcvt.f32.s32 %v591_v53 }
 0x1a2   :  { %v569_v5 = vcvt.f32.s32 %v567_v54  ;;  %v618_v41 = vshll.u32 %v617_v31, 16 }
 0x1a3   :  { %v594_v42 = vshll.u32 %v593_v32, 16 }
 0x1a4   :  { %v570_v18 = vshll.u32 %v569_v5, 16 }
 0x1a7   :  { %v4359_v55 = vpop.xlane.xlu2 %686 }
 0x1a8   :  { %v4361_v57 = vpop.xlane.xlu1 %662  ;;  %v689_v5 = vcvt.f32.s32 %v4359_v55 }
 0x1a9   :  { %v639_v59 = vpop.xlane.xlu0 %638 }
 0x1aa   :  { %v641_v12 = vcvt.f32.s32 %v639_v59 }
 0x1ac   :  { %v642_v58 = vshll.u32 %v641_v12, 16 }
 0x1af   :  { %v4363_v60 = vpop.xlane.xlu2 %758 }
 0x1b0   :  { %v4365_v61 = vpop.xlane.xlu1 %734 }
 0x1b1   :  { %v4367_v62 = vpop.xlane.xlu0 %710 }
 0x1b2   :  { %v713_v54 = vcvt.f32.s32 %v4367_v62 }
 0x1b7   :  { %v493_v0 = vpop.xlane.xlu2 %492 }
 0x1b8   :  { %v4369_v2 = vpop.xlane.xlu1 %806  ;;  %v496_v3 = vcvt.f32.s32 %v493_v0 }
 0x1b9   :  { %v4371_v4 = vpop.xlane.xlu0 %782 }
 0x1ba   :  { %v499_v52 = vadd.s32 %v498_v1, %v496_v3  ;;  %v785_v32 = vcvt.f32.s32 %v4371_v4 }
 0x1bc   :  { %v500_v7 = vrot.slane %v499_v52, 4 }
 0x1be   :  { %v501_v16 = vadd.s32 %v500_v7, %v499_v52  ;;  %v665_v7 = vcvt.f32.s32 %v4361_v57 }
 0x1bf   :  { %v565_v17 = vpop.xlane.xlu2 %564 }
 0x1c0   :  { %v541_v44 = vpop.xlane.xlu1 %540  ;;  %v568_v9 = vcvt.f32.s32 %v565_v17  ;;  %v502_v20 = vrot.slane %v501_v16, 2 }
 0x1c1   :  { %v544_v24 = vcvt.f32.s32 %v541_v44  ;;  %v517_v15 = vpop.xlane.xlu0 %516  ;;  %v714_v44 = vshll.u32 %v713_v54, 16 }
 0x1c2   :  { %v520_v25 = vcvt.f32.s32 %v517_v15  ;;  %v571_v26 = vadd.s32 %v570_v18, %v568_v9  ;;  %v503_v27 = vadd.s32 %v502_v20, %v501_v16 }
 0x1c3   :  { %v547_v28 = vadd.s32 %v546_v23, %v544_v24 }
 0x1c4   :  { %v523_v8 = vadd.s32 %v522_v56, %v520_v25  ;;  %v572_v21 = vrot.slane %v571_v26, 4  ;;  %v504_v29 = vrot.slane %v503_v27, 1 }
 0x1c5   :  { %v548_v33 = vrot.slane %v547_v28, 4 }
 0x1c6   :  { %v524_v22 = vrot.slane %v523_v8, 4  ;;  %v505_v30 = vadd.s32 %v504_v29, %v503_v27  ;;  %v573_v34 = vadd.s32 %v572_v21, %v571_v26  ;;  %v690_v27 = vshll.u32 %v689_v5, 16 }
 0x1c7   :  { %v637_v35 = vpop.xlane.xlu2 %636  ;;  %v549_v36 = vadd.s32 %v548_v33, %v547_v28  ;;  %v666_v28 = vshll.u32 %v665_v7, 16 }
 0x1c8   :  { %v613_v37 = vpop.xlane.xlu1 %612  ;;  %v640_v38 = vcvt.f32.s32 %v637_v35  ;;  %3673 = vpush %v505_v30  ;;  %v525_v39 = vadd.s32 %v524_v22, %v523_v8  ;;  %v574_v40 = vrot.slane %v573_v34, 2 }
 0x1c9   :  { %v616_v43 = vcvt.f32.s32 %v613_v37  ;;  %v589_v45 = vpop.xlane.xlu0 %588  ;;  %v550_v50 = vrot.slane %v549_v36, 2  ;;  %v737_v37 = vcvt.f32.s32 %v4365_v61 }
 0x1ca   :  { %v592_v46 = vcvt.f32.s32 %v589_v45  ;;  %v643_v51 = vadd.s32 %v642_v58, %v640_v38  ;;  %v526_v49 = vrot.slane %v525_v39, 2  ;;  %v575_v53 = vadd.s32 %v574_v40, %v573_v34 }
 0x1cb   :  { %v619_v59 = vadd.s32 %v618_v41, %v616_v43  ;;  %v551_v63 = vadd.s32 %v550_v50, %v549_v36  ;;  %v761_v58 = vcvt.f32.s32 %v4363_v60  ;;  %v786_v43 = vshll.u32 %v785_v32, 16 }
 0x1cc   :  { %v595_v0 = vadd.s32 %v594_v42, %v592_v46  ;;  %v644_v1 = vrot.slane %v643_v51, 4  ;;  %v527_v3 = vadd.s32 %v526_v49, %v525_v39  ;;  %v576_v52 = vrot.slane %v575_v53, 1 }
 0x1cd   :  { %v620_v11 = vrot.slane %v619_v59, 4  ;;  %v552_v14 = vrot.slane %v551_v63, 1 }
 0x1ce   :  { %v596_v16 = vrot.slane %v595_v0, 4  ;;  %v528_v17 = vrot.slane %v527_v3, 1  ;;  %v645_v18 = vadd.s32 %v644_v1, %v643_v51  ;;  %v577_v23 = vadd.s32 %v576_v52, %v575_v53 }
 0x1cf   :  { %v709_v9 = vpop.xlane.xlu2 %708  ;;  %v553_v20 = vadd.s32 %v552_v14, %v551_v63  ;;  %v621_v62 = vadd.s32 %v620_v11, %v619_v59  ;;  %v762_v63 = vshll.u32 %v761_v58, 16 }
 0x1d0   :  { %v685_v24 = vpop.xlane.xlu1 %684  ;;  %v712_v15 = vcvt.f32.s32 %v709_v9  ;;  %v529_v56 = vadd.s32 %v528_v17, %v527_v3  ;;  %v597_v25 = vadd.s32 %v596_v16, %v595_v0  ;;  %v646_v26 = vrot.slane %v645_v18, 2 }
 0x1d1   :  { %v688_v55 = vcvt.f32.s32 %v685_v24  ;;  %v661_v12 = vpop.xlane.xlu0 %660  ;;  %v622_v57 = vrot.slane %v621_v62, 2  ;;  %v738_v0 = vshll.u32 %v737_v37, 16 }
 0x1d2   :  { %v664_v8 = vcvt.f32.s32 %v661_v12  ;;  %v715_v21 = vadd.s32 %v714_v44, %v712_v15  ;;  %3675 = vpush %v529_v56  ;;  %v598_v29 = vrot.slane %v597_v25, 2  ;;  %v647_v31 = vadd.s32 %v646_v26, %v645_v18 }
 0x1d3   :  { %v691_v33 = vadd.s32 %v690_v27, %v688_v55  ;;  %3677 = vpush %v553_v20  ;;  %v623_v22 = vadd.s32 %v622_v57, %v621_v62 }
 0x1d4   :  { %v667_v30 = vadd.s32 %v666_v28, %v664_v8  ;;  %v716_v34 = vrot.slane %v715_v21, 4  ;;  %3679 = vpush %v577_v23  ;;  %v599_v35 = vadd.s32 %v598_v29, %v597_v25  ;;  %v648_v36 = vrot.slane %v647_v31, 1 }
 0x1d5   :  { %v692_v38 = vrot.slane %v691_v33, 4  ;;  %v624_v39 = vrot.slane %v623_v22, 1  ;;  %v809_v23 = vcvt.f32.s32 %v4369_v2 }
 0x1d6   :  { %v668_v40 = vrot.slane %v667_v30, 4  ;;  %v600_v41 = vrot.slane %v599_v35, 1  ;;  %v717_v42 = vadd.s32 %v716_v34, %v715_v21  ;;  %v649_v50 = vadd.s32 %v648_v36, %v647_v31 }
 0x1d7   :  { %v781_v45 = vpop.xlane.xlu2 %780  ;;  %v625_v4 = vadd.s32 %v624_v39, %v623_v22  ;;  %v693_v46 = vadd.s32 %v692_v38, %v691_v33  ;;  %v810_v31 = vshll.u32 %v809_v23, 16 }
 0x1d8   :  { %v757_v51 = vpop.xlane.xlu1 %756  ;;  %v784_v49 = vcvt.f32.s32 %v781_v45  ;;  %v601_v53 = vadd.s32 %v600_v41, %v599_v35  ;;  %v669_v54 = vadd.s32 %v668_v40, %v667_v30  ;;  %v718_v59 = vrot.slane %v717_v42, 2 }
 0x1d9   :  { %v760_v60 = vcvt.f32.s32 %v757_v51  ;;  %v733_v1 = vpop.xlane.xlu0 %732  ;;  %v694_v61 = vrot.slane %v693_v46, 2 }
 0x1da   :  { %v736_v3 = vcvt.f32.s32 %v733_v1  ;;  %v787_v52 = vadd.s32 %v786_v43, %v784_v49  ;;  %3681 = vpush %v601_v53  ;;  %v670_v5 = vrot.slane %v669_v54, 2  ;;  %v719_v7 = vadd.s32 %v718_v59, %v717_v42 }
 0x1db   :  { %v763_v11 = vadd.s32 %v762_v63, %v760_v60  ;;  %3683 = vpush %v625_v4  ;;  %v695_v14 = vadd.s32 %v694_v61, %v693_v46 }
 0x1dc   :  { %v739_v16 = vadd.s32 %v738_v0, %v736_v3  ;;  %v788_v17 = vrot.slane %v787_v52, 4  ;;  %3685 = vpush %v649_v50  ;;  %v671_v18 = vadd.s32 %v670_v5, %v669_v54  ;;  %v720_v44 = vrot.slane %v719_v7, 1 }
 0x1dd   :  { %v764_v9 = vrot.slane %v763_v11, 4  ;;  %v696_v20 = vrot.slane %v695_v14, 1 }
 0x1de   :  { %v740_v62 = vrot.slane %v739_v16, 4  ;;  %v672_v24 = vrot.slane %v671_v18, 1  ;;  %v789_v15 = vadd.s32 %v788_v17, %v787_v52  ;;  %v721_v55 = vadd.s32 %v720_v44, %v719_v7 }
 0x1df   :  { %v697_v56 = vadd.s32 %v696_v20, %v695_v14  ;;  %v765_v25 = vadd.s32 %v764_v9, %v763_v11  ;;  %v829_v27 = vpop.xlane.xlu2 %828 }
 0x1e0   :  { %v831_v26 = vpop.xlane.xlu1 %830  ;;  %v673_v28 = vadd.s32 %v672_v24, %v671_v18  ;;  %v741_v12 = vadd.s32 %v740_v62, %v739_v16  ;;  %v790_v57 = vrot.slane %v789_v15, 2  ;;  %v832_v30 = vcvt.f32.s32 %v829_v27 }
 0x1e1   :  { %v833_v8 = vcvt.f32.s32 %v831_v26  ;;  %v805_v21 = vpop.xlane.xlu0 %804  ;;  %v766_v29 = vrot.slane %v765_v25, 2 }
 0x1e2   :  { %v808_v32 = vcvt.f32.s32 %v805_v21  ;;  %3687 = vpush %v673_v28  ;;  %v742_v33 = vrot.slane %v741_v12, 2  ;;  %v791_v22 = vadd.s32 %v790_v57, %v789_v15 }
 0x1e3   :  { %v834_v2 = vshll.u32 %v833_v8, 16  ;;  %3689 = vpush %v697_v56  ;;  %v767_v34 = vadd.s32 %v766_v29, %v765_v25  ;;  %v479_v29 = vshll.u32 %v4231_v47, 28 }
 0x1e4   :  { %v811_v35 = vadd.s32 %v810_v31, %v808_v32  ;;  %3691 = vpush %v721_v55  ;;  %v743_v36 = vadd.s32 %v742_v33, %v741_v12  ;;  %v792_v58 = vrot.slane %v791_v22, 1 }
 0x1e5   :  { %v835_v37 = vadd.s32 %v834_v2, %v832_v30  ;;  %v768_v38 = vrot.slane %v767_v34, 1 }
 0x1e6   :  { %v812_v39 = vrot.slane %v811_v35, 4  ;;  %v744_v40 = vrot.slane %v743_v36, 1  ;;  %v793_v45 = vadd.s32 %v792_v58, %v791_v22 }
 0x1e7   :  { %v836_v41 = vrot.slane %v835_v37, 4  ;;  %v769_v42 = vadd.s32 %v768_v38, %v767_v34 }
 0x1e8   :  { %v745_v43 = vadd.s32 %v744_v40, %v743_v36  ;;  %v813_v4 = vadd.s32 %v812_v39, %v811_v35 }
 0x1e9   :  { %v837_v50 = vadd.s32 %v836_v41, %v835_v37 }
 0x1ea   :  { %3693 = vpush %v745_v43  ;;  %v814_v46 = vrot.slane %v813_v4, 2 }
 0x1eb   :  { %3695 = vpush %v769_v42  ;;  %v838_v51 = vrot.slane %v837_v50, 2 }
 0x1ec   :  { %3697 = vpush %v793_v45  ;;  %v815_v49 = vadd.s32 %v814_v46, %v813_v4 }
 0x1ed   :  { %v839_v53 = vadd.s32 %v838_v51, %v837_v50 }
 0x1ee   :  { %v816_v54 = vrot.slane %v815_v49, 1 }
 0x1ef   :  { %v840_v59 = vrot.slane %v839_v53, 1 }
 0x1f0   :  { %v817_v63 = vadd.s32 %v816_v54, %v815_v49 }
 0x1f1   :  { %v841_v0 = vadd.s32 %v840_v59, %v839_v53 }
 0x1f2   :  { %3699 = vpush %v817_v63 }
 0x1f3   :  { %3701 = vpush %v841_v0 }
 0x1f9   :  { %s3674_s30 = spop %3673 }
 0x1fa   :  { %v507_v60 = vstv %s3674_s30 }
 0x1fb   :  { %vm4381_vm5 = vcmp.lt.s32.totalorder %v507_v60, %v4235_v48 }
 0x1fc   :  { %v888_v61 = vsel %vm4381_vm5, %v507_v60, 0  ;;  %v859_v35 = vsel %vm4381_vm5, 1, %v3912_v10 }
 0x203   :  { %s3676_s4 = spop %3675 }
 0x204   :  { %v531_v3 = vstv %s3676_s4  ;;  %s3678_s5 = spop %3677 }
 0x205   :  { %vm4388_vm12 = vcmp.lt.s32.totalorder %v531_v3, %v4235_v48  ;;  %v555_v5 = vstv %s3678_s5  ;;  %s3680_s6 = spop %3679 }
 0x206   :  { %v889_v7 = vsel %vm4388_vm12, %v531_v3, 0  ;;  %vm4395_vm13 = vcmp.lt.s32.totalorder %v555_v5, %v4235_v48  ;;  %v579_v14 = vstv %s3680_s6  ;;  %v860_v4 = vsel %vm4388_vm12, 1, %v3912_v10 }
 0x207   :  { %vm903_vm6 = vcmp.gt.s32.totalorder %v888_v61, %v889_v7  ;;  %v890_v16 = vsel %vm4395_vm13, %v555_v5, 0  ;;  %vm4402_vm7 = vcmp.lt.s32.totalorder %v579_v14, %v4235_v48  ;;  %v861_v49 = vsel %vm4395_vm13, 1, %v3912_v10 }
 0x208   :  { %v904_v17 = vsel %vm903_vm6, %v888_v61, %v889_v7  ;;  %v891_v44 = vsel %vm4402_vm7, %v579_v14, 0  ;;  %v862_v59 = vsel %vm4402_vm7, 1, %v3912_v10  ;;  %v874_v52 = vadd.s32 %v860_v4, %v859_v35 }
 0x209   :  { %vm905_vm3 = vcmp.gt.s32.totalorder %v890_v16, %v891_v44  ;;  %v875_v7 = vadd.s32 %v862_v59, %v861_v49 }
 0x20a   :  { %v906_v9 = vsel %vm905_vm3, %v890_v16, %v891_v44  ;;  %v936_v16 = vshra.s32 %v3937_v6, 20 }
 0x20b   :  { %s3682_s7 = spop %3681  ;;  %vm917_vm9 = vcmp.gt.s32.totalorder %v904_v17, %v906_v9 }
 0x20c   :  { %v603_v20 = vstv %s3682_s7  ;;  %s3684_s8 = spop %3683  ;;  %v918_v23 = vsel %vm917_vm9, %v904_v17, %v906_v9 }
 0x20d   :  { %vm4409_vm14 = vcmp.lt.s32.totalorder %v603_v20, %v4235_v48  ;;  %v627_v24 = vstv %s3684_s8  ;;  %s3686_s9 = spop %3685 }
 0x20e   :  { %v892_v15 = vsel %vm4409_vm14, %v603_v20, 0  ;;  %vm4416_vm0 = vcmp.lt.s32.totalorder %v627_v24, %v4235_v48  ;;  %v651_v25 = vstv %s3686_s9  ;;  %v863_v37 = vsel %vm4409_vm14, 1, %v3912_v10 }
 0x20f   :  { %v893_v26 = vsel %vm4416_vm0, %v627_v24, 0  ;;  %vm4423_vm1 = vcmp.lt.s32.totalorder %v651_v25, %v4235_v48  ;;  %v864_v41 = vsel %vm4416_vm0, 1, %v3912_v10 }
 0x210   :  { %vm907_vm8 = vcmp.gt.s32.totalorder %v892_v15, %v893_v26  ;;  %v894_v28 = vsel %vm4423_vm1, %v651_v25, 0  ;;  %v865_v50 = vsel %vm4423_vm1, 1, %v3912_v10  ;;  %v876_v63 = vadd.s32 %v864_v41, %v863_v37 }
 0x211   :  { %v908_v55 = vsel %vm907_vm8, %v892_v15, %v893_v26  ;;  %v881_v25 = vadd.s32 %v875_v7, %v874_v52 }
 0x213   :  { %s3688_s10 = spop %3687 }
 0x214   :  { %v675_v12 = vstv %s3688_s10  ;;  %s3690_s11 = spop %3689 }
 0x215   :  { %vm4430_vm10 = vcmp.lt.s32.totalorder %v675_v12, %v4235_v48  ;;  %v699_v8 = vstv %s3690_s11  ;;  %s3692_s12 = spop %3691 }
 0x216   :  { %v895_v21 = vsel %vm4430_vm10, %v675_v12, 0  ;;  %vm4437_vm11 = vcmp.lt.s32.totalorder %v699_v8, %v4235_v48  ;;  %v723_v31 = vstv %s3692_s12  ;;  %v866_v38 = vsel %vm4430_vm10, 1, %v3912_v10 }
 0x217   :  { %vm909_vm15 = vcmp.gt.s32.totalorder %v894_v28, %v895_v21  ;;  %v896_v32 = vsel %vm4437_vm11, %v699_v8, 0  ;;  %vm4444_vm6 = vcmp.lt.s32.totalorder %v723_v31, %v4235_v48  ;;  %v877_v53 = vadd.s32 %v866_v38, %v865_v50 }
 0x218   :  { %v910_v33 = vsel %vm909_vm15, %v894_v28, %v895_v21  ;;  %v897_v2 = vsel %vm4444_vm6, %v723_v31, 0  ;;  %v867_v0 = vsel %vm4437_vm11, 1, %v3912_v10  ;;  %v868_v1 = vsel %vm4444_vm6, 1, %v3912_v10 }
 0x219   :  { %vm919_vm3 = vcmp.gt.s32.totalorder %v908_v55, %v910_v33  ;;  %vm911_vm9 = vcmp.gt.s32.totalorder %v896_v32, %v897_v2  ;;  %v882_v11 = vadd.s32 %v877_v53, %v876_v63  ;;  %v878_v17 = vadd.s32 %v868_v1, %v867_v0 }
 0x21a   :  { %v920_v30 = vsel %vm919_vm3, %v908_v55, %v910_v33  ;;  %v912_v34 = vsel %vm911_vm9, %v896_v32, %v897_v2  ;;  %v4515_v55 = vand.u32 15, %v936_v16 }
 0x21b   :  { %vm925_vm8 = vcmp.gt.s32.totalorder %v918_v23, %v920_v30  ;;  %s3694_s13 = spop %3693  ;;  %v885_v12 = vadd.s32 %v882_v11, %v881_v25 }
 0x21c   :  { %v747_v36 = vstv %s3694_s13  ;;  %s3696_s14 = spop %3695  ;;  %v926_v58 = vsel %vm925_vm8, %v918_v23, %v920_v30  ;;  %vm986_vm3 = vcmp.le.s32.totalorder %v4515_v55, 2  ;;  %vm962_vm8 = vcmp.le.s32.totalorder %v4515_v55, 1 }
 0x21d   :  { %vm4460_vm15 = vcmp.lt.s32.totalorder %v747_v36, %v4235_v48  ;;  %v771_v40 = vstv %s3696_s14  ;;  %s3698_s15 = spop %3697 }
 0x21e   :  { %v898_v42 = vsel %vm4460_vm15, %v747_v36, 0  ;;  %vm4470_vm5 = vcmp.lt.s32.totalorder %v771_v40, %v4235_v48  ;;  %v795_v45 = vstv %s3698_s15  ;;  %v869_v61 = vsel %vm4460_vm15, 1, %v3912_v10 }
 0x21f   :  { %v899_v46 = vsel %vm4470_vm5, %v771_v40, 0  ;;  %vm4483_vm14 = vcmp.lt.s32.totalorder %v795_v45, %v4235_v48  ;;  %v870_v3 = vsel %vm4470_vm5, 1, %v3912_v10  ;;  %vm938_vm5 = vcmp.le.s32.totalorder %v4515_v55, 0 }
 0x220   :  { %vm913_vm0 = vcmp.gt.s32.totalorder %v898_v42, %v899_v46  ;;  %v900_v54 = vsel %vm4483_vm14, %v795_v45, 0  ;;  %v879_v18 = vadd.s32 %v870_v3, %v869_v61  ;;  %v871_v9 = vsel %vm4483_vm14, 1, %v3912_v10 }
 0x221   :  { %v914_v60 = vsel %vm913_vm0, %v898_v42, %v899_v46  ;;  %vm1058_vm0 = vcmp.le.s32.totalorder %v4515_v55, 5 }
 0x222   :  { %vm921_vm12 = vcmp.gt.s32.totalorder %v912_v34, %v914_v60  ;;  %v883_v26 = vadd.s32 %v879_v18, %v878_v17 }
 0x223   :  { %s3700_s16 = spop %3699  ;;  %v922_v5 = vsel %vm921_vm12, %v912_v34, %v914_v60 }
 0x224   :  { %v819_v14 = vstv %s3700_s16  ;;  %s3702_s17 = spop %3701 }
 0x225   :  { %vm857_vm13 = vcmp.lt.s32.totalorder %v819_v14, %v4235_v48  ;;  %v843_v44 = vstv %s3702_s17 }
 0x226   :  { %v872_v20 = vsel %vm857_vm13, 1, %v3912_v10  ;;  %v901_v23 = vsel %vm857_vm13, %v819_v14, 0  ;;  %vm858_vm7 = vcmp.lt.s32.totalorder %v843_v44, %v4235_v48  ;;  %vm1034_vm13 = vcmp.le.s32.totalorder %v4515_v55, 4 }
 0x227   :  { %v880_v62 = vadd.s32 %v872_v20, %v871_v9  ;;  %vm915_vm1 = vcmp.gt.s32.totalorder %v900_v54, %v901_v23  ;;  %v873_v24 = vsel %vm858_vm7, 1, %v3912_v10  ;;  %v902_v15 = vsel %vm858_vm7, %v843_v44, 0 }
 0x228   :  { %v916_v56 = vsel %vm915_vm1, %v900_v54, %v901_v23  ;;  %vm1010_vm7 = vcmp.le.s32.totalorder %v4515_v55, 3 }
 0x229   :  { %v884_v27 = vadd.s32 %v880_v62, %v873_v24  ;;  %vm923_vm10 = vcmp.gt.s32.totalorder %v916_v56, %v902_v15 }
 0x22a   :  { %v924_v28 = vsel %vm923_vm10, %v916_v56, %v902_v15 }
 0x22b   :  { %v886_v57 = vadd.s32 %v884_v27, %v883_v26  ;;  %vm927_vm11 = vcmp.gt.s32.totalorder %v922_v5, %v924_v28 }
 0x22c   :  { %v928_v8 = vsel %vm927_vm11, %v922_v5, %v924_v28 }
 0x22d   :  { %v887_v21 = vadd.s32 %v886_v57, %v885_v12  ;;  %vm929_vm6 = vcmp.gt.s32.totalorder %v926_v58, %v928_v8 }
 0x22e   :  { %v930_v31 = vsel %vm929_vm6, %v926_v58, %v928_v8  ;;  %vm1130_vm6 = vcmp.le.s32.totalorder %v4515_v55, 8 }
 0x22f   :  { %v4520_v32 = vsub.s32 %v4235_v48, %v930_v31  ;;  %v932_v33 = vshll.u32 %v887_v21, 24  ;;  %vm934_vm9 = vcmp.eq.s32.totalorder %v4229_v13, %v887_v21 }
 0x230   :  { %vm4526_vm15 = vmand %vm4242_vm2, %vm934_vm9  ;;  %vm1082_vm9 = vcmp.le.s32.totalorder %v4515_v55, 6 }
 0x231   :  { %v4531_v47 = vor.u32 %v932_v33, %v479_v29  ;;  %vm987_vm14 = vmand %vm4526_vm15, %vm986_vm3  ;;  %vm1106_vm3 = vcmp.le.s32.totalorder %v4515_v55, 7 }
 0x232   :  { %v988_v48 = vsel %vm987_vm14, 1, %v3912_v10  ;;  %vm963_vm12 = vmand %vm4526_vm15, %vm962_vm8 }
 0x233   :  { %v4541_v13 = vsel %vm33_vm4, %v988_v48, 0  ;;  %v964_v19 = vsel %vm963_vm12, 1, %v3912_v10  ;;  %vm939_vm2 = vmand %vm4526_vm15, %vm938_vm5  ;;  %vm1178_vm12 = vcmp.le.s32.totalorder %v4515_v55, 10 }
 0x234   :  { %v991_v2 = vshrl.u32 %v4541_v13, 16  ;;  %v4549_v30 = vsel %vm33_vm4, %v964_v19, 0  ;;  %v940_v34 = vsel %vm939_vm2, 1, %v3912_v10  ;;  %vm1059_vm1 = vmand %vm4526_vm15, %vm1058_vm0  ;;  %vm1202_vm0 = vcmp.le.s32.totalorder %v4515_v55, 11 }
 0x235   :  { %v967_v35 = vshrl.u32 %v4549_v30, 16  ;;  %v4556_v36 = vsel %vm33_vm4, %v940_v34, 0  ;;  %v1060_v58 = vsel %vm1059_vm1, 1, %v3912_v10  ;;  %vm1035_vm10 = vmand %vm4526_vm15, %vm1034_vm13  ;;  %vm1154_vm13 = vcmp.le.s32.totalorder %v4515_v55, 9 }
 0x236   :  { %v993_v37 = vcvt.s32.f32 %v991_v2  ;;  %v943_v38 = vshrl.u32 %v4556_v36, 16  ;;  %v1036_v39 = vsel %vm1035_vm10, 1, %v3912_v10  ;;  %vm1011_vm11 = vmand %vm4526_vm15, %vm1010_vm7  ;;  %v4567_v41 = vsel %vm33_vm4, %v1060_v58, 0 }
 0x237   :  { %v969_v40 = vcvt.s32.f32 %v967_v35  ;;  %v1012_v42 = vsel %vm1011_vm11, 1, %v3912_v10  ;;  %v4572_v45 = vsel %vm33_vm4, %v1036_v39, 0  ;;  %vm1131_vm8 = vmand %vm4526_vm15, %vm1130_vm6  ;;  %v1063_v50 = vshrl.u32 %v4567_v41, 16 }
 0x238   :  { %996 = vadd.xlane.f32.xlu2 %v993_v37  ;;  %v945_v43 = vcvt.s32.f32 %v943_v38  ;;  %v4576_v4 = vsel %vm33_vm4, %v1012_v42, 0  ;;  %vm1107_vm5 = vmand %vm4526_vm15, %vm1106_vm3  ;;  %v1039_v46 = vshrl.u32 %v4572_v45, 16  ;;  %v1132_v49 = vsel %vm1131_vm8, 1, %v3912_v10 }
 0x239   :  { %972 = vadd.xlane.f32.xlu1 %v969_v40  ;;  %vm1083_vm14 = vmand %vm4526_vm15, %vm1082_vm9  ;;  %v1015_v51 = vshrl.u32 %v4576_v4, 16  ;;  %v1108_v53 = vsel %vm1107_vm5, 1, %v3912_v10  ;;  %v1065_v54 = vcvt.s32.f32 %v1063_v50  ;;  %v4592_v0 = vsel %vm33_vm4, %v1132_v49, 0 }
 0x23a   :  { %948 = vadd.xlane.f32.xlu0 %v945_v43  ;;  %v1084_v59 = vsel %vm1083_vm14, 1, %v3912_v10  ;;  %v1041_v63 = vcvt.s32.f32 %v1039_v46  ;;  %v4596_v1 = vsel %vm33_vm4, %v1108_v53, 0  ;;  %vm1203_vm2 = vmand %vm4526_vm15, %vm1202_vm0  ;;  %v1135_v3 = vshrl.u32 %v4592_v0, 16 }
 0x23b   :  { %v1017_v60 = vcvt.s32.f32 %v1015_v51  ;;  %v1085_v61 = vsel %vm33_vm4, %v1084_v59, 0  ;;  %vm1179_vm7 = vmand %vm4526_vm15, %vm1178_vm12  ;;  %v1111_v52 = vshrl.u32 %v4596_v1, 16  ;;  %v1204_v7 = vsel %vm1203_vm2, 1, %v3912_v10 }
 0x23c   :  { %vm1155_vm1 = vmand %vm4526_vm15, %vm1154_vm13  ;;  %v1087_v5 = vshrl.u32 %v1085_v61, 16  ;;  %v1180_v11 = vsel %vm1179_vm7, 1, %v3912_v10  ;;  %v1137_v14 = vcvt.s32.f32 %v1135_v3  ;;  %v4612_v18 = vsel %vm33_vm4, %v1204_v7, 0 }
 0x23d   :  { %v1156_v16 = vsel %vm1155_vm1, 1, %v3912_v10  ;;  %v1113_v17 = vcvt.s32.f32 %v1111_v52  ;;  %vm1250_vm10 = vcmp.le.s32.totalorder %v4515_v55, 13  ;;  %v4616_v9 = vsel %vm33_vm4, %v1180_v11, 0 }
 0x23e   :  { %v1089_v44 = vcvt.s32.f32 %v1087_v5  ;;  %vm1226_vm11 = vcmp.le.s32.totalorder %v4515_v55, 12  ;;  %v1157_v20 = vsel %vm33_vm4, %v1156_v16, 0  ;;  %v1207_v23 = vshrl.u32 %v4612_v18, 16  ;;  %vm1251_vm6 = vmand %vm4526_vm15, %vm1250_vm10 }
 0x23f   :  { %v1183_v62 = vshrl.u32 %v4616_v9, 16  ;;  %vm1227_vm3 = vmand %vm4526_vm15, %vm1226_vm11  ;;  %v1159_v24 = vshrl.u32 %v1157_v20, 16  ;;  %v1252_v15 = vsel %vm1251_vm6, 1, %v3912_v10  ;;  %v942_v57 = vand.u32 65535, %v4556_v36 }
 0x240   :  { %1068 = vadd.xlane.f32.xlu2 %v1065_v54  ;;  %v1209_v56 = vcvt.s32.f32 %v1207_v23  ;;  %v1228_v25 = vsel %vm1227_vm3, 1, %v3912_v10  ;;  %v1253_v28 = vsel %vm33_vm4, %v1252_v15, 0  ;;  %v1014_v48 = vand.u32 65535, %v4576_v4 }
 0x241   :  { %1044 = vadd.xlane.f32.xlu1 %v1041_v63  ;;  %v1185_v26 = vcvt.s32.f32 %v1183_v62  ;;  %v1161_v27 = vcvt.s32.f32 %v1159_v24  ;;  %v1229_v12 = vsel %vm33_vm4, %v1228_v25, 0  ;;  %v1255_v8 = vshrl.u32 %v1253_v28, 16 }
 0x242   :  { %1020 = vadd.xlane.f32.xlu0 %v1017_v60  ;;  %v1231_v21 = vshrl.u32 %v1229_v12, 16  ;;  %v944_v29 = vcvt.s32.f32 %v942_v57  ;;  %v990_v19 = vand.u32 65535, %v4541_v13  ;;  %v966_v2 = vand.u32 65535, %v4549_v30 }
 0x243   :  { %v1257_v31 = vcvt.s32.f32 %v1255_v8  ;;  %v1016_v34 = vcvt.s32.f32 %v1014_v48  ;;  %v1086_v36 = vand.u32 65535, %v1085_v61  ;;  %v1062_v37 = vand.u32 65535, %v4567_v41 }
 0x244   :  { %v1233_v33 = vcvt.s32.f32 %v1231_v21  ;;  %v992_v35 = vcvt.s32.f32 %v990_v19  ;;  %v968_v58 = vcvt.s32.f32 %v966_v2  ;;  %v1038_v38 = vand.u32 65535, %v4572_v45 }
 0x245   :  { %v1088_v39 = vcvt.s32.f32 %v1086_v36  ;;  %v1064_v40 = vcvt.s32.f32 %v1062_v37  ;;  %v1158_v13 = vand.u32 65535, %v1157_v20  ;;  %v1134_v30 = vand.u32 65535, %v4592_v0 }
 0x246   :  { %v1040_v42 = vcvt.s32.f32 %v1038_v38  ;;  %v1110_v43 = vand.u32 65535, %v4596_v1  ;;  %vm1274_vm9 = vcmp.le.s32.totalorder %v4515_v55, 14  ;;  %v1230_v41 = vand.u32 65535, %v1229_v12 }
 0x247   :  { %v1160_v4 = vcvt.s32.f32 %v1158_v13  ;;  %v1136_v50 = vcvt.s32.f32 %v1134_v30  ;;  %vm1275_vm8 = vmand %vm4526_vm15, %vm1274_vm9  ;;  %v1206_v45 = vand.u32 65535, %v4612_v18  ;;  %v1182_v51 = vand.u32 65535, %v4616_v9 }
 0x248   :  { %1140 = vadd.xlane.f32.xlu2 %v1137_v14  ;;  %v1112_v46 = vcvt.s32.f32 %v1110_v43  ;;  %v1276_v49 = vsel %vm1275_vm8, 1, %v3912_v10  ;;  %v1232_v53 = vcvt.s32.f32 %v1230_v41  ;;  %v1254_v1 = vand.u32 65535, %v1253_v28 }
 0x249   :  { %1116 = vadd.xlane.f32.xlu1 %v1113_v17  ;;  %v1208_v54 = vcvt.s32.f32 %v1206_v45  ;;  %v1277_v59 = vsel %vm33_vm4, %v1276_v49, 0  ;;  %v1184_v63 = vcvt.s32.f32 %v1182_v51 }
 0x24a   :  { %1092 = vadd.xlane.f32.xlu0 %v1089_v44  ;;  %v1278_v0 = vand.u32 65535, %v1277_v59  ;;  %v1279_v60 = vshrl.u32 %v1277_v59, 16  ;;  %v1256_v52 = vcvt.s32.f32 %v1254_v1 }
 0x24c   :  { %v1280_v61 = vcvt.s32.f32 %v1278_v0  ;;  %v1281_v3 = vcvt.s32.f32 %v1279_v60 }
 0x250   :  { %1212 = vadd.xlane.f32.xlu2 %v1209_v56 }
 0x251   :  { %1188 = vadd.xlane.f32.xlu1 %v1185_v26 }
 0x252   :  { %1164 = vadd.xlane.f32.xlu0 %v1161_v27 }
 0x258   :  { %946 = vadd.xlane.f32.xlu2 %v944_v29 }
 0x259   :  { %1260 = vadd.xlane.f32.xlu1 %v1257_v31 }
 0x25a   :  { %1236 = vadd.xlane.f32.xlu0 %v1233_v33 }
 0x260   :  { %1018 = vadd.xlane.f32.xlu2 %v1016_v34 }
 0x261   :  { %994 = vadd.xlane.f32.xlu1 %v992_v35 }
 0x262   :  { %970 = vadd.xlane.f32.xlu0 %v968_v58 }
 0x268   :  { %1090 = vadd.xlane.f32.xlu2 %v1088_v39 }
 0x269   :  { %1066 = vadd.xlane.f32.xlu1 %v1064_v40 }
 0x26a   :  { %1042 = vadd.xlane.f32.xlu0 %v1040_v42 }
 0x270   :  { %1162 = vadd.xlane.f32.xlu2 %v1160_v4 }
 0x271   :  { %1138 = vadd.xlane.f32.xlu1 %v1136_v50 }
 0x272   :  { %1114 = vadd.xlane.f32.xlu0 %v1112_v46 }
 0x278   :  { %1234 = vadd.xlane.f32.xlu2 %v1232_v53 }
 0x279   :  { %1210 = vadd.xlane.f32.xlu1 %v1208_v54 }
 0x27a   :  { %1186 = vadd.xlane.f32.xlu0 %v1184_v63 }
 0x280   :  { %1282 = vadd.xlane.f32.xlu2 %v1280_v61 }
 0x281   :  { %1284 = vadd.xlane.f32.xlu1 %v1281_v3 }
 0x282   :  { %1258 = vadd.xlane.f32.xlu0 %v1256_v52 }
 0x2ab   :  { %v997_v5 = vpop.xlane.xlu2 %996 }
 0x2ac   :  { %v973_v7 = vpop.xlane.xlu1 %972  ;;  %v999_v8 = vcvt.f32.s32 %v997_v5 }
 0x2ad   :  { %v949_v11 = vpop.xlane.xlu0 %948  ;;  %v975_v21 = vcvt.f32.s32 %v973_v7 }
 0x2ae   :  { %v951_v24 = vcvt.f32.s32 %v949_v11  ;;  %v1000_v34 = vshll.u32 %v999_v8, 16 }
 0x2af   :  { %v976_v36 = vshll.u32 %v975_v21, 16 }
 0x2b0   :  { %v952_v56 = vshll.u32 %v951_v24, 16 }
 0x2b3   :  { %v1069_v14 = vpop.xlane.xlu2 %1068 }
 0x2b4   :  { %v1045_v16 = vpop.xlane.xlu1 %1044  ;;  %v1071_v4 = vcvt.f32.s32 %v1069_v14 }
 0x2b5   :  { %v1021_v17 = vpop.xlane.xlu0 %1020  ;;  %v1047_v50 = vcvt.f32.s32 %v1045_v16 }
 0x2b6   :  { %v1023_v12 = vcvt.f32.s32 %v1021_v17  ;;  %v1072_v1 = vshll.u32 %v1071_v4, 16 }
 0x2b7   :  { %v1048_v61 = vshll.u32 %v1047_v50, 16 }
 0x2b8   :  { %v1024_v33 = vshll.u32 %v1023_v12, 16 }
 0x2bb   :  { %v4645_v18 = vpop.xlane.xlu2 %1140 }
 0x2bc   :  { %v4647_v44 = vpop.xlane.xlu1 %1116  ;;  %v1143_v12 = vcvt.f32.s32 %v4645_v18 }
 0x2bd   :  { %v1093_v9 = vpop.xlane.xlu0 %1092 }
 0x2be   :  { %v1095_v42 = vcvt.f32.s32 %v1093_v9 }
 0x2c0   :  { %v1096_v54 = vshll.u32 %v1095_v42, 16 }
 0x2c3   :  { %v4649_v20 = vpop.xlane.xlu2 %1212 }
 0x2c4   :  { %v4651_v23 = vpop.xlane.xlu1 %1188 }
 0x2c5   :  { %v4653_v62 = vpop.xlane.xlu0 %1164 }
 0x2c6   :  { %v1167_v17 = vcvt.f32.s32 %v4653_v62 }
 0x2cb   :  { %v947_v15 = vpop.xlane.xlu2 %946 }
 0x2cc   :  { %v4655_v25 = vpop.xlane.xlu1 %1260  ;;  %v950_v26 = vcvt.f32.s32 %v947_v15 }
 0x2cd   :  { %v4657_v27 = vpop.xlane.xlu0 %1236 }
 0x2ce   :  { %v953_v28 = vadd.s32 %v952_v56, %v950_v26  ;;  %v1239_v50 = vcvt.f32.s32 %v4657_v27 }
 0x2d0   :  { %v954_v57 = vrot.slane %v953_v28, 4 }
 0x2d2   :  { %v955_v29 = vadd.s32 %v954_v57, %v953_v28  ;;  %v1119_v57 = vcvt.f32.s32 %v4647_v44 }
 0x2d3   :  { %v1019_v31 = vpop.xlane.xlu2 %1018 }
 0x2d4   :  { %v995_v48 = vpop.xlane.xlu1 %994  ;;  %v1022_v19 = vcvt.f32.s32 %v1019_v31  ;;  %v956_v2 = vrot.slane %v955_v29, 2 }
 0x2d5   :  { %v998_v35 = vcvt.f32.s32 %v995_v48  ;;  %v971_v58 = vpop.xlane.xlu0 %970  ;;  %v1168_v48 = vshll.u32 %v1167_v17, 16 }
 0x2d6   :  { %v974_v37 = vcvt.f32.s32 %v971_v58  ;;  %v1025_v38 = vadd.s32 %v1024_v33, %v1022_v19  ;;  %v957_v39 = vadd.s32 %v956_v2, %v955_v29 }
 0x2d7   :  { %v1001_v40 = vadd.s32 %v1000_v34, %v998_v35 }
 0x2d8   :  { %v977_v13 = vadd.s32 %v976_v36, %v974_v37  ;;  %v1026_v30 = vrot.slane %v1025_v38, 4  ;;  %v958_v43 = vrot.slane %v957_v39, 1 }
 0x2d9   :  { %v1002_v46 = vrot.slane %v1001_v40, 4 }
 0x2da   :  { %v978_v41 = vrot.slane %v977_v13, 4  ;;  %v959_v45 = vadd.s32 %v958_v43, %v957_v39  ;;  %v1027_v51 = vadd.s32 %v1026_v30, %v1025_v38  ;;  %v1144_v39 = vshll.u32 %v1143_v12, 16 }
 0x2db   :  { %v1091_v49 = vpop.xlane.xlu2 %1090  ;;  %v1003_v53 = vadd.s32 %v1002_v46, %v1001_v40  ;;  %v1120_v40 = vshll.u32 %v1119_v57, 16 }
 0x2dc   :  { %v1067_v59 = vpop.xlane.xlu1 %1066  ;;  %v1094_v63 = vcvt.f32.s32 %v1091_v49  ;;  %3703 = vpush %v959_v45  ;;  %v979_v0 = vadd.s32 %v978_v41, %v977_v13  ;;  %v1028_v60 = vrot.slane %v1027_v51, 2 }
 0x2dd   :  { %v1070_v3 = vcvt.f32.s32 %v1067_v59  ;;  %v1043_v52 = vpop.xlane.xlu0 %1042  ;;  %v1004_v5 = vrot.slane %v1003_v53, 2  ;;  %v1191_v59 = vcvt.f32.s32 %v4651_v23 }
 0x2de   :  { %v1046_v7 = vcvt.f32.s32 %v1043_v52  ;;  %v1097_v11 = vadd.s32 %v1096_v54, %v1094_v63  ;;  %v980_v14 = vrot.slane %v979_v0, 2  ;;  %v1029_v16 = vadd.s32 %v1028_v60, %v1027_v51 }
 0x2df   :  { %v1073_v9 = vadd.s32 %v1072_v1, %v1070_v3  ;;  %v1005_v24 = vadd.s32 %v1004_v5, %v1003_v53  ;;  %v1215_v54 = vcvt.f32.s32 %v4649_v20  ;;  %v1240_v3 = vshll.u32 %v1239_v50, 16 }
 0x2e0   :  { %v1049_v15 = vadd.s32 %v1048_v61, %v1046_v7  ;;  %v1098_v56 = vrot.slane %v1097_v11, 4  ;;  %v981_v26 = vadd.s32 %v980_v14, %v979_v0  ;;  %v1030_v28 = vrot.slane %v1029_v16, 1 }
 0x2e1   :  { %v1074_v8 = vrot.slane %v1073_v9, 4  ;;  %v1006_v21 = vrot.slane %v1005_v24, 1 }
 0x2e2   :  { %v1050_v29 = vrot.slane %v1049_v15, 4  ;;  %v982_v31 = vrot.slane %v981_v26, 1  ;;  %v1099_v33 = vadd.s32 %v1098_v56, %v1097_v11  ;;  %v1031_v34 = vadd.s32 %v1030_v28, %v1029_v16 }
 0x2e3   :  { %v1163_v19 = vpop.xlane.xlu2 %1162  ;;  %v1007_v2 = vadd.s32 %v1006_v21, %v1005_v24  ;;  %v1075_v62 = vadd.s32 %v1074_v8, %v1073_v9  ;;  %v1216_v24 = vshll.u32 %v1215_v54, 16 }
 0x2e4   :  { %v1139_v35 = vpop.xlane.xlu1 %1138  ;;  %v1166_v58 = vcvt.f32.s32 %v1163_v19  ;;  %v983_v36 = vadd.s32 %v982_v31, %v981_v26  ;;  %v1051_v37 = vadd.s32 %v1050_v29, %v1049_v15  ;;  %v1100_v38 = vrot.slane %v1099_v33, 2 }
 0x2e5   :  { %v1142_v18 = vcvt.f32.s32 %v1139_v35  ;;  %v1115_v42 = vpop.xlane.xlu0 %1114  ;;  %v1076_v44 = vrot.slane %v1075_v62, 2  ;;  %v1192_v15 = vshll.u32 %v1191_v59, 16 }
 0x2e6   :  { %v1118_v13 = vcvt.f32.s32 %v1115_v42  ;;  %v1169_v30 = vadd.s32 %v1168_v48, %v1166_v58  ;;  %3705 = vpush %v983_v36  ;;  %v1052_v43 = vrot.slane %v1051_v37, 2  ;;  %v1101_v4 = vadd.s32 %v1100_v38, %v1099_v33 }
 0x2e7   :  { %v1145_v46 = vadd.s32 %v1144_v39, %v1142_v18  ;;  %3707 = vpush %v1007_v2  ;;  %v1077_v41 = vadd.s32 %v1076_v44, %v1075_v62 }
 0x2e8   :  { %v1121_v45 = vadd.s32 %v1120_v40, %v1118_v13  ;;  %v1170_v51 = vrot.slane %v1169_v30, 4  ;;  %3709 = vpush %v1031_v34  ;;  %v1053_v49 = vadd.s32 %v1052_v43, %v1051_v37  ;;  %v1102_v53 = vrot.slane %v1101_v4, 1 }
 0x2e9   :  { %v1146_v63 = vrot.slane %v1145_v46, 4  ;;  %v1078_v0 = vrot.slane %v1077_v41, 1  ;;  %v1263_v34 = vcvt.f32.s32 %v4655_v25 }
 0x2ea   :  { %v1122_v60 = vrot.slane %v1121_v45, 4  ;;  %v1054_v1 = vrot.slane %v1053_v49, 1  ;;  %v1171_v61 = vadd.s32 %v1170_v51, %v1169_v30  ;;  %v1103_v5 = vadd.s32 %v1102_v53, %v1101_v4 }
 0x2eb   :  { %v1235_v52 = vpop.xlane.xlu2 %1234  ;;  %v1079_v27 = vadd.s32 %v1078_v0, %v1077_v41  ;;  %v1147_v7 = vadd.s32 %v1146_v63, %v1145_v46  ;;  %v1264_v4 = vshll.u32 %v1263_v34, 16 }
 0x2ec   :  { %v1211_v11 = vpop.xlane.xlu1 %1210  ;;  %v1238_v14 = vcvt.f32.s32 %v1235_v52  ;;  %v1055_v16 = vadd.s32 %v1054_v1, %v1053_v49  ;;  %v1123_v17 = vadd.s32 %v1122_v60, %v1121_v45  ;;  %v1172_v9 = vrot.slane %v1171_v61, 2 }
 0x2ed   :  { %v1214_v20 = vcvt.f32.s32 %v1211_v11  ;;  %v1187_v56 = vpop.xlane.xlu0 %1186  ;;  %v1148_v23 = vrot.slane %v1147_v7, 2 }
 0x2ee   :  { %v1190_v26 = vcvt.f32.s32 %v1187_v56  ;;  %v1241_v28 = vadd.s32 %v1240_v3, %v1238_v14  ;;  %3711 = vpush %v1055_v16  ;;  %v1124_v12 = vrot.slane %v1123_v17, 2  ;;  %v1173_v57 = vadd.s32 %v1172_v9, %v1171_v61 }
 0x2ef   :  { %v1217_v8 = vadd.s32 %v1216_v24, %v1214_v20  ;;  %3713 = vpush %v1079_v27  ;;  %v1149_v21 = vadd.s32 %v1148_v23, %v1147_v7 }
 0x2f0   :  { %v1193_v29 = vadd.s32 %v1192_v15, %v1190_v26  ;;  %v1242_v31 = vrot.slane %v1241_v28, 4  ;;  %3715 = vpush %v1103_v5  ;;  %v1125_v33 = vadd.s32 %v1124_v12, %v1123_v17  ;;  %v1174_v48 = vrot.slane %v1173_v57, 1 }
 0x2f1   :  { %v1218_v19 = vrot.slane %v1217_v8, 4  ;;  %v1150_v2 = vrot.slane %v1149_v21, 1 }
 0x2f2   :  { %v1194_v62 = vrot.slane %v1193_v29, 4  ;;  %v1126_v35 = vrot.slane %v1125_v33, 1  ;;  %v1243_v58 = vadd.s32 %v1242_v31, %v1241_v28  ;;  %v1175_v18 = vadd.s32 %v1174_v48, %v1173_v57 }
 0x2f3   :  { %v1151_v36 = vadd.s32 %v1150_v2, %v1149_v21  ;;  %v1219_v37 = vadd.s32 %v1218_v19, %v1217_v8  ;;  %v1283_v39 = vpop.xlane.xlu2 %1282 }
 0x2f4   :  { %v1285_v38 = vpop.xlane.xlu1 %1284  ;;  %v1127_v40 = vadd.s32 %v1126_v35, %v1125_v33  ;;  %v1195_v42 = vadd.s32 %v1194_v62, %v1193_v29  ;;  %v1244_v44 = vrot.slane %v1243_v58, 2  ;;  %v1286_v45 = vcvt.f32.s32 %v1283_v39 }
 0x2f5   :  { %v1287_v13 = vcvt.f32.s32 %v1285_v38  ;;  %v1259_v30 = vpop.xlane.xlu0 %1258  ;;  %v1220_v43 = vrot.slane %v1219_v37, 2 }
 0x2f6   :  { %v1262_v50 = vcvt.f32.s32 %v1259_v30  ;;  %3717 = vpush %v1127_v40  ;;  %v1196_v46 = vrot.slane %v1195_v42, 2  ;;  %v1245_v41 = vadd.s32 %v1244_v44, %v1243_v58 }
 0x2f7   :  { %v1288_v25 = vshll.u32 %v1287_v13, 16  ;;  %3719 = vpush %v1151_v36  ;;  %v1221_v51 = vadd.s32 %v1220_v43, %v1219_v37 }
 0x2f8   :  { %v1265_v49 = vadd.s32 %v1264_v4, %v1262_v50  ;;  %3721 = vpush %v1175_v18  ;;  %v1197_v53 = vadd.s32 %v1196_v46, %v1195_v42  ;;  %v1246_v54 = vrot.slane %v1245_v41, 1 }
 0x2f9   :  { %v1289_v59 = vadd.s32 %v1288_v25, %v1286_v45  ;;  %v1222_v63 = vrot.slane %v1221_v51, 1 }
 0x2fa   :  { %v1266_v0 = vrot.slane %v1265_v49, 4  ;;  %v1198_v60 = vrot.slane %v1197_v53, 1  ;;  %v1247_v52 = vadd.s32 %v1246_v54, %v1245_v41 }
 0x2fb   :  { %v1290_v1 = vrot.slane %v1289_v59, 4  ;;  %v1223_v61 = vadd.s32 %v1222_v63, %v1221_v51 }
 0x2fc   :  { %v1199_v3 = vadd.s32 %v1198_v60, %v1197_v53  ;;  %v1267_v27 = vadd.s32 %v1266_v0, %v1265_v49 }
 0x2fd   :  { %v1291_v5 = vadd.s32 %v1290_v1, %v1289_v59 }
 0x2fe   :  { %3723 = vpush %v1199_v3  ;;  %v1268_v7 = vrot.slane %v1267_v27, 2 }
 0x2ff   :  { %3725 = vpush %v1223_v61  ;;  %v1292_v11 = vrot.slane %v1291_v5, 2 }
 0x300   :  { %3727 = vpush %v1247_v52  ;;  %v1269_v14 = vadd.s32 %v1268_v7, %v1267_v27 }
 0x301   :  { %v1293_v16 = vadd.s32 %v1292_v11, %v1291_v5 }
 0x302   :  { %v1270_v17 = vrot.slane %v1269_v14, 1 }
 0x303   :  { %v1294_v9 = vrot.slane %v1293_v16, 1 }
 0x304   :  { %v1271_v24 = vadd.s32 %v1270_v17, %v1269_v14 }
 0x305   :  { %v1295_v15 = vadd.s32 %v1294_v9, %v1293_v16 }
 0x306   :  { %3729 = vpush %v1271_v24 }
 0x307   :  { %3731 = vpush %v1295_v15 }
 0x30d   :  { %s3704_s18 = spop %3703 }
 0x30e   :  { %v961_v20 = vstv %s3704_s18 }
 0x30f   :  { %vm4667_vm5 = vcmp.lt.s32.totalorder %v961_v20, %v4520_v32 }
 0x310   :  { %v1342_v23 = vsel %vm4667_vm5, %v961_v20, 0  ;;  %v1313_v49 = vsel %vm4667_vm5, 1, %v3912_v10 }
 0x317   :  { %s3706_s0 = spop %3705 }
 0x318   :  { %v985_v26 = vstv %s3706_s0  ;;  %s3708_s19 = spop %3707 }
 0x319   :  { %vm4674_vm14 = vcmp.lt.s32.totalorder %v985_v26, %v4520_v32  ;;  %v1009_v12 = vstv %s3708_s19  ;;  %s3710_s20 = spop %3709 }
 0x31a   :  { %v1343_v57 = vsel %vm4674_vm14, %v985_v26, 0  ;;  %vm4681_vm0 = vcmp.lt.s32.totalorder %v1009_v12, %v4520_v32  ;;  %v1033_v21 = vstv %s3710_s20  ;;  %v1314_v27 = vsel %vm4674_vm14, 1, %v3912_v10 }
 0x31b   :  { %vm1357_vm12 = vcmp.gt.s32.totalorder %v1342_v23, %v1343_v57  ;;  %v1344_v29 = vsel %vm4681_vm0, %v1009_v12, 0  ;;  %vm4688_vm13 = vcmp.lt.s32.totalorder %v1033_v21, %v4520_v32  ;;  %v1315_v14 = vsel %vm4681_vm0, 1, %v3912_v10 }
 0x31c   :  { %v1358_v31 = vsel %vm1357_vm12, %v1342_v23, %v1343_v57  ;;  %v1345_v48 = vsel %vm4688_vm13, %v1033_v21, 0  ;;  %v1316_v9 = vsel %vm4688_vm13, 1, %v3912_v10  ;;  %v1328_v28 = vadd.s32 %v1314_v27, %v1313_v49 }
 0x31d   :  { %vm1359_vm2 = vcmp.gt.s32.totalorder %v1344_v29, %v1345_v48  ;;  %v1329_v57 = vadd.s32 %v1316_v9, %v1315_v14 }
 0x31e   :  { %v1360_v19 = vsel %vm1359_vm2, %v1344_v29, %v1345_v48  ;;  %v1390_v29 = vshra.s32 %v3937_v6, 16 }
 0x31f   :  { %s3712_s21 = spop %3711  ;;  %vm1371_vm7 = vcmp.gt.s32.totalorder %v1358_v31, %v1360_v19 }
 0x320   :  { %v1057_v2 = vstv %s3712_s21  ;;  %s3714_s22 = spop %3713  ;;  %v1372_v34 = vsel %vm1371_vm7, %v1358_v31, %v1360_v19 }
 0x321   :  { %vm4695_vm1 = vcmp.lt.s32.totalorder %v1057_v2, %v4520_v32  ;;  %v1081_v35 = vstv %s3714_s22  ;;  %s3716_s23 = spop %3715 }
 0x322   :  { %v1346_v58 = vsel %vm4695_vm1, %v1057_v2, 0  ;;  %vm4702_vm10 = vcmp.lt.s32.totalorder %v1081_v35, %v4520_v32  ;;  %v1105_v37 = vstv %s3716_s23  ;;  %v1317_v59 = vsel %vm4695_vm1, 1, %v3912_v10 }
 0x323   :  { %v1347_v38 = vsel %vm4702_vm10, %v1081_v35, 0  ;;  %vm4709_vm11 = vcmp.lt.s32.totalorder %v1105_v37, %v4520_v32  ;;  %v1318_v1 = vsel %vm4702_vm10, 1, %v3912_v10 }
 0x324   :  { %vm1361_vm6 = vcmp.gt.s32.totalorder %v1346_v58, %v1347_v38  ;;  %v1348_v40 = vsel %vm4709_vm11, %v1105_v37, 0  ;;  %v1319_v5 = vsel %vm4709_vm11, 1, %v3912_v10  ;;  %v1330_v24 = vadd.s32 %v1318_v1, %v1317_v59 }
 0x325   :  { %v1362_v18 = vsel %vm1361_vm6, %v1346_v58, %v1347_v38  ;;  %v1335_v37 = vadd.s32 %v1329_v57, %v1328_v28 }
 0x327   :  { %s3718_s24 = spop %3717 }
 0x328   :  { %v1129_v42 = vstv %s3718_s24  ;;  %s3720_s25 = spop %3719 }
 0x329   :  { %vm4716_vm3 = vcmp.lt.s32.totalorder %v1129_v42, %v4520_v32  ;;  %v1153_v13 = vstv %s3720_s25  ;;  %s3722_s26 = spop %3721 }
 0x32a   :  { %v1349_v30 = vsel %vm4716_vm3, %v1129_v42, 0  ;;  %vm4723_vm9 = vcmp.lt.s32.totalorder %v1153_v13, %v4520_v32  ;;  %v1177_v4 = vstv %s3722_s26  ;;  %v1320_v63 = vsel %vm4716_vm3, 1, %v3912_v10 }
 0x32b   :  { %vm1363_vm8 = vcmp.gt.s32.totalorder %v1348_v40, %v1349_v30  ;;  %v1350_v50 = vsel %vm4723_vm9, %v1153_v13, 0  ;;  %vm4730_vm12 = vcmp.lt.s32.totalorder %v1177_v4, %v4520_v32  ;;  %v1331_v16 = vadd.s32 %v1320_v63, %v1319_v5 }
 0x32c   :  { %v1364_v46 = vsel %vm1363_vm8, %v1348_v40, %v1349_v30  ;;  %v1351_v25 = vsel %vm4730_vm12, %v1177_v4, 0  ;;  %v1321_v15 = vsel %vm4723_vm9, 1, %v3912_v10  ;;  %v1322_v56 = vsel %vm4730_vm12, 1, %v3912_v10 }
 0x32d   :  { %vm1373_vm2 = vcmp.gt.s32.totalorder %v1362_v18, %v1364_v46  ;;  %vm1365_vm7 = vcmp.gt.s32.totalorder %v1350_v50, %v1351_v25  ;;  %v1336_v8 = vadd.s32 %v1331_v16, %v1330_v24  ;;  %v1332_v31 = vadd.s32 %v1322_v56, %v1321_v15 }
 0x32e   :  { %v1374_v45 = vsel %vm1373_vm2, %v1362_v18, %v1364_v46  ;;  %v1366_v51 = vsel %vm1365_vm7, %v1350_v50, %v1351_v25  ;;  %v4801_v18 = vand.u32 15, %v1390_v29 }
 0x32f   :  { %vm1379_vm6 = vcmp.gt.s32.totalorder %v1372_v34, %v1374_v45  ;;  %s3724_s27 = spop %3723  ;;  %v1339_v42 = vadd.s32 %v1336_v8, %v1335_v37 }
 0x330   :  { %v1201_v53 = vstv %s3724_s27  ;;  %s3726_s28 = spop %3725  ;;  %v1380_v54 = vsel %vm1379_vm6, %v1372_v34, %v1374_v45  ;;  %vm1440_vm2 = vcmp.le.s32.totalorder %v4801_v18, 2  ;;  %vm1416_vm6 = vcmp.le.s32.totalorder %v4801_v18, 1 }
 0x331   :  { %vm4746_vm8 = vcmp.lt.s32.totalorder %v1201_v53, %v4520_v32  ;;  %v1225_v60 = vstv %s3726_s28  ;;  %s3728_s29 = spop %3727 }
 0x332   :  { %v1352_v61 = vsel %vm4746_vm8, %v1201_v53, 0  ;;  %vm4756_vm5 = vcmp.lt.s32.totalorder %v1225_v60, %v4520_v32  ;;  %v1249_v52 = vstv %s3728_s29  ;;  %v1323_v23 = vsel %vm4746_vm8, 1, %v3912_v10 }
 0x333   :  { %v1353_v7 = vsel %vm4756_vm5, %v1225_v60, 0  ;;  %vm4769_vm1 = vcmp.lt.s32.totalorder %v1249_v52, %v4520_v32  ;;  %v1324_v26 = vsel %vm4756_vm5, 1, %v3912_v10  ;;  %vm1392_vm5 = vcmp.le.s32.totalorder %v4801_v18, 0 }
 0x334   :  { %vm1367_vm10 = vcmp.gt.s32.totalorder %v1352_v61, %v1353_v7  ;;  %v1354_v17 = vsel %vm4769_vm1, %v1249_v52, 0  ;;  %v1333_v33 = vadd.s32 %v1324_v26, %v1323_v23  ;;  %v1325_v19 = vsel %vm4769_vm1, 1, %v3912_v10 }
 0x335   :  { %v1368_v20 = vsel %vm1367_vm10, %v1352_v61, %v1353_v7  ;;  %vm1512_vm10 = vcmp.le.s32.totalorder %v4801_v18, 5 }
 0x336   :  { %vm1375_vm14 = vcmp.gt.s32.totalorder %v1366_v51, %v1368_v20  ;;  %v1337_v38 = vadd.s32 %v1333_v33, %v1332_v31 }
 0x337   :  { %s3730_s30 = spop %3729  ;;  %v1376_v12 = vsel %vm1375_vm14, %v1366_v51, %v1368_v20 }
 0x338   :  { %v1273_v21 = vstv %s3730_s30  ;;  %s3732_s4 = spop %3731 }
 0x339   :  { %vm1311_vm0 = vcmp.lt.s32.totalorder %v1273_v21, %v4520_v32  ;;  %v1297_v48 = vstv %s3732_s4 }
 0x33a   :  { %v1326_v2 = vsel %vm1311_vm0, 1, %v3912_v10  ;;  %v1355_v34 = vsel %vm1311_vm0, %v1273_v21, 0  ;;  %vm1312_vm13 = vcmp.lt.s32.totalorder %v1297_v48, %v4520_v32 }
 0x33b   :  { %v1334_v62 = vadd.s32 %v1326_v2, %v1325_v19  ;;  %vm1369_vm11 = vcmp.gt.s32.totalorder %v1354_v17, %v1355_v34  ;;  %v1327_v35 = vsel %vm1312_vm13, 1, %v3912_v10  ;;  %v1356_v58 = vsel %vm1312_vm13, %v1297_v48, 0 }
 0x33c   :  { %v1370_v36 = vsel %vm1369_vm11, %v1354_v17, %v1355_v34  ;;  %vm1464_vm13 = vcmp.le.s32.totalorder %v4801_v18, 3 }
 0x33d   :  { %v1338_v39 = vadd.s32 %v1334_v62, %v1327_v35  ;;  %vm1377_vm3 = vcmp.gt.s32.totalorder %v1370_v36, %v1356_v58 }
 0x33e   :  { %v1378_v40 = vsel %vm1377_vm3, %v1370_v36, %v1356_v58 }
 0x33f   :  { %v1340_v44 = vadd.s32 %v1338_v39, %v1337_v38  ;;  %vm1381_vm9 = vcmp.gt.s32.totalorder %v1376_v12, %v1378_v40 }
 0x340   :  { %v1382_v13 = vsel %vm1381_vm9, %v1376_v12, %v1378_v40 }
 0x341   :  { %v1341_v30 = vadd.s32 %v1340_v44, %v1339_v42  ;;  %vm1383_vm12 = vcmp.gt.s32.totalorder %v1380_v54, %v1382_v13 }
 0x342   :  { %v1384_v43 = vsel %vm1383_vm12, %v1380_v54, %v1382_v13  ;;  %vm1584_vm12 = vcmp.le.s32.totalorder %v4801_v18, 8 }
 0x343   :  { %v4805_v4 = vsub.s32 %v4520_v32, %v1384_v43  ;;  %v1386_v50 = vshll.u32 %v1341_v30, 20  ;;  %vm1388_vm7 = vcmp.eq.s32.totalorder %v4515_v55, %v1341_v30 }
 0x344   :  { %vm4811_vm8 = vmand %vm4526_vm15, %vm1388_vm7  ;;  %vm1488_vm15 = vcmp.le.s32.totalorder %v4801_v18, 4  ;;  %vm1536_vm7 = vcmp.le.s32.totalorder %v4801_v18, 6 }
 0x345   :  { %v4817_v41 = vor.u32 %v1386_v50, %v4531_v47  ;;  %vm1441_vm1 = vmand %vm4811_vm8, %vm1440_vm2  ;;  %vm1560_vm2 = vcmp.le.s32.totalorder %v4801_v18, 7 }
 0x346   :  { %v1442_v55 = vsel %vm1441_vm1, 1, %v3912_v10  ;;  %vm1417_vm14 = vmand %vm4811_vm8, %vm1416_vm6 }
 0x347   :  { %v4827_v32 = vsel %vm33_vm4, %v1442_v55, 0  ;;  %v1418_v22 = vsel %vm1417_vm14, 1, %v3912_v10  ;;  %vm1393_vm0 = vmand %vm4811_vm8, %vm1392_vm5  ;;  %vm1632_vm14 = vcmp.le.s32.totalorder %v4801_v18, 10 }
 0x348   :  { %v1445_v47 = vshrl.u32 %v4827_v32, 16  ;;  %v4835_v25 = vsel %vm33_vm4, %v1418_v22, 0  ;;  %v1394_v45 = vsel %vm1393_vm0, 1, %v3912_v10  ;;  %vm1513_vm11 = vmand %vm4811_vm8, %vm1512_vm10  ;;  %vm1656_vm10 = vcmp.le.s32.totalorder %v4801_v18, 11 }
 0x349   :  { %v1421_v51 = vshrl.u32 %v4835_v25, 16  ;;  %v4842_v49 = vsel %vm33_vm4, %v1394_v45, 0  ;;  %v1514_v53 = vsel %vm1513_vm11, 1, %v3912_v10  ;;  %vm1489_vm3 = vmand %vm4811_vm8, %vm1488_vm15  ;;  %vm1608_vm15 = vcmp.le.s32.totalorder %v4801_v18, 9 }
 0x34a   :  { %v1447_v54 = vcvt.s32.f32 %v1445_v47  ;;  %v1397_v59 = vshrl.u32 %v4842_v49, 16  ;;  %v1490_v63 = vsel %vm1489_vm3, 1, %v3912_v10  ;;  %vm1465_vm9 = vmand %vm4811_vm8, %vm1464_vm13  ;;  %v4853_v60 = vsel %vm33_vm4, %v1514_v53, 0 }
 0x34b   :  { %v1423_v0 = vcvt.s32.f32 %v1421_v51  ;;  %v1466_v1 = vsel %vm1465_vm9, 1, %v3912_v10  ;;  %v4858_v3 = vsel %vm33_vm4, %v1490_v63, 0  ;;  %vm1585_vm6 = vmand %vm4811_vm8, %vm1584_vm12  ;;  %v1517_v27 = vshrl.u32 %v4853_v60, 16 }
 0x34c   :  { %1450 = vadd.xlane.f32.xlu2 %v1447_v54  ;;  %v1399_v61 = vcvt.s32.f32 %v1397_v59  ;;  %v4862_v52 = vsel %vm33_vm4, %v1466_v1, 0  ;;  %vm1561_vm5 = vmand %vm4811_vm8, %vm1560_vm2  ;;  %v1493_v5 = vshrl.u32 %v4858_v3, 16  ;;  %v1586_v11 = vsel %vm1585_vm6, 1, %v3912_v10 }
 0x34d   :  { %1426 = vadd.xlane.f32.xlu1 %v1423_v0  ;;  %vm1537_vm1 = vmand %vm4811_vm8, %vm1536_vm7  ;;  %v1469_v7 = vshrl.u32 %v4862_v52, 16  ;;  %v1562_v14 = vsel %vm1561_vm5, 1, %v3912_v10  ;;  %v1519_v16 = vcvt.s32.f32 %v1517_v27  ;;  %v4878_v24 = vsel %vm33_vm4, %v1586_v11, 0 }
 0x34e   :  { %1402 = vadd.xlane.f32.xlu0 %v1399_v61  ;;  %v1538_v17 = vsel %vm1537_vm1, 1, %v3912_v10  ;;  %v1495_v9 = vcvt.s32.f32 %v1493_v5  ;;  %v4882_v20 = vsel %vm33_vm4, %v1562_v14, 0  ;;  %vm1657_vm0 = vmand %vm4811_vm8, %vm1656_vm10  ;;  %v1589_v23 = vshrl.u32 %v4878_v24, 16 }
 0x34f   :  { %v1471_v15 = vcvt.s32.f32 %v1469_v7  ;;  %v1539_v56 = vsel %vm33_vm4, %v1538_v17, 0  ;;  %vm1633_vm13 = vmand %vm4811_vm8, %vm1632_vm14  ;;  %v1565_v26 = vshrl.u32 %v4882_v20, 16  ;;  %v1658_v12 = vsel %vm1657_vm0, 1, %v3912_v10 }
 0x350   :  { %vm1609_vm11 = vmand %vm4811_vm8, %vm1608_vm15  ;;  %v1541_v28 = vshrl.u32 %v1539_v56, 16  ;;  %v1634_v57 = vsel %vm1633_vm13, 1, %v3912_v10  ;;  %v1591_v8 = vcvt.s32.f32 %v1589_v23  ;;  %v4898_v31 = vsel %vm33_vm4, %v1658_v12, 0 }
 0x351   :  { %v1610_v21 = vsel %vm1609_vm11, 1, %v3912_v10  ;;  %v1567_v29 = vcvt.s32.f32 %v1565_v26  ;;  %vm1704_vm3 = vcmp.le.s32.totalorder %v4801_v18, 13  ;;  %v4902_v48 = vsel %vm33_vm4, %v1634_v57, 0 }
 0x352   :  { %v1543_v33 = vcvt.s32.f32 %v1541_v28  ;;  %vm1680_vm9 = vcmp.le.s32.totalorder %v4801_v18, 12  ;;  %v1611_v19 = vsel %vm33_vm4, %v1610_v21, 0  ;;  %v1661_v2 = vshrl.u32 %v4898_v31, 16  ;;  %vm1705_vm12 = vmand %vm4811_vm8, %vm1704_vm3 }
 0x353   :  { %v1637_v34 = vshrl.u32 %v4902_v48, 16  ;;  %vm1681_vm2 = vmand %vm4811_vm8, %vm1680_vm9  ;;  %v1613_v62 = vshrl.u32 %v1611_v19, 16  ;;  %v1706_v35 = vsel %vm1705_vm12, 1, %v3912_v10  ;;  %v1396_v42 = vand.u32 65535, %v4842_v49 }
 0x354   :  { %1522 = vadd.xlane.f32.xlu2 %v1519_v16  ;;  %v1663_v58 = vcvt.s32.f32 %v1661_v2  ;;  %v1682_v36 = vsel %vm1681_vm2, 1, %v3912_v10  ;;  %v1707_v39 = vsel %vm33_vm4, %v1706_v35, 0  ;;  %v1468_v55 = vand.u32 65535, %v4862_v52 }
 0x355   :  { %1498 = vadd.xlane.f32.xlu1 %v1495_v9  ;;  %v1639_v37 = vcvt.s32.f32 %v1637_v34  ;;  %v1615_v38 = vcvt.s32.f32 %v1613_v62  ;;  %v1683_v40 = vsel %vm33_vm4, %v1682_v36, 0  ;;  %v1709_v44 = vshrl.u32 %v1707_v39, 16 }
 0x356   :  { %1474 = vadd.xlane.f32.xlu0 %v1471_v15  ;;  %v1685_v13 = vshrl.u32 %v1683_v40, 16  ;;  %v1398_v30 = vcvt.s32.f32 %v1396_v42  ;;  %v1444_v22 = vand.u32 65535, %v4827_v32  ;;  %v1420_v47 = vand.u32 65535, %v4835_v25 }
 0x357   :  { %v1711_v43 = vcvt.s32.f32 %v1709_v44  ;;  %v1470_v45 = vcvt.s32.f32 %v1468_v55  ;;  %v1540_v49 = vand.u32 65535, %v1539_v56  ;;  %v1516_v54 = vand.u32 65535, %v4853_v60 }
 0x358   :  { %v1687_v50 = vcvt.s32.f32 %v1685_v13  ;;  %v1446_v51 = vcvt.s32.f32 %v1444_v22  ;;  %v1422_v53 = vcvt.s32.f32 %v1420_v47  ;;  %v1492_v59 = vand.u32 65535, %v4858_v3 }
 0x359   :  { %v1542_v63 = vcvt.s32.f32 %v1540_v49  ;;  %v1518_v0 = vcvt.s32.f32 %v1516_v54  ;;  %v1612_v32 = vand.u32 65535, %v1611_v19  ;;  %v1588_v25 = vand.u32 65535, %v4878_v24 }
 0x35a   :  { %v1494_v1 = vcvt.s32.f32 %v1492_v59  ;;  %v1564_v61 = vand.u32 65535, %v4882_v20  ;;  %vm1728_vm7 = vcmp.le.s32.totalorder %v4801_v18, 14  ;;  %v1684_v60 = vand.u32 65535, %v1683_v40 }
 0x35b   :  { %v1614_v52 = vcvt.s32.f32 %v1612_v32  ;;  %v1590_v27 = vcvt.s32.f32 %v1588_v25  ;;  %vm1729_vm6 = vmand %vm4811_vm8, %vm1728_vm7  ;;  %v1660_v3 = vand.u32 65535, %v4898_v31  ;;  %v1636_v7 = vand.u32 65535, %v4902_v48 }
 0x35c   :  { %1594 = vadd.xlane.f32.xlu2 %v1591_v8  ;;  %v1566_v5 = vcvt.s32.f32 %v1564_v61  ;;  %v1730_v11 = vsel %vm1729_vm6, 1, %v3912_v10  ;;  %v1686_v14 = vcvt.s32.f32 %v1684_v60  ;;  %v1708_v20 = vand.u32 65535, %v1707_v39 }
 0x35d   :  { %1570 = vadd.xlane.f32.xlu1 %v1567_v29  ;;  %v1662_v16 = vcvt.s32.f32 %v1660_v3  ;;  %v1731_v17 = vsel %vm33_vm4, %v1730_v11, 0  ;;  %v1638_v9 = vcvt.s32.f32 %v1636_v7 }
 0x35e   :  { %1546 = vadd.xlane.f32.xlu0 %v1543_v33  ;;  %v1732_v24 = vand.u32 65535, %v1731_v17  ;;  %v1733_v15 = vshrl.u32 %v1731_v17, 16  ;;  %v1710_v26 = vcvt.s32.f32 %v1708_v20 }
 0x360   :  { %v1734_v56 = vcvt.s32.f32 %v1732_v24  ;;  %v1735_v23 = vcvt.s32.f32 %v1733_v15 }
 0x364   :  { %1666 = vadd.xlane.f32.xlu2 %v1663_v58 }
 0x365   :  { %1642 = vadd.xlane.f32.xlu1 %v1639_v37 }
 0x366   :  { %1618 = vadd.xlane.f32.xlu0 %v1615_v38 }
 0x36c   :  { %1400 = vadd.xlane.f32.xlu2 %v1398_v30 }
 0x36d   :  { %1714 = vadd.xlane.f32.xlu1 %v1711_v43 }
 0x36e   :  { %1690 = vadd.xlane.f32.xlu0 %v1687_v50 }
 0x374   :  { %1472 = vadd.xlane.f32.xlu2 %v1470_v45 }
 0x375   :  { %1448 = vadd.xlane.f32.xlu1 %v1446_v51 }
 0x376   :  { %1424 = vadd.xlane.f32.xlu0 %v1422_v53 }
 0x37c   :  { %1544 = vadd.xlane.f32.xlu2 %v1542_v63 }
 0x37d   :  { %1520 = vadd.xlane.f32.xlu1 %v1518_v0 }
 0x37e   :  { %1496 = vadd.xlane.f32.xlu0 %v1494_v1 }
 0x384   :  { %1616 = vadd.xlane.f32.xlu2 %v1614_v52 }
 0x385   :  { %1592 = vadd.xlane.f32.xlu1 %v1590_v27 }
 0x386   :  { %1568 = vadd.xlane.f32.xlu0 %v1566_v5 }
 0x38c   :  { %1688 = vadd.xlane.f32.xlu2 %v1686_v14 }
 0x38d   :  { %1664 = vadd.xlane.f32.xlu1 %v1662_v16 }
 0x38e   :  { %1640 = vadd.xlane.f32.xlu0 %v1638_v9 }
 0x394   :  { %1736 = vadd.xlane.f32.xlu2 %v1734_v56 }
 0x395   :  { %1738 = vadd.xlane.f32.xlu1 %v1735_v23 }
 0x396   :  { %1712 = vadd.xlane.f32.xlu0 %v1710_v26 }
 0x3bf   :  { %v1451_v28 = vpop.xlane.xlu2 %1450 }
 0x3c0   :  { %v1427_v12 = vpop.xlane.xlu1 %1426  ;;  %v1453_v44 = vcvt.f32.s32 %v1451_v28 }
 0x3c1   :  { %v1403_v57 = vpop.xlane.xlu0 %1402  ;;  %v1429_v13 = vcvt.f32.s32 %v1427_v12 }
 0x3c2   :  { %v1405_v62 = vcvt.f32.s32 %v1403_v57  ;;  %v1454_v45 = vshll.u32 %v1453_v44, 16 }
 0x3c3   :  { %v1430_v49 = vshll.u32 %v1429_v13, 16 }
 0x3c4   :  { %v1406_v58 = vshll.u32 %v1405_v62, 16 }
 0x3c7   :  { %v1523_v8 = vpop.xlane.xlu2 %1522 }
 0x3c8   :  { %v1499_v21 = vpop.xlane.xlu1 %1498  ;;  %v1525_v52 = vcvt.f32.s32 %v1523_v8 }
 0x3c9   :  { %v1475_v29 = vpop.xlane.xlu0 %1474  ;;  %v1501_v27 = vcvt.f32.s32 %v1499_v21 }
 0x3ca   :  { %v1477_v40 = vcvt.f32.s32 %v1475_v29  ;;  %v1526_v20 = vshll.u32 %v1525_v52, 16 }
 0x3cb   :  { %v1502_v56 = vshll.u32 %v1501_v27, 16 }
 0x3cc   :  { %v1478_v50 = vshll.u32 %v1477_v40, 16 }
 0x3cf   :  { %v4931_v31 = vpop.xlane.xlu2 %1594 }
 0x3d0   :  { %v4933_v33 = vpop.xlane.xlu1 %1570  ;;  %v1597_v40 = vcvt.f32.s32 %v4931_v31 }
 0x3d1   :  { %v1547_v48 = vpop.xlane.xlu0 %1546 }
 0x3d2   :  { %v1549_v1 = vcvt.f32.s32 %v1547_v48 }
 0x3d4   :  { %v1550_v16 = vshll.u32 %v1549_v1, 16 }
 0x3d7   :  { %v4935_v19 = vpop.xlane.xlu2 %1666 }
 0x3d8   :  { %v4937_v2 = vpop.xlane.xlu1 %1642 }
 0x3d9   :  { %v4939_v34 = vpop.xlane.xlu0 %1618 }
 0x3da   :  { %v1621_v29 = vcvt.f32.s32 %v4939_v34 }
 0x3df   :  { %v1401_v35 = vpop.xlane.xlu2 %1400 }
 0x3e0   :  { %v4941_v36 = vpop.xlane.xlu1 %1714  ;;  %v1404_v37 = vcvt.f32.s32 %v1401_v35 }
 0x3e1   :  { %v4943_v38 = vpop.xlane.xlu0 %1690 }
 0x3e2   :  { %v1407_v39 = vadd.s32 %v1406_v58, %v1404_v37  ;;  %v1693_v27 = vcvt.f32.s32 %v4943_v38 }
 0x3e4   :  { %v1408_v42 = vrot.slane %v1407_v39, 4 }
 0x3e6   :  { %v1409_v30 = vadd.s32 %v1408_v42, %v1407_v39  ;;  %v1573_v42 = vcvt.f32.s32 %v4933_v33 }
 0x3e7   :  { %v1473_v43 = vpop.xlane.xlu2 %1472 }
 0x3e8   :  { %v1449_v55 = vpop.xlane.xlu1 %1448  ;;  %v1476_v22 = vcvt.f32.s32 %v1473_v43  ;;  %v1410_v47 = vrot.slane %v1409_v30, 2 }
 0x3e9   :  { %v1452_v51 = vcvt.f32.s32 %v1449_v55  ;;  %v1425_v53 = vpop.xlane.xlu0 %1424  ;;  %v1622_v55 = vshll.u32 %v1621_v29, 16 }
 0x3ea   :  { %v1428_v54 = vcvt.f32.s32 %v1425_v53  ;;  %v1479_v59 = vadd.s32 %v1478_v50, %v1476_v22  ;;  %v1411_v63 = vadd.s32 %v1410_v47, %v1409_v30 }
 0x3eb   :  { %v1455_v0 = vadd.s32 %v1454_v45, %v1452_v51 }
 0x3ec   :  { %v1431_v32 = vadd.s32 %v1430_v49, %v1428_v54  ;;  %v1480_v25 = vrot.slane %v1479_v59, 4  ;;  %v1412_v61 = vrot.slane %v1411_v63, 1 }
 0x3ed   :  { %v1456_v5 = vrot.slane %v1455_v0, 4 }
 0x3ee   :  { %v1432_v60 = vrot.slane %v1431_v32, 4  ;;  %v1481_v3 = vadd.s32 %v1480_v25, %v1479_v59  ;;  %v1413_v7 = vadd.s32 %v1412_v61, %v1411_v63  ;;  %v1598_v63 = vshll.u32 %v1597_v40, 16 }
 0x3ef   :  { %v1457_v11 = vadd.s32 %v1456_v5, %v1455_v0  ;;  %v1545_v14 = vpop.xlane.xlu2 %1544  ;;  %v1574_v0 = vshll.u32 %v1573_v42, 16 }
 0x3f0   :  { %v1433_v17 = vadd.s32 %v1432_v60, %v1431_v32  ;;  %v1521_v9 = vpop.xlane.xlu1 %1520  ;;  %v1548_v24 = vcvt.f32.s32 %v1545_v14  ;;  %3733 = vpush %v1413_v7  ;;  %v1482_v15 = vrot.slane %v1481_v3, 2 }
 0x3f1   :  { %v1524_v23 = vcvt.f32.s32 %v1521_v9  ;;  %v1497_v26 = vpop.xlane.xlu0 %1496  ;;  %v1458_v28 = vrot.slane %v1457_v11, 2 }
 0x3f2   :  { %v1500_v12 = vcvt.f32.s32 %v1497_v26  ;;  %v1551_v57 = vadd.s32 %v1550_v16, %v1548_v24  ;;  %v1434_v8 = vrot.slane %v1433_v17, 2  ;;  %v1483_v21 = vadd.s32 %v1482_v15, %v1481_v3 }
 0x3f3   :  { %v1527_v48 = vadd.s32 %v1526_v20, %v1524_v23  ;;  %v1459_v62 = vadd.s32 %v1458_v28, %v1457_v11  ;;  %v1669_v16 = vcvt.f32.s32 %v4935_v19  ;;  %v1694_v23 = vshll.u32 %v1693_v27, 16 }
 0x3f4   :  { %v1503_v35 = vadd.s32 %v1502_v56, %v1500_v12  ;;  %v1552_v58 = vrot.slane %v1551_v57, 4  ;;  %v1435_v37 = vadd.s32 %v1434_v8, %v1433_v17  ;;  %v1484_v39 = vrot.slane %v1483_v21, 1 }
 0x3f5   :  { %v1528_v44 = vrot.slane %v1527_v48, 4  ;;  %v1460_v13 = vrot.slane %v1459_v62, 1  ;;  %v1645_v17 = vcvt.f32.s32 %v4937_v2 }
 0x3f6   :  { %v1504_v30 = vrot.slane %v1503_v35, 4  ;;  %v1553_v43 = vadd.s32 %v1552_v58, %v1551_v57  ;;  %v1436_v50 = vrot.slane %v1435_v37, 1  ;;  %v1485_v34 = vadd.s32 %v1484_v39, %v1483_v21 }
 0x3f7   :  { %v1529_v22 = vadd.s32 %v1528_v44, %v1527_v48  ;;  %v1617_v47 = vpop.xlane.xlu2 %1616  ;;  %v1461_v45 = vadd.s32 %v1460_v13, %v1459_v62  ;;  %v1670_v62 = vshll.u32 %v1669_v16, 16 }
 0x3f8   :  { %v1505_v51 = vadd.s32 %v1504_v30, %v1503_v35  ;;  %v1593_v53 = vpop.xlane.xlu1 %1592  ;;  %v1620_v49 = vcvt.f32.s32 %v1617_v47  ;;  %v1437_v54 = vadd.s32 %v1436_v50, %v1435_v37  ;;  %v1554_v59 = vrot.slane %v1553_v43, 2 }
 0x3f9   :  { %v1596_v31 = vcvt.f32.s32 %v1593_v53  ;;  %v1569_v1 = vpop.xlane.xlu0 %1568  ;;  %v1530_v33 = vrot.slane %v1529_v22, 2  ;;  %v1646_v35 = vshll.u32 %v1645_v17, 16 }
 0x3fa   :  { %v1572_v32 = vcvt.f32.s32 %v1569_v1  ;;  %v1623_v25 = vadd.s32 %v1622_v55, %v1620_v49  ;;  %3735 = vpush %v1437_v54  ;;  %v1506_v61 = vrot.slane %v1505_v51, 2  ;;  %v1555_v52 = vadd.s32 %v1554_v59, %v1553_v43 }
 0x3fb   :  { %v1599_v5 = vadd.s32 %v1598_v63, %v1596_v31  ;;  %3737 = vpush %v1461_v45  ;;  %v1531_v60 = vadd.s32 %v1530_v33, %v1529_v22  ;;  %v1717_v45 = vcvt.f32.s32 %v4941_v36 }
 0x3fc   :  { %v1575_v3 = vadd.s32 %v1574_v0, %v1572_v32  ;;  %v1624_v7 = vrot.slane %v1623_v25, 4  ;;  %3739 = vpush %v1485_v34  ;;  %v1507_v11 = vadd.s32 %v1506_v61, %v1505_v51  ;;  %v1556_v14 = vrot.slane %v1555_v52, 1 }
 0x3fd   :  { %v1600_v9 = vrot.slane %v1599_v5, 4  ;;  %v1532_v24 = vrot.slane %v1531_v60, 1 }
 0x3fe   :  { %v1576_v15 = vrot.slane %v1575_v3, 4  ;;  %v1625_v20 = vadd.s32 %v1624_v7, %v1623_v25  ;;  %v1508_v56 = vrot.slane %v1507_v11, 1  ;;  %v1557_v12 = vadd.s32 %v1556_v14, %v1555_v52 }
 0x3ff   :  { %v1601_v26 = vadd.s32 %v1600_v9, %v1599_v5  ;;  %v1689_v38 = vpop.xlane.xlu2 %1688  ;;  %v1533_v28 = vadd.s32 %v1532_v24, %v1531_v60  ;;  %v1718_v52 = vshll.u32 %v1717_v45, 16 }
 0x400   :  { %v1577_v57 = vadd.s32 %v1576_v15, %v1575_v3  ;;  %v1665_v8 = vpop.xlane.xlu1 %1664  ;;  %v1692_v21 = vcvt.f32.s32 %v1689_v38  ;;  %v1509_v29 = vadd.s32 %v1508_v56, %v1507_v11  ;;  %v1626_v48 = vrot.slane %v1625_v20, 2 }
 0x401   :  { %v1668_v19 = vcvt.f32.s32 %v1665_v8  ;;  %v1641_v58 = vpop.xlane.xlu0 %1640  ;;  %v1602_v2 = vrot.slane %v1601_v26, 2 }
 0x402   :  { %v1644_v37 = vcvt.f32.s32 %v1641_v58  ;;  %v1695_v39 = vadd.s32 %v1694_v23, %v1692_v21  ;;  %3741 = vpush %v1509_v29  ;;  %v1578_v40 = vrot.slane %v1577_v57, 2  ;;  %v1627_v42 = vadd.s32 %v1626_v48, %v1625_v20 }
 0x403   :  { %v1671_v44 = vadd.s32 %v1670_v62, %v1668_v19  ;;  %3743 = vpush %v1533_v28  ;;  %v1603_v13 = vadd.s32 %v1602_v2, %v1601_v26 }
 0x404   :  { %v1647_v30 = vadd.s32 %v1646_v35, %v1644_v37  ;;  %v1696_v43 = vrot.slane %v1695_v39, 4  ;;  %3745 = vpush %v1557_v12  ;;  %v1579_v50 = vadd.s32 %v1578_v40, %v1577_v57  ;;  %v1628_v55 = vrot.slane %v1627_v42, 1 }
 0x405   :  { %v1672_v22 = vrot.slane %v1671_v44, 4  ;;  %v1604_v47 = vrot.slane %v1603_v13, 1 }
 0x406   :  { %v1648_v34 = vrot.slane %v1647_v30, 4  ;;  %v1697_v51 = vadd.s32 %v1696_v43, %v1695_v39  ;;  %v1580_v53 = vrot.slane %v1579_v50, 1  ;;  %v1629_v1 = vadd.s32 %v1628_v55, %v1627_v42 }
 0x407   :  { %v1673_v49 = vadd.s32 %v1672_v22, %v1671_v44  ;;  %v1605_v54 = vadd.s32 %v1604_v47, %v1603_v13  ;;  %v1737_v0 = vpop.xlane.xlu2 %1736 }
 0x408   :  { %v1649_v59 = vadd.s32 %v1648_v34, %v1647_v30  ;;  %v1739_v63 = vpop.xlane.xlu1 %1738  ;;  %v1581_v31 = vadd.s32 %v1580_v53, %v1579_v50  ;;  %v1698_v33 = vrot.slane %v1697_v51, 2  ;;  %v1740_v3 = vcvt.f32.s32 %v1737_v0 }
 0x409   :  { %v1741_v32 = vcvt.f32.s32 %v1739_v63  ;;  %v1713_v25 = vpop.xlane.xlu0 %1712  ;;  %v1674_v61 = vrot.slane %v1673_v49, 2 }
 0x40a   :  { %v1716_v27 = vcvt.f32.s32 %v1713_v25  ;;  %3747 = vpush %v1581_v31  ;;  %v1650_v5 = vrot.slane %v1649_v59, 2  ;;  %v1699_v60 = vadd.s32 %v1698_v33, %v1697_v51 }
 0x40b   :  { %v1742_v36 = vshll.u32 %v1741_v32, 16  ;;  %3749 = vpush %v1605_v54  ;;  %v1675_v7 = vadd.s32 %v1674_v61, %v1673_v49 }
 0x40c   :  { %v1719_v11 = vadd.s32 %v1718_v52, %v1716_v27  ;;  %3751 = vpush %v1629_v1  ;;  %v1651_v14 = vadd.s32 %v1650_v5, %v1649_v59  ;;  %v1700_v16 = vrot.slane %v1699_v60, 1 }
 0x40d   :  { %v1743_v17 = vadd.s32 %v1742_v36, %v1740_v3  ;;  %v1676_v9 = vrot.slane %v1675_v7, 1 }
 0x40e   :  { %v1720_v24 = vrot.slane %v1719_v11, 4  ;;  %v1652_v15 = vrot.slane %v1651_v14, 1  ;;  %v1701_v38 = vadd.s32 %v1700_v16, %v1699_v60 }
 0x40f   :  { %v1744_v20 = vrot.slane %v1743_v17, 4  ;;  %v1677_v56 = vadd.s32 %v1676_v9, %v1675_v7 }
 0x410   :  { %v1721_v23 = vadd.s32 %v1720_v24, %v1719_v11  ;;  %v1653_v26 = vadd.s32 %v1652_v15, %v1651_v14 }
 0x411   :  { %v1745_v28 = vadd.s32 %v1744_v20, %v1743_v17 }
 0x412   :  { %3753 = vpush %v1653_v26  ;;  %v1722_v12 = vrot.slane %v1721_v23, 2 }
 0x413   :  { %3755 = vpush %v1677_v56  ;;  %v1746_v57 = vrot.slane %v1745_v28, 2 }
 0x414   :  { %3757 = vpush %v1701_v38  ;;  %v1723_v8 = vadd.s32 %v1722_v12, %v1721_v23 }
 0x415   :  { %v1747_v21 = vadd.s32 %v1746_v57, %v1745_v28 }
 0x416   :  { %v1724_v29 = vrot.slane %v1723_v8, 1 }
 0x417   :  { %v1748_v48 = vrot.slane %v1747_v21, 1 }
 0x418   :  { %v1725_v62 = vadd.s32 %v1724_v29, %v1723_v8 }
 0x419   :  { %v1749_v35 = vadd.s32 %v1748_v48, %v1747_v21 }
 0x41a   :  { %3759 = vpush %v1725_v62 }
 0x41b   :  { %3761 = vpush %v1749_v35 }
 0x421   :  { %s3734_s5 = spop %3733 }
 0x422   :  { %v1415_v19 = vstv %s3734_s5 }
 0x423   :  { %vm4953_vm5 = vcmp.lt.s32.totalorder %v1415_v19, %v4805_v4 }
 0x424   :  { %v1796_v2 = vsel %vm4953_vm5, %v1415_v19, 0  ;;  %v1767_v11 = vsel %vm4953_vm5, 1, %v3912_v10 }
 0x42b   :  { %s3736_s6 = spop %3735 }
 0x42c   :  { %v1439_v37 = vstv %s3736_s6  ;;  %s3738_s7 = spop %3737 }
 0x42d   :  { %vm4960_vm1 = vcmp.lt.s32.totalorder %v1439_v37, %v4805_v4  ;;  %v1463_v40 = vstv %s3738_s7  ;;  %s3740_s8 = spop %3739 }
 0x42e   :  { %v1797_v42 = vsel %vm4960_vm1, %v1439_v37, 0  ;;  %vm4967_vm10 = vcmp.lt.s32.totalorder %v1463_v40, %v4805_v4  ;;  %v1487_v13 = vstv %s3740_s8  ;;  %v1768_v38 = vsel %vm4960_vm1, 1, %v3912_v10 }
 0x42f   :  { %vm1811_vm14 = vcmp.gt.s32.totalorder %v1796_v2, %v1797_v42  ;;  %v1798_v30 = vsel %vm4967_vm10, %v1463_v40, 0  ;;  %vm4974_vm15 = vcmp.lt.s32.totalorder %v1487_v13, %v4805_v4  ;;  %v1769_v8 = vsel %vm4967_vm10, 1, %v3912_v10 }
 0x430   :  { %v1812_v43 = vsel %vm1811_vm14, %v1796_v2, %v1797_v42  ;;  %v1799_v55 = vsel %vm4974_vm15, %v1487_v13, 0  ;;  %v1770_v48 = vsel %vm4974_vm15, 1, %v3912_v10  ;;  %v1782_v39 = vadd.s32 %v1768_v38, %v1767_v11 }
 0x431   :  { %vm1813_vm0 = vcmp.gt.s32.totalorder %v1798_v30, %v1799_v55  ;;  %v1783_v42 = vadd.s32 %v1770_v48, %v1769_v8 }
 0x432   :  { %v1814_v22 = vsel %vm1813_vm0, %v1798_v30, %v1799_v55  ;;  %v1844_v30 = vshra.s32 %v3937_v6, 12 }
 0x433   :  { %s3742_s9 = spop %3741  ;;  %vm1825_vm13 = vcmp.gt.s32.totalorder %v1812_v43, %v1814_v22 }
 0x434   :  { %v1511_v47 = vstv %s3742_s9  ;;  %s3744_s10 = spop %3743  ;;  %v1826_v45 = vsel %vm1825_vm13, %v1812_v43, %v1814_v22 }
 0x435   :  { %vm4981_vm11 = vcmp.lt.s32.totalorder %v1511_v47, %v4805_v4  ;;  %v1535_v51 = vstv %s3744_s10  ;;  %s3746_s11 = spop %3745 }
 0x436   :  { %v1800_v53 = vsel %vm4981_vm11, %v1511_v47, 0  ;;  %vm4988_vm3 = vcmp.lt.s32.totalorder %v1535_v51, %v4805_v4  ;;  %v1559_v54 = vstv %s3746_s11  ;;  %v1771_v17 = vsel %vm4981_vm11, 1, %v3912_v10 }
 0x437   :  { %v1801_v59 = vsel %vm4988_vm3, %v1535_v51, 0  ;;  %vm4995_vm9 = vcmp.lt.s32.totalorder %v1559_v54, %v4805_v4  ;;  %v1772_v20 = vsel %vm4988_vm3, 1, %v3912_v10 }
 0x438   :  { %vm1815_vm12 = vcmp.gt.s32.totalorder %v1800_v53, %v1801_v59  ;;  %v1802_v0 = vsel %vm4995_vm9, %v1559_v54, 0  ;;  %v1773_v28 = vsel %vm4995_vm9, 1, %v3912_v10  ;;  %v1784_v62 = vadd.s32 %v1772_v20, %v1771_v17 }
 0x439   :  { %v1816_v31 = vsel %vm1815_vm12, %v1800_v53, %v1801_v59  ;;  %v1789_v54 = vadd.s32 %v1783_v42, %v1782_v39 }
 0x43b   :  { %s3748_s12 = spop %3747 }
 0x43c   :  { %v1583_v1 = vstv %s3748_s12  ;;  %s3750_s13 = spop %3749 }
 0x43d   :  { %vm5002_vm2 = vcmp.lt.s32.totalorder %v1583_v1, %v4805_v4  ;;  %v1607_v32 = vstv %s3750_s13  ;;  %s3752_s14 = spop %3751 }
 0x43e   :  { %v1803_v25 = vsel %vm5002_vm2, %v1583_v1, 0  ;;  %vm5009_vm7 = vcmp.lt.s32.totalorder %v1607_v32, %v4805_v4  ;;  %v1631_v52 = vstv %s3752_s14  ;;  %v1774_v9 = vsel %vm5002_vm2, 1, %v3912_v10 }
 0x43f   :  { %vm1817_vm6 = vcmp.gt.s32.totalorder %v1802_v0, %v1803_v25  ;;  %v1804_v27 = vsel %vm5009_vm7, %v1607_v32, 0  ;;  %vm5016_vm14 = vcmp.lt.s32.totalorder %v1631_v52, %v4805_v4  ;;  %v1785_v21 = vadd.s32 %v1774_v9, %v1773_v28 }
 0x440   :  { %v1818_v5 = vsel %vm1817_vm6, %v1802_v0, %v1803_v25  ;;  %v1805_v36 = vsel %vm5016_vm14, %v1631_v52, 0  ;;  %v1775_v35 = vsel %vm5009_vm7, 1, %v3912_v10  ;;  %v1776_v58 = vsel %vm5016_vm14, 1, %v3912_v10 }
 0x441   :  { %vm1827_vm0 = vcmp.gt.s32.totalorder %v1816_v31, %v1818_v5  ;;  %vm1819_vm13 = vcmp.gt.s32.totalorder %v1804_v27, %v1805_v36  ;;  %v1790_v44 = vadd.s32 %v1785_v21, %v1784_v62  ;;  %v1786_v43 = vadd.s32 %v1776_v58, %v1775_v35 }
 0x442   :  { %v1828_v3 = vsel %vm1827_vm0, %v1816_v31, %v1818_v5  ;;  %v1820_v7 = vsel %vm1819_vm13, %v1804_v27, %v1805_v36  ;;  %v5087_v31 = vand.u32 15, %v1844_v30 }
 0x443   :  { %vm1833_vm12 = vcmp.gt.s32.totalorder %v1826_v45, %v1828_v3  ;;  %s3754_s15 = spop %3753  ;;  %v1793_v1 = vadd.s32 %v1790_v44, %v1789_v54 }
 0x444   :  { %v1655_v14 = vstv %s3754_s15  ;;  %s3756_s16 = spop %3755  ;;  %v1834_v16 = vsel %vm1833_vm12, %v1826_v45, %v1828_v3  ;;  %vm1894_vm0 = vcmp.le.s32.totalorder %v5087_v31, 2  ;;  %vm1870_vm12 = vcmp.le.s32.totalorder %v5087_v31, 1 }
 0x445   :  { %vm5032_vm6 = vcmp.lt.s32.totalorder %v1655_v14, %v4805_v4  ;;  %v1679_v15 = vstv %s3756_s16  ;;  %s3758_s17 = spop %3757 }
 0x446   :  { %v1806_v56 = vsel %vm5032_vm6, %v1655_v14, 0  ;;  %vm5042_vm5 = vcmp.lt.s32.totalorder %v1679_v15, %v4805_v4  ;;  %v1703_v26 = vstv %s3758_s17  ;;  %v1777_v2 = vsel %vm5032_vm6, 1, %v3912_v10 }
 0x447   :  { %v1807_v12 = vsel %vm5042_vm5, %v1679_v15, 0  ;;  %vm5055_vm11 = vcmp.lt.s32.totalorder %v1703_v26, %v4805_v4  ;;  %v1778_v37 = vsel %vm5042_vm5, 1, %v3912_v10  ;;  %vm1846_vm5 = vcmp.le.s32.totalorder %v5087_v31, 0 }
 0x448   :  { %vm1821_vm3 = vcmp.gt.s32.totalorder %v1806_v56, %v1807_v12  ;;  %v1808_v29 = vsel %vm5055_vm11, %v1703_v26, 0  ;;  %v1787_v50 = vadd.s32 %v1778_v37, %v1777_v2  ;;  %v1779_v22 = vsel %vm5055_vm11, 1, %v3912_v10 }
 0x449   :  { %v1822_v19 = vsel %vm1821_vm3, %v1806_v56, %v1807_v12  ;;  %vm1966_vm3 = vcmp.le.s32.totalorder %v5087_v31, 5 }
 0x44a   :  { %vm1829_vm1 = vcmp.gt.s32.totalorder %v1820_v7, %v1822_v19  ;;  %v1791_v59 = vadd.s32 %v1787_v50, %v1786_v43 }
 0x44b   :  { %s3760_s18 = spop %3759  ;;  %v1830_v40 = vsel %vm1829_vm1, %v1820_v7, %v1822_v19 }
 0x44c   :  { %v1727_v13 = vstv %s3760_s18  ;;  %s3762_s0 = spop %3761 }
 0x44d   :  { %vm1765_vm10 = vcmp.lt.s32.totalorder %v1727_v13, %v4805_v4  ;;  %v1751_v55 = vstv %s3762_s0 }
 0x44e   :  { %v1780_v47 = vsel %vm1765_vm10, 1, %v3912_v10  ;;  %v1809_v45 = vsel %vm1765_vm10, %v1727_v13, 0  ;;  %vm1766_vm15 = vcmp.lt.s32.totalorder %v1751_v55, %v4805_v4 }
 0x44f   :  { %v1788_v34 = vadd.s32 %v1780_v47, %v1779_v22  ;;  %vm1823_vm9 = vcmp.gt.s32.totalorder %v1808_v29, %v1809_v45  ;;  %v1781_v51 = vsel %vm1766_vm15, 1, %v3912_v10  ;;  %v1810_v53 = vsel %vm1766_vm15, %v1751_v55, 0 }
 0x450   :  { %v1824_v49 = vsel %vm1823_vm9, %v1808_v29, %v1809_v45  ;;  %vm1918_vm15 = vcmp.le.s32.totalorder %v5087_v31, 3 }
 0x451   :  { %v1792_v63 = vadd.s32 %v1788_v34, %v1781_v51  ;;  %vm1831_vm2 = vcmp.gt.s32.totalorder %v1824_v49, %v1810_v53 }
 0x452   :  { %v1832_v0 = vsel %vm1831_vm2, %v1824_v49, %v1810_v53 }
 0x453   :  { %v1794_v33 = vadd.s32 %v1792_v63, %v1791_v59  ;;  %vm1835_vm7 = vcmp.gt.s32.totalorder %v1830_v40, %v1832_v0 }
 0x454   :  { %v1836_v32 = vsel %vm1835_vm7, %v1830_v40, %v1832_v0 }
 0x455   :  { %v1795_v25 = vadd.s32 %v1794_v33, %v1793_v1  ;;  %vm1837_vm14 = vcmp.gt.s32.totalorder %v1834_v16, %v1836_v32 }
 0x456   :  { %v1838_v61 = vsel %vm1837_vm14, %v1834_v16, %v1836_v32  ;;  %vm2038_vm14 = vcmp.le.s32.totalorder %v5087_v31, 8 }
 0x457   :  { %v5091_v52 = vsub.s32 %v4805_v4, %v1838_v61  ;;  %v1840_v27 = vshll.u32 %v1795_v25, 16  ;;  %vm1842_vm13 = vcmp.eq.s32.totalorder %v4801_v18, %v1795_v25 }
 0x458   :  { %vm5097_vm6 = vmand %vm4811_vm8, %vm1842_vm13  ;;  %vm1942_vm8 = vcmp.le.s32.totalorder %v5087_v31, 4  ;;  %vm1990_vm13 = vcmp.le.s32.totalorder %v5087_v31, 6 }
 0x459   :  { %v5103_v60 = vor.u32 %v1840_v27, %v4817_v41  ;;  %vm1895_vm11 = vmand %vm5097_vm6, %vm1894_vm0  ;;  %vm2014_vm0 = vcmp.le.s32.totalorder %v5087_v31, 7 }
 0x45a   :  { %v1896_v18 = vsel %vm1895_vm11, 1, %v3912_v10  ;;  %vm1871_vm1 = vmand %vm5097_vm6, %vm1870_vm12 }
 0x45b   :  { %v5113_v4 = vsel %vm33_vm4, %v1896_v18, 0  ;;  %v1872_v46 = vsel %vm1871_vm1, 1, %v3912_v10  ;;  %vm1847_vm10 = vmand %vm5097_vm6, %vm1846_vm5  ;;  %vm2086_vm1 = vcmp.le.s32.totalorder %v5087_v31, 10 }
 0x45c   :  { %v1899_v41 = vshrl.u32 %v5113_v4, 16  ;;  %v5121_v36 = vsel %vm33_vm4, %v1872_v46, 0  ;;  %v1848_v3 = vsel %vm1847_vm10, 1, %v3912_v10  ;;  %vm1967_vm9 = vmand %vm5097_vm6, %vm1966_vm3  ;;  %vm2110_vm3 = vcmp.le.s32.totalorder %v5087_v31, 11 }
 0x45d   :  { %v1875_v7 = vshrl.u32 %v5121_v36, 16  ;;  %v5128_v11 = vsel %vm33_vm4, %v1848_v3, 0  ;;  %v1968_v14 = vsel %vm1967_vm9, 1, %v3912_v10  ;;  %vm1943_vm2 = vmand %vm5097_vm6, %vm1942_vm8  ;;  %vm2062_vm8 = vcmp.le.s32.totalorder %v5087_v31, 9 }
 0x45e   :  { %v1901_v16 = vcvt.s32.f32 %v1899_v41  ;;  %v1851_v17 = vshrl.u32 %v5128_v11, 16  ;;  %v1944_v9 = vsel %vm1943_vm2, 1, %v3912_v10  ;;  %vm1919_vm7 = vmand %vm5097_vm6, %vm1918_vm15  ;;  %v5139_v15 = vsel %vm33_vm4, %v1968_v14, 0 }
 0x45f   :  { %v1877_v24 = vcvt.s32.f32 %v1875_v7  ;;  %v1920_v20 = vsel %vm1919_vm7, 1, %v3912_v10  ;;  %v5144_v23 = vsel %vm33_vm4, %v1944_v9, 0  ;;  %vm2039_vm12 = vmand %vm5097_vm6, %vm2038_vm14  ;;  %v1971_v38 = vshrl.u32 %v5139_v15, 16 }
 0x460   :  { %1904 = vadd.xlane.f32.xlu2 %v1901_v16  ;;  %v1853_v56 = vcvt.s32.f32 %v1851_v17  ;;  %v5148_v26 = vsel %vm33_vm4, %v1920_v20, 0  ;;  %vm2015_vm5 = vmand %vm5097_vm6, %vm2014_vm0  ;;  %v1947_v28 = vshrl.u32 %v5144_v23, 16  ;;  %v2040_v57 = vsel %vm2039_vm12, 1, %v3912_v10 }
 0x461   :  { %1880 = vadd.xlane.f32.xlu1 %v1877_v24  ;;  %vm1991_vm11 = vmand %vm5097_vm6, %vm1990_vm13  ;;  %v1923_v12 = vshrl.u32 %v5148_v26, 16  ;;  %v2016_v8 = vsel %vm2015_vm5, 1, %v3912_v10  ;;  %v1973_v21 = vcvt.s32.f32 %v1971_v38  ;;  %v5164_v62 = vsel %vm33_vm4, %v2040_v57, 0 }
 0x462   :  { %1856 = vadd.xlane.f32.xlu0 %v1853_v56  ;;  %v1992_v29 = vsel %vm1991_vm11, 1, %v3912_v10  ;;  %v1949_v48 = vcvt.s32.f32 %v1947_v28  ;;  %v5168_v19 = vsel %vm33_vm4, %v2016_v8, 0  ;;  %vm2111_vm10 = vmand %vm5097_vm6, %vm2110_vm3  ;;  %v2043_v2 = vshrl.u32 %v5164_v62, 16 }
 0x463   :  { %v1925_v35 = vcvt.s32.f32 %v1923_v12  ;;  %v1993_v58 = vsel %vm33_vm4, %v1992_v29, 0  ;;  %vm2087_vm15 = vmand %vm5097_vm6, %vm2086_vm1  ;;  %v2019_v37 = vshrl.u32 %v5168_v19, 16  ;;  %v2112_v40 = vsel %vm2111_vm10, 1, %v3912_v10 }
 0x464   :  { %vm2063_vm9 = vmand %vm5097_vm6, %vm2062_vm8  ;;  %v1995_v39 = vshrl.u32 %v1993_v58, 16  ;;  %v2088_v42 = vsel %vm2087_vm15, 1, %v3912_v10  ;;  %v2045_v44 = vcvt.s32.f32 %v2043_v2  ;;  %v5184_v43 = vsel %vm33_vm4, %v2112_v40, 0 }
 0x465   :  { %v2064_v13 = vsel %vm2063_vm9, 1, %v3912_v10  ;;  %v2021_v30 = vcvt.s32.f32 %v2019_v37  ;;  %vm2158_vm2 = vcmp.le.s32.totalorder %v5087_v31, 13  ;;  %v5188_v55 = vsel %vm33_vm4, %v2088_v42, 0 }
 0x466   :  { %v1997_v50 = vcvt.s32.f32 %v1995_v39  ;;  %vm2134_vm7 = vcmp.le.s32.totalorder %v5087_v31, 12  ;;  %v2065_v22 = vsel %vm33_vm4, %v2064_v13, 0  ;;  %v2115_v47 = vshrl.u32 %v5184_v43, 16  ;;  %vm2159_vm14 = vmand %vm5097_vm6, %vm2158_vm2 }
 0x467   :  { %v2091_v45 = vshrl.u32 %v5188_v55, 16  ;;  %vm2135_vm0 = vmand %vm5097_vm6, %vm2134_vm7  ;;  %v2067_v34 = vshrl.u32 %v2065_v22, 16  ;;  %v2160_v51 = vsel %vm2159_vm14, 1, %v3912_v10  ;;  %v1850_v1 = vand.u32 65535, %v5128_v11 }
 0x468   :  { %1976 = vadd.xlane.f32.xlu2 %v1973_v21  ;;  %v2117_v53 = vcvt.s32.f32 %v2115_v47  ;;  %v2136_v49 = vsel %vm2135_vm0, 1, %v3912_v10  ;;  %v2161_v63 = vsel %vm33_vm4, %v2160_v51, 0  ;;  %v1922_v18 = vand.u32 65535, %v5148_v26 }
 0x469   :  { %1952 = vadd.xlane.f32.xlu1 %v1949_v48  ;;  %v2093_v54 = vcvt.s32.f32 %v2091_v45  ;;  %v2069_v59 = vcvt.s32.f32 %v2067_v34  ;;  %v2137_v0 = vsel %vm33_vm4, %v2136_v49, 0  ;;  %v2163_v33 = vshrl.u32 %v2161_v63, 16 }
 0x46a   :  { %1928 = vadd.xlane.f32.xlu0 %v1925_v35  ;;  %v2139_v32 = vshrl.u32 %v2137_v0, 16  ;;  %v1852_v25 = vcvt.s32.f32 %v1850_v1  ;;  %v1898_v46 = vand.u32 65535, %v5113_v4  ;;  %v1874_v41 = vand.u32 65535, %v5121_v36 }
 0x46b   :  { %v2165_v61 = vcvt.s32.f32 %v2163_v33  ;;  %v1924_v3 = vcvt.s32.f32 %v1922_v18  ;;  %v1994_v11 = vand.u32 65535, %v1993_v58  ;;  %v1970_v16 = vand.u32 65535, %v5139_v15 }
 0x46c   :  { %v2141_v27 = vcvt.s32.f32 %v2139_v32  ;;  %v1900_v7 = vcvt.s32.f32 %v1898_v46  ;;  %v1876_v14 = vcvt.s32.f32 %v1874_v41  ;;  %v1946_v17 = vand.u32 65535, %v5144_v23 }
 0x46d   :  { %v1996_v9 = vcvt.s32.f32 %v1994_v11  ;;  %v1972_v24 = vcvt.s32.f32 %v1970_v16  ;;  %v2066_v4 = vand.u32 65535, %v2065_v22  ;;  %v2042_v36 = vand.u32 65535, %v5164_v62 }
 0x46e   :  { %v1948_v20 = vcvt.s32.f32 %v1946_v17  ;;  %v2018_v56 = vand.u32 65535, %v5168_v19  ;;  %vm2182_vm13 = vcmp.le.s32.totalorder %v5087_v31, 14  ;;  %v2138_v15 = vand.u32 65535, %v2137_v0 }
 0x46f   :  { %v2068_v26 = vcvt.s32.f32 %v2066_v4  ;;  %v2044_v38 = vcvt.s32.f32 %v2042_v36  ;;  %vm2183_vm12 = vmand %vm5097_vm6, %vm2182_vm13  ;;  %v2114_v23 = vand.u32 65535, %v5184_v43  ;;  %v2090_v12 = vand.u32 65535, %v5188_v55 }
 0x470   :  { %2048 = vadd.xlane.f32.xlu2 %v2045_v44  ;;  %v2020_v28 = vcvt.s32.f32 %v2018_v56  ;;  %v2184_v57 = vsel %vm2183_vm12, 1, %v3912_v10  ;;  %v2140_v8 = vcvt.s32.f32 %v2138_v15  ;;  %v2162_v19 = vand.u32 65535, %v2161_v63 }
 0x471   :  { %2024 = vadd.xlane.f32.xlu1 %v2021_v30  ;;  %v2116_v21 = vcvt.s32.f32 %v2114_v23  ;;  %v2185_v29 = vsel %vm33_vm4, %v2184_v57, 0  ;;  %v2092_v48 = vcvt.s32.f32 %v2090_v12 }
 0x472   :  { %2000 = vadd.xlane.f32.xlu0 %v1997_v50  ;;  %v2186_v62 = vand.u32 65535, %v2185_v29  ;;  %v2187_v35 = vshrl.u32 %v2185_v29, 16  ;;  %v2164_v37 = vcvt.s32.f32 %v2162_v19 }
 0x474   :  { %v2188_v58 = vcvt.s32.f32 %v2186_v62  ;;  %v2189_v2 = vcvt.s32.f32 %v2187_v35 }
 0x478   :  { %2120 = vadd.xlane.f32.xlu2 %v2117_v53 }
 0x479   :  { %2096 = vadd.xlane.f32.xlu1 %v2093_v54 }
 0x47a   :  { %2072 = vadd.xlane.f32.xlu0 %v2069_v59 }
 0x480   :  { %1854 = vadd.xlane.f32.xlu2 %v1852_v25 }
 0x481   :  { %2168 = vadd.xlane.f32.xlu1 %v2165_v61 }
 0x482   :  { %2144 = vadd.xlane.f32.xlu0 %v2141_v27 }
 0x488   :  { %1926 = vadd.xlane.f32.xlu2 %v1924_v3 }
 0x489   :  { %1902 = vadd.xlane.f32.xlu1 %v1900_v7 }
 0x48a   :  { %1878 = vadd.xlane.f32.xlu0 %v1876_v14 }
 0x490   :  { %1998 = vadd.xlane.f32.xlu2 %v1996_v9 }
 0x491   :  { %1974 = vadd.xlane.f32.xlu1 %v1972_v24 }
 0x492   :  { %1950 = vadd.xlane.f32.xlu0 %v1948_v20 }
 0x498   :  { %2070 = vadd.xlane.f32.xlu2 %v2068_v26 }
 0x499   :  { %2046 = vadd.xlane.f32.xlu1 %v2044_v38 }
 0x49a   :  { %2022 = vadd.xlane.f32.xlu0 %v2020_v28 }
 0x4a0   :  { %2142 = vadd.xlane.f32.xlu2 %v2140_v8 }
 0x4a1   :  { %2118 = vadd.xlane.f32.xlu1 %v2116_v21 }
 0x4a2   :  { %2094 = vadd.xlane.f32.xlu0 %v2092_v48 }
 0x4a8   :  { %2190 = vadd.xlane.f32.xlu2 %v2188_v58 }
 0x4a9   :  { %2192 = vadd.xlane.f32.xlu1 %v2189_v2 }
 0x4aa   :  { %2166 = vadd.xlane.f32.xlu0 %v2164_v37 }
 0x4d3   :  { %v1905_v39 = vpop.xlane.xlu2 %1904 }
 0x4d4   :  { %v1881_v40 = vpop.xlane.xlu1 %1880  ;;  %v1907_v33 = vcvt.f32.s32 %v1905_v39 }
 0x4d5   :  { %v1857_v42 = vpop.xlane.xlu0 %1856  ;;  %v1883_v32 = vcvt.f32.s32 %v1881_v40 }
 0x4d6   :  { %v1859_v34 = vcvt.f32.s32 %v1857_v42  ;;  %v1908_v3 = vshll.u32 %v1907_v33, 16 }
 0x4d7   :  { %v1884_v11 = vshll.u32 %v1883_v32, 16 }
 0x4d8   :  { %v1860_v53 = vshll.u32 %v1859_v34, 16 }
 0x4db   :  { %v1977_v44 = vpop.xlane.xlu2 %1976 }
 0x4dc   :  { %v1953_v13 = vpop.xlane.xlu1 %1952  ;;  %v1979_v26 = vcvt.f32.s32 %v1977_v44 }
 0x4dd   :  { %v1929_v30 = vpop.xlane.xlu0 %1928  ;;  %v1955_v38 = vcvt.f32.s32 %v1953_v13 }
 0x4de   :  { %v1931_v0 = vcvt.f32.s32 %v1929_v30  ;;  %v1980_v19 = vshll.u32 %v1979_v26, 16 }
 0x4df   :  { %v1956_v58 = vshll.u32 %v1955_v38, 16 }
 0x4e0   :  { %v1932_v27 = vshll.u32 %v1931_v0, 16 }
 0x4e3   :  { %v5217_v43 = vpop.xlane.xlu2 %2048 }
 0x4e4   :  { %v5219_v50 = vpop.xlane.xlu1 %2024  ;;  %v2051_v0 = vcvt.f32.s32 %v5217_v43 }
 0x4e5   :  { %v2001_v55 = vpop.xlane.xlu0 %2000 }
 0x4e6   :  { %v2003_v20 = vcvt.f32.s32 %v2001_v55 }
 0x4e8   :  { %v2004_v21 = vshll.u32 %v2003_v20, 16 }
 0x4eb   :  { %v5221_v22 = vpop.xlane.xlu2 %2120 }
 0x4ec   :  { %v5223_v47 = vpop.xlane.xlu1 %2096 }
 0x4ed   :  { %v5225_v45 = vpop.xlane.xlu0 %2072 }
 0x4ee   :  { %v2075_v30 = vcvt.f32.s32 %v5225_v45 }
 0x4f3   :  { %v1855_v51 = vpop.xlane.xlu2 %1854 }
 0x4f4   :  { %v5227_v49 = vpop.xlane.xlu1 %2168  ;;  %v1858_v54 = vcvt.f32.s32 %v1855_v51 }
 0x4f5   :  { %v5229_v59 = vpop.xlane.xlu0 %2144 }
 0x4f6   :  { %v1861_v63 = vadd.s32 %v1860_v53, %v1858_v54  ;;  %v2147_v38 = vcvt.f32.s32 %v5229_v59 }
 0x4f8   :  { %v1862_v1 = vrot.slane %v1861_v63, 4 }
 0x4fa   :  { %v1863_v25 = vadd.s32 %v1862_v1, %v1861_v63  ;;  %v2027_v1 = vcvt.f32.s32 %v5219_v50 }
 0x4fb   :  { %v1927_v61 = vpop.xlane.xlu2 %1926 }
 0x4fc   :  { %v1903_v18 = vpop.xlane.xlu1 %1902  ;;  %v1930_v46 = vcvt.f32.s32 %v1927_v61  ;;  %v1864_v41 = vrot.slane %v1863_v25, 2 }
 0x4fd   :  { %v1906_v7 = vcvt.f32.s32 %v1903_v18  ;;  %v1879_v14 = vpop.xlane.xlu0 %1878  ;;  %v2076_v18 = vshll.u32 %v2075_v30, 16 }
 0x4fe   :  { %v1882_v16 = vcvt.f32.s32 %v1879_v14  ;;  %v1933_v17 = vadd.s32 %v1932_v27, %v1930_v46  ;;  %v1865_v9 = vadd.s32 %v1864_v41, %v1863_v25 }
 0x4ff   :  { %v1909_v24 = vadd.s32 %v1908_v3, %v1906_v7 }
 0x500   :  { %v1885_v4 = vadd.s32 %v1884_v11, %v1882_v16  ;;  %v1934_v36 = vrot.slane %v1933_v17, 4  ;;  %v1866_v56 = vrot.slane %v1865_v9, 1 }
 0x501   :  { %v1910_v28 = vrot.slane %v1909_v24, 4 }
 0x502   :  { %v1886_v15 = vrot.slane %v1885_v4, 4  ;;  %v1935_v23 = vadd.s32 %v1934_v36, %v1933_v17  ;;  %v1867_v12 = vadd.s32 %v1866_v56, %v1865_v9  ;;  %v2052_v9 = vshll.u32 %v2051_v0, 16 }
 0x503   :  { %v1911_v57 = vadd.s32 %v1910_v28, %v1909_v24  ;;  %v1999_v8 = vpop.xlane.xlu2 %1998  ;;  %v2028_v24 = vshll.u32 %v2027_v1, 16 }
 0x504   :  { %v1887_v29 = vadd.s32 %v1886_v15, %v1885_v4  ;;  %v1975_v48 = vpop.xlane.xlu1 %1974  ;;  %v2002_v62 = vcvt.f32.s32 %v1999_v8  ;;  %3763 = vpush %v1867_v12  ;;  %v1936_v35 = vrot.slane %v1935_v23, 2 }
 0x505   :  { %v1978_v2 = vcvt.f32.s32 %v1975_v48  ;;  %v1951_v37 = vpop.xlane.xlu0 %1950  ;;  %v1912_v39 = vrot.slane %v1911_v57, 2 }
 0x506   :  { %v1954_v40 = vcvt.f32.s32 %v1951_v37  ;;  %v2005_v42 = vadd.s32 %v2004_v21, %v2002_v62  ;;  %v1888_v44 = vrot.slane %v1887_v29, 2  ;;  %v1937_v13 = vadd.s32 %v1936_v35, %v1935_v23 }
 0x507   :  { %v1981_v55 = vadd.s32 %v1980_v19, %v1978_v2  ;;  %v1913_v34 = vadd.s32 %v1912_v39, %v1911_v57  ;;  %v2123_v21 = vcvt.f32.s32 %v5221_v22  ;;  %v2148_v2 = vshll.u32 %v2147_v38, 16 }
 0x508   :  { %v1957_v51 = vadd.s32 %v1956_v58, %v1954_v40  ;;  %v2006_v53 = vrot.slane %v2005_v42, 4  ;;  %v1889_v54 = vadd.s32 %v1888_v44, %v1887_v29  ;;  %v1938_v63 = vrot.slane %v1937_v13, 1 }
 0x509   :  { %v1982_v33 = vrot.slane %v1981_v55, 4  ;;  %v1914_v32 = vrot.slane %v1913_v34, 1  ;;  %v2099_v29 = vcvt.f32.s32 %v5223_v47 }
 0x50a   :  { %v1958_v25 = vrot.slane %v1957_v51, 4  ;;  %v2007_v61 = vadd.s32 %v2006_v53, %v2005_v42  ;;  %v1890_v27 = vrot.slane %v1889_v54, 1  ;;  %v1939_v45 = vadd.s32 %v1938_v63, %v1937_v13 }
 0x50b   :  { %v1983_v46 = vadd.s32 %v1982_v33, %v1981_v55  ;;  %v2071_v41 = vpop.xlane.xlu2 %2070  ;;  %v1915_v3 = vadd.s32 %v1914_v32, %v1913_v34  ;;  %v2124_v34 = vshll.u32 %v2123_v21, 16 }
 0x50c   :  { %v1959_v7 = vadd.s32 %v1958_v25, %v1957_v51  ;;  %v2047_v14 = vpop.xlane.xlu1 %2046  ;;  %v2074_v11 = vcvt.f32.s32 %v2071_v41  ;;  %v1891_v16 = vadd.s32 %v1890_v27, %v1889_v54  ;;  %v2008_v17 = vrot.slane %v2007_v61, 2 }
 0x50d   :  { %v2050_v43 = vcvt.f32.s32 %v2047_v14  ;;  %v2023_v20 = vpop.xlane.xlu0 %2022  ;;  %v1984_v50 = vrot.slane %v1983_v46, 2  ;;  %v2100_v51 = vshll.u32 %v2099_v29, 16 }
 0x50e   :  { %v2026_v4 = vcvt.f32.s32 %v2023_v20  ;;  %v2077_v36 = vadd.s32 %v2076_v18, %v2074_v11  ;;  %3765 = vpush %v1891_v16  ;;  %v1960_v56 = vrot.slane %v1959_v7, 2  ;;  %v2009_v26 = vadd.s32 %v2008_v17, %v2007_v61 }
 0x50f   :  { %v2053_v28 = vadd.s32 %v2052_v9, %v2050_v43  ;;  %3767 = vpush %v1915_v3  ;;  %v1985_v15 = vadd.s32 %v1984_v50, %v1983_v46  ;;  %v2171_v3 = vcvt.f32.s32 %v5227_v49 }
 0x510   :  { %v2029_v23 = vadd.s32 %v2028_v24, %v2026_v4  ;;  %v2078_v12 = vrot.slane %v2077_v36, 4  ;;  %3769 = vpush %v1939_v45  ;;  %v1961_v57 = vadd.s32 %v1960_v56, %v1959_v7  ;;  %v2010_v8 = vrot.slane %v2009_v26, 1 }
 0x511   :  { %v2054_v48 = vrot.slane %v2053_v28, 4  ;;  %v1986_v62 = vrot.slane %v1985_v15, 1 }
 0x512   :  { %v2030_v35 = vrot.slane %v2029_v23, 4  ;;  %v2079_v19 = vadd.s32 %v2078_v12, %v2077_v36  ;;  %v1962_v58 = vrot.slane %v1961_v57, 1  ;;  %v2011_v40 = vadd.s32 %v2010_v8, %v2009_v26 }
 0x513   :  { %v2055_v37 = vadd.s32 %v2054_v48, %v2053_v28  ;;  %v2143_v59 = vpop.xlane.xlu2 %2142  ;;  %v1987_v39 = vadd.s32 %v1986_v62, %v1985_v15  ;;  %v2172_v26 = vshll.u32 %v2171_v3, 16 }
 0x514   :  { %v2031_v42 = vadd.s32 %v2030_v35, %v2029_v23  ;;  %v2119_v44 = vpop.xlane.xlu1 %2118  ;;  %v2146_v13 = vcvt.f32.s32 %v2143_v59  ;;  %v1963_v30 = vadd.s32 %v1962_v58, %v1961_v57  ;;  %v2080_v55 = vrot.slane %v2079_v19, 2 }
 0x515   :  { %v2122_v22 = vcvt.f32.s32 %v2119_v44  ;;  %v2095_v53 = vpop.xlane.xlu0 %2094  ;;  %v2056_v47 = vrot.slane %v2055_v37, 2 }
 0x516   :  { %v2098_v54 = vcvt.f32.s32 %v2095_v53  ;;  %v2149_v63 = vadd.s32 %v2148_v2, %v2146_v13  ;;  %3771 = vpush %v1963_v30  ;;  %v2032_v0 = vrot.slane %v2031_v42, 2  ;;  %v2081_v1 = vadd.s32 %v2080_v55, %v2079_v19 }
 0x517   :  { %v2125_v33 = vadd.s32 %v2124_v34, %v2122_v22  ;;  %3773 = vpush %v1987_v39  ;;  %v2057_v32 = vadd.s32 %v2056_v47, %v2055_v37 }
 0x518   :  { %v2101_v25 = vadd.s32 %v2100_v51, %v2098_v54  ;;  %v2150_v61 = vrot.slane %v2149_v63, 4  ;;  %3775 = vpush %v2011_v40  ;;  %v2033_v27 = vadd.s32 %v2032_v0, %v2031_v42  ;;  %v2082_v18 = vrot.slane %v2081_v1, 1 }
 0x519   :  { %v2126_v46 = vrot.slane %v2125_v33, 4  ;;  %v2058_v41 = vrot.slane %v2057_v32, 1 }
 0x51a   :  { %v2102_v45 = vrot.slane %v2101_v25, 4  ;;  %v2151_v7 = vadd.s32 %v2150_v61, %v2149_v63  ;;  %v2034_v14 = vrot.slane %v2033_v27, 1  ;;  %v2083_v20 = vadd.s32 %v2082_v18, %v2081_v1 }
 0x51b   :  { %v2127_v11 = vadd.s32 %v2126_v46, %v2125_v33  ;;  %v2059_v16 = vadd.s32 %v2058_v41, %v2057_v32  ;;  %v2191_v24 = vpop.xlane.xlu2 %2190 }
 0x51c   :  { %v2103_v17 = vadd.s32 %v2102_v45, %v2101_v25  ;;  %v2193_v9 = vpop.xlane.xlu1 %2192  ;;  %v2035_v43 = vadd.s32 %v2034_v14, %v2033_v27  ;;  %v2152_v50 = vrot.slane %v2151_v7, 2  ;;  %v2194_v23 = vcvt.f32.s32 %v2191_v24 }
 0x51d   :  { %v2195_v4 = vcvt.f32.s32 %v2193_v9  ;;  %v2167_v36 = vpop.xlane.xlu0 %2166  ;;  %v2128_v56 = vrot.slane %v2127_v11, 2 }
 0x51e   :  { %v2170_v38 = vcvt.f32.s32 %v2167_v36  ;;  %3777 = vpush %v2035_v43  ;;  %v2104_v28 = vrot.slane %v2103_v17, 2  ;;  %v2153_v15 = vadd.s32 %v2152_v50, %v2151_v7 }
 0x51f   :  { %v2196_v49 = vshll.u32 %v2195_v4, 16  ;;  %3779 = vpush %v2059_v16  ;;  %v2129_v12 = vadd.s32 %v2128_v56, %v2127_v11 }
 0x520   :  { %v2173_v57 = vadd.s32 %v2172_v26, %v2170_v38  ;;  %3781 = vpush %v2083_v20  ;;  %v2105_v8 = vadd.s32 %v2104_v28, %v2103_v17  ;;  %v2154_v21 = vrot.slane %v2153_v15, 1 }
 0x521   :  { %v2197_v29 = vadd.s32 %v2196_v49, %v2194_v23  ;;  %v2130_v48 = vrot.slane %v2129_v12, 1 }
 0x522   :  { %v2174_v62 = vrot.slane %v2173_v57, 4  ;;  %v2106_v35 = vrot.slane %v2105_v8, 1  ;;  %v2155_v59 = vadd.s32 %v2154_v21, %v2153_v15 }
 0x523   :  { %v2198_v19 = vrot.slane %v2197_v29, 4  ;;  %v2131_v58 = vadd.s32 %v2130_v48, %v2129_v12 }
 0x524   :  { %v2175_v2 = vadd.s32 %v2174_v62, %v2173_v57  ;;  %v2107_v37 = vadd.s32 %v2106_v35, %v2105_v8 }
 0x525   :  { %v2199_v39 = vadd.s32 %v2198_v19, %v2197_v29 }
 0x526   :  { %3783 = vpush %v2107_v37  ;;  %v2176_v40 = vrot.slane %v2175_v2, 2 }
 0x527   :  { %3785 = vpush %v2131_v58  ;;  %v2200_v42 = vrot.slane %v2199_v39, 2 }
 0x528   :  { %3787 = vpush %v2155_v59  ;;  %v2177_v44 = vadd.s32 %v2176_v40, %v2175_v2 }
 0x529   :  { %v2201_v13 = vadd.s32 %v2200_v42, %v2199_v39 }
 0x52a   :  { %v2178_v30 = vrot.slane %v2177_v44, 1 }
 0x52b   :  { %v2202_v55 = vrot.slane %v2201_v13, 1 }
 0x52c   :  { %v2179_v34 = vadd.s32 %v2178_v30, %v2177_v44 }
 0x52d   :  { %v2203_v51 = vadd.s32 %v2202_v55, %v2201_v13 }
 0x52e   :  { %3789 = vpush %v2179_v34 }
 0x52f   :  { %3791 = vpush %v2203_v51 }
 0x535   :  { %s3764_s19 = spop %3763 }
 0x536   :  { %v1869_v22 = vstv %s3764_s19 }
 0x537   :  { %vm5239_vm5 = vcmp.lt.s32.totalorder %v1869_v22, %v5091_v52 }
 0x538   :  { %v2250_v47 = vsel %vm5239_vm5, %v1869_v22, 0  ;;  %v2221_v57 = vsel %vm5239_vm5, 1, %v3912_v10 }
 0x53f   :  { %s3766_s20 = spop %3765 }
 0x540   :  { %v1893_v54 = vstv %s3766_s20  ;;  %s3768_s21 = spop %3767 }
 0x541   :  { %vm5246_vm11 = vcmp.lt.s32.totalorder %v1893_v54, %v5091_v52  ;;  %v1917_v0 = vstv %s3768_s21  ;;  %s3770_s22 = spop %3769 }
 0x542   :  { %v2251_v1 = vsel %vm5246_vm11, %v1893_v54, 0  ;;  %vm5253_vm3 = vcmp.lt.s32.totalorder %v1917_v0, %v5091_v52  ;;  %v1941_v32 = vstv %s3770_s22  ;;  %v2222_v59 = vsel %vm5246_vm11, 1, %v3912_v10 }
 0x543   :  { %vm2265_vm1 = vcmp.gt.s32.totalorder %v2250_v47, %v2251_v1  ;;  %v2252_v25 = vsel %vm5253_vm3, %v1917_v0, 0  ;;  %vm5260_vm8 = vcmp.lt.s32.totalorder %v1941_v32, %v5091_v52  ;;  %v2223_v44 = vsel %vm5253_vm3, 1, %v3912_v10 }
 0x544   :  { %v2266_v61 = vsel %vm2265_vm1, %v2250_v47, %v2251_v1  ;;  %v2253_v18 = vsel %vm5260_vm8, %v1941_v32, 0  ;;  %v2224_v55 = vsel %vm5260_vm8, 1, %v3912_v10  ;;  %v2236_v63 = vadd.s32 %v2222_v59, %v2221_v57 }
 0x545   :  { %vm2267_vm10 = vcmp.gt.s32.totalorder %v2252_v25, %v2253_v18  ;;  %v2237_v1 = vadd.s32 %v2224_v55, %v2223_v44 }
 0x546   :  { %v2268_v46 = vsel %vm2267_vm10, %v2252_v25, %v2253_v18  ;;  %v2298_v25 = vshra.s32 %v3937_v6, 8 }
 0x547   :  { %s3772_s23 = spop %3771  ;;  %vm2279_vm15 = vcmp.gt.s32.totalorder %v2266_v61, %v2268_v46 }
 0x548   :  { %v1965_v41 = vstv %s3772_s23  ;;  %s3774_s24 = spop %3773  ;;  %v2280_v3 = vsel %vm2279_vm15, %v2266_v61, %v2268_v46 }
 0x549   :  { %vm5267_vm9 = vcmp.lt.s32.totalorder %v1965_v41, %v5091_v52  ;;  %v1989_v7 = vstv %s3774_s24  ;;  %s3776_s25 = spop %3775 }
 0x54a   :  { %v2254_v14 = vsel %vm5267_vm9, %v1965_v41, 0  ;;  %vm5274_vm2 = vcmp.lt.s32.totalorder %v1989_v7, %v5091_v52  ;;  %v2013_v16 = vstv %s3776_s25  ;;  %v2225_v29 = vsel %vm5267_vm9, 1, %v3912_v10 }
 0x54b   :  { %v2255_v17 = vsel %vm5274_vm2, %v1989_v7, 0  ;;  %vm5281_vm7 = vcmp.lt.s32.totalorder %v2013_v16, %v5091_v52  ;;  %v2226_v19 = vsel %vm5274_vm2, 1, %v3912_v10 }
 0x54c   :  { %vm2269_vm14 = vcmp.gt.s32.totalorder %v2254_v14, %v2255_v17  ;;  %v2256_v24 = vsel %vm5281_vm7, %v2013_v16, 0  ;;  %v2227_v39 = vsel %vm5281_vm7, 1, %v3912_v10  ;;  %v2238_v34 = vadd.s32 %v2226_v19, %v2225_v29 }
 0x54d   :  { %v2270_v43 = vsel %vm2269_vm14, %v2254_v14, %v2255_v17  ;;  %v2243_v16 = vadd.s32 %v2237_v1, %v2236_v63 }
 0x54f   :  { %s3778_s26 = spop %3777 }
 0x550   :  { %v2037_v20 = vstv %s3778_s26  ;;  %s3780_s27 = spop %3779 }
 0x551   :  { %vm5288_vm0 = vcmp.lt.s32.totalorder %v2037_v20, %v5091_v52  ;;  %v2061_v4 = vstv %s3780_s27  ;;  %s3782_s28 = spop %3781 }
 0x552   :  { %v2257_v36 = vsel %vm5288_vm0, %v2037_v20, 0  ;;  %vm5295_vm13 = vcmp.lt.s32.totalorder %v2061_v4, %v5091_v52  ;;  %v2085_v26 = vstv %s3782_s28  ;;  %v2228_v48 = vsel %vm5288_vm0, 1, %v3912_v10 }
 0x553   :  { %vm2271_vm12 = vcmp.gt.s32.totalorder %v2256_v24, %v2257_v36  ;;  %v2258_v38 = vsel %vm5295_vm13, %v2061_v4, 0  ;;  %vm5302_vm1 = vcmp.lt.s32.totalorder %v2085_v26, %v5091_v52  ;;  %v2239_v13 = vadd.s32 %v2228_v48, %v2227_v39 }
 0x554   :  { %v2272_v28 = vsel %vm2271_vm12, %v2256_v24, %v2257_v36  ;;  %v2259_v49 = vsel %vm5302_vm1, %v2085_v26, 0  ;;  %v2229_v51 = vsel %vm5295_vm13, 1, %v3912_v10  ;;  %v2230_v53 = vsel %vm5302_vm1, 1, %v3912_v10 }
 0x555   :  { %vm2281_vm10 = vcmp.gt.s32.totalorder %v2270_v43, %v2272_v28  ;;  %vm2273_vm15 = vcmp.gt.s32.totalorder %v2258_v38, %v2259_v49  ;;  %v2244_v33 = vadd.s32 %v2239_v13, %v2238_v34  ;;  %v2240_v61 = vadd.s32 %v2230_v53, %v2229_v51 }
 0x556   :  { %v2282_v23 = vsel %vm2281_vm10, %v2270_v43, %v2272_v28  ;;  %v2274_v12 = vsel %vm2273_vm15, %v2258_v38, %v2259_v49  ;;  %v5373_v43 = vand.u32 15, %v2298_v25 }
 0x557   :  { %vm2287_vm14 = vcmp.gt.s32.totalorder %v2280_v3, %v2282_v23  ;;  %s3784_s29 = spop %3783  ;;  %v2247_v20 = vadd.s32 %v2244_v33, %v2243_v16 }
 0x558   :  { %v2109_v8 = vstv %s3784_s29  ;;  %s3786_s30 = spop %3785  ;;  %v2288_v21 = vsel %vm2287_vm14, %v2280_v3, %v2282_v23  ;;  %vm2348_vm10 = vcmp.le.s32.totalorder %v5373_v43, 2  ;;  %vm2324_vm14 = vcmp.le.s32.totalorder %v5373_v43, 1 }
 0x559   :  { %vm5318_vm12 = vcmp.lt.s32.totalorder %v2109_v8, %v5091_v52  ;;  %v2133_v35 = vstv %s3786_s30  ;;  %s3788_s4 = spop %3787 }
 0x55a   :  { %v2260_v58 = vsel %vm5318_vm12, %v2109_v8, 0  ;;  %vm5328_vm5 = vcmp.lt.s32.totalorder %v2133_v35, %v5091_v52  ;;  %v2157_v37 = vstv %s3788_s4  ;;  %v2231_v47 = vsel %vm5318_vm12, 1, %v3912_v10 }
 0x55b   :  { %v2261_v40 = vsel %vm5328_vm5, %v2133_v35, 0  ;;  %vm5341_vm9 = vcmp.lt.s32.totalorder %v2157_v37, %v5091_v52  ;;  %v2232_v54 = vsel %vm5328_vm5, 1, %v3912_v10  ;;  %vm2300_vm5 = vcmp.le.s32.totalorder %v5373_v43, 0 }
 0x55c   :  { %vm2275_vm2 = vcmp.gt.s32.totalorder %v2260_v58, %v2261_v40  ;;  %v2262_v30 = vsel %vm5341_vm9, %v2157_v37, 0  ;;  %v2241_v27 = vadd.s32 %v2232_v54, %v2231_v47  ;;  %v2233_v46 = vsel %vm5341_vm9, 1, %v3912_v10 }
 0x55d   :  { %v2276_v22 = vsel %vm2275_vm2, %v2260_v58, %v2261_v40  ;;  %vm2420_vm2 = vcmp.le.s32.totalorder %v5373_v43, 5 }
 0x55e   :  { %vm2283_vm11 = vcmp.gt.s32.totalorder %v2274_v12, %v2276_v22  ;;  %v2245_v17 = vadd.s32 %v2241_v27, %v2240_v61 }
 0x55f   :  { %s3790_s5 = spop %3789  ;;  %v2284_v0 = vsel %vm2283_vm11, %v2274_v12, %v2276_v22 }
 0x560   :  { %v2181_v32 = vstv %s3790_s5  ;;  %s3792_s6 = spop %3791 }
 0x561   :  { %vm2219_vm3 = vcmp.lt.s32.totalorder %v2181_v32, %v5091_v52  ;;  %v2205_v18 = vstv %s3792_s6 }
 0x562   :  { %v2234_v41 = vsel %vm2219_vm3, 1, %v3912_v10  ;;  %v2263_v3 = vsel %vm2219_vm3, %v2181_v32, 0  ;;  %vm2220_vm8 = vcmp.lt.s32.totalorder %v2205_v18, %v5091_v52 }
 0x563   :  { %v2242_v45 = vadd.s32 %v2234_v41, %v2233_v46  ;;  %vm2277_vm7 = vcmp.gt.s32.totalorder %v2262_v30, %v2263_v3  ;;  %v2235_v7 = vsel %vm2220_vm8, 1, %v3912_v10  ;;  %v2264_v14 = vsel %vm2220_vm8, %v2205_v18, 0 }
 0x564   :  { %v2278_v11 = vsel %vm2277_vm7, %v2262_v30, %v2263_v3  ;;  %vm2372_vm8 = vcmp.le.s32.totalorder %v5373_v43, 3 }
 0x565   :  { %v2246_v9 = vadd.s32 %v2242_v45, %v2235_v7  ;;  %vm2285_vm0 = vcmp.gt.s32.totalorder %v2278_v11, %v2264_v14 }
 0x566   :  { %v2286_v24 = vsel %vm2285_vm0, %v2278_v11, %v2264_v14 }
 0x567   :  { %v2248_v50 = vadd.s32 %v2246_v9, %v2245_v17  ;;  %vm2289_vm13 = vcmp.gt.s32.totalorder %v2284_v0, %v2286_v24 }
 0x568   :  { %v2290_v4 = vsel %vm2289_vm13, %v2284_v0, %v2286_v24 }
 0x569   :  { %v2249_v36 = vadd.s32 %v2248_v50, %v2247_v20  ;;  %vm2291_vm1 = vcmp.gt.s32.totalorder %v2288_v21, %v2290_v4 }
 0x56a   :  { %v2292_v56 = vsel %vm2291_vm1, %v2288_v21, %v2290_v4  ;;  %vm2492_vm1 = vcmp.le.s32.totalorder %v5373_v43, 8 }
 0x56b   :  { %v5377_v26 = vsub.s32 %v5091_v52, %v2292_v56  ;;  %v2294_v38 = vshll.u32 %v2249_v36, 12  ;;  %vm2296_vm15 = vcmp.eq.s32.totalorder %v5087_v31, %v2249_v36 }
 0x56c   :  { %vm5383_vm12 = vmand %vm5097_vm6, %vm2296_vm15  ;;  %vm2396_vm6 = vcmp.le.s32.totalorder %v5373_v43, 4  ;;  %vm2444_vm15 = vcmp.le.s32.totalorder %v5373_v43, 6 }
 0x56d   :  { %v5389_v15 = vor.u32 %v2294_v38, %v5103_v60  ;;  %vm2349_vm9 = vmand %vm5383_vm12, %vm2348_vm10  ;;  %vm2468_vm10 = vcmp.le.s32.totalorder %v5373_v43, 7 }
 0x56e   :  { %v2350_v31 = vsel %vm2349_vm9, 1, %v3912_v10  ;;  %vm2325_vm11 = vmand %vm5383_vm12, %vm2324_vm14 }
 0x56f   :  { %v5399_v52 = vsel %vm33_vm4, %v2350_v31, 0  ;;  %v2326_v5 = vsel %vm2325_vm11, 1, %v3912_v10  ;;  %vm2301_vm3 = vmand %vm5383_vm12, %vm2300_vm5  ;;  %vm2540_vm11 = vcmp.le.s32.totalorder %v5373_v43, 10 }
 0x570   :  { %v2353_v60 = vshrl.u32 %v5399_v52, 16  ;;  %v5407_v49 = vsel %vm33_vm4, %v2326_v5, 0  ;;  %v2302_v23 = vsel %vm2301_vm3, 1, %v3912_v10  ;;  %vm2421_vm7 = vmand %vm5383_vm12, %vm2420_vm2  ;;  %vm2564_vm2 = vcmp.le.s32.totalorder %v5373_v43, 11 }
 0x571   :  { %v2329_v12 = vshrl.u32 %v5407_v49, 16  ;;  %v5414_v57 = vsel %vm33_vm4, %v2302_v23, 0  ;;  %v2422_v8 = vsel %vm2421_vm7, 1, %v3912_v10  ;;  %vm2397_vm0 = vmand %vm5383_vm12, %vm2396_vm6  ;;  %vm2516_vm6 = vcmp.le.s32.totalorder %v5373_v43, 9 }
 0x572   :  { %v2355_v21 = vcvt.s32.f32 %v2353_v60  ;;  %v2305_v29 = vshrl.u32 %v5414_v57, 16  ;;  %v2398_v48 = vsel %vm2397_vm0, 1, %v3912_v10  ;;  %vm2373_vm13 = vmand %vm5383_vm12, %vm2372_vm8  ;;  %v5425_v35 = vsel %vm33_vm4, %v2422_v8, 0 }
 0x573   :  { %v2331_v62 = vcvt.s32.f32 %v2329_v12  ;;  %v2374_v19 = vsel %vm2373_vm13, 1, %v3912_v10  ;;  %v5430_v2 = vsel %vm33_vm4, %v2398_v48, 0  ;;  %vm2493_vm14 = vmand %vm5383_vm12, %vm2492_vm1  ;;  %v2425_v59 = vshrl.u32 %v5425_v35, 16 }
 0x574   :  { %2358 = vadd.xlane.f32.xlu2 %v2355_v21  ;;  %v2307_v58 = vcvt.s32.f32 %v2305_v29  ;;  %v5434_v37 = vsel %vm33_vm4, %v2374_v19, 0  ;;  %vm2469_vm5 = vmand %vm5383_vm12, %vm2468_vm10  ;;  %v2401_v39 = vshrl.u32 %v5430_v2, 16  ;;  %v2494_v42 = vsel %vm2493_vm14, 1, %v3912_v10 }
 0x575   :  { %2334 = vadd.xlane.f32.xlu1 %v2331_v62  ;;  %vm2445_vm9 = vmand %vm5383_vm12, %vm2444_vm15  ;;  %v2377_v40 = vshrl.u32 %v5434_v37, 16  ;;  %v2470_v44 = vsel %vm2469_vm5, 1, %v3912_v10  ;;  %v2427_v13 = vcvt.s32.f32 %v2425_v59  ;;  %v5450_v34 = vsel %vm33_vm4, %v2494_v42, 0 }
 0x576   :  { %2310 = vadd.xlane.f32.xlu0 %v2307_v58  ;;  %v2446_v30 = vsel %vm2445_vm9, 1, %v3912_v10  ;;  %v2403_v55 = vcvt.s32.f32 %v2401_v39  ;;  %v5454_v22 = vsel %vm33_vm4, %v2470_v44, 0  ;;  %vm2565_vm3 = vmand %vm5383_vm12, %vm2564_vm2  ;;  %v2497_v47 = vshrl.u32 %v5450_v34, 16 }
 0x577   :  { %v2379_v51 = vcvt.s32.f32 %v2377_v40  ;;  %v2447_v53 = vsel %vm33_vm4, %v2446_v30, 0  ;;  %vm2541_vm8 = vmand %vm5383_vm12, %vm2540_vm11  ;;  %v2473_v54 = vshrl.u32 %v5454_v22, 16  ;;  %v2566_v0 = vsel %vm2565_vm3, 1, %v3912_v10 }
 0x578   :  { %vm2517_vm7 = vmand %vm5383_vm12, %vm2516_vm6  ;;  %v2449_v63 = vshrl.u32 %v2447_v53, 16  ;;  %v2542_v1 = vsel %vm2541_vm8, 1, %v3912_v10  ;;  %v2499_v33 = vcvt.s32.f32 %v2497_v47  ;;  %v5470_v61 = vsel %vm33_vm4, %v2566_v0, 0 }
 0x579   :  { %v2518_v32 = vsel %vm2517_vm7, 1, %v3912_v10  ;;  %v2475_v25 = vcvt.s32.f32 %v2473_v54  ;;  %vm2612_vm0 = vcmp.le.s32.totalorder %v5373_v43, 13  ;;  %v5474_v18 = vsel %vm33_vm4, %v2542_v1, 0 }
 0x57a   :  { %v2451_v27 = vcvt.s32.f32 %v2449_v63  ;;  %vm2588_vm13 = vcmp.le.s32.totalorder %v5373_v43, 12  ;;  %v2519_v46 = vsel %vm33_vm4, %v2518_v32, 0  ;;  %v2569_v41 = vshrl.u32 %v5470_v61, 16  ;;  %vm2613_vm1 = vmand %vm5383_vm12, %vm2612_vm0 }
 0x57b   :  { %v2545_v3 = vshrl.u32 %v5474_v18, 16  ;;  %vm2589_vm10 = vmand %vm5383_vm12, %vm2588_vm13  ;;  %v2521_v45 = vshrl.u32 %v2519_v46, 16  ;;  %v2614_v7 = vsel %vm2613_vm1, 1, %v3912_v10  ;;  %v2304_v20 = vand.u32 65535, %v5414_v57 }
 0x57c   :  { %2430 = vadd.xlane.f32.xlu2 %v2427_v13  ;;  %v2571_v14 = vcvt.s32.f32 %v2569_v41  ;;  %v2590_v11 = vsel %vm2589_vm10, 1, %v3912_v10  ;;  %v2615_v9 = vsel %vm33_vm4, %v2614_v7, 0  ;;  %v2376_v31 = vand.u32 65535, %v5434_v37 }
 0x57d   :  { %2406 = vadd.xlane.f32.xlu1 %v2403_v55  ;;  %v2547_v16 = vcvt.s32.f32 %v2545_v3  ;;  %v2523_v17 = vcvt.s32.f32 %v2521_v45  ;;  %v2591_v24 = vsel %vm33_vm4, %v2590_v11, 0  ;;  %v2617_v50 = vshrl.u32 %v2615_v9, 16 }
 0x57e   :  { %2382 = vadd.xlane.f32.xlu0 %v2379_v51  ;;  %v2593_v4 = vshrl.u32 %v2591_v24, 16  ;;  %v2306_v36 = vcvt.s32.f32 %v2304_v20  ;;  %v2352_v5 = vand.u32 65535, %v5399_v52  ;;  %v2328_v60 = vand.u32 65535, %v5407_v49 }
 0x57f   :  { %v2619_v56 = vcvt.s32.f32 %v2617_v50  ;;  %v2378_v23 = vcvt.s32.f32 %v2376_v31  ;;  %v2448_v57 = vand.u32 65535, %v2447_v53  ;;  %v2424_v21 = vand.u32 65535, %v5425_v35 }
 0x580   :  { %v2595_v38 = vcvt.s32.f32 %v2593_v4  ;;  %v2354_v12 = vcvt.s32.f32 %v2352_v5  ;;  %v2330_v8 = vcvt.s32.f32 %v2328_v60  ;;  %v2400_v29 = vand.u32 65535, %v5430_v2 }
 0x581   :  { %v2450_v48 = vcvt.s32.f32 %v2448_v57  ;;  %v2426_v62 = vcvt.s32.f32 %v2424_v21  ;;  %v2520_v52 = vand.u32 65535, %v2519_v46  ;;  %v2496_v49 = vand.u32 65535, %v5450_v34 }
 0x582   :  { %v2402_v19 = vcvt.s32.f32 %v2400_v29  ;;  %v2472_v58 = vand.u32 65535, %v5454_v22  ;;  %vm2636_vm15 = vcmp.le.s32.totalorder %v5373_v43, 14  ;;  %v2592_v35 = vand.u32 65535, %v2591_v24 }
 0x583   :  { %v2522_v37 = vcvt.s32.f32 %v2520_v52  ;;  %v2498_v59 = vcvt.s32.f32 %v2496_v49  ;;  %vm2637_vm14 = vmand %vm5383_vm12, %vm2636_vm15  ;;  %v2568_v2 = vand.u32 65535, %v5470_v61  ;;  %v2544_v40 = vand.u32 65535, %v5474_v18 }
 0x584   :  { %2502 = vadd.xlane.f32.xlu2 %v2499_v33  ;;  %v2474_v39 = vcvt.s32.f32 %v2472_v58  ;;  %v2638_v42 = vsel %vm2637_vm14, 1, %v3912_v10  ;;  %v2594_v44 = vcvt.s32.f32 %v2592_v35  ;;  %v2616_v22 = vand.u32 65535, %v2615_v9 }
 0x585   :  { %2478 = vadd.xlane.f32.xlu1 %v2475_v25  ;;  %v2570_v13 = vcvt.s32.f32 %v2568_v2  ;;  %v2639_v30 = vsel %vm33_vm4, %v2638_v42, 0  ;;  %v2546_v55 = vcvt.s32.f32 %v2544_v40 }
 0x586   :  { %2454 = vadd.xlane.f32.xlu0 %v2451_v27  ;;  %v2640_v34 = vand.u32 65535, %v2639_v30  ;;  %v2641_v51 = vshrl.u32 %v2639_v30, 16  ;;  %v2618_v54 = vcvt.s32.f32 %v2616_v22 }
 0x588   :  { %v2642_v53 = vcvt.s32.f32 %v2640_v34  ;;  %v2643_v47 = vcvt.s32.f32 %v2641_v51 }
 0x58c   :  { %2574 = vadd.xlane.f32.xlu2 %v2571_v14 }
 0x58d   :  { %2550 = vadd.xlane.f32.xlu1 %v2547_v16 }
 0x58e   :  { %2526 = vadd.xlane.f32.xlu0 %v2523_v17 }
 0x594   :  { %2308 = vadd.xlane.f32.xlu2 %v2306_v36 }
 0x595   :  { %2622 = vadd.xlane.f32.xlu1 %v2619_v56 }
 0x596   :  { %2598 = vadd.xlane.f32.xlu0 %v2595_v38 }
 0x59c   :  { %2380 = vadd.xlane.f32.xlu2 %v2378_v23 }
 0x59d   :  { %2356 = vadd.xlane.f32.xlu1 %v2354_v12 }
 0x59e   :  { %2332 = vadd.xlane.f32.xlu0 %v2330_v8 }
 0x5a4   :  { %2452 = vadd.xlane.f32.xlu2 %v2450_v48 }
 0x5a5   :  { %2428 = vadd.xlane.f32.xlu1 %v2426_v62 }
 0x5a6   :  { %2404 = vadd.xlane.f32.xlu0 %v2402_v19 }
 0x5ac   :  { %2524 = vadd.xlane.f32.xlu2 %v2522_v37 }
 0x5ad   :  { %2500 = vadd.xlane.f32.xlu1 %v2498_v59 }
 0x5ae   :  { %2476 = vadd.xlane.f32.xlu0 %v2474_v39 }
 0x5b4   :  { %2596 = vadd.xlane.f32.xlu2 %v2594_v44 }
 0x5b5   :  { %2572 = vadd.xlane.f32.xlu1 %v2570_v13 }
 0x5b6   :  { %2548 = vadd.xlane.f32.xlu0 %v2546_v55 }
 0x5bc   :  { %2644 = vadd.xlane.f32.xlu2 %v2642_v53 }
 0x5bd   :  { %2646 = vadd.xlane.f32.xlu1 %v2643_v47 }
 0x5be   :  { %2620 = vadd.xlane.f32.xlu0 %v2618_v54 }
 0x5e7   :  { %v2359_v63 = vpop.xlane.xlu2 %2358 }
 0x5e8   :  { %v2335_v0 = vpop.xlane.xlu1 %2334  ;;  %v2361_v50 = vcvt.f32.s32 %v2359_v63 }
 0x5e9   :  { %v2311_v1 = vpop.xlane.xlu0 %2310  ;;  %v2337_v4 = vcvt.f32.s32 %v2335_v0 }
 0x5ea   :  { %v2313_v45 = vcvt.f32.s32 %v2311_v1  ;;  %v2362_v23 = vshll.u32 %v2361_v50, 16 }
 0x5eb   :  { %v2338_v57 = vshll.u32 %v2337_v4, 16 }
 0x5ec   :  { %v2314_v14 = vshll.u32 %v2313_v45, 16 }
 0x5ef   :  { %v2431_v33 = vpop.xlane.xlu2 %2430 }
 0x5f0   :  { %v2407_v32 = vpop.xlane.xlu1 %2406  ;;  %v2433_v37 = vcvt.f32.s32 %v2431_v33 }
 0x5f1   :  { %v2383_v25 = vpop.xlane.xlu0 %2382  ;;  %v2409_v59 = vcvt.f32.s32 %v2407_v32 }
 0x5f2   :  { %v2385_v24 = vcvt.f32.s32 %v2383_v25  ;;  %v2434_v22 = vshll.u32 %v2433_v37, 16 }
 0x5f3   :  { %v2410_v53 = vshll.u32 %v2409_v59, 16 }
 0x5f4   :  { %v2386_v38 = vshll.u32 %v2385_v24, 16 }
 0x5f7   :  { %v5503_v61 = vpop.xlane.xlu2 %2502 }
 0x5f8   :  { %v5505_v27 = vpop.xlane.xlu1 %2478  ;;  %v2505_v24 = vcvt.f32.s32 %v5503_v61 }
 0x5f9   :  { %v2455_v18 = vpop.xlane.xlu0 %2454 }
 0x5fa   :  { %v2457_v19 = vcvt.f32.s32 %v2455_v18 }
 0x5fc   :  { %v2458_v13 = vshll.u32 %v2457_v19, 16 }
 0x5ff   :  { %v5507_v46 = vpop.xlane.xlu2 %2574 }
 0x600   :  { %v5509_v41 = vpop.xlane.xlu1 %2550 }
 0x601   :  { %v5511_v3 = vpop.xlane.xlu0 %2526 }
 0x602   :  { %v2529_v25 = vcvt.f32.s32 %v5511_v3 }
 0x607   :  { %v2309_v7 = vpop.xlane.xlu2 %2308 }
 0x608   :  { %v5513_v11 = vpop.xlane.xlu1 %2622  ;;  %v2312_v16 = vcvt.f32.s32 %v2309_v7 }
 0x609   :  { %v5515_v17 = vpop.xlane.xlu0 %2598 }
 0x60a   :  { %v2315_v9 = vadd.s32 %v2314_v14, %v2312_v16  ;;  %v2601_v59 = vcvt.f32.s32 %v5515_v17 }
 0x60c   :  { %v2316_v20 = vrot.slane %v2315_v9, 4 }
 0x60e   :  { %v2317_v36 = vadd.s32 %v2316_v20, %v2315_v9  ;;  %v2481_v20 = vcvt.f32.s32 %v5505_v27 }
 0x60f   :  { %v2381_v56 = vpop.xlane.xlu2 %2380 }
 0x610   :  { %v2357_v31 = vpop.xlane.xlu1 %2356  ;;  %v2384_v5 = vcvt.f32.s32 %v2381_v56  ;;  %v2318_v60 = vrot.slane %v2317_v36, 2 }
 0x611   :  { %v2360_v12 = vcvt.f32.s32 %v2357_v31  ;;  %v2333_v8 = vpop.xlane.xlu0 %2332  ;;  %v2530_v31 = vshll.u32 %v2529_v25, 16 }
 0x612   :  { %v2336_v21 = vcvt.f32.s32 %v2333_v8  ;;  %v2387_v29 = vadd.s32 %v2386_v38, %v2384_v5  ;;  %v2319_v48 = vadd.s32 %v2318_v60, %v2317_v36 }
 0x613   :  { %v2363_v62 = vadd.s32 %v2362_v23, %v2360_v12 }
 0x614   :  { %v2339_v52 = vadd.s32 %v2338_v57, %v2336_v21  ;;  %v2388_v49 = vrot.slane %v2387_v29, 4  ;;  %v2320_v58 = vrot.slane %v2319_v48, 1 }
 0x615   :  { %v2364_v39 = vrot.slane %v2363_v62, 4 }
 0x616   :  { %v2340_v35 = vrot.slane %v2339_v52, 4  ;;  %v2389_v2 = vadd.s32 %v2388_v49, %v2387_v29  ;;  %v2321_v40 = vadd.s32 %v2320_v58, %v2319_v48  ;;  %v2506_v48 = vshll.u32 %v2505_v24, 16 }
 0x617   :  { %v2365_v42 = vadd.s32 %v2364_v39, %v2363_v62  ;;  %v2453_v44 = vpop.xlane.xlu2 %2452  ;;  %v2482_v62 = vshll.u32 %v2481_v20, 16 }
 0x618   :  { %v2341_v30 = vadd.s32 %v2340_v35, %v2339_v52  ;;  %v2429_v55 = vpop.xlane.xlu1 %2428  ;;  %v2456_v34 = vcvt.f32.s32 %v2453_v44  ;;  %3793 = vpush %v2321_v40  ;;  %v2390_v51 = vrot.slane %v2389_v2, 2 }
 0x619   :  { %v2432_v47 = vcvt.f32.s32 %v2429_v55  ;;  %v2405_v54 = vpop.xlane.xlu0 %2404  ;;  %v2366_v63 = vrot.slane %v2365_v42, 2 }
 0x61a   :  { %v2408_v0 = vcvt.f32.s32 %v2405_v54  ;;  %v2459_v1 = vadd.s32 %v2458_v13, %v2456_v34  ;;  %v2342_v33 = vrot.slane %v2341_v30, 2  ;;  %v2391_v32 = vadd.s32 %v2390_v51, %v2389_v2 }
 0x61b   :  { %v2435_v18 = vadd.s32 %v2434_v22, %v2432_v47  ;;  %v2367_v45 = vadd.s32 %v2366_v63, %v2365_v42  ;;  %v2577_v13 = vcvt.f32.s32 %v5507_v46  ;;  %v2602_v47 = vshll.u32 %v2601_v59, 16 }
 0x61c   :  { %v2411_v7 = vadd.s32 %v2410_v53, %v2408_v0  ;;  %v2460_v14 = vrot.slane %v2459_v1, 4  ;;  %v2343_v16 = vadd.s32 %v2342_v33, %v2341_v30  ;;  %v2392_v9 = vrot.slane %v2391_v32, 1 }
 0x61d   :  { %v2436_v50 = vrot.slane %v2435_v18, 4  ;;  %v2368_v4 = vrot.slane %v2367_v45, 1  ;;  %v2553_v30 = vcvt.f32.s32 %v5509_v41 }
 0x61e   :  { %v2412_v36 = vrot.slane %v2411_v7, 4  ;;  %v2461_v56 = vadd.s32 %v2460_v14, %v2459_v1  ;;  %v2344_v38 = vrot.slane %v2343_v16, 1  ;;  %v2393_v3 = vadd.s32 %v2392_v9, %v2391_v32 }
 0x61f   :  { %v2437_v5 = vadd.s32 %v2436_v50, %v2435_v18  ;;  %v2525_v60 = vpop.xlane.xlu2 %2524  ;;  %v2369_v23 = vadd.s32 %v2368_v4, %v2367_v45  ;;  %v2578_v45 = vshll.u32 %v2577_v13, 16 }
 0x620   :  { %v2413_v12 = vadd.s32 %v2412_v36, %v2411_v7  ;;  %v2501_v8 = vpop.xlane.xlu1 %2500  ;;  %v2528_v57 = vcvt.f32.s32 %v2525_v60  ;;  %v2345_v21 = vadd.s32 %v2344_v38, %v2343_v16  ;;  %v2462_v29 = vrot.slane %v2461_v56, 2 }
 0x621   :  { %v2504_v61 = vcvt.f32.s32 %v2501_v8  ;;  %v2477_v19 = vpop.xlane.xlu0 %2476  ;;  %v2438_v27 = vrot.slane %v2437_v5, 2  ;;  %v2554_v7 = vshll.u32 %v2553_v30, 16 }
 0x622   :  { %v2480_v52 = vcvt.f32.s32 %v2477_v19  ;;  %v2531_v49 = vadd.s32 %v2530_v31, %v2528_v57  ;;  %3795 = vpush %v2345_v21  ;;  %v2414_v58 = vrot.slane %v2413_v12, 2  ;;  %v2463_v37 = vadd.s32 %v2462_v29, %v2461_v56 }
 0x623   :  { %v2507_v39 = vadd.s32 %v2506_v48, %v2504_v61  ;;  %3797 = vpush %v2369_v23  ;;  %v2439_v35 = vadd.s32 %v2438_v27, %v2437_v5  ;;  %v2625_v23 = vcvt.f32.s32 %v5513_v11 }
 0x624   :  { %v2483_v2 = vadd.s32 %v2482_v62, %v2480_v52  ;;  %v2532_v40 = vrot.slane %v2531_v49, 4  ;;  %3799 = vpush %v2393_v3  ;;  %v2415_v42 = vadd.s32 %v2414_v58, %v2413_v12  ;;  %v2464_v44 = vrot.slane %v2463_v37, 1 }
 0x625   :  { %v2508_v55 = vrot.slane %v2507_v39, 4  ;;  %v2440_v34 = vrot.slane %v2439_v35, 1 }
 0x626   :  { %v2484_v51 = vrot.slane %v2483_v2, 4  ;;  %v2533_v22 = vadd.s32 %v2532_v40, %v2531_v49  ;;  %v2416_v53 = vrot.slane %v2415_v42, 1  ;;  %v2465_v0 = vadd.s32 %v2464_v44, %v2463_v37 }
 0x627   :  { %v2509_v54 = vadd.s32 %v2508_v55, %v2507_v39  ;;  %v2597_v17 = vpop.xlane.xlu2 %2596  ;;  %v2441_v63 = vadd.s32 %v2440_v34, %v2439_v35  ;;  %v2626_v37 = vshll.u32 %v2625_v23, 16 }
 0x628   :  { %v2485_v1 = vadd.s32 %v2484_v51, %v2483_v2  ;;  %v2573_v33 = vpop.xlane.xlu1 %2572  ;;  %v2600_v32 = vcvt.f32.s32 %v2597_v17  ;;  %v2417_v25 = vadd.s32 %v2416_v53, %v2415_v42  ;;  %v2534_v18 = vrot.slane %v2533_v22, 2 }
 0x629   :  { %v2576_v46 = vcvt.f32.s32 %v2573_v33  ;;  %v2549_v14 = vpop.xlane.xlu0 %2548  ;;  %v2510_v41 = vrot.slane %v2509_v54, 2 }
 0x62a   :  { %v2552_v16 = vcvt.f32.s32 %v2549_v14  ;;  %v2603_v9 = vadd.s32 %v2602_v47, %v2600_v32  ;;  %3801 = vpush %v2417_v25  ;;  %v2486_v24 = vrot.slane %v2485_v1, 2  ;;  %v2535_v20 = vadd.s32 %v2534_v18, %v2533_v22 }
 0x62b   :  { %v2579_v50 = vadd.s32 %v2578_v45, %v2576_v46  ;;  %3803 = vpush %v2441_v63  ;;  %v2511_v4 = vadd.s32 %v2510_v41, %v2509_v54 }
 0x62c   :  { %v2555_v36 = vadd.s32 %v2554_v7, %v2552_v16  ;;  %v2604_v56 = vrot.slane %v2603_v9, 4  ;;  %3805 = vpush %v2465_v0  ;;  %v2487_v38 = vadd.s32 %v2486_v24, %v2485_v1  ;;  %v2536_v31 = vrot.slane %v2535_v20, 1 }
 0x62d   :  { %v2580_v5 = vrot.slane %v2579_v50, 4  ;;  %v2512_v60 = vrot.slane %v2511_v4, 1 }
 0x62e   :  { %v2556_v3 = vrot.slane %v2555_v36, 4  ;;  %v2605_v12 = vadd.s32 %v2604_v56, %v2603_v9  ;;  %v2488_v8 = vrot.slane %v2487_v38, 1  ;;  %v2537_v19 = vadd.s32 %v2536_v31, %v2535_v20 }
 0x62f   :  { %v2581_v57 = vadd.s32 %v2580_v5, %v2579_v50  ;;  %v2513_v21 = vadd.s32 %v2512_v60, %v2511_v4  ;;  %v2645_v62 = vpop.xlane.xlu2 %2644 }
 0x630   :  { %v2557_v29 = vadd.s32 %v2556_v3, %v2555_v36  ;;  %v2647_v48 = vpop.xlane.xlu1 %2646  ;;  %v2489_v61 = vadd.s32 %v2488_v8, %v2487_v38  ;;  %v2606_v27 = vrot.slane %v2605_v12, 2  ;;  %v2648_v2 = vcvt.f32.s32 %v2645_v62 }
 0x631   :  { %v2649_v52 = vcvt.f32.s32 %v2647_v48  ;;  %v2621_v49 = vpop.xlane.xlu0 %2620  ;;  %v2582_v58 = vrot.slane %v2581_v57, 2 }
 0x632   :  { %v2624_v59 = vcvt.f32.s32 %v2621_v49  ;;  %3807 = vpush %v2489_v61  ;;  %v2558_v39 = vrot.slane %v2557_v29, 2  ;;  %v2607_v35 = vadd.s32 %v2606_v27, %v2605_v12 }
 0x633   :  { %v2650_v11 = vshll.u32 %v2649_v52, 16  ;;  %3809 = vpush %v2513_v21  ;;  %v2583_v40 = vadd.s32 %v2582_v58, %v2581_v57 }
 0x634   :  { %v2627_v42 = vadd.s32 %v2626_v37, %v2624_v59  ;;  %3811 = vpush %v2537_v19  ;;  %v2559_v44 = vadd.s32 %v2558_v39, %v2557_v29  ;;  %v2608_v13 = vrot.slane %v2607_v35, 1 }
 0x635   :  { %v2651_v30 = vadd.s32 %v2650_v11, %v2648_v2  ;;  %v2584_v55 = vrot.slane %v2583_v40, 1 }
 0x636   :  { %v2628_v34 = vrot.slane %v2627_v42, 4  ;;  %v2560_v51 = vrot.slane %v2559_v44, 1  ;;  %v2609_v17 = vadd.s32 %v2608_v13, %v2607_v35 }
 0x637   :  { %v2652_v22 = vrot.slane %v2651_v30, 4  ;;  %v2585_v53 = vadd.s32 %v2584_v55, %v2583_v40 }
 0x638   :  { %v2629_v47 = vadd.s32 %v2628_v34, %v2627_v42  ;;  %v2561_v54 = vadd.s32 %v2560_v51, %v2559_v44 }
 0x639   :  { %v2653_v63 = vadd.s32 %v2652_v22, %v2651_v30 }
 0x63a   :  { %3813 = vpush %v2561_v54  ;;  %v2630_v0 = vrot.slane %v2629_v47, 2 }
 0x63b   :  { %3815 = vpush %v2585_v53  ;;  %v2654_v1 = vrot.slane %v2653_v63, 2 }
 0x63c   :  { %3817 = vpush %v2609_v17  ;;  %v2631_v33 = vadd.s32 %v2630_v0, %v2629_v47 }
 0x63d   :  { %v2655_v32 = vadd.s32 %v2654_v1, %v2653_v63 }
 0x63e   :  { %v2632_v25 = vrot.slane %v2631_v33, 1 }
 0x63f   :  { %v2656_v18 = vrot.slane %v2655_v32, 1 }
 0x640   :  { %v2633_v45 = vadd.s32 %v2632_v25, %v2631_v33 }
 0x641   :  { %v2657_v7 = vadd.s32 %v2656_v18, %v2655_v32 }
 0x642   :  { %3819 = vpush %v2633_v45 }
 0x643   :  { %3821 = vpush %v2657_v7 }
 0x649   :  { %s3794_s7 = spop %3793 }
 0x64a   :  { %v2323_v46 = vstv %s3794_s7 }
 0x64b   :  { %vm5525_vm5 = vcmp.lt.s32.totalorder %v2323_v46, %v5377_v26 }
 0x64c   :  { %v2704_v41 = vsel %vm5525_vm5, %v2323_v46, 0  ;;  %v2675_v42 = vsel %vm5525_vm5, 1, %v3912_v10 }
 0x653   :  { %s3796_s8 = spop %3795 }
 0x654   :  { %v2347_v16 = vstv %s3796_s8  ;;  %s3798_s9 = spop %3797 }
 0x655   :  { %vm5532_vm9 = vcmp.lt.s32.totalorder %v2347_v16, %v5377_v26  ;;  %v2371_v24 = vstv %s3798_s9  ;;  %s3800_s10 = spop %3799 }
 0x656   :  { %v2705_v20 = vsel %vm5532_vm9, %v2347_v16, 0  ;;  %vm5539_vm2 = vcmp.lt.s32.totalorder %v2371_v24, %v5377_v26  ;;  %v2395_v4 = vstv %s3800_s10  ;;  %v2676_v17 = vsel %vm5532_vm9, 1, %v3912_v10 }
 0x657   :  { %vm2719_vm11 = vcmp.gt.s32.totalorder %v2704_v41, %v2705_v20  ;;  %v2706_v36 = vsel %vm5539_vm2, %v2371_v24, 0  ;;  %vm5546_vm6 = vcmp.lt.s32.totalorder %v2395_v4, %v5377_v26  ;;  %v2677_v33 = vsel %vm5539_vm2, 1, %v3912_v10 }
 0x658   :  { %v2720_v56 = vsel %vm2719_vm11, %v2704_v41, %v2705_v20  ;;  %v2707_v31 = vsel %vm5546_vm6, %v2395_v4, 0  ;;  %v2678_v18 = vsel %vm5546_vm6, 1, %v3912_v10  ;;  %v2690_v9 = vadd.s32 %v2676_v17, %v2675_v42 }
 0x659   :  { %vm2721_vm3 = vcmp.gt.s32.totalorder %v2706_v36, %v2707_v31  ;;  %v2691_v20 = vadd.s32 %v2678_v18, %v2677_v33 }
 0x65a   :  { %v2722_v5 = vsel %vm2721_vm3, %v2706_v36, %v2707_v31  ;;  %v2752_v36 = vshra.s32 %v3937_v6, 4 }
 0x65b   :  { %s3802_s11 = spop %3801  ;;  %vm2733_vm8 = vcmp.gt.s32.totalorder %v2720_v56, %v2722_v5 }
 0x65c   :  { %v2419_v60 = vstv %s3802_s11  ;;  %s3804_s12 = spop %3803  ;;  %v2734_v23 = vsel %vm2733_vm8, %v2720_v56, %v2722_v5 }
 0x65d   :  { %vm5553_vm7 = vcmp.lt.s32.totalorder %v2419_v60, %v5377_v26  ;;  %v2443_v12 = vstv %s3804_s12  ;;  %s3806_s13 = spop %3805 }
 0x65e   :  { %v2708_v8 = vsel %vm5553_vm7, %v2419_v60, 0  ;;  %vm5560_vm0 = vcmp.lt.s32.totalorder %v2443_v12, %v5377_v26  ;;  %v2467_v21 = vstv %s3806_s13  ;;  %v2679_v30 = vsel %vm5553_vm7, 1, %v3912_v10 }
 0x65f   :  { %v2709_v29 = vsel %vm5560_vm0, %v2443_v12, 0  ;;  %vm5567_vm13 = vcmp.lt.s32.totalorder %v2467_v21, %v5377_v26  ;;  %v2680_v22 = vsel %vm5560_vm0, 1, %v3912_v10 }
 0x660   :  { %vm2723_vm1 = vcmp.gt.s32.totalorder %v2708_v8, %v2709_v29  ;;  %v2710_v62 = vsel %vm5567_vm13, %v2467_v21, 0  ;;  %v2681_v63 = vsel %vm5567_vm13, 1, %v3912_v10  ;;  %v2692_v45 = vadd.s32 %v2680_v22, %v2679_v30 }
 0x661   :  { %v2724_v61 = vsel %vm2723_vm1, %v2708_v8, %v2709_v29  ;;  %v2697_v21 = vadd.s32 %v2691_v20, %v2690_v9 }
 0x663   :  { %s3808_s14 = spop %3807 }
 0x664   :  { %v2491_v19 = vstv %s3808_s14  ;;  %s3810_s15 = spop %3809 }
 0x665   :  { %vm5574_vm10 = vcmp.lt.s32.totalorder %v2491_v19, %v5377_v26  ;;  %v2515_v52 = vstv %s3810_s15  ;;  %s3812_s16 = spop %3811 }
 0x666   :  { %v2711_v49 = vsel %vm5574_vm10, %v2491_v19, 0  ;;  %vm5581_vm15 = vcmp.lt.s32.totalorder %v2515_v52, %v5377_v26  ;;  %v2539_v37 = vstv %s3812_s16  ;;  %v2682_v55 = vsel %vm5574_vm10, 1, %v3912_v10 }
 0x667   :  { %vm2725_vm14 = vcmp.gt.s32.totalorder %v2710_v62, %v2711_v49  ;;  %v2712_v59 = vsel %vm5581_vm15, %v2515_v52, 0  ;;  %vm5588_vm11 = vcmp.lt.s32.totalorder %v2539_v37, %v5377_v26  ;;  %v2693_v32 = vadd.s32 %v2682_v55, %v2681_v63 }
 0x668   :  { %v2726_v39 = vsel %vm2725_vm14, %v2710_v62, %v2711_v49  ;;  %v2713_v11 = vsel %vm5588_vm11, %v2539_v37, 0  ;;  %v2683_v7 = vsel %vm5581_vm15, 1, %v3912_v10  ;;  %v2684_v14 = vsel %vm5588_vm11, 1, %v3912_v10 }
 0x669   :  { %vm2735_vm3 = vcmp.gt.s32.totalorder %v2724_v61, %v2726_v39  ;;  %vm2727_vm8 = vcmp.gt.s32.totalorder %v2712_v59, %v2713_v11  ;;  %v2698_v50 = vadd.s32 %v2693_v32, %v2692_v45  ;;  %v2694_v56 = vadd.s32 %v2684_v14, %v2683_v7 }
 0x66a   :  { %v2736_v2 = vsel %vm2735_vm3, %v2724_v61, %v2726_v39  ;;  %v2728_v40 = vsel %vm2727_vm8, %v2712_v59, %v2713_v11  ;;  %v5659_v61 = vand.u32 15, %v2752_v36 }
 0x66b   :  { %vm2741_vm1 = vcmp.gt.s32.totalorder %v2734_v23, %v2736_v2  ;;  %s3814_s17 = spop %3813  ;;  %v2701_v19 = vadd.s32 %v2698_v50, %v2697_v21 }
 0x66c   :  { %v2563_v44 = vstv %s3814_s17  ;;  %s3816_s18 = spop %3815  ;;  %v2742_v13 = vsel %vm2741_vm1, %v2734_v23, %v2736_v2  ;;  %vm2802_vm3 = vcmp.le.s32.totalorder %v5659_v61, 2  ;;  %vm2778_vm1 = vcmp.le.s32.totalorder %v5659_v61, 1 }
 0x66d   :  { %vm5604_vm14 = vcmp.lt.s32.totalorder %v2563_v44, %v5377_v26  ;;  %v2587_v51 = vstv %s3816_s18  ;;  %s3818_s0 = spop %3817 }
 0x66e   :  { %v2714_v53 = vsel %vm5604_vm14, %v2563_v44, 0  ;;  %vm5614_vm5 = vcmp.lt.s32.totalorder %v2587_v51, %v5377_v26  ;;  %v2611_v54 = vstv %s3818_s0  ;;  %v2685_v41 = vsel %vm5604_vm14, 1, %v3912_v10 }
 0x66f   :  { %v2715_v0 = vsel %vm5614_vm5, %v2587_v51, 0  ;;  %vm5627_vm7 = vcmp.lt.s32.totalorder %v2611_v54, %v5377_v26  ;;  %v2686_v16 = vsel %vm5614_vm5, 1, %v3912_v10  ;;  %vm2754_vm5 = vcmp.le.s32.totalorder %v5659_v61, 0 }
 0x670   :  { %vm2729_vm0 = vcmp.gt.s32.totalorder %v2714_v53, %v2715_v0  ;;  %v2716_v25 = vsel %vm5627_vm7, %v2611_v54, 0  ;;  %v2695_v38 = vadd.s32 %v2686_v16, %v2685_v41  ;;  %v2687_v5 = vsel %vm5627_vm7, 1, %v3912_v10 }
 0x671   :  { %v2730_v46 = vsel %vm2729_vm0, %v2714_v53, %v2715_v0  ;;  %vm2874_vm0 = vcmp.le.s32.totalorder %v5659_v61, 5 }
 0x672   :  { %vm2737_vm9 = vcmp.gt.s32.totalorder %v2728_v40, %v2730_v46  ;;  %v2699_v29 = vadd.s32 %v2695_v38, %v2694_v56 }
 0x673   :  { %s3820_s19 = spop %3819  ;;  %v2738_v24 = vsel %vm2737_vm9, %v2728_v40, %v2730_v46 }
 0x674   :  { %v2635_v4 = vstv %s3820_s19  ;;  %s3822_s20 = spop %3821 }
 0x675   :  { %vm2673_vm2 = vcmp.lt.s32.totalorder %v2635_v4, %v5377_v26  ;;  %v2659_v31 = vstv %s3822_s20 }
 0x676   :  { %v2688_v60 = vsel %vm2673_vm2, 1, %v3912_v10  ;;  %v2717_v23 = vsel %vm2673_vm2, %v2635_v4, 0  ;;  %vm2674_vm6 = vcmp.lt.s32.totalorder %v2659_v31, %v5377_v26 }
 0x677   :  { %v2696_v3 = vadd.s32 %v2688_v60, %v2687_v5  ;;  %vm2731_vm13 = vcmp.gt.s32.totalorder %v2716_v25, %v2717_v23  ;;  %v2689_v12 = vsel %vm2674_vm6, 1, %v3912_v10  ;;  %v2718_v8 = vsel %vm2674_vm6, %v2659_v31, 0 }
 0x678   :  { %v2732_v57 = vsel %vm2731_vm13, %v2716_v25, %v2717_v23  ;;  %vm2826_vm6 = vcmp.le.s32.totalorder %v5659_v61, 3 }
 0x679   :  { %v2700_v48 = vadd.s32 %v2696_v3, %v2689_v12  ;;  %vm2739_vm10 = vcmp.gt.s32.totalorder %v2732_v57, %v2718_v8 }
 0x67a   :  { %v2740_v62 = vsel %vm2739_vm10, %v2732_v57, %v2718_v8 }
 0x67b   :  { %v2702_v27 = vadd.s32 %v2700_v48, %v2699_v29  ;;  %vm2743_vm15 = vcmp.gt.s32.totalorder %v2738_v24, %v2740_v62 }
 0x67c   :  { %v2744_v52 = vsel %vm2743_vm15, %v2738_v24, %v2740_v62 }
 0x67d   :  { %v2703_v49 = vadd.s32 %v2702_v27, %v2701_v19  ;;  %vm2745_vm11 = vcmp.gt.s32.totalorder %v2742_v13, %v2744_v52 }
 0x67e   :  { %v2746_v58 = vsel %vm2745_vm11, %v2742_v13, %v2744_v52  ;;  %vm2946_vm11 = vcmp.le.s32.totalorder %v5659_v61, 8 }
 0x67f   :  { %v5663_v37 = vsub.s32 %v5377_v26, %v2746_v58  ;;  %v2748_v59 = vshll.u32 %v2703_v49, 8  ;;  %vm2750_vm8 = vcmp.eq.s32.totalorder %v5373_v43, %v2703_v49 }
 0x680   :  { %vm5669_vm14 = vmand %vm5383_vm12, %vm2750_vm8  ;;  %vm2850_vm12 = vcmp.le.s32.totalorder %v5659_v61, 4  ;;  %vm2898_vm8 = vcmp.le.s32.totalorder %v5659_v61, 6 }
 0x681   :  { %v5675_v35 = vor.u32 %v2748_v59, %v5389_v15  ;;  %vm2803_vm7 = vmand %vm5669_vm14, %vm2802_vm3  ;;  %vm2922_vm3 = vcmp.le.s32.totalorder %v5659_v61, 7 }
 0x682   :  { %v2804_v43 = vsel %vm2803_vm7, 1, %v3912_v10  ;;  %vm2779_vm9 = vmand %vm5669_vm14, %vm2778_vm1 }
 0x683   :  { %v5685_v26 = vsel %vm33_vm4, %v2804_v43, 0  ;;  %v2780_v28 = vsel %vm2779_vm9, 1, %v3912_v10  ;;  %vm2755_vm2 = vmand %vm5669_vm14, %vm2754_vm5  ;;  %vm2994_vm9 = vcmp.le.s32.totalorder %v5659_v61, 10 }
 0x684   :  { %v2807_v15 = vshrl.u32 %v5685_v26, 16  ;;  %v5693_v11 = vsel %vm33_vm4, %v2780_v28, 0  ;;  %v2756_v2 = vsel %vm2755_vm2, 1, %v3912_v10  ;;  %vm2875_vm13 = vmand %vm5669_vm14, %vm2874_vm0  ;;  %vm3018_vm0 = vcmp.le.s32.totalorder %v5659_v61, 11 }
 0x685   :  { %v2783_v40 = vshrl.u32 %v5693_v11, 16  ;;  %v5700_v42 = vsel %vm33_vm4, %v2756_v2, 0  ;;  %v2876_v44 = vsel %vm2875_vm13, 1, %v3912_v10  ;;  %vm2851_vm10 = vmand %vm5669_vm14, %vm2850_vm12  ;;  %vm2970_vm12 = vcmp.le.s32.totalorder %v5659_v61, 9 }
 0x686   :  { %v2809_v13 = vcvt.s32.f32 %v2807_v15  ;;  %v2759_v30 = vshrl.u32 %v5700_v42, 16  ;;  %v2852_v55 = vsel %vm2851_vm10, 1, %v3912_v10  ;;  %vm2827_vm15 = vmand %vm5669_vm14, %vm2826_vm6  ;;  %v5711_v51 = vsel %vm33_vm4, %v2876_v44, 0 }
 0x687   :  { %v2785_v34 = vcvt.s32.f32 %v2783_v40  ;;  %v2828_v22 = vsel %vm2827_vm15, 1, %v3912_v10  ;;  %v5716_v47 = vsel %vm33_vm4, %v2852_v55, 0  ;;  %vm2947_vm1 = vmand %vm5669_vm14, %vm2946_vm11  ;;  %v2879_v17 = vshrl.u32 %v5711_v51, 16 }
 0x688   :  { %2812 = vadd.xlane.f32.xlu2 %v2809_v13  ;;  %v2761_v53 = vcvt.s32.f32 %v2759_v30  ;;  %v5720_v54 = vsel %vm33_vm4, %v2828_v22, 0  ;;  %vm2923_vm5 = vmand %vm5669_vm14, %vm2922_vm3  ;;  %v2855_v63 = vshrl.u32 %v5716_v47, 16  ;;  %v2948_v1 = vsel %vm2947_vm1, 1, %v3912_v10 }
 0x689   :  { %2788 = vadd.xlane.f32.xlu1 %v2785_v34  ;;  %vm2899_vm7 = vmand %vm5669_vm14, %vm2898_vm8  ;;  %v2831_v0 = vshrl.u32 %v5720_v54, 16  ;;  %v2924_v33 = vsel %vm2923_vm5, 1, %v3912_v10  ;;  %v2881_v32 = vcvt.s32.f32 %v2879_v17  ;;  %v5736_v45 = vsel %vm33_vm4, %v2948_v1, 0 }
 0x68a   :  { %2764 = vadd.xlane.f32.xlu0 %v2761_v53  ;;  %v2900_v25 = vsel %vm2899_vm7, 1, %v3912_v10  ;;  %v2857_v18 = vcvt.s32.f32 %v2855_v63  ;;  %v5740_v46 = vsel %vm33_vm4, %v2924_v33, 0  ;;  %vm3019_vm2 = vmand %vm5669_vm14, %vm3018_vm0  ;;  %v2951_v41 = vshrl.u32 %v5736_v45, 16 }
 0x68b   :  { %v2833_v7 = vcvt.s32.f32 %v2831_v0  ;;  %v2901_v14 = vsel %vm33_vm4, %v2900_v25, 0  ;;  %vm2995_vm6 = vmand %vm5669_vm14, %vm2994_vm9  ;;  %v2927_v16 = vshrl.u32 %v5740_v46, 16  ;;  %v3020_v24 = vsel %vm3019_vm2, 1, %v3912_v10 }
 0x68c   :  { %vm2971_vm13 = vmand %vm5669_vm14, %vm2970_vm12  ;;  %v2903_v9 = vshrl.u32 %v2901_v14, 16  ;;  %v2996_v20 = vsel %vm2995_vm6, 1, %v3912_v10  ;;  %v2953_v50 = vcvt.s32.f32 %v2951_v41  ;;  %v5756_v56 = vsel %vm33_vm4, %v3020_v24, 0 }
 0x68d   :  { %v2972_v4 = vsel %vm2971_vm13, 1, %v3912_v10  ;;  %v2929_v36 = vcvt.s32.f32 %v2927_v16  ;;  %vm3066_vm10 = vcmp.le.s32.totalorder %v5659_v61, 13  ;;  %v5760_v31 = vsel %vm33_vm4, %v2996_v20, 0 }
 0x68e   :  { %v2905_v38 = vcvt.s32.f32 %v2903_v9  ;;  %vm3042_vm15 = vcmp.le.s32.totalorder %v5659_v61, 12  ;;  %v2973_v5 = vsel %vm33_vm4, %v2972_v4, 0  ;;  %v3023_v60 = vshrl.u32 %v5756_v56, 16  ;;  %vm3067_vm11 = vmand %vm5669_vm14, %vm3066_vm10 }
 0x68f   :  { %v2999_v23 = vshrl.u32 %v5760_v31, 16  ;;  %vm3043_vm3 = vmand %vm5669_vm14, %vm3042_vm15  ;;  %v2975_v3 = vshrl.u32 %v2973_v5, 16  ;;  %v3068_v12 = vsel %vm3067_vm11, 1, %v3912_v10  ;;  %v2758_v19 = vand.u32 65535, %v5700_v42 }
 0x690   :  { %2884 = vadd.xlane.f32.xlu2 %v2881_v32  ;;  %v3025_v8 = vcvt.s32.f32 %v3023_v60  ;;  %v3044_v57 = vsel %vm3043_vm3, 1, %v3912_v10  ;;  %v3069_v48 = vsel %vm33_vm4, %v3068_v12, 0  ;;  %v2830_v43 = vand.u32 65535, %v5720_v54 }
 0x691   :  { %2860 = vadd.xlane.f32.xlu1 %v2857_v18  ;;  %v3001_v21 = vcvt.s32.f32 %v2999_v23  ;;  %v2977_v29 = vcvt.s32.f32 %v2975_v3  ;;  %v3045_v62 = vsel %vm33_vm4, %v3044_v57, 0  ;;  %v3071_v27 = vshrl.u32 %v3069_v48, 16 }
 0x692   :  { %2836 = vadd.xlane.f32.xlu0 %v2833_v7  ;;  %v3047_v52 = vshrl.u32 %v3045_v62, 16  ;;  %v2760_v49 = vcvt.s32.f32 %v2758_v19  ;;  %v2806_v28 = vand.u32 65535, %v5685_v26  ;;  %v2782_v15 = vand.u32 65535, %v5693_v11 }
 0x693   :  { %v3073_v58 = vcvt.s32.f32 %v3071_v27  ;;  %v2832_v2 = vcvt.s32.f32 %v2830_v43  ;;  %v2902_v42 = vand.u32 65535, %v2901_v14  ;;  %v2878_v13 = vand.u32 65535, %v5711_v51 }
 0x694   :  { %v3049_v59 = vcvt.s32.f32 %v3047_v52  ;;  %v2808_v40 = vcvt.s32.f32 %v2806_v28  ;;  %v2784_v44 = vcvt.s32.f32 %v2782_v15  ;;  %v2854_v30 = vand.u32 65535, %v5716_v47 }
 0x695   :  { %v2904_v55 = vcvt.s32.f32 %v2902_v42  ;;  %v2880_v34 = vcvt.s32.f32 %v2878_v13  ;;  %v2974_v26 = vand.u32 65535, %v2973_v5  ;;  %v2950_v11 = vand.u32 65535, %v5736_v45 }
 0x696   :  { %v2856_v22 = vcvt.s32.f32 %v2854_v30  ;;  %v2926_v53 = vand.u32 65535, %v5740_v46  ;;  %vm3090_vm8 = vcmp.le.s32.totalorder %v5659_v61, 14  ;;  %v3046_v51 = vand.u32 65535, %v3045_v62 }
 0x697   :  { %v2976_v54 = vcvt.s32.f32 %v2974_v26  ;;  %v2952_v17 = vcvt.s32.f32 %v2950_v11  ;;  %vm3091_vm1 = vmand %vm5669_vm14, %vm3090_vm8  ;;  %v3022_v47 = vand.u32 65535, %v5756_v56  ;;  %v2998_v0 = vand.u32 65535, %v5760_v31 }
 0x698   :  { %2956 = vadd.xlane.f32.xlu2 %v2953_v50  ;;  %v2928_v63 = vcvt.s32.f32 %v2926_v53  ;;  %v3092_v1 = vsel %vm3091_vm1, 1, %v3912_v10  ;;  %v3048_v33 = vcvt.s32.f32 %v3046_v51  ;;  %v3070_v46 = vand.u32 65535, %v3069_v48 }
 0x699   :  { %2932 = vadd.xlane.f32.xlu1 %v2929_v36  ;;  %v3024_v32 = vcvt.s32.f32 %v3022_v47  ;;  %v3093_v25 = vsel %vm33_vm4, %v3092_v1, 0  ;;  %v3000_v18 = vcvt.s32.f32 %v2998_v0 }
 0x69a   :  { %2908 = vadd.xlane.f32.xlu0 %v2905_v38  ;;  %v3094_v45 = vand.u32 65535, %v3093_v25  ;;  %v3095_v7 = vshrl.u32 %v3093_v25, 16  ;;  %v3072_v16 = vcvt.s32.f32 %v3070_v46 }
 0x69c   :  { %v3096_v14 = vcvt.s32.f32 %v3094_v45  ;;  %v3097_v41 = vcvt.s32.f32 %v3095_v7 }
 0x6a0   :  { %3028 = vadd.xlane.f32.xlu2 %v3025_v8 }
 0x6a1   :  { %3004 = vadd.xlane.f32.xlu1 %v3001_v21 }
 0x6a2   :  { %2980 = vadd.xlane.f32.xlu0 %v2977_v29 }
 0x6a8   :  { %2762 = vadd.xlane.f32.xlu2 %v2760_v49 }
 0x6a9   :  { %3076 = vadd.xlane.f32.xlu1 %v3073_v58 }
 0x6aa   :  { %3052 = vadd.xlane.f32.xlu0 %v3049_v59 }
 0x6b0   :  { %2834 = vadd.xlane.f32.xlu2 %v2832_v2 }
 0x6b1   :  { %2810 = vadd.xlane.f32.xlu1 %v2808_v40 }
 0x6b2   :  { %2786 = vadd.xlane.f32.xlu0 %v2784_v44 }
 0x6b8   :  { %2906 = vadd.xlane.f32.xlu2 %v2904_v55 }
 0x6b9   :  { %2882 = vadd.xlane.f32.xlu1 %v2880_v34 }
 0x6ba   :  { %2858 = vadd.xlane.f32.xlu0 %v2856_v22 }
 0x6c0   :  { %2978 = vadd.xlane.f32.xlu2 %v2976_v54 }
 0x6c1   :  { %2954 = vadd.xlane.f32.xlu1 %v2952_v17 }
 0x6c2   :  { %2930 = vadd.xlane.f32.xlu0 %v2928_v63 }
 0x6c8   :  { %3050 = vadd.xlane.f32.xlu2 %v3048_v33 }
 0x6c9   :  { %3026 = vadd.xlane.f32.xlu1 %v3024_v32 }
 0x6ca   :  { %3002 = vadd.xlane.f32.xlu0 %v3000_v18 }
 0x6d0   :  { %3098 = vadd.xlane.f32.xlu2 %v3096_v14 }
 0x6d1   :  { %3100 = vadd.xlane.f32.xlu1 %v3097_v41 }
 0x6d2   :  { %3074 = vadd.xlane.f32.xlu0 %v3072_v16 }
 0x6fb   :  { %v2813_v9 = vpop.xlane.xlu2 %2812 }
 0x6fc   :  { %v2789_v24 = vpop.xlane.xlu1 %2788  ;;  %v2815_v27 = vcvt.f32.s32 %v2813_v9 }
 0x6fd   :  { %v2765_v20 = vpop.xlane.xlu0 %2764  ;;  %v2791_v52 = vcvt.f32.s32 %v2789_v24 }
 0x6fe   :  { %v2767_v3 = vcvt.f32.s32 %v2765_v20  ;;  %v2816_v2 = vshll.u32 %v2815_v27, 16 }
 0x6ff   :  { %v2792_v42 = vshll.u32 %v2791_v52, 16 }
 0x700   :  { %v2768_v8 = vshll.u32 %v2767_v3, 16 }
 0x703   :  { %v2885_v50 = vpop.xlane.xlu2 %2884 }
 0x704   :  { %v2861_v4 = vpop.xlane.xlu1 %2860  ;;  %v2887_v54 = vcvt.f32.s32 %v2885_v50 }
 0x705   :  { %v2837_v36 = vpop.xlane.xlu0 %2836  ;;  %v2863_v17 = vcvt.f32.s32 %v2861_v4 }
 0x706   :  { %v2839_v62 = vcvt.f32.s32 %v2837_v36  ;;  %v2888_v46 = vshll.u32 %v2887_v54, 16 }
 0x707   :  { %v2864_v14 = vshll.u32 %v2863_v17, 16 }
 0x708   :  { %v2840_v59 = vshll.u32 %v2839_v62, 16 }
 0x70b   :  { %v5789_v56 = vpop.xlane.xlu2 %2956 }
 0x70c   :  { %v5791_v38 = vpop.xlane.xlu1 %2932  ;;  %v2959_v62 = vcvt.f32.s32 %v5789_v56 }
 0x70d   :  { %v2909_v31 = vpop.xlane.xlu0 %2908 }
 0x70e   :  { %v2911_v22 = vcvt.f32.s32 %v2909_v31 }
 0x710   :  { %v2912_v32 = vshll.u32 %v2911_v22, 16 }
 0x713   :  { %v5793_v5 = vpop.xlane.xlu2 %3028 }
 0x714   :  { %v5795_v60 = vpop.xlane.xlu1 %3004 }
 0x715   :  { %v5797_v23 = vpop.xlane.xlu0 %2980 }
 0x716   :  { %v2983_v36 = vcvt.f32.s32 %v5797_v23 }
 0x71b   :  { %v2763_v12 = vpop.xlane.xlu2 %2762 }
 0x71c   :  { %v5799_v57 = vpop.xlane.xlu1 %3076  ;;  %v2766_v21 = vcvt.f32.s32 %v2763_v12 }
 0x71d   :  { %v5801_v29 = vpop.xlane.xlu0 %3052 }
 0x71e   :  { %v2769_v48 = vadd.s32 %v2768_v8, %v2766_v21  ;;  %v3055_v17 = vcvt.f32.s32 %v5801_v29 }
 0x720   :  { %v2770_v19 = vrot.slane %v2769_v48, 4 }
 0x722   :  { %v2771_v49 = vadd.s32 %v2770_v19, %v2769_v48  ;;  %v2935_v19 = vcvt.f32.s32 %v5791_v38 }
 0x723   :  { %v2835_v58 = vpop.xlane.xlu2 %2834 }
 0x724   :  { %v2811_v43 = vpop.xlane.xlu1 %2810  ;;  %v2838_v28 = vcvt.f32.s32 %v2835_v58  ;;  %v2772_v15 = vrot.slane %v2771_v49, 2 }
 0x725   :  { %v2814_v40 = vcvt.f32.s32 %v2811_v43  ;;  %v2787_v44 = vpop.xlane.xlu0 %2786  ;;  %v2984_v43 = vshll.u32 %v2983_v36, 16 }
 0x726   :  { %v2790_v13 = vcvt.f32.s32 %v2787_v44  ;;  %v2841_v30 = vadd.s32 %v2840_v59, %v2838_v28  ;;  %v2773_v55 = vadd.s32 %v2772_v15, %v2771_v49 }
 0x727   :  { %v2817_v34 = vadd.s32 %v2816_v2, %v2814_v40 }
 0x728   :  { %v2793_v26 = vadd.s32 %v2792_v42, %v2790_v13  ;;  %v2842_v11 = vrot.slane %v2841_v30, 4  ;;  %v2774_v53 = vrot.slane %v2773_v55, 1 }
 0x729   :  { %v2818_v63 = vrot.slane %v2817_v34, 4 }
 0x72a   :  { %v2794_v51 = vrot.slane %v2793_v26, 4  ;;  %v2843_v47 = vadd.s32 %v2842_v11, %v2841_v30  ;;  %v2775_v0 = vadd.s32 %v2774_v53, %v2773_v55  ;;  %v2960_v55 = vshll.u32 %v2959_v62, 16 }
 0x72b   :  { %v2819_v1 = vadd.s32 %v2818_v63, %v2817_v34  ;;  %v2907_v33 = vpop.xlane.xlu2 %2906  ;;  %v2936_v34 = vshll.u32 %v2935_v19, 16 }
 0x72c   :  { %v2795_v25 = vadd.s32 %v2794_v51, %v2793_v26  ;;  %v2883_v18 = vpop.xlane.xlu1 %2882  ;;  %v2910_v45 = vcvt.f32.s32 %v2907_v33  ;;  %3823 = vpush %v2775_v0  ;;  %v2844_v7 = vrot.slane %v2843_v47, 2 }
 0x72d   :  { %v2886_v41 = vcvt.f32.s32 %v2883_v18  ;;  %v2859_v16 = vpop.xlane.xlu0 %2858  ;;  %v2820_v9 = vrot.slane %v2819_v1, 2 }
 0x72e   :  { %v2862_v24 = vcvt.f32.s32 %v2859_v16  ;;  %v2913_v20 = vadd.s32 %v2912_v32, %v2910_v45  ;;  %v2796_v50 = vrot.slane %v2795_v25, 2  ;;  %v2845_v4 = vadd.s32 %v2844_v7, %v2843_v47 }
 0x72f   :  { %v2889_v31 = vadd.s32 %v2888_v46, %v2886_v41  ;;  %v2821_v3 = vadd.s32 %v2820_v9, %v2819_v1  ;;  %v3031_v32 = vcvt.f32.s32 %v5793_v5  ;;  %v3056_v41 = vshll.u32 %v3055_v17, 16 }
 0x730   :  { %v2865_v12 = vadd.s32 %v2864_v14, %v2862_v24  ;;  %v2914_v8 = vrot.slane %v2913_v20, 4  ;;  %v2797_v21 = vadd.s32 %v2796_v50, %v2795_v25  ;;  %v2846_v48 = vrot.slane %v2845_v4, 1 }
 0x731   :  { %v2890_v27 = vrot.slane %v2889_v31, 4  ;;  %v2822_v52 = vrot.slane %v2821_v3, 1  ;;  %v3007_v25 = vcvt.f32.s32 %v5795_v60 }
 0x732   :  { %v2866_v49 = vrot.slane %v2865_v12, 4  ;;  %v2915_v58 = vadd.s32 %v2914_v8, %v2913_v20  ;;  %v2798_v59 = vrot.slane %v2797_v21, 1  ;;  %v2847_v23 = vadd.s32 %v2846_v48, %v2845_v4 }
 0x733   :  { %v2891_v28 = vadd.s32 %v2890_v27, %v2889_v31  ;;  %v2979_v15 = vpop.xlane.xlu2 %2978  ;;  %v2823_v2 = vadd.s32 %v2822_v52, %v2821_v3  ;;  %v3032_v3 = vshll.u32 %v3031_v32, 16 }
 0x734   :  { %v2867_v40 = vadd.s32 %v2866_v49, %v2865_v12  ;;  %v2955_v44 = vpop.xlane.xlu1 %2954  ;;  %v2982_v42 = vcvt.f32.s32 %v2979_v15  ;;  %v2799_v13 = vadd.s32 %v2798_v59, %v2797_v21  ;;  %v2916_v30 = vrot.slane %v2915_v58, 2 }
 0x735   :  { %v2958_v56 = vcvt.f32.s32 %v2955_v44  ;;  %v2931_v22 = vpop.xlane.xlu0 %2930  ;;  %v2892_v38 = vrot.slane %v2891_v28, 2  ;;  %v3008_v12 = vshll.u32 %v3007_v25, 16 }
 0x736   :  { %v2934_v26 = vcvt.f32.s32 %v2931_v22  ;;  %v2985_v11 = vadd.s32 %v2984_v43, %v2982_v42  ;;  %3825 = vpush %v2799_v13  ;;  %v2868_v53 = vrot.slane %v2867_v40, 2  ;;  %v2917_v54 = vadd.s32 %v2916_v30, %v2915_v58 }
 0x737   :  { %v2961_v63 = vadd.s32 %v2960_v55, %v2958_v56  ;;  %3827 = vpush %v2823_v2  ;;  %v2893_v51 = vadd.s32 %v2892_v38, %v2891_v28  ;;  %v3079_v2 = vcvt.f32.s32 %v5799_v57 }
 0x738   :  { %v2937_v47 = vadd.s32 %v2936_v34, %v2934_v26  ;;  %v2986_v0 = vrot.slane %v2985_v11, 4  ;;  %3829 = vpush %v2847_v23  ;;  %v2869_v1 = vadd.s32 %v2868_v53, %v2867_v40  ;;  %v2918_v33 = vrot.slane %v2917_v54, 1 }
 0x739   :  { %v2962_v18 = vrot.slane %v2961_v63, 4  ;;  %v2894_v45 = vrot.slane %v2893_v51, 1 }
 0x73a   :  { %v2938_v7 = vrot.slane %v2937_v47, 4  ;;  %v2987_v46 = vadd.s32 %v2986_v0, %v2985_v11  ;;  %v2870_v14 = vrot.slane %v2869_v1, 1  ;;  %v2919_v24 = vadd.s32 %v2918_v33, %v2917_v54 }
 0x73b   :  { %v2963_v16 = vadd.s32 %v2962_v18, %v2961_v63  ;;  %v3051_v29 = vpop.xlane.xlu2 %3050  ;;  %v2895_v9 = vadd.s32 %v2894_v45, %v2893_v51  ;;  %v3080_v54 = vshll.u32 %v3079_v2, 16 }
 0x73c   :  { %v2939_v20 = vadd.s32 %v2938_v7, %v2937_v47  ;;  %v3027_v50 = vpop.xlane.xlu1 %3026  ;;  %v3054_v4 = vcvt.f32.s32 %v3051_v29  ;;  %v2871_v36 = vadd.s32 %v2870_v14, %v2869_v1  ;;  %v2988_v31 = vrot.slane %v2987_v46, 2 }
 0x73d   :  { %v3030_v5 = vcvt.f32.s32 %v3027_v50  ;;  %v3003_v8 = vpop.xlane.xlu0 %3002  ;;  %v2964_v60 = vrot.slane %v2963_v16, 2 }
 0x73e   :  { %v3006_v21 = vcvt.f32.s32 %v3003_v8  ;;  %v3057_v48 = vadd.s32 %v3056_v41, %v3054_v4  ;;  %3831 = vpush %v2871_v36  ;;  %v2940_v62 = vrot.slane %v2939_v20, 2  ;;  %v2989_v19 = vadd.s32 %v2988_v31, %v2987_v46 }
 0x73f   :  { %v3033_v27 = vadd.s32 %v3032_v3, %v3030_v5  ;;  %3833 = vpush %v2895_v9  ;;  %v2965_v52 = vadd.s32 %v2964_v60, %v2963_v16 }
 0x740   :  { %v3009_v49 = vadd.s32 %v3008_v12, %v3006_v21  ;;  %v3058_v58 = vrot.slane %v3057_v48, 4  ;;  %3835 = vpush %v2919_v24  ;;  %v2941_v59 = vadd.s32 %v2940_v62, %v2939_v20  ;;  %v2990_v43 = vrot.slane %v2989_v19, 1 }
 0x741   :  { %v3034_v28 = vrot.slane %v3033_v27, 4  ;;  %v2966_v15 = vrot.slane %v2965_v52, 1 }
 0x742   :  { %v3010_v23 = vrot.slane %v3009_v49, 4  ;;  %v3059_v40 = vadd.s32 %v3058_v58, %v3057_v48  ;;  %v2942_v44 = vrot.slane %v2941_v59, 1  ;;  %v2991_v22 = vadd.s32 %v2990_v43, %v2989_v19 }
 0x743   :  { %v3035_v42 = vadd.s32 %v3034_v28, %v3033_v27  ;;  %v2967_v13 = vadd.s32 %v2966_v15, %v2965_v52  ;;  %v3099_v34 = vpop.xlane.xlu2 %3098 }
 0x744   :  { %v3011_v30 = vadd.s32 %v3010_v23, %v3009_v49  ;;  %v3101_v55 = vpop.xlane.xlu1 %3100  ;;  %v2943_v56 = vadd.s32 %v2942_v44, %v2941_v59  ;;  %v3060_v38 = vrot.slane %v3059_v40, 2  ;;  %v3102_v47 = vcvt.f32.s32 %v3099_v34 }
 0x745   :  { %v3103_v26 = vcvt.f32.s32 %v3101_v55  ;;  %v3075_v11 = vpop.xlane.xlu0 %3074  ;;  %v3036_v53 = vrot.slane %v3035_v42, 2 }
 0x746   :  { %v3078_v17 = vcvt.f32.s32 %v3075_v11  ;;  %3837 = vpush %v2943_v56  ;;  %v3012_v63 = vrot.slane %v3011_v30, 2  ;;  %v3061_v51 = vadd.s32 %v3060_v38, %v3059_v40 }
 0x747   :  { %v3104_v57 = vshll.u32 %v3103_v26, 16  ;;  %3839 = vpush %v2967_v13  ;;  %v3037_v0 = vadd.s32 %v3036_v53, %v3035_v42 }
 0x748   :  { %v3081_v1 = vadd.s32 %v3080_v54, %v3078_v17  ;;  %3841 = vpush %v2991_v22  ;;  %v3013_v33 = vadd.s32 %v3012_v63, %v3011_v30  ;;  %v3062_v32 = vrot.slane %v3061_v51, 1 }
 0x749   :  { %v3105_v25 = vadd.s32 %v3104_v57, %v3102_v47  ;;  %v3038_v18 = vrot.slane %v3037_v0, 1 }
 0x74a   :  { %v3082_v45 = vrot.slane %v3081_v1, 4  ;;  %v3014_v7 = vrot.slane %v3013_v33, 1  ;;  %v3063_v29 = vadd.s32 %v3062_v32, %v3061_v51 }
 0x74b   :  { %v3106_v46 = vrot.slane %v3105_v25, 4  ;;  %v3039_v14 = vadd.s32 %v3038_v18, %v3037_v0 }
 0x74c   :  { %v3083_v41 = vadd.s32 %v3082_v45, %v3081_v1  ;;  %v3015_v16 = vadd.s32 %v3014_v7, %v3013_v33 }
 0x74d   :  { %v3107_v9 = vadd.s32 %v3106_v46, %v3105_v25 }
 0x74e   :  { %3843 = vpush %v3015_v16  ;;  %v3084_v24 = vrot.slane %v3083_v41, 2 }
 0x74f   :  { %3845 = vpush %v3039_v14  ;;  %v3108_v20 = vrot.slane %v3107_v9, 2 }
 0x750   :  { %3847 = vpush %v3063_v29  ;;  %v3085_v50 = vadd.s32 %v3084_v24, %v3083_v41 }
 0x751   :  { %v3109_v4 = vadd.s32 %v3108_v20, %v3107_v9 }
 0x752   :  { %v3086_v36 = vrot.slane %v3085_v50, 1 }
 0x753   :  { %v3110_v31 = vrot.slane %v3109_v4, 1 }
 0x754   :  { %v3087_v3 = vadd.s32 %v3086_v36, %v3085_v50 }
 0x755   :  { %v3111_v12 = vadd.s32 %v3110_v31, %v3109_v4 }
 0x756   :  { %3849 = vpush %v3087_v3 }
 0x757   :  { %3851 = vpush %v3111_v12 }
 0x75d   :  { %s3824_s21 = spop %3823 }
 0x75e   :  { %v2777_v5 = vstv %s3824_s21 }
 0x75f   :  { %vm5811_vm5 = vcmp.lt.s32.totalorder %v2777_v5, %v5663_v37 }
 0x760   :  { %v3158_v60 = vsel %vm5811_vm5, %v2777_v5, 0  ;;  %v3129_v48 = vsel %vm5811_vm5, 1, %v3912_v10 }
 0x767   :  { %s3826_s22 = spop %3825 }
 0x768   :  { %v2801_v21 = vstv %s3826_s22  ;;  %s3828_s23 = spop %3827 }
 0x769   :  { %vm5818_vm7 = vcmp.lt.s32.totalorder %v2801_v21, %v5663_v37  ;;  %v2825_v62 = vstv %s3828_s23  ;;  %s3830_s24 = spop %3829  ;;  %s3913_s23 = smov [#allocation4]  }
 0x76a   :  { %v3159_v19 = vsel %vm5818_vm7, %v2801_v21, 0  ;;  %vm5825_vm0 = vcmp.lt.s32.totalorder %v2825_v62, %v5663_v37  ;;  %v2849_v52 = vstv %s3830_s24  ;;  %v3130_v16 = vsel %vm5818_vm7, 1, %v3912_v10  ;;  %s3627_s24 = sshll.u32 %s3913_s23, 4  ;;  %s3628_s24 = int_to_ptr.vmem [resolvable:$true] %s3627_s24 }
 0x76b   :  { %vm3173_vm9 = vcmp.gt.s32.totalorder %v3158_v60, %v3159_v19  ;;  %v3160_v49 = vsel %vm5825_vm0, %v2825_v62, 0  ;;  %vm5832_vm12 = vcmp.lt.s32.totalorder %v2849_v52, %v5663_v37  ;;  %v3131_v20 = vsel %vm5825_vm0, 1, %v3912_v10 }
 0x76c   :  { %v3174_v58 = vsel %vm3173_vm9, %v3158_v60, %v3159_v19  ;;  %v3161_v43 = vsel %vm5832_vm12, %v2849_v52, 0  ;;  %v3132_v36 = vsel %vm5832_vm12, 1, %v3912_v10  ;;  %v3144_v19 = vadd.s32 %v3130_v16, %v3129_v48 }
 0x76d   :  { %vm3175_vm2 = vcmp.gt.s32.totalorder %v3160_v49, %v3161_v43  ;;  %v3145_v27 = vadd.s32 %v3132_v36, %v3131_v20 }
 0x76e   :  { %v3176_v28 = vsel %vm3175_vm2, %v3160_v49, %v3161_v43 }
 0x76f   :  { %s3832_s25 = spop %3831  ;;  %vm3187_vm6 = vcmp.gt.s32.totalorder %v3174_v58, %v3176_v28  ;;  %v3151_v42 = vadd.s32 %v3145_v27, %v3144_v19 }
 0x770   :  { %v2873_v15 = vstv %s3832_s25  ;;  %s3834_s26 = spop %3833  ;;  %v3188_v2 = vsel %vm3187_vm6, %v3174_v58, %v3176_v28 }
 0x771   :  { %vm5839_vm13 = vcmp.lt.s32.totalorder %v2873_v15, %v5663_v37  ;;  %v2897_v40 = vstv %s3834_s26  ;;  %s3836_s27 = spop %3835 }
 0x772   :  { %v3162_v44 = vsel %vm5839_vm13, %v2873_v15, 0  ;;  %vm5846_vm10 = vcmp.lt.s32.totalorder %v2897_v40, %v5663_v37  ;;  %v2921_v13 = vstv %s3836_s27  ;;  %v3133_v32 = vsel %vm5839_vm13, 1, %v3912_v10  ;;  %s3629_s27 = sshll.u32 %s6149_s2, 4  ;;  %s3630_s27 = int_to_ptr.hbm [resolvable:$true] %s3629_s27 }
 0x773   :  { %v3163_v30 = vsel %vm5846_vm10, %v2897_v40, 0  ;;  %vm5853_vm15 = vcmp.lt.s32.totalorder %v2921_v13, %v5663_v37  ;;  %v3134_v7 = vsel %vm5846_vm10, 1, %v3912_v10 }
 0x774   :  { %vm3177_vm11 = vcmp.gt.s32.totalorder %v3162_v44, %v3163_v30  ;;  %v3164_v34 = vsel %vm5853_vm15, %v2921_v13, 0  ;;  %v3135_v29 = vsel %vm5853_vm15, 1, %v3912_v10  ;;  %v3146_v31 = vadd.s32 %v3134_v7, %v3133_v32 }
 0x775   :  { %v3178_v56 = vsel %vm3177_vm11, %v3162_v44, %v3163_v30 }
 0x777   :  { %s3838_s28 = spop %3837 }
 0x778   :  { %v2945_v22 = vstv %s3838_s28  ;;  %s3840_s29 = spop %3839 }
 0x779   :  { %vm5860_vm3 = vcmp.lt.s32.totalorder %v2945_v22, %v5663_v37  ;;  %v2969_v26 = vstv %s3840_s29  ;;  %s3842_s30 = spop %3841 }
 0x77a   :  { %v3165_v11 = vsel %vm5860_vm3, %v2945_v22, 0  ;;  %vm5867_vm8 = vcmp.lt.s32.totalorder %v2969_v26, %v5663_v37  ;;  %v2993_v54 = vstv %s3842_s30  ;;  %v3136_v25 = vsel %vm5860_vm3, 1, %v3912_v10 }
 0x77b   :  { %vm3179_vm1 = vcmp.gt.s32.totalorder %v3164_v34, %v3165_v11  ;;  %v3166_v17 = vsel %vm5867_vm8, %v2969_v26, 0  ;;  %vm5874_vm9 = vcmp.lt.s32.totalorder %v2993_v54, %v5663_v37  ;;  %v3147_v50 = vadd.s32 %v3136_v25, %v3135_v29 }
 0x77c   :  { %v3180_v63 = vsel %vm3179_vm1, %v3164_v34, %v3165_v11  ;;  %v3167_v57 = vsel %vm5874_vm9, %v2993_v54, 0  ;;  %v3137_v3 = vsel %vm5867_vm8, 1, %v3912_v10  ;;  %v3138_v5 = vsel %vm5874_vm9, 1, %v3912_v10 }
 0x77d   :  { %vm3189_vm2 = vcmp.gt.s32.totalorder %v3178_v56, %v3180_v63  ;;  %vm3181_vm6 = vcmp.gt.s32.totalorder %v3166_v17, %v3167_v57  ;;  %v3152_v52 = vadd.s32 %v3147_v50, %v3146_v31  ;;  %v3148_v58 = vadd.s32 %v3138_v5, %v3137_v3 }
 0x77e   :  { %v3190_v47 = vsel %vm3189_vm2, %v3178_v56, %v3180_v63  ;;  %v3182_v0 = vsel %vm3181_vm6, %v3166_v17, %v3167_v57  ;;  %v5945_v34 = vand.u32 15, %v3937_v6 }
 0x77f   :  { %vm3195_vm11 = vcmp.gt.s32.totalorder %v3188_v2, %v3190_v47  ;;  %s3844_s4 = spop %3843  ;;  %v3155_v56 = vadd.s32 %v3152_v52, %v3151_v42 }
 0x780   :  { %v3017_v1 = vstv %s3844_s4  ;;  %s3846_s5 = spop %3845  ;;  %v3196_v33 = vsel %vm3195_vm11, %v3188_v2, %v3190_v47  ;;  %vm3255_vm2 = vcmp.le.s32.totalorder %v5945_v34, 2  ;;  %vm3231_vm11 = vcmp.le.s32.totalorder %v5945_v34, 1 }
 0x781   :  { %vm5887_vm1 = vcmp.lt.s32.totalorder %v3017_v1, %v5663_v37  ;;  %v3041_v45 = vstv %s3846_s5  ;;  %s3848_s6 = spop %3847 }
 0x782   :  { %v3168_v46 = vsel %vm5887_vm1, %v3017_v1, 0  ;;  %vm5897_vm13 = vcmp.lt.s32.totalorder %v3041_v45, %v5663_v37  ;;  %v3065_v41 = vstv %s3848_s6  ;;  %v3139_v60 = vsel %vm5887_vm1, 1, %v3912_v10 }
 0x783   :  { %v3169_v9 = vsel %vm5897_vm13, %v3041_v45, 0  ;;  %vm5910_vm10 = vcmp.lt.s32.totalorder %v3065_v41, %v5663_v37  ;;  %v3140_v21 = vsel %vm5897_vm13, 1, %v3912_v10  ;;  %vm3207_vm13 = vcmp.le.s32.totalorder %v5945_v34, 0 }
 0x784   :  { %vm3183_vm3 = vcmp.gt.s32.totalorder %v3168_v46, %v3169_v9  ;;  %v3170_v4 = vsel %vm5910_vm10, %v3065_v41, 0  ;;  %v3149_v59 = vadd.s32 %v3140_v21, %v3139_v60  ;;  %v3141_v28 = vsel %vm5910_vm10, 1, %v3912_v10 }
 0x785   :  { %v3184_v12 = vsel %vm3183_vm3, %v3168_v46, %v3169_v9  ;;  %vm3327_vm3 = vcmp.le.s32.totalorder %v5945_v34, 5 }
 0x786   :  { %vm3191_vm7 = vcmp.gt.s32.totalorder %v3182_v0, %v3184_v12  ;;  %v3153_v13 = vadd.s32 %v3149_v59, %v3148_v58 }
 0x787   :  { %s3850_s7 = spop %3849  ;;  %v3192_v62 = vsel %vm3191_vm7, %v3182_v0, %v3184_v12 }
 0x788   :  { %v3089_v49 = vstv %s3850_s7  ;;  %s3852_s8 = spop %3851 }
 0x789   :  { %vm3127_vm0 = vcmp.lt.s32.totalorder %v3089_v49, %v5663_v37  ;;  %v3113_v43 = vstv %s3852_s8 }
 0x78a   :  { %v3142_v15 = vsel %vm3127_vm0, 1, %v3912_v10  ;;  %v3171_v8 = vsel %vm3127_vm0, %v3089_v49, 0  ;;  %vm3128_vm5 = vcmp.lt.s32.totalorder %v3113_v43, %v5663_v37 }
 0x78b   :  { %v3150_v2 = vadd.s32 %v3142_v15, %v3141_v28  ;;  %vm3185_vm12 = vcmp.gt.s32.totalorder %v3170_v4, %v3171_v8  ;;  %v3143_v23 = vsel %vm3128_vm5, 1, %v3912_v10  ;;  %v3172_v40 = vsel %vm3128_vm5, %v3113_v43, 0 }
 0x78c   :  { %v3186_v44 = vsel %vm3185_vm12, %v3170_v4, %v3171_v8  ;;  %vm3279_vm5 = vcmp.le.s32.totalorder %v5945_v34, 3 }
 0x78d   :  { %v3154_v30 = vadd.s32 %v3150_v2, %v3143_v23  ;;  %vm3193_vm15 = vcmp.gt.s32.totalorder %v3186_v44, %v3172_v40 }
 0x78e   :  { %v3194_v55 = vsel %vm3193_vm15, %v3186_v44, %v3172_v40 }
 0x78f   :  { %v3156_v22 = vadd.s32 %v3154_v30, %v3153_v13  ;;  %vm3197_vm8 = vcmp.gt.s32.totalorder %v3192_v62, %v3194_v55 }
 0x790   :  { %v3198_v38 = vsel %vm3197_vm8, %v3192_v62, %v3194_v55 }
 0x791   :  { %v3157_v26 = vadd.s32 %v3156_v22, %v3155_v56  ;;  %vm3199_vm9 = vcmp.gt.s32.totalorder %v3196_v33, %v3198_v38 }
 0x792   :  { %v3200_v11 = vsel %vm3199_vm9, %v3196_v33, %v3198_v38  ;;  %vm3399_vm9 = vcmp.le.s32.totalorder %v5945_v34, 8 }
 0x793   :  { %v5949_v53 = vsub.s32 %v5663_v37, %v3200_v11  ;;  %v3202_v54 = vshll.u32 %v3157_v26, 4  ;;  %vm3204_vm6 = vcmp.eq.s32.totalorder %v5659_v61, %v3157_v26 }
 0x794   :  { %vm5955_vm1 = vmand %vm5669_vm14, %vm3204_vm6  ;;  %vm3303_vm14 = vcmp.le.s32.totalorder %v5945_v34, 4  ;;  %vm3351_vm6 = vcmp.le.s32.totalorder %v5945_v34, 6 }
 0x795   :  { %vm3256_vm10 = vmand %vm5955_vm1, %vm3255_vm2  ;;  %v5964_v37 = vor.u32 %v3202_v54, %v5675_v35  ;;  %vm3375_vm2 = vcmp.le.s32.totalorder %v5945_v34, 7 }
 0x796   :  { %v3257_v61 = vsel %vm3256_vm10, 1, %v3912_v10  ;;  %vm3232_vm7 = vmand %vm5955_vm1, %vm3231_vm11 }
 0x797   :  { %v5971_v39 = vsel %vm33_vm4, %v3257_v61, 0  ;;  %v3233_v17 = vsel %vm3232_vm7, 1, %v3912_v10  ;;  %vm3208_vm0 = vmand %vm5955_vm1, %vm3207_vm13  ;;  %vm3471_vm7 = vcmp.le.s32.totalorder %v5945_v34, 11 }
 0x798   :  { %v3260_v35 = vshrl.u32 %v5971_v39, 16  ;;  %v5979_v63 = vsel %vm33_vm4, %v3233_v17, 0  ;;  %v3209_v51 = vsel %vm3208_vm0, 1, %v3912_v10  ;;  %vm3328_vm12 = vmand %vm5955_vm1, %vm3327_vm3  ;;  %vm3543_vm3 = vcmp.le.s32.totalorder %v5945_v34, 14 }
 0x799   :  { %v3236_v57 = vshrl.u32 %v5979_v63, 16  ;;  %v5986_v47 = vsel %vm33_vm4, %v3209_v51, 0  ;;  %v3329_v0 = vsel %vm3328_vm12, 1, %v3912_v10  ;;  %vm3304_vm15 = vmand %vm5955_vm1, %vm3303_vm14  ;;  %vm3447_vm14 = vcmp.le.s32.totalorder %v5945_v34, 10 }
 0x79a   :  { %v3262_v1 = vcvt.s32.f32 %v3260_v35  ;;  %v3212_v33 = vshrl.u32 %v5986_v47, 16  ;;  %v3305_v32 = vsel %vm3304_vm15, 1, %v3912_v10  ;;  %vm3280_vm8 = vmand %vm5955_vm1, %vm3279_vm5  ;;  %v5997_v18 = vsel %vm33_vm4, %v3329_v0, 0 }
 0x79b   :  { %v3238_v25 = vcvt.s32.f32 %v3236_v57  ;;  %v3281_v45 = vsel %vm3280_vm8, 1, %v3912_v10  ;;  %v6002_v46 = vsel %vm33_vm4, %v3305_v32, 0  ;;  %vm3400_vm11 = vmand %vm5955_vm1, %vm3399_vm9  ;;  %v3332_v41 = vshrl.u32 %v5997_v18, 16 }
 0x79c   :  { %3265 = vadd.xlane.f32.xlu2 %v3262_v1  ;;  %v3214_v7 = vcvt.s32.f32 %v3212_v33  ;;  %v6006_v14 = vsel %vm33_vm4, %v3281_v45, 0  ;;  %vm3376_vm13 = vmand %vm5955_vm1, %vm3375_vm2  ;;  %v3308_v16 = vshrl.u32 %v6002_v46, 16  ;;  %v3401_v9 = vsel %vm3400_vm11, 1, %v3912_v10 }
 0x79d   :  { %3241 = vadd.xlane.f32.xlu1 %v3238_v25  ;;  %vm3352_vm10 = vmand %vm5955_vm1, %vm3351_vm6  ;;  %v3284_v29 = vshrl.u32 %v6006_v14, 16  ;;  %v3377_v24 = vsel %vm3376_vm13, 1, %v3912_v10  ;;  %v3334_v20 = vcvt.s32.f32 %v3332_v41  ;;  %v6023_v36 = vsel %vm33_vm4, %v3401_v9, 0 }
 0x79e   :  { %3217 = vadd.xlane.f32.xlu0 %v3214_v7  ;;  %v3353_v50 = vsel %vm3352_vm10, 1, %v3912_v10  ;;  %v3310_v4 = vcvt.s32.f32 %v3308_v16  ;;  %vm6028_vm0 = vmand %vm5955_vm1, %vm3543_vm3  ;;  %v6033_v12 = vsel %vm33_vm4, %v3377_v24, 0  ;;  %vm3423_vm5 = vcmp.le.s32.totalorder %v5945_v34, 9 }
 0x79f   :  { %v3286_v3 = vcvt.s32.f32 %v3284_v29  ;;  %v3354_v5 = vsel %vm33_vm4, %v3353_v50, 0  ;;  %vm3472_vm12 = vmand %vm5955_vm1, %vm3471_vm7  ;;  %v3404_v60 = vshrl.u32 %v6023_v36, 16  ;;  %v3380_v21 = vshrl.u32 %v6033_v12, 16 }
 0x7a0   :  { %vm3448_vm15 = vmand %vm5955_vm1, %vm3447_vm14  ;;  %v3356_v48 = vshrl.u32 %v3354_v5, 16  ;;  %v3473_v62 = vsel %vm3472_vm12, 1, %v3912_v10  ;;  %vm3519_vm9 = vcmp.le.s32.totalorder %v5945_v34, 13  ;;  %vm3495_vm2 = vcmp.le.s32.totalorder %v5945_v34, 12 }
 0x7a1   :  { %vm3424_vm8 = vmand %vm5955_vm1, %vm3423_vm5  ;;  %v3449_v19 = vsel %vm3448_vm15, 1, %v3912_v10  ;;  %v3406_v27 = vcvt.s32.f32 %v3404_v60  ;;  %v3382_v49 = vcvt.s32.f32 %v3380_v21  ;;  %v6049_v58 = vsel %vm33_vm4, %v3473_v62, 0 }
 0x7a2   :  { %v3425_v52 = vsel %vm3424_vm8, 1, %v3912_v10  ;;  %v3358_v59 = vcvt.s32.f32 %v3356_v48  ;;  %v6053_v43 = vsel %vm33_vm4, %v3449_v19, 0  ;;  %v3476_v15 = vshrl.u32 %v6049_v58, 16  ;;  %vm3520_vm6 = vmand %vm5955_vm1, %vm3519_vm9 }
 0x7a3   :  { %v3426_v28 = vsel %vm33_vm4, %v3425_v52, 0  ;;  %v3452_v8 = vshrl.u32 %v6053_v43, 16  ;;  %vm3496_vm11 = vmand %vm5955_vm1, %vm3495_vm2  ;;  %v3521_v23 = vsel %vm3520_vm6, 1, %v3912_v10  ;;  %v3211_v34 = vand.u32 65535, %v5986_v47 }
 0x7a4   :  { %3337 = vadd.xlane.f32.xlu2 %v3334_v20  ;;  %v3428_v2 = vshrl.u32 %v3426_v28, 16  ;;  %v3478_v40 = vcvt.s32.f32 %v3476_v15  ;;  %v3497_v44 = vsel %vm3496_vm11, 1, %v3912_v10  ;;  %v3522_v30 = vsel %vm33_vm4, %v3521_v23, 0 }
 0x7a5   :  { %3313 = vadd.xlane.f32.xlu1 %v3310_v4  ;;  %v3454_v42 = vcvt.s32.f32 %v3452_v8  ;;  %v3498_v55 = vsel %vm33_vm4, %v3497_v44, 0  ;;  %v3524_v56 = vshrl.u32 %v3522_v30, 16  ;;  %v3213_v38 = vcvt.s32.f32 %v3211_v34 }
 0x7a6   :  { %3289 = vadd.xlane.f32.xlu0 %v3286_v3  ;;  %v3430_v13 = vcvt.s32.f32 %v3428_v2  ;;  %v3500_v22 = vshrl.u32 %v3498_v55, 16  ;;  %v3283_v54 = vand.u32 65535, %v6006_v14  ;;  %v3259_v6 = vand.u32 65535, %v5971_v39 }
 0x7a7   :  { %v3526_v26 = vcvt.s32.f32 %v3524_v56  ;;  %v3235_v61 = vand.u32 65535, %v5979_v63  ;;  %v3355_v57 = vand.u32 65535, %v3354_v5  ;;  %v3331_v47 = vand.u32 65535, %v5997_v18 }
 0x7a8   :  { %v3502_v11 = vcvt.s32.f32 %v3500_v22  ;;  %v3285_v17 = vcvt.s32.f32 %v3283_v54  ;;  %v3261_v35 = vcvt.s32.f32 %v3259_v6  ;;  %v3307_v0 = vand.u32 65535, %v6002_v46 }
 0x7a9   :  { %v3237_v51 = vcvt.s32.f32 %v3235_v61  ;;  %v3357_v1 = vcvt.s32.f32 %v3355_v57  ;;  %v3333_v33 = vcvt.s32.f32 %v3331_v47  ;;  %v3427_v39 = vand.u32 65535, %v3426_v28 }
 0x7aa   :  { %v3309_v32 = vcvt.s32.f32 %v3307_v0  ;;  %v3403_v63 = vand.u32 65535, %v6023_v36  ;;  %v3379_v25 = vand.u32 65535, %v6033_v12  ;;  %v3499_v18 = vand.u32 65535, %v3498_v55 }
 0x7ab   :  { %v3429_v45 = vcvt.s32.f32 %v3427_v39  ;;  %v3475_v46 = vand.u32 65535, %v6049_v58  ;;  %v3451_v41 = vand.u32 65535, %v6053_v43  ;;  %v3545_v16 = vsel %vm6028_vm0, 1, %v3912_v10 }
 0x7ac   :  { %3409 = vadd.xlane.f32.xlu2 %v3406_v27  ;;  %v3405_v7 = vcvt.s32.f32 %v3403_v63  ;;  %v3381_v14 = vcvt.s32.f32 %v3379_v25  ;;  %v3501_v29 = vcvt.s32.f32 %v3499_v18  ;;  %v3546_v24 = vsel %vm33_vm4, %v3545_v16, 0 }
 0x7ad   :  { %3385 = vadd.xlane.f32.xlu1 %v3382_v49  ;;  %v3477_v9 = vcvt.s32.f32 %v3475_v46  ;;  %v3453_v20 = vcvt.s32.f32 %v3451_v41  ;;  %v3547_v50 = vand.u32 65535, %v3546_v24  ;;  %v3548_v4 = vshrl.u32 %v3546_v24, 16 }
 0x7ae   :  { %3361 = vadd.xlane.f32.xlu0 %v3358_v59  ;;  %v3523_v36 = vand.u32 65535, %v3522_v30 }
 0x7af   :  { %v3549_v3 = vcvt.s32.f32 %v3547_v50  ;;  %v3550_v12 = vcvt.s32.f32 %v3548_v4 }
 0x7b0   :  { %v3525_v5 = vcvt.s32.f32 %v3523_v36 }
 0x7b4   :  { %3481 = vadd.xlane.f32.xlu2 %v3478_v40 }
 0x7b5   :  { %3457 = vadd.xlane.f32.xlu1 %v3454_v42 }
 0x7b6   :  { %3433 = vadd.xlane.f32.xlu0 %v3430_v13 }
 0x7bc   :  { %3215 = vadd.xlane.f32.xlu2 %v3213_v38 }
 0x7bd   :  { %3529 = vadd.xlane.f32.xlu1 %v3526_v26 }
 0x7be   :  { %3505 = vadd.xlane.f32.xlu0 %v3502_v11 }
 0x7c4   :  { %3287 = vadd.xlane.f32.xlu2 %v3285_v17 }
 0x7c5   :  { %3263 = vadd.xlane.f32.xlu1 %v3261_v35 }
 0x7c6   :  { %3239 = vadd.xlane.f32.xlu0 %v3237_v51 }
 0x7cc   :  { %3359 = vadd.xlane.f32.xlu2 %v3357_v1 }
 0x7cd   :  { %3335 = vadd.xlane.f32.xlu1 %v3333_v33 }
 0x7ce   :  { %3311 = vadd.xlane.f32.xlu0 %v3309_v32 }
 0x7d4   :  { %3431 = vadd.xlane.f32.xlu2 %v3429_v45 }
 0x7d5   :  { %3407 = vadd.xlane.f32.xlu1 %v3405_v7 }
 0x7d6   :  { %3383 = vadd.xlane.f32.xlu0 %v3381_v14 }
 0x7dc   :  { %3503 = vadd.xlane.f32.xlu2 %v3501_v29 }
 0x7dd   :  { %3479 = vadd.xlane.f32.xlu1 %v3477_v9 }
 0x7de   :  { %3455 = vadd.xlane.f32.xlu0 %v3453_v20 }
 0x7e4   :  { %3551 = vadd.xlane.f32.xlu2 %v3549_v3 }
 0x7e5   :  { %3553 = vadd.xlane.f32.xlu1 %v3550_v12 }
 0x7e6   :  { %3527 = vadd.xlane.f32.xlu0 %v3525_v5 }
 0x80f   :  { %v3266_v60 = vpop.xlane.xlu2 %3265 }
 0x810   :  { %v3242_v31 = vpop.xlane.xlu1 %3241  ;;  %v3268_v30 = vcvt.f32.s32 %v3266_v60 }
 0x811   :  { %v3218_v21 = vpop.xlane.xlu0 %3217  ;;  %v3244_v55 = vcvt.f32.s32 %v3242_v31 }
 0x812   :  { %v3220_v28 = vcvt.f32.s32 %v3218_v21  ;;  %v3269_v54 = vshll.u32 %v3268_v30, 16 }
 0x813   :  { %v3245_v17 = vshll.u32 %v3244_v55, 16 }
 0x814   :  { %v3221_v8 = vshll.u32 %v3220_v28, 16 }
 0x817   :  { %v3338_v48 = vpop.xlane.xlu2 %3337 }
 0x818   :  { %v3314_v62 = vpop.xlane.xlu1 %3313  ;;  %v3340_v39 = vcvt.f32.s32 %v3338_v48 }
 0x819   :  { %v3290_v19 = vpop.xlane.xlu0 %3289  ;;  %v3316_v63 = vcvt.f32.s32 %v3314_v62 }
 0x81a   :  { %v3292_v42 = vcvt.f32.s32 %v3290_v19  ;;  %v3341_v20 = vshll.u32 %v3340_v39, 16 }
 0x81b   :  { %v3317_v50 = vshll.u32 %v3316_v63, 16 }
 0x81c   :  { %v3293_v22 = vshll.u32 %v3292_v42, 16 }
 0x81f   :  { %v6081_v27 = vpop.xlane.xlu2 %3409 }
 0x820   :  { %v6083_v52 = vpop.xlane.xlu1 %3385 }
 0x821   :  { %v3362_v49 = vpop.xlane.xlu0 %3361 }
 0x822   :  { %v3364_v0 = vcvt.f32.s32 %v3362_v49 }
 0x824   :  { %v3365_v41 = vshll.u32 %v3364_v0, 16 }
 0x827   :  { %v6085_v58 = vpop.xlane.xlu2 %3481 }
 0x828   :  { %v6087_v59 = vpop.xlane.xlu1 %3457 }
 0x829   :  { %v6089_v43 = vpop.xlane.xlu0 %3433 }
 0x82a   :  { %v3436_v21 = vcvt.f32.s32 %v6089_v43 }
 0x82f   :  { %v3216_v15 = vpop.xlane.xlu2 %3215 }
 0x830   :  { %v6091_v2 = vpop.xlane.xlu1 %3529  ;;  %v3219_v23 = vcvt.f32.s32 %v3216_v15 }
 0x831   :  { %v6093_v40 = vpop.xlane.xlu0 %3505 }
 0x832   :  { %v3222_v44 = vadd.s32 %v3221_v8, %v3219_v23  ;;  %v3412_v8 = vcvt.f32.s32 %v6081_v27  ;;  %v3388_v23 = vcvt.f32.s32 %v6083_v52 }
 0x834   :  { %v3223_v13 = vrot.slane %v3222_v44, 4 }
 0x836   :  { %v3224_v34 = vadd.s32 %v3223_v13, %v3222_v44 }
 0x837   :  { %v3288_v56 = vpop.xlane.xlu2 %3287 }
 0x838   :  { %v3264_v38 = vpop.xlane.xlu1 %3263  ;;  %v3291_v26 = vcvt.f32.s32 %v3288_v56  ;;  %v3225_v11 = vrot.slane %v3224_v34, 2 }
 0x839   :  { %v3267_v6 = vcvt.f32.s32 %v3264_v38  ;;  %v3240_v61 = vpop.xlane.xlu0 %3239 }
 0x83a   :  { %v3243_v35 = vcvt.f32.s32 %v3240_v61  ;;  %v3294_v51 = vadd.s32 %v3293_v22, %v3291_v26  ;;  %v3226_v57 = vadd.s32 %v3225_v11, %v3224_v34  ;;  %v3437_v34 = vshll.u32 %v3436_v21, 16 }
 0x83b   :  { %v3270_v47 = vadd.s32 %v3269_v54, %v3267_v6 }
 0x83c   :  { %v3246_v1 = vadd.s32 %v3245_v17, %v3243_v35  ;;  %v3295_v33 = vrot.slane %v3294_v51, 4  ;;  %v3227_v32 = vrot.slane %v3226_v57, 1  ;;  %v3413_v17 = vshll.u32 %v3412_v8, 16 }
 0x83d   :  { %v3271_v25 = vrot.slane %v3270_v47, 4  ;;  %v3389_v35 = vshll.u32 %v3388_v23, 16 }
 0x83e   :  { %v3247_v45 = vrot.slane %v3246_v1, 4  ;;  %v3296_v7 = vadd.s32 %v3295_v33, %v3294_v51  ;;  %v3228_v14 = vadd.s32 %v3227_v32, %v3226_v57  ;;  %v3508_v33 = vcvt.f32.s32 %v6093_v40 }
 0x83f   :  { %v3272_v18 = vadd.s32 %v3271_v25, %v3270_v47  ;;  %v3360_v46 = vpop.xlane.xlu2 %3359 }
 0x840   :  { %v3248_v16 = vadd.s32 %v3247_v45, %v3246_v1  ;;  %v3336_v29 = vpop.xlane.xlu1 %3335  ;;  %v3363_v9 = vcvt.f32.s32 %v3360_v46  ;;  %3853 = vpush %v3228_v14  ;;  %v3297_v24 = vrot.slane %v3296_v7, 2  ;;  %v3484_v14 = vcvt.f32.s32 %v6085_v58 }
 0x841   :  { %v3339_v4 = vcvt.f32.s32 %v3336_v29  ;;  %v3312_v36 = vpop.xlane.xlu0 %3311  ;;  %v3273_v3 = vrot.slane %v3272_v18, 2 }
 0x842   :  { %v3315_v12 = vcvt.f32.s32 %v3312_v36  ;;  %v3366_v5 = vadd.s32 %v3365_v41, %v3363_v9  ;;  %v3249_v60 = vrot.slane %v3248_v16, 2  ;;  %v3298_v31 = vadd.s32 %v3297_v24, %v3296_v7 }
 0x843   :  { %v3342_v48 = vadd.s32 %v3341_v20, %v3339_v4  ;;  %v3274_v62 = vadd.s32 %v3273_v3, %v3272_v18  ;;  %v3460_v18 = vcvt.f32.s32 %v6087_v59  ;;  %v3509_v24 = vshll.u32 %v3508_v33, 16 }
 0x844   :  { %v3318_v19 = vadd.s32 %v3317_v50, %v3315_v12  ;;  %v3367_v49 = vrot.slane %v3366_v5, 4  ;;  %v3250_v28 = vadd.s32 %v3249_v60, %v3248_v16  ;;  %v3299_v15 = vrot.slane %v3298_v31, 1 }
 0x845   :  { %v3343_v44 = vrot.slane %v3342_v48, 4  ;;  %v3275_v42 = vrot.slane %v3274_v62, 1  ;;  %v3461_v21 = vshll.u32 %v3460_v18, 16 }
 0x846   :  { %v3319_v13 = vrot.slane %v3318_v19, 4  ;;  %v3368_v30 = vadd.s32 %v3367_v49, %v3366_v5  ;;  %v3251_v55 = vrot.slane %v3250_v28, 1  ;;  %v3300_v43 = vadd.s32 %v3299_v15, %v3298_v31 }
 0x847   :  { %v3344_v56 = vadd.s32 %v3343_v44, %v3342_v48  ;;  %v3432_v22 = vpop.xlane.xlu2 %3431  ;;  %v3276_v38 = vadd.s32 %v3275_v42, %v3274_v62  ;;  %v3485_v31 = vshll.u32 %v3484_v14, 16 }
 0x848   :  { %v3320_v26 = vadd.s32 %v3319_v13, %v3318_v19  ;;  %v3408_v11 = vpop.xlane.xlu1 %3407  ;;  %v3435_v54 = vcvt.f32.s32 %v3432_v22  ;;  %v3252_v6 = vadd.s32 %v3251_v55, %v3250_v28  ;;  %v3369_v61 = vrot.slane %v3368_v30, 2 }
 0x849   :  { %v3411_v27 = vcvt.f32.s32 %v3408_v11  ;;  %v3384_v51 = vpop.xlane.xlu0 %3383  ;;  %v3345_v52 = vrot.slane %v3344_v56, 2 }
 0x84a   :  { %v3387_v57 = vcvt.f32.s32 %v3384_v51  ;;  %v3438_v47 = vadd.s32 %v3437_v34, %v3435_v54  ;;  %3855 = vpush %v3252_v6  ;;  %v3321_v0 = vrot.slane %v3320_v26, 2  ;;  %v3370_v1 = vadd.s32 %v3369_v61, %v3368_v30 }
 0x84b   :  { %v3414_v32 = vadd.s32 %v3413_v17, %v3411_v27  ;;  %3857 = vpush %v3276_v38  ;;  %v3346_v39 = vadd.s32 %v3345_v52, %v3344_v56  ;;  %v3532_v34 = vcvt.f32.s32 %v6091_v2 }
 0x84c   :  { %v3390_v63 = vadd.s32 %v3389_v35, %v3387_v57  ;;  %v3439_v25 = vrot.slane %v3438_v47, 4  ;;  %3859 = vpush %v3300_v43  ;;  %v3322_v45 = vadd.s32 %v3321_v0, %v3320_v26  ;;  %v3371_v7 = vrot.slane %v3370_v1, 1 }
 0x84d   :  { %v3415_v46 = vrot.slane %v3414_v32, 4  ;;  %v3347_v41 = vrot.slane %v3346_v39, 1  ;;  %v3533_v57 = vshll.u32 %v3532_v34, 16 }
 0x84e   :  { %v3391_v16 = vrot.slane %v3390_v63, 4  ;;  %v3440_v29 = vadd.s32 %v3439_v25, %v3438_v47  ;;  %v3323_v9 = vrot.slane %v3322_v45, 1  ;;  %v3372_v4 = vadd.s32 %v3371_v7, %v3370_v1 }
 0x84f   :  { %v3416_v20 = vadd.s32 %v3415_v46, %v3414_v32  ;;  %v3504_v40 = vpop.xlane.xlu2 %3503  ;;  %v3348_v50 = vadd.s32 %v3347_v41, %v3346_v39 }
 0x850   :  { %v3392_v36 = vadd.s32 %v3391_v16, %v3390_v63  ;;  %v3480_v3 = vpop.xlane.xlu1 %3479  ;;  %v3507_v12 = vcvt.f32.s32 %v3504_v40  ;;  %v3324_v5 = vadd.s32 %v3323_v9, %v3322_v45  ;;  %v3441_v60 = vrot.slane %v3440_v29, 2 }
 0x851   :  { %v3483_v58 = vcvt.f32.s32 %v3480_v3  ;;  %v3456_v48 = vpop.xlane.xlu0 %3455  ;;  %v3417_v59 = vrot.slane %v3416_v20, 2 }
 0x852   :  { %v3459_v62 = vcvt.f32.s32 %v3456_v48  ;;  %v3510_v19 = vadd.s32 %v3509_v24, %v3507_v12  ;;  %3861 = vpush %v3324_v5  ;;  %v3393_v49 = vrot.slane %v3392_v36, 2  ;;  %v3442_v28 = vadd.s32 %v3441_v60, %v3440_v29 }
 0x853   :  { %v3486_v15 = vadd.s32 %v3485_v31, %v3483_v58  ;;  %3863 = vpush %v3348_v50  ;;  %v3418_v8 = vadd.s32 %v3417_v59, %v3416_v20 }
 0x854   :  { %v3462_v23 = vadd.s32 %v3461_v21, %v3459_v62  ;;  %v3511_v44 = vrot.slane %v3510_v19, 4  ;;  %3865 = vpush %v3372_v4  ;;  %v3394_v42 = vadd.s32 %v3393_v49, %v3392_v36  ;;  %v3443_v13 = vrot.slane %v3442_v28, 1 }
 0x855   :  { %v3487_v30 = vrot.slane %v3486_v15, 4  ;;  %v3419_v55 = vrot.slane %v3418_v8, 1 }
 0x856   :  { %v3463_v56 = vrot.slane %v3462_v23, 4  ;;  %v3512_v22 = vadd.s32 %v3511_v44, %v3510_v19  ;;  %v3395_v38 = vrot.slane %v3394_v42, 1  ;;  %v3444_v17 = vadd.s32 %v3443_v13, %v3442_v28 }
 0x857   :  { %v3488_v43 = vadd.s32 %v3487_v30, %v3486_v15  ;;  %v3420_v26 = vadd.s32 %v3419_v55, %v3418_v8  ;;  %v3552_v6 = vpop.xlane.xlu2 %3551 }
 0x858   :  { %v3464_v11 = vadd.s32 %v3463_v56, %v3462_v23  ;;  %v3554_v54 = vpop.xlane.xlu1 %3553  ;;  %v3396_v61 = vadd.s32 %v3395_v38, %v3394_v42  ;;  %v3513_v35 = vrot.slane %v3512_v22, 2  ;;  %v3555_v33 = vcvt.f32.s32 %v3552_v6 }
 0x859   :  { %v3556_v27 = vcvt.f32.s32 %v3554_v54  ;;  %v3528_v51 = vpop.xlane.xlu0 %3527  ;;  %v3489_v52 = vrot.slane %v3488_v43, 2 }
 0x85a   :  { %v3531_v47 = vcvt.f32.s32 %v3528_v51  ;;  %3867 = vpush %v3396_v61  ;;  %v3465_v0 = vrot.slane %v3464_v11, 2  ;;  %v3514_v1 = vadd.s32 %v3513_v35, %v3512_v22 }
 0x85b   :  { %v3557_v2 = vshll.u32 %v3556_v27, 16  ;;  %3869 = vpush %v3420_v26  ;;  %v3490_v32 = vadd.s32 %v3489_v52, %v3488_v43 }
 0x85c   :  { %v3534_v39 = vadd.s32 %v3533_v57, %v3531_v47  ;;  %3871 = vpush %v3444_v17  ;;  %v3466_v63 = vadd.s32 %v3465_v0, %v3464_v11  ;;  %v3515_v25 = vrot.slane %v3514_v1, 1 }
 0x85d   :  { %v3558_v45 = vadd.s32 %v3557_v2, %v3555_v33  ;;  %v3491_v7 = vrot.slane %v3490_v32, 1 }
 0x85e   :  { %v3535_v14 = vrot.slane %v3534_v39, 4  ;;  %v3467_v18 = vrot.slane %v3466_v63, 1  ;;  %v3516_v9 = vadd.s32 %v3515_v25, %v3514_v1 }
 0x85f   :  { %v3559_v46 = vrot.slane %v3558_v45, 4  ;;  %v3492_v41 = vadd.s32 %v3491_v7, %v3490_v32 }
 0x860   :  { %v3536_v16 = vadd.s32 %v3535_v14, %v3534_v39  ;;  %v3468_v29 = vadd.s32 %v3467_v18, %v3466_v63 }
 0x861   :  { %v3560_v24 = vadd.s32 %v3559_v46, %v3558_v45  ;;  %v3885_v46 = vld [vmem:[%s6148_s1] sm:$0xff] }
 0x862   :  { %3873 = vpush %v3468_v29  ;;  %v3537_v20 = vrot.slane %v3536_v16, 2 }
 0x863   :  { %3875 = vpush %v3492_v41  ;;  %v3561_v40 = vrot.slane %v3560_v24, 2 }
 0x864   :  { %3877 = vpush %v3516_v9  ;;  %v3538_v50 = vadd.s32 %v3537_v20, %v3536_v16 }
 0x865   :  { %v3562_v4 = vadd.s32 %v3561_v40, %v3560_v24 }
 0x866   :  { %v3539_v36 = vrot.slane %v3538_v50, 1 }
 0x867   :  { %v3563_v3 = vrot.slane %v3562_v4, 1 }
 0x868   :  { %v3540_v12 = vadd.s32 %v3539_v36, %v3538_v50 }
 0x869   :  { %v3564_v5 = vadd.s32 %v3563_v3, %v3562_v4 }
 0x86a   :  { %3879 = vpush %v3540_v12 }
 0x86b   :  { %3881 = vpush %v3564_v5 }
 0x871   :  { %s3854_s9 = spop %3853 }
 0x872   :  { %v3230_v60 = vstv %s3854_s9 }
 0x873   :  { %vm3567_vm1 = vcmp.lt.s32.totalorder %v3230_v60, %v5949_v53 }
 0x874   :  { %v3582_v62 = vsel %vm3567_vm1, 1, %v3912_v10 }
 0x87b   :  { %s3856_s10 = spop %3855 }
 0x87c   :  { %s3858_s11 = spop %3857  ;;  %v3254_v31 = vstv %s3856_s10 }
 0x87d   :  { %s3860_s12 = spop %3859  ;;  %v3278_v21 = vstv %s3858_s11  ;;  %vm3568_vm13 = vcmp.lt.s32.totalorder %v3254_v31, %v5949_v53 }
 0x87e   :  { %v3302_v48 = vstv %s3860_s12  ;;  %vm3569_vm10 = vcmp.lt.s32.totalorder %v3278_v21, %v5949_v53  ;;  %v3583_v44 = vsel %vm3568_vm13, 1, %v3912_v10  ;;  %vm3617_vm13 = vcmask 0  }
 0x87f   :  { %vm3570_vm7 = vcmp.lt.s32.totalorder %v3302_v48, %v5949_v53  ;;  %v3584_v42 = vsel %vm3569_vm10, 1, %v3912_v10  ;;  %v3597_v26 = vadd.s32 %v3583_v44, %v3582_v62 }
 0x880   :  { %v3585_v55 = vsel %vm3570_vm7, 1, %v3912_v10 }
 0x881   :  { %v3598_v54 = vadd.s32 %v3585_v55, %v3584_v42 }
 0x883   :  { %s3862_s13 = spop %3861  ;;  %v3604_v33 = vadd.s32 %v3598_v54, %v3597_v26 }
 0x884   :  { %s3864_s14 = spop %3863  ;;  %v3326_v59 = vstv %s3862_s13 }
 0x885   :  { %s3866_s15 = spop %3865  ;;  %v3350_v19 = vstv %s3864_s14  ;;  %vm3571_vm14 = vcmp.lt.s32.totalorder %v3326_v59, %v5949_v53 }
 0x886   :  { %v3374_v49 = vstv %s3866_s15  ;;  %vm3572_vm0 = vcmp.lt.s32.totalorder %v3350_v19, %v5949_v53  ;;  %v3586_v34 = vsel %vm3571_vm14, 1, %v3912_v10 }
 0x887   :  { %vm3573_vm5 = vcmp.lt.s32.totalorder %v3374_v49, %v5949_v53  ;;  %v3587_v56 = vsel %vm3572_vm0, 1, %v3912_v10 }
 0x888   :  { %v3588_v22 = vsel %vm3573_vm5, 1, %v3912_v10  ;;  %v3599_v35 = vadd.s32 %v3587_v56, %v3586_v34 }
 0x88b   :  { %s3868_s16 = spop %3867 }
 0x88c   :  { %s6102_s17 = spop %3869  ;;  %v3398_v58 = vstv %s3868_s16 }
 0x88d   :  { %s3872_s18 = spop %3871  ;;  %vm3574_vm3 = vcmp.lt.s32.totalorder %v3398_v58, %v5949_v53  ;;  %v3422_v8 = vstv %s6102_s17 }
 0x88e   :  { %v3446_v23 = vstv %s3872_s18  ;;  %v3589_v13 = vsel %vm3574_vm3, 1, %v3912_v10  ;;  %vm3575_vm8 = vcmp.lt.s32.totalorder %v3422_v8, %v5949_v53 }
 0x88f   :  { %vm3576_vm9 = vcmp.lt.s32.totalorder %v3446_v23, %v5949_v53  ;;  %v3600_v11 = vadd.s32 %v3589_v13, %v3588_v22  ;;  %v3590_v6 = vsel %vm3575_vm8, 1, %v3912_v10 }
 0x890   :  { %v3591_v61 = vsel %vm3576_vm9, 1, %v3912_v10 }
 0x891   :  { %v3605_v47 = vadd.s32 %v3600_v11, %v3599_v35  ;;  %v3601_v0 = vadd.s32 %v3591_v61, %v3590_v6 }
 0x893   :  { %s3874_s0 = spop %3873  ;;  %v3608_v63 = vadd.s32 %v3605_v47, %v3604_v33 }
 0x894   :  { %v3470_v28 = vstv %s3874_s0  ;;  %s3876_s19 = spop %3875 }
 0x895   :  { %v3494_v15 = vstv %s3876_s19  ;;  %s3878_s20 = spop %3877  ;;  %vm3577_vm12 = vcmp.lt.s32.totalorder %v3470_v28, %v5949_v53 }
 0x896   :  { %vm3578_vm15 = vcmp.lt.s32.totalorder %v3494_v15, %v5949_v53  ;;  %v3518_v30 = vstv %s3878_s20  ;;  %v3592_v38 = vsel %vm3577_vm12, 1, %v3912_v10 }
 0x897   :  { %v3593_v43 = vsel %vm3578_vm15, 1, %v3912_v10  ;;  %vm3579_vm2 = vcmp.lt.s32.totalorder %v3518_v30, %v5949_v53 }
 0x898   :  { %v3602_v27 = vadd.s32 %v3593_v43, %v3592_v38  ;;  %v3594_v52 = vsel %vm3579_vm2, 1, %v3912_v10 }
 0x89a   :  { %v3606_v32 = vadd.s32 %v3602_v27, %v3601_v0 }
 0x89b   :  { %s3880_s21 = spop %3879 }
 0x89c   :  { %v3542_v17 = vstv %s3880_s21  ;;  %s3882_s22 = spop %3881 }
 0x89d   :  { %vm3580_vm6 = vcmp.lt.s32.totalorder %v3542_v17, %v5949_v53  ;;  %v3566_v51 = vstv %s3882_s22 }
 0x89e   :  { %v3595_v57 = vsel %vm3580_vm6, 1, %v3912_v10  ;;  %vm3581_vm11 = vcmp.lt.s32.totalorder %v3566_v51, %v5949_v53 }
 0x89f   :  { %v3603_v1 = vadd.s32 %v3595_v57, %v3594_v52  ;;  %v3596_v2 = vsel %vm3581_vm11, 1, %v3912_v10 }
 0x8a1   :  { %v3607_v39 = vadd.s32 %v3603_v1, %v3596_v2 }
 0x8a3   :  { %v3609_v25 = vadd.s32 %v3607_v39, %v3606_v32 }
 0x8a5   :  { %v3610_v45 = vadd.s32 %v3609_v25, %v3608_v63 }
 0x8a7   :  { %v3611_v7 = vor.u32 %v3610_v45, %v5964_v37 }
 0x8a9   :  { %vm3612_vm1 = vcmp.lt.s32.totalorder %v3611_v7, 0  ;;  %v3613_v53 = vxor.u32 2147483648, %v3611_v7  ;;  %v3614_v14 = vxor.u32 4294967295, %v3611_v7 }
 0x8ab   :  { %v3615_v18 = vsel %vm3612_vm1, %v3613_v53, %v3614_v14 }
 0x8ac   :  { %3618 = vst.msk [vmem:[#allocation4] sm:$0x1] %vm3617_vm13, %v3615_v18  ;;  %vm3619_vm10 = vcmp.gt.f32.partialorder %v3885_v46, %v3615_v18 }
 0x8ad   :  { %v3620_v37 = vsel %vm3619_vm10, 1, %v3912_v10  ;;  %3632 = dma.vmem_to_hbm [thread:$0]  %s3628_s24, 16, %s3630_s27, [#allocation5]  }
 0x8ae   :  { %3621 = vst.msk [vmem:[%s6150_s3] sm:$0xff] %vm33_vm4, %v3620_v37 }
 0x8af   :  { %3910 = dma.done.wait [#allocation5], 16  }
 0x8b0   :  { %3911 = vsyncadd [#allocation5], 4294967280 }
 0x8b1   :  { %3641 = vsyncpa [#allocation5], 1 }

</bundles_post_ra>
